<compile_context>
chip_gen: v7x
topology: tpu7x:2x2x1
jax: 0.10.0
libtpu: 0.0.40
codegen_flags: <defaults>
</compile_context>

<pallas_src>
import jax
import jax.numpy as jnp
import numpy as np
from jax.experimental import pallas as pl
from jax.experimental.pallas import tpu as pltpu

# ----------------------------- model dimensions -----------------------------
NZ = 50                     # latent channels: main() hard-codes 50 input channels
NGF = 8                     # generator width (torch script used a global ngf)
C1, C2, C3 = 4 * NGF, 2 * NGF, NGF      # 32, 16, 8
H1, W1 = 12, 10             # after ConvT(50, 32, (12, 10), 1, 0)
H2, W2 = 24, 20             # after ConvT(32, 16, 2, 2, 0)
H3, W3 = 48, 40             # after ConvT(16, 8, 2, 2, 0)
H4, W4 = 96, 80             # after ConvT(8, 1, 4, 2, 1)
HF, WF = 192, 160           # after F.interpolate(x, (192, 160), 'nearest')
BN_EPS = 1e-5

WC1 = W1 * C1               # 320
WC2 = W2 * C2               # 320
WC3 = W3 * C3               # 320
OUT_BLK = 2 * WF            # 320: one output block = image rows (2*h4, 2*h4+1), width-duplicated


# ----------------------------- fused Pallas kernel -----------------------------

def _generator_kernel(zrep_ref, w1_ref, k1_ref, kt1_ref, g1_ref, b1_ref,
                      c2_ref, k2_ref, kt2_ref, g2_ref, b2_ref,
                      c3_ref, k3_ref, kt3_ref, g3_ref, b3_ref,
                      c4_ref, o_ref):
    f32 = jnp.float32
    bf16 = jnp.bfloat16
    rows = zrep_ref.shape[0]           # n * H1
    n = rows // H1

    def mm(a, b):
        # single-pass bf16 MXU matmul, f32 accumulation
        return jnp.dot(a.astype(bf16), b.astype(bf16), preferred_element_type=f32)

    def bn_relu(x, k_ref, kt_ref, g_ref, b_ref, count):
        # training-mode BatchNorm (batch stats, biased var via E[x^2]-mean^2) + ReLU.
        # channel(col) = col % C; pooling / broadcast-back via host-built one-hots.
        s1 = jnp.sum(x, axis=0, keepdims=True)
        s2 = jnp.sum(x * x, axis=0, keepdims=True)
        pooled = mm(jnp.concatenate([s1, s2], axis=0), k_ref[...]) * (1.0 / count)
        mean = pooled[0:1, :]
        var = pooled[1:2, :] - mean * mean
        scale = g_ref[...] * jax.lax.rsqrt(var + BN_EPS)
        shift = b_ref[...] - mean * scale
        cols = mm(jnp.concatenate([scale, shift], axis=0), kt_ref[...])
        return jnp.maximum(x * cols[0:1, :] + cols[1:2, :], 0.0)

    # ---- main[0:3]: ConvTranspose2d(50, 32, (12, 10), 1, 0) + BN + ReLU ----
    x1 = bn_relu(mm(zrep_ref[...], w1_ref[...]),
                 k1_ref, kt1_ref, g1_ref, b1_ref, n * H1 * W1)        # (rows, 320)

    # ---- main[3:6]: ConvTranspose2d(32, 16, 2, 2, 0) + BN + ReLU ----
    # one matmul; column phases k2 = 0,1 correspond to h2 = 2*h1 + k2
    y2 = bn_relu(mm(x1, c2_ref[...]),
                 k2_ref, kt2_ref, g2_ref, b2_ref, n * H2 * W2)        # (rows, 640)

    # ---- main[6:9]: ConvTranspose2d(16, 8, 2, 2, 0) + BN + ReLU ----
    # per-phase matmuls; phases (k2, k3) -> h3 = 4*h1 + 2*k2 + k3
    y3 = jnp.concatenate([mm(y2[:, :WC2], c3_ref[...]),
                          mm(y2[:, WC2:], c3_ref[...])], axis=1)      # (rows, 1280)
    y3 = bn_relu(y3, k3_ref, kt3_ref, g3_ref, b3_ref, n * H3 * W3)

    # ---- main[9:11]: ConvTranspose2d(8, 1, 4, 2, 1) + Tanh, upsample folded ----
    # a[p] column block j corresponds to output phase q = 4*k2 + 2*k3 + j - 1,
    # i.e. image height pair h4 = 8*h1 + q  (width 2x-nearest already folded into c4).
    a = [mm(y3[:, p * WC3:(p + 1) * WC3], c4_ref[...]) for p in range(4)]

    def blk(t, j):
        return t[:, j * OUT_BLK:(j + 1) * OUT_BLK]

    zero_row = jnp.zeros((1, OUT_BLK), f32)
    # q = -1 of the next h1 row lands on this row's q = 7; q = 8 of the previous
    # h1 row lands on this row's q = 0.  Mask at sample boundaries (h1 = 0 / 11).
    from_next = jnp.concatenate([blk(a[0], 0)[1:, :], zero_row], axis=0)
    from_prev = jnp.concatenate([zero_row, blk(a[3], 3)[:-1, :]], axis=0)
    h_idx = jax.lax.broadcasted_iota(jnp.int32, (rows, OUT_BLK), 0) % H1
    from_next = jnp.where(h_idx != H1 - 1, from_next, 0.0)
    from_prev = jnp.where(h_idx != 0, from_prev, 0.0)

    out_blocks = [
        blk(a[0], 1) + from_prev,             # q = 0
        blk(a[0], 2) + blk(a[1], 0),          # q = 1
        blk(a[0], 3) + blk(a[1], 1),          # q = 2
        blk(a[1], 2) + blk(a[2], 0),          # q = 3
        blk(a[1], 3) + blk(a[2], 1),          # q = 4
        blk(a[2], 2) + blk(a[3], 0),          # q = 5
        blk(a[2], 3) + blk(a[3], 1),          # q = 6
        blk(a[3], 2) + from_next,             # q = 7
    ]
    # lane-dense single store: (rows, 2560) == (n, 1, 192, 160) in row-major order
    o_ref[...] = jnp.tanh(jnp.concatenate(out_blocks, axis=1))


# --------------------- constant operand preparation (batch-independent) ---------------------

def _col_weight_mats(w, w_in, w_out, c_in, c_out, taps, stride, pad):
    """C[kh] (w_in*c_in, w_out*c_out): column-space ConvT factor for height-tap kh."""
    c = np.zeros((taps, w_in * c_in, w_out * c_out), np.float32)
    for kh in range(taps):
        for win in range(w_in):
            for kw in range(taps):
                wout = stride * win - pad + kw
                if 0 <= wout < w_out:
                    c[kh, win * c_in:(win + 1) * c_in,
                      wout * c_out:(wout + 1) * c_out] += w[:, :, kh, kw]
    return c


def _pool_one_hots(cols, c):
    """k (cols, c): pool columns -> channel;  kt (c, cols): tile channel -> columns."""
    k = np.zeros((cols, c), np.float32)
    k[np.arange(cols), np.arange(cols) % c] = 1.0
    return k, np.ascontiguousarray(k.T)


def prepare_operands(params):
    w1 = np.asarray(params["w1"], np.float32)   # (50, 32, 12, 10) torch ConvT layout
    w2 = np.asarray(params["w2"], np.float32)   # (32, 16, 2, 2)
    w3 = np.asarray(params["w3"], np.float32)   # (16, 8, 2, 2)
    w4 = np.asarray(params["w4"], np.float32)   # (8, 1, 4, 4)

    # layer 1: per output-height (NZ, W1*C1) blocks stacked on rows -> one matmul
    w1m = np.transpose(w1, (0, 2, 3, 1)).reshape(NZ, H1 * WC1)
    wstack = np.concatenate([w1m[:, h * WC1:(h + 1) * WC1] for h in range(H1)], axis=0)

    c2 = _col_weight_mats(w2, W1, W2, C1, C2, 2, 2, 0)     # (2, 320, 320)
    c3 = _col_weight_mats(w3, W2, W3, C2, C3, 2, 2, 0)     # (2, 320, 320)
    c4 = _col_weight_mats(w4, W3, W4, C3, 1, 4, 2, 1)      # (4, 320, 80)

    # fold exact 2x nearest upsample: each 320-wide block = [img row 2h | img row 2h+1],
    # both equal to the width-duplicated conv row.
    uc = np.zeros((W4, OUT_BLK), np.float32)
    uc[(np.arange(OUT_BLK) % WF) // 2, np.arange(OUT_BLK)] = 1.0

    c2cat = np.concatenate([c2[0], c2[1]], axis=1)                     # (320, 640)
    c3cat = np.concatenate([c3[0], c3[1]], axis=1)                     # (320, 640)
    c4cat = np.concatenate([c4[k] @ uc for k in range(4)], axis=1)     # (320, 1280)

    k1, kt1 = _pool_one_hots(WC1, C1)
    k2, kt2 = _pool_one_hots(2 * WC2, C2)
    k3, kt3 = _pool_one_hots(4 * WC3, C3)

    bf = jnp.bfloat16
    ops = {
        "wstack": jnp.asarray(wstack, bf),
        "c2cat": jnp.asarray(c2cat, bf),
        "c3cat": jnp.asarray(c3cat, bf),
        "c4cat": jnp.asarray(c4cat, bf),
        "k1": jnp.asarray(k1, bf), "kt1": jnp.asarray(kt1, bf),
        "k2": jnp.asarray(k2, bf), "kt2": jnp.asarray(kt2, bf),
        "k3": jnp.asarray(k3, bf), "kt3": jnp.asarray(kt3, bf),
        "g1": jnp.asarray(np.asarray(params["g1"], np.float32).reshape(1, C1)),
        "b1": jnp.asarray(np.asarray(params["b1"], np.float32).reshape(1, C1)),
        "g2": jnp.asarray(np.asarray(params["g2"], np.float32).reshape(1, C2)),
        "b2": jnp.asarray(np.asarray(params["b2"], np.float32).reshape(1, C2)),
        "g3": jnp.asarray(np.asarray(params["g3"], np.float32).reshape(1, C3)),
        "b3": jnp.asarray(np.asarray(params["b3"], np.float32).reshape(1, C3)),
    }
    return ops


# ------------------------------ full forward ------------------------------

def conditional_generator_forward(ops, z, label):
    del label  # unused by the torch forward()
    n = z.shape[0]
    rows = n * H1
    z2d = z.reshape(n, NZ).astype(jnp.float32)   # z.squeeze().unsqueeze(-1).unsqueeze(-1)

    # block-expanded latent: zrep[b*12+h, h*NZ:(h+1)*NZ] = z[b].  Makes the first ConvT a
    # single MXU matmul that lands directly in (batch*height, width*channel) row layout.
    eye = jnp.eye(H1, dtype=jnp.float32)
    zrep = (eye[None, :, :, None] * z2d[:, None, None, :]).reshape(rows, H1 * NZ)

    operands = (zrep,
                ops["wstack"], ops["k1"], ops["kt1"], ops["g1"], ops["b1"],
                ops["c2cat"], ops["k2"], ops["kt2"], ops["g2"], ops["b2"],
                ops["c3cat"], ops["k3"], ops["kt3"], ops["g3"], ops["b3"],
                ops["c4cat"])

    flops = 2 * rows * (H1 * NZ * WC1            # layer 1
                        + WC1 * 2 * WC2          # layer 2
                        + 2 * WC2 * 2 * WC3      # layer 3 (2 phases)
                        + 4 * WC3 * 4 * OUT_BLK)  # layer 4 (4 phases)
    const_bytes = sum(int(np.prod(o.shape)) * o.dtype.itemsize
                      for o in operands[1:])
    bytes_accessed = const_bytes + rows * H1 * NZ * 4 + rows * 8 * OUT_BLK * 4

    out2d = pl.pallas_call(
        _generator_kernel,
        out_shape=jax.ShapeDtypeStruct((rows, 8 * OUT_BLK), jnp.float32),
        in_specs=[pl.BlockSpec(memory_space=pltpu.MemorySpace.VMEM)
                  for _ in operands],
        out_specs=pl.BlockSpec(memory_space=pltpu.MemorySpace.VMEM),
        compiler_params=pltpu.CompilerParams(vmem_limit_bytes=32 * 1024 * 1024),
        cost_estimate=pl.CostEstimate(flops=int(flops),
                                      transcendentals=int(rows * 8 * OUT_BLK),
                                      bytes_accessed=int(bytes_accessed)),
    )(*operands)

    return out2d.reshape(n, 1, HF, WF)            # NCHW, like the torch module


def init_params(key):
    ks = jax.random.split(key, 4)
    # ConvTranspose2d weight layout (PyTorch): (in_channels, out_channels, kH, kW)
    return {
        "w1": 0.05 * jax.random.normal(ks[0], (NZ, C1, H1, W1), jnp.float32),
        "w2": 0.05 * jax.random.normal(ks[1], (C1, C2, 2, 2), jnp.float32),
        "w3": 0.05 * jax.random.normal(ks[2], (C2, C3, 2, 2), jnp.float32),
        "w4": 0.05 * jax.random.normal(ks[3], (C3, 1, 4, 4), jnp.float32),
        # BatchNorm affine params (PyTorch default init)
        "g1": jnp.ones((C1,), jnp.float32), "b1": jnp.zeros((C1,), jnp.float32),
        "g2": jnp.ones((C2,), jnp.float32), "b2": jnp.zeros((C2,), jnp.float32),
        "g3": jnp.ones((C3,), jnp.float32), "b3": jnp.zeros((C3,), jnp.float32),
    }


# --------------------- pure-JAX reference (correctness check) ---------------------

def _convT_ref(x, w, stride, pad):
    kh, kw = int(w.shape[2]), int(w.shape[3])
    wf = jnp.transpose(jnp.flip(w, axis=(2, 3)), (1, 0, 2, 3))   # OIHW
    return jax.lax.conv_general_dilated(
        x, wf, window_strides=(1, 1),
        padding=((kh - 1 - pad, kh - 1 - pad), (kw - 1 - pad, kw - 1 - pad)),
        lhs_dilation=(stride, stride),
        dimension_numbers=("NCHW", "OIHW", "NCHW"),
        precision=jax.lax.Precision.HIGHEST)


def _bn_relu_ref(x, g, b):
    mean = jnp.mean(x, axis=(0, 2, 3), keepdims=True)
    var = jnp.mean(jnp.square(x - mean), axis=(0, 2, 3), keepdims=True)
    y = (x - mean) * jax.lax.rsqrt(var + BN_EPS)
    y = y * g.reshape(1, -1, 1, 1) + b.reshape(1, -1, 1, 1)
    return jnp.maximum(y, 0.0)


def reference_forward(params, z):
    x = z.reshape(z.shape[0], NZ, 1, 1)
    x = _bn_relu_ref(_convT_ref(x, params["w1"], 1, 0), params["g1"], params["b1"])
    x = _bn_relu_ref(_convT_ref(x, params["w2"], 2, 0), params["g2"], params["b2"])
    x = _bn_relu_ref(_convT_ref(x, params["w3"], 2, 0), params["g3"], params["b3"])
    x = jnp.tanh(_convT_ref(x, params["w4"], 2, 1))
    return jnp.repeat(jnp.repeat(x, 2, axis=2), 2, axis=3)        # (N, 1, 192, 160)


if __name__ == "__main__":
    key = jax.random.PRNGKey(0)
    pkey, zkey = jax.random.split(key)
    params = init_params(pkey)

    batch = 2
    ops = prepare_operands(params)                                # batch-independent

    z = jax.random.normal(zkey, (batch, NZ, 1, 1), jnp.float32)   # NCHW latent
    label = jnp.zeros((batch,), jnp.int32)                        # unused by forward()

    fwd = jax.jit(conditional_generator_forward)
    img = jax.block_until_ready(fwd(ops, z, label))

    assert img.shape == (batch, 1, HF, WF), img.shape
    assert bool(jnp.all(jnp.isfinite(img)))

    ref = reference_forward(params, z)
    err = float(jnp.max(jnp.abs(img - ref)))
    assert err < 3e-2, f"max abs error vs reference: {err}"

    print("KERNEL_OK")
</pallas_src>

<mosaic_0001>
module attributes {stable_mosaic.version = 11 : i64} {
  func.func @_generator_kernel(%arg0: memref<24x600xf32, #tpu.memory_space<vmem>>, %arg1: memref<600x320xbf16, #tpu.memory_space<vmem>>, %arg2: memref<320x32xbf16, #tpu.memory_space<vmem>>, %arg3: memref<32x320xbf16, #tpu.memory_space<vmem>>, %arg4: memref<1x32xf32, #tpu.memory_space<vmem>>, %arg5: memref<1x32xf32, #tpu.memory_space<vmem>>, %arg6: memref<320x640xbf16, #tpu.memory_space<vmem>>, %arg7: memref<640x16xbf16, #tpu.memory_space<vmem>>, %arg8: memref<16x640xbf16, #tpu.memory_space<vmem>>, %arg9: memref<1x16xf32, #tpu.memory_space<vmem>>, %arg10: memref<1x16xf32, #tpu.memory_space<vmem>>, %arg11: memref<320x640xbf16, #tpu.memory_space<vmem>>, %arg12: memref<1280x8xbf16, #tpu.memory_space<vmem>>, %arg13: memref<8x1280xbf16, #tpu.memory_space<vmem>>, %arg14: memref<1x8xf32, #tpu.memory_space<vmem>>, %arg15: memref<1x8xf32, #tpu.memory_space<vmem>>, %arg16: memref<320x1280xbf16, #tpu.memory_space<vmem>>, %arg17: memref<24x2560xf32, #tpu.memory_space<vmem>>) attributes {dimension_semantics = [], scalar_prefetch = 0 : i64, scratch_operands = 0 : i64, tpu.core_type = #tpu.core_type<tc>} {
    %c0 = arith.constant 0 : index
    %c0_0 = arith.constant 0 : index
    %0 = vector.load %arg0[%c0, %c0_0] : memref<24x600xf32, #tpu.memory_space<vmem>>, vector<24x600xf32>
    %c0_1 = arith.constant 0 : index
    %c0_2 = arith.constant 0 : index
    %1 = vector.load %arg1[%c0_1, %c0_2] : memref<600x320xbf16, #tpu.memory_space<vmem>>, vector<600x320xbf16>
    %2 = arith.truncf %0 : vector<24x600xf32> to vector<24x600xbf16>
    %cst = arith.constant dense<0.000000e+00> : vector<24x320xf32>
    %3 = tpu.matmul %2, %1, %cst {dimension_numbers = #tpu.dot_dimension_numbers<[1], [0], [0], [1], [0, 0, 1, 1], [], []>} : vector<24x600xbf16>, vector<600x320xbf16>, vector<24x320xf32> -> vector<24x320xf32>
    %cst_3 = arith.constant dense<0.000000e+00> : vector<320xf32>
    %4 = vector.multi_reduction <add>, %3, %cst_3 [0] : vector<24x320xf32> to vector<320xf32>
    %5 = vector.shape_cast %4 : vector<320xf32> to vector<1x320xf32>
    %6 = arith.mulf %3, %3 : vector<24x320xf32>
    %cst_4 = arith.constant dense<0.000000e+00> : vector<320xf32>
    %7 = vector.multi_reduction <add>, %6, %cst_4 [0] : vector<24x320xf32> to vector<320xf32>
    %8 = vector.shape_cast %7 : vector<320xf32> to vector<1x320xf32>
    %9 = tpu.concatenate %5, %8 in 0 : vector<1x320xf32>, vector<1x320xf32> -> vector<2x320xf32>
    %c0_5 = arith.constant 0 : index
    %c0_6 = arith.constant 0 : index
    %10 = vector.load %arg2[%c0_5, %c0_6] : memref<320x32xbf16, #tpu.memory_space<vmem>>, vector<320x32xbf16>
    %11 = arith.truncf %9 : vector<2x320xf32> to vector<2x320xbf16>
    %cst_7 = arith.constant dense<0.000000e+00> : vector<2x32xf32>
    %12 = tpu.matmul %11, %10, %cst_7 {dimension_numbers = #tpu.dot_dimension_numbers<[1], [0], [0], [1], [0, 0, 1, 1], [], []>} : vector<2x320xbf16>, vector<320x32xbf16>, vector<2x32xf32> -> vector<2x32xf32>
    %cst_8 = arith.constant 0.00416666688 : f32
    %13 = vector.broadcast %cst_8 : f32 to vector<2x32xf32>
    %14 = arith.mulf %12, %13 : vector<2x32xf32>
    %15 = vector.extract_strided_slice %14 {offsets = [0, 0], sizes = [1, 32], strides = [1, 1]} : vector<2x32xf32> to vector<1x32xf32>
    %16 = vector.extract_strided_slice %14 {offsets = [1, 0], sizes = [1, 32], strides = [1, 1]} : vector<2x32xf32> to vector<1x32xf32>
    %17 = arith.mulf %15, %15 : vector<1x32xf32>
    %18 = arith.subf %16, %17 : vector<1x32xf32>
    %c0_9 = arith.constant 0 : index
    %c0_10 = arith.constant 0 : index
    %19 = vector.load %arg4[%c0_9, %c0_10] : memref<1x32xf32, #tpu.memory_space<vmem>>, vector<1x32xf32>
    %cst_11 = arith.constant 9.99999974E-6 : f32
    %20 = vector.broadcast %cst_11 : f32 to vector<1x32xf32>
    %21 = arith.addf %18, %20 : vector<1x32xf32>
    %22 = math.rsqrt %21 : vector<1x32xf32>
    %23 = arith.mulf %19, %22 : vector<1x32xf32>
    %c0_12 = arith.constant 0 : index
    %c0_13 = arith.constant 0 : index
    %24 = vector.load %arg5[%c0_12, %c0_13] : memref<1x32xf32, #tpu.memory_space<vmem>>, vector<1x32xf32>
    %25 = arith.mulf %15, %23 : vector<1x32xf32>
    %26 = arith.subf %24, %25 : vector<1x32xf32>
    %27 = tpu.concatenate %23, %26 in 0 : vector<1x32xf32>, vector<1x32xf32> -> vector<2x32xf32>
    %c0_14 = arith.constant 0 : index
    %c0_15 = arith.constant 0 : index
    %28 = vector.load %arg3[%c0_14, %c0_15] : memref<32x320xbf16, #tpu.memory_space<vmem>>, vector<32x320xbf16>
    %29 = arith.truncf %27 : vector<2x32xf32> to vector<2x32xbf16>
    %cst_16 = arith.constant dense<0.000000e+00> : vector<2x320xf32>
    %30 = tpu.matmul %29, %28, %cst_16 {dimension_numbers = #tpu.dot_dimension_numbers<[1], [0], [0], [1], [0, 0, 1, 1], [], []>} : vector<2x32xbf16>, vector<32x320xbf16>, vector<2x320xf32> -> vector<2x320xf32>
    %31 = vector.extract_strided_slice %30 {offsets = [0, 0], sizes = [1, 320], strides = [1, 1]} : vector<2x320xf32> to vector<1x320xf32>
    %32 = vector.broadcast %31 : vector<1x320xf32> to vector<24x320xf32>
    %33 = arith.mulf %3, %32 : vector<24x320xf32>
    %34 = vector.extract_strided_slice %30 {offsets = [1, 0], sizes = [1, 320], strides = [1, 1]} : vector<2x320xf32> to vector<1x320xf32>
    %35 = vector.broadcast %34 : vector<1x320xf32> to vector<24x320xf32>
    %36 = arith.addf %33, %35 : vector<24x320xf32>
    %cst_17 = arith.constant 0.000000e+00 : f32
    %37 = vector.broadcast %cst_17 : f32 to vector<24x320xf32>
    %38 = arith.maximumf %36, %37 : vector<24x320xf32>
    %c0_18 = arith.constant 0 : index
    %c0_19 = arith.constant 0 : index
    %39 = vector.load %arg6[%c0_18, %c0_19] : memref<320x640xbf16, #tpu.memory_space<vmem>>, vector<320x640xbf16>
    %40 = arith.truncf %38 : vector<24x320xf32> to vector<24x320xbf16>
    %cst_20 = arith.constant dense<0.000000e+00> : vector<24x640xf32>
    %41 = tpu.matmul %40, %39, %cst_20 {dimension_numbers = #tpu.dot_dimension_numbers<[1], [0], [0], [1], [0, 0, 1, 1], [], []>} : vector<24x320xbf16>, vector<320x640xbf16>, vector<24x640xf32> -> vector<24x640xf32>
    %cst_21 = arith.constant dense<0.000000e+00> : vector<640xf32>
    %42 = vector.multi_reduction <add>, %41, %cst_21 [0] : vector<24x640xf32> to vector<640xf32>
    %43 = vector.shape_cast %42 : vector<640xf32> to vector<1x640xf32>
    %44 = arith.mulf %41, %41 : vector<24x640xf32>
    %cst_22 = arith.constant dense<0.000000e+00> : vector<640xf32>
    %45 = vector.multi_reduction <add>, %44, %cst_22 [0] : vector<24x640xf32> to vector<640xf32>
    %46 = vector.shape_cast %45 : vector<640xf32> to vector<1x640xf32>
    %47 = tpu.concatenate %43, %46 in 0 : vector<1x640xf32>, vector<1x640xf32> -> vector<2x640xf32>
    %c0_23 = arith.constant 0 : index
    %c0_24 = arith.constant 0 : index
    %48 = vector.load %arg7[%c0_23, %c0_24] : memref<640x16xbf16, #tpu.memory_space<vmem>>, vector<640x16xbf16>
    %49 = arith.truncf %47 : vector<2x640xf32> to vector<2x640xbf16>
    %cst_25 = arith.constant dense<0.000000e+00> : vector<2x16xf32>
    %50 = tpu.matmul %49, %48, %cst_25 {dimension_numbers = #tpu.dot_dimension_numbers<[1], [0], [0], [1], [0, 0, 1, 1], [], []>} : vector<2x640xbf16>, vector<640x16xbf16>, vector<2x16xf32> -> vector<2x16xf32>
    %cst_26 = arith.constant 0.00104166672 : f32
    %51 = vector.broadcast %cst_26 : f32 to vector<2x16xf32>
    %52 = arith.mulf %50, %51 : vector<2x16xf32>
    %53 = vector.extract_strided_slice %52 {offsets = [0, 0], sizes = [1, 16], strides = [1, 1]} : vector<2x16xf32> to vector<1x16xf32>
    %54 = vector.extract_strided_slice %52 {offsets = [1, 0], sizes = [1, 16], strides = [1, 1]} : vector<2x16xf32> to vector<1x16xf32>
    %55 = arith.mulf %53, %53 : vector<1x16xf32>
    %56 = arith.subf %54, %55 : vector<1x16xf32>
    %c0_27 = arith.constant 0 : index
    %c0_28 = arith.constant 0 : index
    %57 = vector.load %arg9[%c0_27, %c0_28] : memref<1x16xf32, #tpu.memory_space<vmem>>, vector<1x16xf32>
    %cst_29 = arith.constant 9.99999974E-6 : f32
    %58 = vector.broadcast %cst_29 : f32 to vector<1x16xf32>
    %59 = arith.addf %56, %58 : vector<1x16xf32>
    %60 = math.rsqrt %59 : vector<1x16xf32>
    %61 = arith.mulf %57, %60 : vector<1x16xf32>
    %c0_30 = arith.constant 0 : index
    %c0_31 = arith.constant 0 : index
    %62 = vector.load %arg10[%c0_30, %c0_31] : memref<1x16xf32, #tpu.memory_space<vmem>>, vector<1x16xf32>
    %63 = arith.mulf %53, %61 : vector<1x16xf32>
    %64 = arith.subf %62, %63 : vector<1x16xf32>
    %65 = tpu.concatenate %61, %64 in 0 : vector<1x16xf32>, vector<1x16xf32> -> vector<2x16xf32>
    %c0_32 = arith.constant 0 : index
    %c0_33 = arith.constant 0 : index
    %66 = vector.load %arg8[%c0_32, %c0_33] : memref<16x640xbf16, #tpu.memory_space<vmem>>, vector<16x640xbf16>
    %67 = arith.truncf %65 : vector<2x16xf32> to vector<2x16xbf16>
    %cst_34 = arith.constant dense<0.000000e+00> : vector<2x640xf32>
    %68 = tpu.matmul %67, %66, %cst_34 {dimension_numbers = #tpu.dot_dimension_numbers<[1], [0], [0], [1], [0, 0, 1, 1], [], []>} : vector<2x16xbf16>, vector<16x640xbf16>, vector<2x640xf32> -> vector<2x640xf32>
    %69 = vector.extract_strided_slice %68 {offsets = [0, 0], sizes = [1, 640], strides = [1, 1]} : vector<2x640xf32> to vector<1x640xf32>
    %70 = vector.broadcast %69 : vector<1x640xf32> to vector<24x640xf32>
    %71 = arith.mulf %41, %70 : vector<24x640xf32>
    %72 = vector.extract_strided_slice %68 {offsets = [1, 0], sizes = [1, 640], strides = [1, 1]} : vector<2x640xf32> to vector<1x640xf32>
    %73 = vector.broadcast %72 : vector<1x640xf32> to vector<24x640xf32>
    %74 = arith.addf %71, %73 : vector<24x640xf32>
    %cst_35 = arith.constant 0.000000e+00 : f32
    %75 = vector.broadcast %cst_35 : f32 to vector<24x640xf32>
    %76 = arith.maximumf %74, %75 : vector<24x640xf32>
    %77 = vector.extract_strided_slice %76 {offsets = [0, 0], sizes = [24, 320], strides = [1, 1]} : vector<24x640xf32> to vector<24x320xf32>
    %c0_36 = arith.constant 0 : index
    %c0_37 = arith.constant 0 : index
    %78 = vector.load %arg11[%c0_36, %c0_37] : memref<320x640xbf16, #tpu.memory_space<vmem>>, vector<320x640xbf16>
    %79 = arith.truncf %77 : vector<24x320xf32> to vector<24x320xbf16>
    %cst_38 = arith.constant dense<0.000000e+00> : vector<24x640xf32>
    %80 = tpu.matmul %79, %78, %cst_38 {dimension_numbers = #tpu.dot_dimension_numbers<[1], [0], [0], [1], [0, 0, 1, 1], [], []>} : vector<24x320xbf16>, vector<320x640xbf16>, vector<24x640xf32> -> vector<24x640xf32>
    %81 = vector.extract_strided_slice %76 {offsets = [0, 320], sizes = [24, 320], strides = [1, 1]} : vector<24x640xf32> to vector<24x320xf32>
    %c0_39 = arith.constant 0 : index
    %c0_40 = arith.constant 0 : index
    %82 = vector.load %arg11[%c0_39, %c0_40] : memref<320x640xbf16, #tpu.memory_space<vmem>>, vector<320x640xbf16>
    %83 = arith.truncf %81 : vector<24x320xf32> to vector<24x320xbf16>
    %cst_41 = arith.constant dense<0.000000e+00> : vector<24x640xf32>
    %84 = tpu.matmul %83, %82, %cst_41 {dimension_numbers = #tpu.dot_dimension_numbers<[1], [0], [0], [1], [0, 0, 1, 1], [], []>} : vector<24x320xbf16>, vector<320x640xbf16>, vector<24x640xf32> -> vector<24x640xf32>
    %85 = tpu.concatenate %80, %84 in 1 : vector<24x640xf32>, vector<24x640xf32> -> vector<24x1280xf32>
    %cst_42 = arith.constant dense<0.000000e+00> : vector<1280xf32>
    %86 = vector.multi_reduction <add>, %85, %cst_42 [0] : vector<24x1280xf32> to vector<1280xf32>
    %87 = vector.shape_cast %86 : vector<1280xf32> to vector<1x1280xf32>
    %88 = arith.mulf %85, %85 : vector<24x1280xf32>
    %cst_43 = arith.constant dense<0.000000e+00> : vector<1280xf32>
    %89 = vector.multi_reduction <add>, %88, %cst_43 [0] : vector<24x1280xf32> to vector<1280xf32>
    %90 = vector.shape_cast %89 : vector<1280xf32> to vector<1x1280xf32>
    %91 = tpu.concatenate %87, %90 in 0 : vector<1x1280xf32>, vector<1x1280xf32> -> vector<2x1280xf32>
    %c0_44 = arith.constant 0 : index
    %c0_45 = arith.constant 0 : index
    %92 = vector.load %arg12[%c0_44, %c0_45] : memref<1280x8xbf16, #tpu.memory_space<vmem>>, vector<1280x8xbf16>
    %93 = arith.truncf %91 : vector<2x1280xf32> to vector<2x1280xbf16>
    %cst_46 = arith.constant dense<0.000000e+00> : vector<2x8xf32>
    %94 = tpu.matmul %93, %92, %cst_46 {dimension_numbers = #tpu.dot_dimension_numbers<[1], [0], [0], [1], [0, 0, 1, 1], [], []>} : vector<2x1280xbf16>, vector<1280x8xbf16>, vector<2x8xf32> -> vector<2x8xf32>
    %cst_47 = arith.constant 2.6041668E-4 : f32
    %95 = vector.broadcast %cst_47 : f32 to vector<2x8xf32>
    %96 = arith.mulf %94, %95 : vector<2x8xf32>
    %97 = vector.extract_strided_slice %96 {offsets = [0, 0], sizes = [1, 8], strides = [1, 1]} : vector<2x8xf32> to vector<1x8xf32>
    %98 = vector.extract_strided_slice %96 {offsets = [1, 0], sizes = [1, 8], strides = [1, 1]} : vector<2x8xf32> to vector<1x8xf32>
    %99 = arith.mulf %97, %97 : vector<1x8xf32>
    %100 = arith.subf %98, %99 : vector<1x8xf32>
    %c0_48 = arith.constant 0 : index
    %c0_49 = arith.constant 0 : index
    %101 = vector.load %arg14[%c0_48, %c0_49] : memref<1x8xf32, #tpu.memory_space<vmem>>, vector<1x8xf32>
    %cst_50 = arith.constant 9.99999974E-6 : f32
    %102 = vector.broadcast %cst_50 : f32 to vector<1x8xf32>
    %103 = arith.addf %100, %102 : vector<1x8xf32>
    %104 = math.rsqrt %103 : vector<1x8xf32>
    %105 = arith.mulf %101, %104 : vector<1x8xf32>
    %c0_51 = arith.constant 0 : index
    %c0_52 = arith.constant 0 : index
    %106 = vector.load %arg15[%c0_51, %c0_52] : memref<1x8xf32, #tpu.memory_space<vmem>>, vector<1x8xf32>
    %107 = arith.mulf %97, %105 : vector<1x8xf32>
    %108 = arith.subf %106, %107 : vector<1x8xf32>
    %109 = tpu.concatenate %105, %108 in 0 : vector<1x8xf32>, vector<1x8xf32> -> vector<2x8xf32>
    %c0_53 = arith.constant 0 : index
    %c0_54 = arith.constant 0 : index
    %110 = vector.load %arg13[%c0_53, %c0_54] : memref<8x1280xbf16, #tpu.memory_space<vmem>>, vector<8x1280xbf16>
    %111 = arith.truncf %109 : vector<2x8xf32> to vector<2x8xbf16>
    %cst_55 = arith.constant dense<0.000000e+00> : vector<2x1280xf32>
    %112 = tpu.matmul %111, %110, %cst_55 {dimension_numbers = #tpu.dot_dimension_numbers<[1], [0], [0], [1], [0, 0, 1, 1], [], []>} : vector<2x8xbf16>, vector<8x1280xbf16>, vector<2x1280xf32> -> vector<2x1280xf32>
    %113 = vector.extract_strided_slice %112 {offsets = [0, 0], sizes = [1, 1280], strides = [1, 1]} : vector<2x1280xf32> to vector<1x1280xf32>
    %114 = vector.broadcast %113 : vector<1x1280xf32> to vector<24x1280xf32>
    %115 = arith.mulf %85, %114 : vector<24x1280xf32>
    %116 = vector.extract_strided_slice %112 {offsets = [1, 0], sizes = [1, 1280], strides = [1, 1]} : vector<2x1280xf32> to vector<1x1280xf32>
    %117 = vector.broadcast %116 : vector<1x1280xf32> to vector<24x1280xf32>
    %118 = arith.addf %115, %117 : vector<24x1280xf32>
    %cst_56 = arith.constant 0.000000e+00 : f32
    %119 = vector.broadcast %cst_56 : f32 to vector<24x1280xf32>
    %120 = arith.maximumf %118, %119 : vector<24x1280xf32>
    %121 = vector.extract_strided_slice %120 {offsets = [0, 0], sizes = [24, 320], strides = [1, 1]} : vector<24x1280xf32> to vector<24x320xf32>
    %c0_57 = arith.constant 0 : index
    %c0_58 = arith.constant 0 : index
    %122 = vector.load %arg16[%c0_57, %c0_58] : memref<320x1280xbf16, #tpu.memory_space<vmem>>, vector<320x1280xbf16>
    %123 = arith.truncf %121 : vector<24x320xf32> to vector<24x320xbf16>
    %cst_59 = arith.constant dense<0.000000e+00> : vector<24x1280xf32>
    %124 = tpu.matmul %123, %122, %cst_59 {dimension_numbers = #tpu.dot_dimension_numbers<[1], [0], [0], [1], [0, 0, 1, 1], [], []>} : vector<24x320xbf16>, vector<320x1280xbf16>, vector<24x1280xf32> -> vector<24x1280xf32>
    %125 = vector.extract_strided_slice %120 {offsets = [0, 320], sizes = [24, 320], strides = [1, 1]} : vector<24x1280xf32> to vector<24x320xf32>
    %c0_60 = arith.constant 0 : index
    %c0_61 = arith.constant 0 : index
    %126 = vector.load %arg16[%c0_60, %c0_61] : memref<320x1280xbf16, #tpu.memory_space<vmem>>, vector<320x1280xbf16>
    %127 = arith.truncf %125 : vector<24x320xf32> to vector<24x320xbf16>
    %cst_62 = arith.constant dense<0.000000e+00> : vector<24x1280xf32>
    %128 = tpu.matmul %127, %126, %cst_62 {dimension_numbers = #tpu.dot_dimension_numbers<[1], [0], [0], [1], [0, 0, 1, 1], [], []>} : vector<24x320xbf16>, vector<320x1280xbf16>, vector<24x1280xf32> -> vector<24x1280xf32>
    %129 = vector.extract_strided_slice %120 {offsets = [0, 640], sizes = [24, 320], strides = [1, 1]} : vector<24x1280xf32> to vector<24x320xf32>
    %c0_63 = arith.constant 0 : index
    %c0_64 = arith.constant 0 : index
    %130 = vector.load %arg16[%c0_63, %c0_64] : memref<320x1280xbf16, #tpu.memory_space<vmem>>, vector<320x1280xbf16>
    %131 = arith.truncf %129 : vector<24x320xf32> to vector<24x320xbf16>
    %cst_65 = arith.constant dense<0.000000e+00> : vector<24x1280xf32>
    %132 = tpu.matmul %131, %130, %cst_65 {dimension_numbers = #tpu.dot_dimension_numbers<[1], [0], [0], [1], [0, 0, 1, 1], [], []>} : vector<24x320xbf16>, vector<320x1280xbf16>, vector<24x1280xf32> -> vector<24x1280xf32>
    %133 = vector.extract_strided_slice %120 {offsets = [0, 960], sizes = [24, 320], strides = [1, 1]} : vector<24x1280xf32> to vector<24x320xf32>
    %c0_66 = arith.constant 0 : index
    %c0_67 = arith.constant 0 : index
    %134 = vector.load %arg16[%c0_66, %c0_67] : memref<320x1280xbf16, #tpu.memory_space<vmem>>, vector<320x1280xbf16>
    %135 = arith.truncf %133 : vector<24x320xf32> to vector<24x320xbf16>
    %cst_68 = arith.constant dense<0.000000e+00> : vector<24x1280xf32>
    %136 = tpu.matmul %135, %134, %cst_68 {dimension_numbers = #tpu.dot_dimension_numbers<[1], [0], [0], [1], [0, 0, 1, 1], [], []>} : vector<24x320xbf16>, vector<320x1280xbf16>, vector<24x1280xf32> -> vector<24x1280xf32>
    %cst_69 = arith.constant 0.000000e+00 : f32
    %137 = vector.broadcast %cst_69 : f32 to vector<1x320xf32>
    %138 = vector.extract_strided_slice %124 {offsets = [0, 0], sizes = [24, 320], strides = [1, 1]} : vector<24x1280xf32> to vector<24x320xf32>
    %139 = vector.extract_strided_slice %138 {offsets = [1, 0], sizes = [23, 320], strides = [1, 1]} : vector<24x320xf32> to vector<23x320xf32>
    %140 = tpu.concatenate %139, %137 in 0 : vector<23x320xf32>, vector<1x320xf32> -> vector<24x320xf32>
    %141 = vector.extract_strided_slice %136 {offsets = [0, 960], sizes = [24, 320], strides = [1, 1]} : vector<24x1280xf32> to vector<24x320xf32>
    %142 = vector.extract_strided_slice %141 {offsets = [0, 0], sizes = [23, 320], strides = [1, 1]} : vector<24x320xf32> to vector<23x320xf32>
    %143 = tpu.concatenate %137, %142 in 0 : vector<1x320xf32>, vector<23x320xf32> -> vector<24x320xf32>
    %144 = tpu.iota {dimensions = array<i32: 0>} : vector<24x320xi32>
    %c12_i32 = arith.constant 12 : i32
    %c0_i32 = arith.constant 0 : i32
    %145 = arith.cmpi eq, %c12_i32, %c0_i32 : i32
    %c1_i32 = arith.constant 1 : i32
    %146 = arith.select %145, %c1_i32, %c12_i32 : i32
    %147 = vector.broadcast %146 : i32 to vector<24x320xi32>
    %148 = arith.remsi %144, %147 : vector<24x320xi32>
    %c0_i32_70 = arith.constant 0 : i32
    %149 = vector.broadcast %c0_i32_70 : i32 to vector<24x320xi32>
    %150 = arith.cmpi ne, %148, %149 : vector<24x320xi32>
    %c0_i32_71 = arith.constant 0 : i32
    %151 = vector.broadcast %c0_i32_71 : i32 to vector<24x320xi32>
    %152 = arith.cmpi slt, %148, %151 : vector<24x320xi32>
    %c0_i32_72 = arith.constant 0 : i32
    %153 = arith.cmpi slt, %146, %c0_i32_72 : i32
    %154 = vector.broadcast %153 : i1 to vector<24x320xi1>
    %155 = vector.broadcast %154 : vector<24x320xi1> to vector<24x320xi1>
    %156 = arith.xori %152, %155 : vector<24x320xi1>
    %157 = arith.andi %156, %150 : vector<24x320xi1>
    %158 = vector.broadcast %146 : i32 to vector<24x320xi32>
    %159 = arith.addi %148, %158 : vector<24x320xi32>
    %160 = arith.select %157, %159, %148 : vector<24x320xi1>, vector<24x320xi32>
    %c11_i32 = arith.constant 11 : i32
    %161 = vector.broadcast %c11_i32 : i32 to vector<24x320xi32>
    %162 = arith.cmpi ne, %160, %161 : vector<24x320xi32>
    %cst_73 = arith.constant 0.000000e+00 : f32
    %163 = vector.broadcast %cst_73 : f32 to vector<24x320xf32>
    %164 = arith.select %162, %140, %163 : vector<24x320xi1>, vector<24x320xf32>
    %c0_i32_74 = arith.constant 0 : i32
    %165 = vector.broadcast %c0_i32_74 : i32 to vector<24x320xi32>
    %166 = arith.cmpi ne, %160, %165 : vector<24x320xi32>
    %cst_75 = arith.constant 0.000000e+00 : f32
    %167 = vector.broadcast %cst_75 : f32 to vector<24x320xf32>
    %168 = arith.select %166, %143, %167 : vector<24x320xi1>, vector<24x320xf32>
    %169 = vector.extract_strided_slice %124 {offsets = [0, 320], sizes = [24, 320], strides = [1, 1]} : vector<24x1280xf32> to vector<24x320xf32>
    %170 = arith.addf %169, %168 : vector<24x320xf32>
    %171 = vector.extract_strided_slice %124 {offsets = [0, 640], sizes = [24, 320], strides = [1, 1]} : vector<24x1280xf32> to vector<24x320xf32>
    %172 = vector.extract_strided_slice %128 {offsets = [0, 0], sizes = [24, 320], strides = [1, 1]} : vector<24x1280xf32> to vector<24x320xf32>
    %173 = arith.addf %171, %172 : vector<24x320xf32>
    %174 = vector.extract_strided_slice %124 {offsets = [0, 960], sizes = [24, 320], strides = [1, 1]} : vector<24x1280xf32> to vector<24x320xf32>
    %175 = vector.extract_strided_slice %128 {offsets = [0, 320], sizes = [24, 320], strides = [1, 1]} : vector<24x1280xf32> to vector<24x320xf32>
    %176 = arith.addf %174, %175 : vector<24x320xf32>
    %177 = vector.extract_strided_slice %128 {offsets = [0, 640], sizes = [24, 320], strides = [1, 1]} : vector<24x1280xf32> to vector<24x320xf32>
    %178 = vector.extract_strided_slice %132 {offsets = [0, 0], sizes = [24, 320], strides = [1, 1]} : vector<24x1280xf32> to vector<24x320xf32>
    %179 = arith.addf %177, %178 : vector<24x320xf32>
    %180 = vector.extract_strided_slice %128 {offsets = [0, 960], sizes = [24, 320], strides = [1, 1]} : vector<24x1280xf32> to vector<24x320xf32>
    %181 = vector.extract_strided_slice %132 {offsets = [0, 320], sizes = [24, 320], strides = [1, 1]} : vector<24x1280xf32> to vector<24x320xf32>
    %182 = arith.addf %180, %181 : vector<24x320xf32>
    %183 = vector.extract_strided_slice %132 {offsets = [0, 640], sizes = [24, 320], strides = [1, 1]} : vector<24x1280xf32> to vector<24x320xf32>
    %184 = vector.extract_strided_slice %136 {offsets = [0, 0], sizes = [24, 320], strides = [1, 1]} : vector<24x1280xf32> to vector<24x320xf32>
    %185 = arith.addf %183, %184 : vector<24x320xf32>
    %186 = vector.extract_strided_slice %132 {offsets = [0, 960], sizes = [24, 320], strides = [1, 1]} : vector<24x1280xf32> to vector<24x320xf32>
    %187 = vector.extract_strided_slice %136 {offsets = [0, 320], sizes = [24, 320], strides = [1, 1]} : vector<24x1280xf32> to vector<24x320xf32>
    %188 = arith.addf %186, %187 : vector<24x320xf32>
    %189 = vector.extract_strided_slice %136 {offsets = [0, 640], sizes = [24, 320], strides = [1, 1]} : vector<24x1280xf32> to vector<24x320xf32>
    %190 = arith.addf %189, %164 : vector<24x320xf32>
    %191 = tpu.concatenate %170, %173, %176, %179, %182, %185, %188, %190 in 1 : vector<24x320xf32>, vector<24x320xf32>, vector<24x320xf32>, vector<24x320xf32>, vector<24x320xf32>, vector<24x320xf32>, vector<24x320xf32>, vector<24x320xf32> -> vector<24x2560xf32>
    %192 = math.tanh %191 : vector<24x2560xf32>
    %c0_76 = arith.constant 0 : index
    %c0_77 = arith.constant 0 : index
    %193 = vector.load %arg17[%c0_76, %c0_77] : memref<24x2560xf32, #tpu.memory_space<vmem>>, vector<24x2560xf32>
    tpu.vector_store %arg17[%c0_76, %c0_77], %192 {strides = array<i32>} : memref<24x2560xf32, #tpu.memory_space<vmem>>, vector<24x2560xf32>,
    return
  }
}

</mosaic_0001>

<bundles_post_ra>
// kernel: conditional_generator_forward.1
= control target key start
LH: loop header
LB: loop body
LE: loop exit
PB: predicated region body
PF: predicated region fallthrough
CT: control target
= control target key end

     0   :  { %s19214_s0 = inlined_call_operand.vmem [shape: f32[24,600], index: 0, kind: input, shape index: {}]   ;;  %s19215_s1 = inlined_call_operand.vmem [shape: bf16[600,320], index: 1, kind: input, shape index: {}]   ;;  %s19216_s2 = inlined_call_operand.vmem [shape: bf16[320,32], index: 2, kind: input, shape index: {}]   ;;  %s19217_s3 = inlined_call_operand.vmem [shape: bf16[32,320], index: 3, kind: input, shape index: {}]   ;;  %s19218_s4 = inlined_call_operand.vmem [shape: f32[1,32], index: 4, kind: input, shape index: {}]   ;;  %s19219_s5 = inlined_call_operand.vmem [shape: f32[1,32], index: 5, kind: input, shape index: {}]   ;;  %s19220_s6 = inlined_call_operand.vmem [shape: bf16[320,640], index: 6, kind: input, shape index: {}]   ;;  %s19221_s7 = inlined_call_operand.vmem [shape: bf16[640,16], index: 7, kind: input, shape index: {}]   ;;  %s19222_s8 = inlined_call_operand.vmem [shape: bf16[16,640], index: 8, kind: input, shape index: {}]   ;;  %s19223_s9 = inlined_call_operand.vmem [shape: f32[1,16], index: 9, kind: input, shape index: {}]   ;;  %s19224_s10 = inlined_call_operand.vmem [shape: f32[1,16], index: 10, kind: input, shape index: {}]   ;;  %s19225_s11 = inlined_call_operand.hbm [shape: bf16[320,640], index: 11, kind: input, shape index: {}]   ;;  %s19226_s12 = inlined_call_operand.vmem [shape: bf16[1280,8], index: 12, kind: input, shape index: {}]   ;;  %s19227_s13 = inlined_call_operand.vmem [shape: bf16[8,1280], index: 13, kind: input, shape index: {}]   ;;  %s19228_s14 = inlined_call_operand.vmem [shape: f32[1,8], index: 14, kind: input, shape index: {}]   ;;  %s19229_s15 = inlined_call_operand.vmem [shape: f32[1,8], index: 15, kind: input, shape index: {}]   ;;  %s19230_s16 = inlined_call_operand.vmem [shape: bf16[320,1280], index: 16, kind: input, shape index: {}]   ;;  %s19231_s17 = inlined_call_operand.vmem [shape: f32[24,2560], index: 17, kind: output, shape index: {}]  }
   0x1   :  { %19502 = sst [smem:[#allocation123_spill]] %s19214_s0 }
   0x2   :  { %19503 = sst [smem:[#allocation124_spill]] %s19215_s1 }
   0x3   :  { %22 = vsyncpa [#allocation3], 0  ;;  %s13066_s24 = smov [#allocation2]   ;;  %s13042_s28 = scalar_lea.hbm %s19225_s11, 12800 }
   0x4   :  { %s50_s25 = sshll.u32 %s13066_s24, 4  ;;  %p13043_p0 = scmp.ne.s32.totalorder %s19225_s11, %s13042_s28  ;;  %s51_s25 = int_to_ptr.vmem [resolvable:$true] %s50_s25 }
   0x5   :  { %p13046_p1 = scmp.lt.u32.totalorder %s13042_s28, %s19225_s11 }
   0x7   :  { %p13048_p2 = pnand %p13046_p1, %p13043_p0 }
   0x9   :  { %13051 = shalt.err (!%p13048_p2)
}
   0xa   :  { %s13052_s19 = scalar_lea.vmem %s51_s25, 12800  ;;  %p13057_p4 = scmp.lt.s32.totalorder %s51_s25, %s51_s25 }
   0xb   :  { %p13053_p3 = scmp.ne.s32.totalorder %s51_s25, %s13052_s19  ;;  %p13058_p5 = scmp.lt.s32.totalorder %s13052_s19, %s13052_s19 }
   0xd   :  { %p13059_p6 = por %p13058_p5, %p13057_p4 }
   0xf   :  { %p13060_p7 = pnand %p13059_p6, %p13053_p3 }
  0x11   :  { %13063 = shalt.err (!%p13060_p7)
}
  0x12   :  { %s13067_s1 = smov 320   ;;  %s13068_s20 = smov 20  }
  0x13   :  { %56 = dma.hbm_to_vmem [thread:$0]  %s19225_s11, 12800, %s51_s25, [#allocation3], %s13067_s1, %s13067_s1, %s13068_s20  }
  0x14   :  { %13064 = dma.done.wait [#allocation3], 12800  }
  0x15   :  { %13065 = vsyncadd [#allocation3], 4294954496  ;;  %s19504_s26 = sld [smem:[#allocation124_spill]]  ;;  %s19505_s20 = sld [smem:[#allocation123_spill]]  ;;  %vm846_vm0 = vcmask 719872   ;;  %vm853_vm1 = vcmask 1043456  }
  0x16   :  { %vm1176_vm2 = vcmask 523264   ;;  %vm1224_vm3 = vcmask 1040384   ;;  %vm13071_vm4 = vmmov 0   ;;  %vm1552_vm5 = vcmask 261120  }
  0x17   :  { %vm3255_vm6 = vcmask 130048   ;;  %vm5873_vm7 = vcmask 64512   ;;  %vm9627_vm10 = vcmask 1046528  }
  0x1b   :  { %v11778_v0 = vld [vmem:[%s19504_s26 + $0x4] ss:$12 sps:$4 sm:$0xff]   ;;  %v11780_v1 = vld [vmem:[%s19504_s26] ss:$12 sps:$4 sm:$0xff]   ;;  %v11781_v2 = vld [vmem:[%s19504_s26 + $0x1c] ss:$12 sps:$4 sm:$0xff]  }
  0x1c   :  { %863 = vmatprep.subr.bf16.mxu0 %v11778_v0  ;;  %v11783_v3 = vld [vmem:[%s19504_s26 + $0x18] ss:$12 sps:$4 sm:$0xff]   ;;  %v11784_v4 = vld [vmem:[%s19504_s26 + $0x34] ss:$12 sps:$4 sm:$0xff]   ;;  %v11786_v5 = vld [vmem:[%s19504_s26 + $0x30] ss:$12 sps:$4 sm:$0xff]  }
  0x1d   :  { %864 = vmatpush1.bf16.msra.mxu0 %v11780_v1  ;;  %v11793_v6 = vld [vmem:[%s19504_s26 + $0xc8] ss:$12 sps:$4 sm:$0xff]   ;;  %v11787_v7 = vld [vmem:[%s19504_s26 + $0x4c] ss:$12 sps:$4 sm:$0xff]   ;;  %v11790_v11 = vld [vmem:[%s19504_s26 + $0x64] ss:$12 sps:$4 sm:$0xff]  }
  0x1e   :  { %865 = vmatprep.subr.bf16.mxu0 %v11781_v2  ;;  %v11789_v8 = vld [vmem:[%s19504_s26 + $0x48] ss:$12 sps:$4 sm:$0xff]   ;;  %11096 = vmatprep.subr.bf16.mxu1 %v11793_v6  ;;  %v11798_v10 = vld [vmem:[%s19504_s26 + $0xe0] ss:$12 sps:$4 sm:$0xff]   ;;  %v11803_v13 = vld [vmem:[%s19504_s26 + $0xf8] ss:$12 sps:$4 sm:$0xff]  }
  0x1f   :  { %v11796_v9 = vld [vmem:[%s19504_s26 + $0x8] ss:$12 sps:$4 sm:$0xff]   ;;  %v11801_v12 = vld [vmem:[%s19504_s26 + $0x20] ss:$12 sps:$4 sm:$0xff]   ;;  %v11806_v16 = vld [vmem:[%s19504_s26 + $0x38] ss:$12 sps:$4 sm:$0xff]  }
  0x20   :  { %11097 = vmatpush3.bf16.msra.mxu1 %v11796_v9  ;;  %v11792_v14 = vld [vmem:[%s19504_s26 + $0x60] ss:$12 sps:$4 sm:$0xff]   ;;  %v11794_v15 = vld [vmem:[%s19504_s26 + $0x7c] ss:$12 sps:$4 sm:$0xff]   ;;  %v11797_v18 = vld [vmem:[%s19504_s26 + $0x78] ss:$12 sps:$4 sm:$0xff]  }
  0x21   :  { %866 = vmatpush1.bf16.msra.mxu0 %v11783_v3  ;;  %11098 = vmatprep.subr.bf16.mxu1 %v11798_v10  ;;  %v11808_v17 = vld [vmem:[%s19504_s26 + $0x110] ss:$12 sps:$4 sm:$0xff]   ;;  %v11799_v19 = vld [vmem:[%s19504_s26 + $0x94] ss:$12 sps:$4 sm:$0xff]   ;;  %v11804_v23 = vld [vmem:[%s19504_s26 + $0xac] ss:$12 sps:$4 sm:$0xff]  }
  0x22   :  { %867 = vmatprep.subr.bf16.mxu0 %v11784_v4  ;;  %v11811_v20 = vld [vmem:[%s19504_s26 + $0x50] ss:$12 sps:$4 sm:$0xff]   ;;  %v11813_v21 = vld [vmem:[%s19504_s26 + $0x128] ss:$12 sps:$4 sm:$0xff]   ;;  %v11818_v25 = vld [vmem:[%s19504_s26 + $0x140] ss:$12 sps:$4 sm:$0xff]  }
  0x23   :  { %v11802_v22 = vld [vmem:[%s19504_s26 + $0x90] ss:$12 sps:$4 sm:$0xff]   ;;  %v11816_v24 = vld [vmem:[%s19504_s26 + $0x68] ss:$12 sps:$4 sm:$0xff]   ;;  %v11821_v28 = vld [vmem:[%s19504_s26 + $0x80] ss:$12 sps:$4 sm:$0xff]  }
  0x24   :  { %11099 = vmatpush3.bf16.msra.mxu1 %v11801_v12  ;;  %v11807_v26 = vld [vmem:[%s19504_s26 + $0xa8] ss:$12 sps:$4 sm:$0xff]   ;;  %v11809_v27 = vld [vmem:[%s19504_s26 + $0xc4] ss:$12 sps:$4 sm:$0xff]   ;;  %v11812_v30 = vld [vmem:[%s19504_s26 + $0xc0] ss:$12 sps:$4 sm:$0xff]  }
  0x25   :  { %868 = vmatpush1.bf16.msra.mxu0 %v11786_v5  ;;  %11100 = vmatprep.subr.bf16.mxu1 %v11803_v13  ;;  %v11823_v29 = vld [vmem:[%s19504_s26 + $0x158] ss:$12 sps:$4 sm:$0xff]   ;;  %v11814_v31 = vld [vmem:[%s19504_s26 + $0xdc] ss:$12 sps:$4 sm:$0xff]   ;;  %v77_v36 = vld [vmem:[%s19505_s20 + $0x30] sm:$0xff] }
  0x26   :  { %869 = vmatprep.subr.bf16.mxu0 %v11787_v7  ;;  %v11826_v32 = vld [vmem:[%s19504_s26 + $0x98] ss:$12 sps:$4 sm:$0xff]   ;;  %v11828_v33 = vld [vmem:[%s19504_s26 + $0x170] ss:$12 sps:$4 sm:$0xff]   ;;  %v72_v35 = vld [vmem:[%s19505_s20 + $0x8] sm:$0xff] }
  0x27   :  { %v11817_v34 = vld [vmem:[%s19504_s26 + $0xd8] ss:$12 sps:$4 sm:$0xff]   ;;  %v11819_v37 = vld [vmem:[%s19504_s26 + $0xf4] ss:$12 sps:$4 sm:$0xff]   ;;  %v11831_v38 = vld [vmem:[%s19504_s26 + $0xb0] ss:$12 sps:$4 sm:$0xff]   ;;  %v237_v39 = vpack.c.bf16 %v77_v36, %v72_v35 }
  0x28   :  { %11101 = vmatpush3.bf16.msra.mxu1 %v11806_v16  ;;  %v11833_v40 = vld [vmem:[%s19504_s26 + $0x248] ss:$12 sps:$4 sm:$0xff]   ;;  %v71_v41 = vld [vmem:[%s19505_s20] sm:$0xff]  ;;  %v11822_v43 = vld [vmem:[%s19504_s26 + $0xf0] ss:$12 sps:$4 sm:$0xff]  }
  0x29   :  { %870 = vmatpush1.bf16.msra.mxu0 %v11789_v8  ;;  %11102 = vmatprep.subr.bf16.mxu1 %v11808_v17  ;;  %v76_v42 = vld [vmem:[%s19505_s20 + $0x28] sm:$0xff]  ;;  %v11829_v50 = vld [vmem:[%s19504_s26 + $0x124] ss:$12 sps:$4 sm:$0xff]   ;;  %v11839_v57 = vld [vmem:[%s19504_s26 + $0x154] ss:$12 sps:$4 sm:$0xff]  }
  0x2a   :  { %871 = vmatprep.subr.bf16.mxu0 %v11790_v11  ;;  %1048 = vmatprep.mubr.bf16.mxu1 %v237_v39  ;;  %v11824_v44 = vld [vmem:[%s19504_s26 + $0x10c] ss:$12 sps:$4 sm:$0xff]   ;;  %v13308_v45 = vpack.c.bf16 %v76_v42, %v71_v41  ;;  %v11836_v46 = vld [vmem:[%s19504_s26 + $0x188] ss:$12 sps:$4 sm:$0xff]   ;;  %v11848_v55 = vld [vmem:[%s19504_s26 + $0x290] ss:$12 sps:$4 sm:$0xff]  }
  0x2b   :  { %895 = vmatprep.mubr.bf16.mxu0 %v237_v39  ;;  %v11838_v47 = vld [vmem:[%s19504_s26 + $0x260] ss:$12 sps:$4 sm:$0xff]   ;;  %v11827_v48 = vld [vmem:[%s19504_s26 + $0x108] ss:$12 sps:$4 sm:$0xff]   ;;  %v11843_v51 = vld [vmem:[%s19504_s26 + $0x278] ss:$12 sps:$4 sm:$0xff]  }
  0x2c   :  { %11103 = vmatpush3.bf16.msra.mxu1 %v11811_v20  ;;  %v11841_v49 = vld [vmem:[%s19504_s26 + $0x1a0] ss:$12 sps:$4 sm:$0xff]   ;;  %v11834_v53 = vld [vmem:[%s19504_s26 + $0x13c] ss:$12 sps:$4 sm:$0xff]   ;;  %v11846_v54 = vld [vmem:[%s19504_s26 + $0x1b8] ss:$12 sps:$4 sm:$0xff]  }
  0x2d   :  { %872 = vmatpush1.bf16.msra.mxu0 %v11792_v14  ;;  %11104 = vmatprep.subr.bf16.mxu1 %v11813_v21  ;;  %v11832_v52 = vld [vmem:[%s19504_s26 + $0x120] ss:$12 sps:$4 sm:$0xff]   ;;  %v11837_v56 = vld [vmem:[%s19504_s26 + $0x138] ss:$12 sps:$4 sm:$0xff]   ;;  %v11852_v58 = vld [vmem:[%s19504_s26 + $0x1d0] ss:$12 sps:$4 sm:$0xff]  }
  0x2e   :  { %873 = vmatprep.subr.bf16.mxu0 %v11794_v15  ;;  %v11853_v59 = vld [vmem:[%s19504_s26 + $0x2a8] ss:$12 sps:$4 sm:$0xff]   ;;  %v11842_v60 = vld [vmem:[%s19504_s26 + $0x150] ss:$12 sps:$4 sm:$0xff]   ;;  %v11844_v61 = vld [vmem:[%s19504_s26 + $0x16c] ss:$12 sps:$4 sm:$0xff]  }
  0x2f   :  { %v82_v62 = vld [vmem:[%s19505_s20 + $0x58] sm:$0xff]  ;;  %v11857_v63 = vld [vmem:[%s19504_s26 + $0x1e8] ss:$12 sps:$4 sm:$0xff]   ;;  %v11858_v1 = vld [vmem:[%s19504_s26 + $0x2c0] ss:$12 sps:$4 sm:$0xff]  }
  0x30   :  { %11105 = vmatpush3.bf16.msra.mxu1 %v11816_v24  ;;  %v242_v0 = vpack.c.bf16 %v82_v62, %v82_v62  ;;  %v81_v2 = vld [vmem:[%s19505_s20 + $0x50] sm:$0xff]  ;;  %v11862_v5 = vld [vmem:[%s19504_s26 + $0x200] ss:$12 sps:$4 sm:$0xff]   ;;  %v11863_v7 = vld [vmem:[%s19504_s26 + $0x2d8] ss:$12 sps:$4 sm:$0xff]  }
  0x31   :  { %874 = vmatpush1.bf16.msra.mxu0 %v11797_v18  ;;  %11106 = vmatprep.subr.bf16.mxu1 %v11818_v25  ;;  %v11847_v3 = vld [vmem:[%s19504_s26 + $0x168] ss:$12 sps:$4 sm:$0xff]   ;;  %v241_v4 = vpack.c.bf16 %v81_v2, %v81_v2  ;;  %v11851_v6 = vld [vmem:[%s19504_s26 + $0x184] ss:$12 sps:$4 sm:$0xff]   ;;  %v11849_v8 = vld [vmem:[%s19504_s26 + $0x180] ss:$12 sps:$4 sm:$0xff]  }
  0x32   :  { %875 = vmatprep.subr.bf16.mxu0 %v11799_v19  ;;  %v74_v9 = vld [vmem:[%s19505_s20 + $0x18] sm:$0xff]  ;;  %v79_v10 = vld [vmem:[%s19505_s20 + $0x40] sm:$0xff]  ;;  %v73_v18 = vld [vmem:[%s19505_s20 + $0x10] sm:$0xff] }
  0x33   :  { %v11867_v11 = vld [vmem:[%s19504_s26 + $0x218] ss:$12 sps:$4 sm:$0xff]   ;;  %v239_v12 = vpack.c.bf16 %v79_v10, %v74_v9  ;;  %v11856_v13 = vld [vmem:[%s19504_s26 + $0x19c] ss:$12 sps:$4 sm:$0xff]   ;;  %v11861_v16 = vld [vmem:[%s19504_s26 + $0x1b4] ss:$12 sps:$4 sm:$0xff]  }
  0x34   :  { %11107 = vmatpush3.bf16.msra.mxu1 %v11821_v28  ;;  %v11868_v14 = vld [vmem:[%s19504_s26 + $0x2f0] ss:$12 sps:$4 sm:$0xff]   ;;  %v11854_v15 = vld [vmem:[%s19504_s26 + $0x198] ss:$12 sps:$4 sm:$0xff]   ;;  %v11873_v20 = vld [vmem:[%s19504_s26 + $0x308] ss:$12 sps:$4 sm:$0xff]  }
  0x35   :  { %876 = vmatpush1.bf16.msra.mxu0 %v11802_v22  ;;  %11108 = vmatprep.subr.bf16.mxu1 %v11823_v29  ;;  %v11872_v17 = vld [vmem:[%s19504_s26 + $0x230] ss:$12 sps:$4 sm:$0xff]   ;;  %v11877_v24 = vld [vmem:[%s19504_s26 + $0x320] ss:$12 sps:$4 sm:$0xff]   ;;  %v11921_v10 = vld [vmem:[%s19504_s26 + $0x348] ss:$12 sps:$4 sm:$0xff]  }
  0x36   :  { %877 = vmatprep.subr.bf16.mxu0 %v11804_v23  ;;  %v78_v19 = vld [vmem:[%s19505_s20 + $0x38] sm:$0xff]  ;;  %v84_v25 = vld [vmem:[%s19505_s20 + $0x68] sm:$0xff]  ;;  %v11871_v28 = vld [vmem:[%s19504_s26 + $0x1e4] ss:$12 sps:$4 sm:$0xff]  }
  0x37   :  { %v13420_v21 = vpack.c.bf16 %v78_v19, %v73_v18  ;;  %v11859_v22 = vld [vmem:[%s19504_s26 + $0x1b0] ss:$12 sps:$4 sm:$0xff]   ;;  %v11866_v23 = vld [vmem:[%s19504_s26 + $0x1cc] ss:$12 sps:$4 sm:$0xff]   ;;  %v83_v29 = vld [vmem:[%s19505_s20 + $0x60] sm:$0xff] }
  0x38   :  { %11109 = vmatpush3.bf16.msra.mxu1 %v11826_v32  ;;  %v75_v32 = vld [vmem:[%s19505_s20 + $0x20] sm:$0xff]  ;;  %v11876_v35 = vld [vmem:[%s19504_s26 + $0x1fc] ss:$12 sps:$4 sm:$0xff]   ;;  %v11884_v42 = vld [vmem:[%s19504_s26 + $0x22c] ss:$12 sps:$4 sm:$0xff]  }
  0x39   :  { %878 = vmatpush1.bf16.msra.mxu0 %v11807_v26  ;;  %11110 = vmatprep.subr.bf16.mxu1 %v11828_v33  ;;  %v13434_v26 = vpack.c.bf16 %v84_v25, %v84_v25  ;;  %v80_v33 = vld [vmem:[%s19505_s20 + $0x48] sm:$0xff]  ;;  %v11885_v36 = vld [vmem:[%s19504_s26 + $0x350] ss:$12 sps:$4 sm:$0xff]   ;;  %v11880_v39 = vld [vmem:[%s19504_s26 + $0x214] ss:$12 sps:$4 sm:$0xff]  }
  0x3a   :  { %879 = vmatprep.subr.bf16.mxu0 %v11809_v27  ;;  %v11864_v27 = vld [vmem:[%s19504_s26 + $0x1c8] ss:$12 sps:$4 sm:$0xff]   ;;  %v11878_v41 = vld [vmem:[%s19504_s26 + $0x210] ss:$12 sps:$4 sm:$0xff]   ;;  %v11911_v62 = vld [vmem:[%s19504_s26 + $0x2ec] ss:$12 sps:$4 sm:$0xff]  }
  0x3b   :  { %v234_v2 = vld [vmem:[%s19504_s26 + $0x378] sm:$0xff]  ;;  %v11932_v18 = vld [vmem:[%s19216_s2 + $0x8] sm:$0xff]   ;;  %v11933_v19 = vld [vmem:[%s19216_s2 + $0x50] sm:$0xff]  }
  0x3c   :  { %11111 = vmatpush3.bf16.msra.mxu1 %v11831_v38  ;;  %v11874_v38 = vld [vmem:[%s19504_s26 + $0x1f8] ss:$12 sps:$4 sm:$0xff]   ;;  %v11939_v25 = vld [vmem:[%s19216_s2 + $0x68] sm:$0xff]  }
  0x3d   :  { %880 = vmatpush1.bf16.msra.mxu0 %v11812_v30  ;;  %11124 = vmatprep.subr.bf16.mxu1 %v11833_v40  ;;  %v11881_v30 = vld [vmem:[%s19504_s26 + $0x338] ss:$12 sps:$4 sm:$0xff]   ;;  %v11889_v40 = vld [vmem:[%s19504_s26 + $0x368] ss:$12 sps:$4 sm:$0xff]  }
  0x3e   :  { %881 = vmatprep.subr.bf16.mxu0 %v11814_v31  ;;  %v13450_v31 = vpack.c.bf16 %v83_v29, %v83_v29 }
  0x3f   :  { %1049 = vmatmul.mubr.bf16.vlgmr.msra.gmra.mrb[0].mxu1 %v13308_v45 }
  0x40   :  { %11125 = vmatpush3.bf16.msra.mxu1 %v11836_v46  ;;  %1056 = vmatprep.mubr.bf16.mxu1 %v242_v0  ;;  %v85_v46 = vld [vmem:[%s19505_s20 + $0x70] sm:$0xff] }
  0x41   :  { %882 = vmatpush1.bf16.msra.mxu0 %v11817_v34  ;;  %11126 = vmatprep.subr.bf16.mxu1 %v11838_v47  ;;  %v11869_v34 = vld [vmem:[%s19504_s26 + $0x1e0] ss:$12 sps:$4 sm:$0xff]  }
  0x42   :  { %883 = vmatprep.subr.bf16.mxu0 %v11819_v37  ;;  %v13467_v37 = vpack.c.bf16 %v80_v33, %v75_v32  ;;  %v11941_v32 = vld [vmem:[%s19216_s2 + $0x70] sm:$0xff]  }
  0x44   :  { %11127 = vmatpush3.bf16.msra.mxu1 %v11841_v49  ;;  %v11892_v49 = vld [vmem:[%s19504_s26 + $0x25c] ss:$12 sps:$4 sm:$0xff]  }
  0x45   :  { %884 = vmatpush1.bf16.msra.mxu0 %v11822_v43  ;;  %11128 = vmatprep.subr.bf16.mxu1 %v11843_v51  ;;  %v11893_v43 = vld [vmem:[%s19504_s26 + $0x380] ss:$0 sps:$4 sm:$0xff]   ;;  %v11890_v51 = vld [vmem:[%s19504_s26 + $0x258] ss:$12 sps:$4 sm:$0xff]  }
  0x46   :  { %885 = vmatprep.subr.bf16.mxu0 %v11824_v44  ;;  %v11882_v44 = vld [vmem:[%s19504_s26 + $0x228] ss:$12 sps:$4 sm:$0xff]   ;;  %v861_v47 = vsel %vm853_vm1, %v11893_v43, 0 }
  0x47   :  { %1057 = vmatmul.mubr.bf16.gmra.mrb[4].mxu1 %v241_v4 }
  0x48   :  { %11129 = vmatpush3.bf16.msra.mxu1 %v11846_v54  ;;  %1096 = vmatprep.mubr.bf16.mxu1 %v239_v12  ;;  %v11899_v54 = vld [vmem:[%s19504_s26 + $0x28c] ss:$12 sps:$4 sm:$0xff]  }
  0x49   :  { %886 = vmatpush1.bf16.msra.mxu0 %v11827_v48  ;;  %11130 = vmatprep.subr.bf16.mxu1 %v11848_v55  ;;  %v11886_v48 = vld [vmem:[%s19504_s26 + $0x240] ss:$12 sps:$4 sm:$0xff]   ;;  %v11897_v55 = vld [vmem:[%s19504_s26 + $0x288] ss:$12 sps:$4 sm:$0xff]  }
  0x4a   :  { %887 = vmatprep.subr.bf16.mxu0 %v11829_v50  ;;  %v13507_v50 = vpack.c.bf16 %v85_v46, %v85_v46 }
  0x4c   :  { %11131 = vmatpush3.bf16.msra.mxu1 %v11852_v58  ;;  %v11905_v58 = vld [vmem:[%s19504_s26 + $0x2bc] ss:$12 sps:$4 sm:$0xff]  }
  0x4d   :  { %888 = vmatpush1.bf16.msra.mxu0 %v11832_v52  ;;  %11132 = vmatprep.subr.bf16.mxu1 %v11853_v59  ;;  %v11896_v52 = vld [vmem:[%s19504_s26 + $0x274] ss:$12 sps:$4 sm:$0xff]   ;;  %v11903_v59 = vld [vmem:[%s19504_s26 + $0x2b8] ss:$12 sps:$4 sm:$0xff]  }
  0x4e   :  { %889 = vmatprep.subr.bf16.mxu0 %v11834_v53  ;;  %v11894_v53 = vld [vmem:[%s19504_s26 + $0x270] ss:$12 sps:$4 sm:$0xff]  }
  0x50   :  { %11133 = vmatpush3.bf16.msra.mxu1 %v11857_v63  ;;  %v11909_v63 = vld [vmem:[%s19504_s26 + $0x2e8] ss:$12 sps:$4 sm:$0xff]  }
  0x51   :  { %890 = vmatpush1.bf16.msra.mxu0 %v11837_v56  ;;  %11134 = vmatprep.subr.bf16.mxu1 %v11858_v1  ;;  %v11902_v56 = vld [vmem:[%s19504_s26 + $0x2a4] ss:$12 sps:$4 sm:$0xff]   ;;  %v11912_v1 = vld [vmem:[%s19504_s26 + $0x300] ss:$12 sps:$4 sm:$0xff]  }
  0x52   :  { %891 = vmatprep.subr.bf16.mxu0 %v11839_v57  ;;  %v11900_v57 = vld [vmem:[%s19504_s26 + $0x2a0] ss:$12 sps:$4 sm:$0xff]  }
  0x54   :  { %11135 = vmatpush3.bf16.msra.mxu1 %v11862_v5  ;;  %v11920_v5 = vld [vmem:[%s19504_s26 + $0x334] ss:$12 sps:$4 sm:$0xff]  }
  0x55   :  { %892 = vmatpush1.bf16.msra.mxu0 %v11842_v60  ;;  %11136 = vmatprep.subr.bf16.mxu1 %v11863_v7  ;;  %v11908_v60 = vld [vmem:[%s19504_s26 + $0x2d4] ss:$12 sps:$4 sm:$0xff]   ;;  %v11918_v7 = vld [vmem:[%s19504_s26 + $0x330] ss:$12 sps:$4 sm:$0xff]  }
  0x56   :  { %893 = vmatprep.subr.bf16.mxu0 %v11844_v61  ;;  %v11906_v61 = vld [vmem:[%s19504_s26 + $0x2d0] ss:$12 sps:$4 sm:$0xff]  }
  0x58   :  { %11137 = vmatpush3.bf16.msra.mxu1 %v11867_v11  ;;  %v11926_v11 = vld [vmem:[%s19504_s26 + $0x364] ss:$12 sps:$4 sm:$0xff]  }
  0x59   :  { %894 = vmatpush1.bf16.msra.mxu0 %v11847_v3  ;;  %11138 = vmatprep.subr.bf16.mxu1 %v11868_v14  ;;  %v11917_v3 = vld [vmem:[%s19504_s26 + $0x31c] ss:$12 sps:$4 sm:$0xff]   ;;  %v10454_v14 = vcombine.high %v234_v2, %v234_v2 }
  0x5a   :  { %914 = vmatprep.subr.bf16.mxu0 %v11851_v6  ;;  %v10453_v6 = vcombine.low %v234_v2, %v234_v2 }
  0x5c   :  { %896 = vmatmul.mubr.bf16.vlgmr.msra.gmra.mrb[0].mxu0 %v13308_v45  ;;  %11139 = vmatpush3.bf16.msra.mxu1 %v11872_v17  ;;  %v11888_v45 = vld [vmem:[%s19504_s26 + $0x244] ss:$12 sps:$4 sm:$0xff]   ;;  %v855_v9 = vsel %vm853_vm1, %v10453_v6, 0  ;;  %v11931_v17 = vld [vmem:[%s19216_s2 + $0x48] sm:$0xff]  }
  0x5d   :  { %915 = vmatpush1.bf16.msra.mxu0 %v11849_v8  ;;  %905 = vmatprep.mubr.bf16.mxu0 %v242_v0  ;;  %v11914_v0 = vld [vmem:[%s19504_s26 + $0x304] ss:$12 sps:$4 sm:$0xff]   ;;  %v11923_v8 = vld [vmem:[%s19504_s26 + $0x34c] ss:$12 sps:$4 sm:$0xff]  }
  0x5e   :  { %916 = vmatprep.subr.bf16.mxu0 %v11856_v13  ;;  %11457 = vmatprep.subr.bf16.mxu1 %v11873_v20  ;;  %v11924_v13 = vld [vmem:[%s19504_s26 + $0x360] ss:$12 sps:$4 sm:$0xff]  }
  0x5f   :  { %1097 = vmatmul.mubr.bf16.vlgmr.msra.gmra.mrb[8].mxu1 %v13420_v21 }
  0x60   :  { %11458 = vmatpush3.bf16.msra.mxu1 %v11873_v20  ;;  %1104 = vmatprep.mubr.bf16.mxu1 %v13434_v26  ;;  %v11934_v20 = vld [vmem:[%s19216_s2 + $0x10] sm:$0xff]  }
  0x61   :  { %917 = vmatpush1.bf16.msra.mxu0 %v11854_v15  ;;  %11459 = vmatprep.subr.bf16.mxu1 %v11877_v24  ;;  %v11929_v15 = vld [vmem:[%s19216_s2 + $0x40] sm:$0xff]  }
  0x62   :  { %918 = vmatprep.subr.bf16.mxu0 %v11861_v16  ;;  %v11930_v16 = vld [vmem:[%s19216_s2] sm:$0xff]  }
  0x64   :  { %906 = vmatmul.mubr.bf16.gmra.mrb[4].mxu0 %v241_v4  ;;  %11460 = vmatpush3.bf16.msra.mxu1 %v11877_v24  ;;  %v11915_v4 = vld [vmem:[%s19504_s26 + $0x318] ss:$12 sps:$4 sm:$0xff]  }
  0x65   :  { %919 = vmatpush1.bf16.msra.mxu0 %v11859_v22  ;;  %946 = vmatprep.mubr.bf16.mxu0 %v239_v12  ;;  %v19234_v12 = vmov 0   ;;  %v11936_v22 = vld [vmem:[%s19216_s2 + $0x18] sm:$0xff]   ;;  %v11938_v24 = vld [vmem:[%s19216_s2 + $0x20] sm:$0xff]  }
  0x66   :  { %920 = vmatprep.subr.bf16.mxu0 %v11866_v23  ;;  %11461 = vmatprep.subr.bf16.mxu1 %v11881_v30  ;;  %v11937_v23 = vld [vmem:[%s19216_s2 + $0x60] sm:$0xff]  }
  0x67   :  { %1105 = vmatmul.mubr.bf16.gmra.mrb[12].mxu1 %v13450_v31 }
  0x68   :  { %11462 = vmatpush3.bf16.msra.mxu1 %v11881_v30  ;;  %11469 = vmatprep.mubr.msk.bf16.mxu1 %vm846_vm0, %v13467_v37 }
  0x69   :  { %921 = vmatpush1.bf16.msra.mxu0 %v11864_v27  ;;  %11463 = vmatprep.subr.bf16.mxu1 %v11885_v36  ;;  %v11940_v27 = vld [vmem:[%s19216_s2 + $0x28] sm:$0xff]  }
  0x6a   :  { %922 = vmatprep.subr.bf16.mxu0 %v11871_v28 }
  0x6c   :  { %11464 = vmatpush3.bf16.msra.mxu1 %v11885_v36  ;;  %v11944_v36 = vld [vmem:[%s19216_s2 + $0x38] sm:$0xff]  }
  0x6d   :  { %923 = vmatpush1.bf16.msra.mxu0 %v11869_v34  ;;  %11465 = vmatprep.subr.bf16.mxu1 %v11889_v40  ;;  %v11942_v34 = vld [vmem:[%s19216_s2 + $0x30] sm:$0xff]  }
  0x6e   :  { %924 = vmatprep.subr.bf16.mxu0 %v11876_v35  ;;  %v11943_v35 = vld [vmem:[%s19216_s2 + $0x78] sm:$0xff]  }
  0x70   :  { %11466 = vmatpush3.bf16.msra.mxu1 %v11889_v40 }
  0x71   :  { %925 = vmatpush1.bf16.msra.mxu0 %v11874_v38  ;;  %11763 = vmatprep.subr.msk.bf16.mxu1 %vm853_vm1, %v11893_v43 }
  0x72   :  { %926 = vmatprep.subr.bf16.mxu0 %v11880_v39 }
  0x74   :  { %11468 = vmatpush3.bf16.msra.mxu1 %v861_v47 }
  0x75   :  { %927 = vmatpush1.bf16.msra.mxu0 %v11878_v41  ;;  %11160 = vmatprep.subr.bf16.mxu1 %v11929_v15 }
  0x76   :  { %928 = vmatprep.subr.bf16.mxu0 %v11884_v42 }
  0x77   :  { %11470 = vmatmul.mubr.msk.bf16.vlgmr.msra.gmra.mrb[16].mxu1 %vm846_vm0, %v13507_v50 }
  0x78   :  { %11161 = vmatpush3.bf16.msra.mxu1 %v11930_v16 }
  0x79   :  { %929 = vmatpush1.bf16.msra.mxu0 %v11882_v44  ;;  %11162 = vmatprep.subr.bf16.mxu1 %v11931_v17 }
  0x7a   :  { %930 = vmatprep.subr.bf16.mxu0 %v11888_v45 }
  0x7c   :  { %11163 = vmatpush3.bf16.msra.mxu1 %v11932_v18 }
  0x7d   :  { %931 = vmatpush1.bf16.msra.mxu0 %v11886_v48  ;;  %11164 = vmatprep.subr.bf16.mxu1 %v11933_v19 }
  0x7e   :  { %932 = vmatprep.subr.bf16.mxu0 %v11892_v49 }
  0x80   :  { %11165 = vmatpush3.bf16.msra.mxu1 %v11934_v20 }
  0x81   :  { %933 = vmatpush1.bf16.msra.mxu0 %v11890_v51 }
  0x82   :  { %934 = vmatprep.subr.bf16.mxu0 %v11896_v52 }
  0x85   :  { %935 = vmatpush1.bf16.msra.mxu0 %v11894_v53 }
  0x86   :  { %936 = vmatprep.subr.bf16.mxu0 %v11899_v54 }
  0x89   :  { %937 = vmatpush1.bf16.msra.mxu0 %v11897_v55 }
  0x8a   :  { %938 = vmatprep.subr.bf16.mxu0 %v11902_v56 }
  0x8d   :  { %939 = vmatpush1.bf16.msra.mxu0 %v11900_v57 }
  0x8e   :  { %940 = vmatprep.subr.bf16.mxu0 %v11905_v58 }
  0x91   :  { %941 = vmatpush1.bf16.msra.mxu0 %v11903_v59 }
  0x92   :  { %942 = vmatprep.subr.bf16.mxu0 %v11908_v60 }
  0x95   :  { %943 = vmatpush1.bf16.msra.mxu0 %v11906_v61 }
  0x96   :  { %944 = vmatprep.subr.bf16.mxu0 %v11911_v62 }
  0x99   :  { %945 = vmatpush1.bf16.msra.mxu0 %v11909_v63 }
  0x9a   :  { %965 = vmatprep.subr.bf16.mxu0 %v11914_v0 }
  0x9c   :  { %947 = vmatmul.mubr.bf16.vlgmr.msra.gmra.mrb[0].mxu0 %v13420_v21  ;;  %v11935_v21 = vld [vmem:[%s19216_s2 + $0x58] sm:$0xff]  }
  0x9d   :  { %966 = vmatpush1.bf16.msra.mxu0 %v11912_v1  ;;  %956 = vmatprep.mubr.bf16.mxu0 %v13434_v26 }
  0x9e   :  { %967 = vmatprep.subr.bf16.mxu0 %v11917_v3  ;;  %11166 = vmatprep.subr.bf16.mxu1 %v11935_v21 }
  0x9f   :  { %11167 = vmatpush3.bf16.msra.mxu1 %v11936_v22 }
  0xa0   :  { %11168 = vmatprep.subr.bf16.mxu1 %v11937_v23 }
  0xa1   :  { %968 = vmatpush1.bf16.msra.mxu0 %v11915_v4 }
  0xa2   :  { %969 = vmatprep.subr.bf16.mxu0 %v11920_v5 }
  0xa3   :  { %11169 = vmatpush3.bf16.msra.mxu1 %v11938_v24 }
  0xa4   :  { %957 = vmatmul.mubr.bf16.gmra.mrb[4].mxu0 %v13450_v31  ;;  %11170 = vmatprep.subr.bf16.mxu1 %v11939_v25 }
  0xa5   :  { %970 = vmatpush1.bf16.msra.mxu0 %v11918_v7  ;;  %997 = vmatprep.mubr.bf16.mxu0 %v19234_v12 }
  0xa6   :  { %971 = vmatprep.subr.bf16.mxu0 %v11923_v8 }
  0xa7   :  { %11171 = vmatpush3.bf16.msra.mxu1 %v11940_v27 }
  0xa8   :  { %11172 = vmatprep.subr.bf16.mxu1 %v11941_v32 }
  0xa9   :  { %972 = vmatpush1.bf16.msra.mxu0 %v11921_v10 }
  0xaa   :  { %973 = vmatprep.subr.bf16.mxu0 %v11926_v11 }
  0xab   :  { %11173 = vmatpush3.bf16.msra.mxu1 %v11942_v34 }
  0xac   :  { %11174 = vmatprep.subr.bf16.mxu1 %v11943_v35 }
  0xad   :  { %974 = vmatpush1.bf16.msra.mxu0 %v11924_v13 }
  0xae   :  { %10456 = vmatprep.subr.msk.bf16.mxu0 %vm853_vm1, %v10454_v14 }
  0xaf   :  { %11175 = vmatpush3.bf16.msra.mxu1 %v11944_v36 }
  0xb1   :  { %976 = vmatpush1.bf16.msra.mxu0 %v855_v9 }
  0xb4   :  { %10457 = vmatmul.mubr.msk.bf16.vlgmr.msra.gmra.mrb[0].mxu0 %vm846_vm0, %v13467_v37  ;;  %v13070_v37 = vmov 0.0  }
  0xb5   :  { %1007 = vmatprep.mubr.bf16.mxu0 %v19234_v12  ;;  %11473 = vmatprep.subr.bf16.mxu1 %v13070_v37 }
  0xbc   :  { %10458 = vmatmul.mubr.msk.bf16.gmra.mrb[4].mxu0 %vm846_vm0, %v13507_v50 }
 0x112   :  { %v11112_v26 = vpop.f32.mrb[0].mxu1 }
 0x113   :  { %v11113_v28 = vpop.f32.mrb[1].mxu1 }
 0x114   :  { %v11114_v29 = vadd.f32 %v11113_v28, %v11112_v26  ;;  %v11115_v30 = vpop.f32.mrb[2].mxu1 }
 0x115   :  { %v11116_v31 = vpop.f32.mrb[3].mxu1 }
 0x116   :  { %v11117_v33 = vadd.f32 %v11116_v31, %v11115_v30 }
 0x11a   :  { %v11118_v38 = vpop.f32.mrb[4].mxu1 }
 0x11b   :  { %v11119_v39 = vpop.f32.mrb[5].mxu1 }
 0x11c   :  { %v11120_v40 = vadd.f32 %v11119_v39, %v11118_v38  ;;  %v11121_v41 = vpop.f32.mrb[6].mxu1 }
 0x11d   :  { %v11122_v42 = vpop.f32.mrb[7].mxu1 }
 0x132   :  { %v11140_v43 = vpop.f32.mrb[8].mxu1 }
 0x133   :  { %v11141_v44 = vpop.f32.mrb[9].mxu1 }
 0x134   :  { %v11142_v45 = vadd.f32 %v11141_v44, %v11140_v43  ;;  %v11143_v46 = vpop.f32.mrb[10].mxu1 }
 0x135   :  { %v11144_v47 = vpop.f32.mrb[11].mxu1 }
 0x136   :  { %v11145_v48 = vadd.f32 %v11144_v47, %v11143_v46  ;;  %v1099_v49 = vadd.f32 %v11142_v45, %v11114_v29 }
 0x138   :  { %v1102_v50 = vadd.f32 %v11145_v48, %v11117_v33 }
 0x13a   :  { %v11146_v51 = vpop.f32.mrb[12].mxu1 }
 0x13b   :  { %v11147_v52 = vpop.f32.mrb[13].mxu1 }
 0x13c   :  { %v11148_v53 = vadd.f32 %v11147_v52, %v11146_v51  ;;  %v11149_v54 = vpop.f32.mrb[14].mxu1 }
 0x13d   :  { %v11150_v55 = vpop.f32.mrb[15].mxu1 }
 0x13e   :  { %v1107_v56 = vadd.f32 %v11148_v53, %v11120_v40 }
 0x14a   :  { %v11471_v57 = vpop.f32.mrb[16].mxu1 }
 0x14b   :  { %v13643_v58 = vadd.f32 %v11471_v57, %v1107_v56  ;;  %v1146_v59 = vpop.f32.mrb[17].mxu1 }
 0x14c   :  { %v13645_v60 = vadd.f32 %v1146_v59, %v1099_v49  ;;  %v11472_v61 = vpop.f32.mrb[18].mxu1 }
 0x14d   :  { %v1149_v62 = vpop.f32.mrb[19].mxu1  ;;  %v1196_v13 = vmul.f32 %v13643_v58, %v13643_v58  ;;  %v1180_v26 = vsel %vm1176_vm2, %v13643_v58, 0.0 }
 0x14e   :  { %v13647_v63 = vadd.f32 %v1149_v62, %v1102_v50  ;;  %v1190_v2 = vmul.f32 %v13645_v60, %v13645_v60  ;;  %v1177_v14 = vsel %vm1176_vm2, %v13645_v60, 0.0 }
 0x14f   :  { %v1216_v27 = vsel %vm1176_vm2, %v1196_v13, 0.0 }
 0x150   :  { %v1193_v3 = vmul.f32 %v13647_v63, %v13647_v63  ;;  %v1213_v16 = vsel %vm1176_vm2, %v1190_v2, 0.0  ;;  %v1178_v17 = vsel %vm1176_vm2, %v13647_v63, 0.0 }
 0x151   :  { %v1179_v21 = vadd.f32 %v1178_v17, %v1177_v14  ;;  %v11945_v14 = vld [vmem:[%s19216_s2 + $0x80] sm:$0xff]  }
 0x152   :  { %v1214_v18 = vsel %vm1176_vm2, %v1193_v3, 0.0 }
 0x153   :  { %v1215_v22 = vadd.f32 %v1214_v18, %v1213_v16  ;;  %v1181_v36 = vadd.f32 %v1180_v26, %v1179_v21  ;;  %v11946_v18 = vld [vmem:[%s19216_s2 + $0x88] sm:$0xff]   ;;  %v11948_v26 = vld [vmem:[%s19216_s2 + $0x98] sm:$0xff]  }
 0x155   :  { %v1217_v38 = vadd.f32 %v1216_v27, %v1215_v22  ;;  %v1182_v47 = vrot.slane %v1181_v36, 4  ;;  %v11947_v22 = vld [vmem:[%s19216_s2 + $0x90] sm:$0xff]  }
 0x157   :  { %v1218_v48 = vrot.slane %v1217_v38, 4  ;;  %v1183_v57 = vadd.f32 %v1182_v47, %v1181_v36  ;;  %v11963_v36 = vld [vmem:[%s19220_s6 + $0x28] ss:$20 sps:$4 sm:$0xff]   ;;  %v11993_v47 = vld [vmem:[%s19220_s6 + $0xf0] ss:$20 sps:$4 sm:$0xff]  }
 0x159   :  { %v1219_v59 = vadd.f32 %v1218_v48, %v1217_v38  ;;  %v11971_v38 = vld [vmem:[%s19220_s6 + $0x54] ss:$20 sps:$4 sm:$0xff]   ;;  %v12001_v48 = vld [vmem:[%s19220_s6 + $0x11c] ss:$20 sps:$4 sm:$0xff]  }
 0x187   :  { %v13649_v0 = vpop.f32.mrb[0].mxu0 }
 0x188   :  { %v13651_v1 = vpop.f32.mrb[1].mxu0  ;;  %v1188_v5 = vmul.f32 %v13649_v0, %v13649_v0 }
 0x189   :  { %v13657_v4 = vpop.f32.mrb[2].mxu0  ;;  %v1189_v9 = vmul.f32 %v13651_v1, %v13651_v1 }
 0x18a   :  { %v1160_v6 = vadd.f32 %v13657_v4, %v13649_v0  ;;  %v1191_v7 = vmul.f32 %v13657_v4, %v13657_v4  ;;  %v13665_v8 = vpop.f32.mrb[3].mxu0 }
 0x18b   :  { %v1168_v10 = vadd.f32 %v13665_v8, %v13651_v1  ;;  %v1192_v11 = vmul.f32 %v13665_v8, %v13665_v8 }
 0x18c   :  { %v1197_v15 = vadd.f32 %v1191_v7, %v1188_v5  ;;  %v1184_v7 = vrot.slane %v1183_v57, 2 }
 0x18d   :  { %v1205_v19 = vadd.f32 %v1192_v11, %v1189_v9  ;;  %v1220_v9 = vrot.slane %v1219_v59, 2 }
 0x18e   :  { %v1185_v16 = vadd.f32 %v1184_v7, %v1183_v57  ;;  %v12023_v57 = vld [vmem:[%s19220_s6 + $0x1b8] ss:$20 sps:$4 sm:$0xff]  }
 0x18f   :  { %v13681_v20 = vpop.f32.mrb[4].mxu0  ;;  %v1221_v17 = vadd.f32 %v1220_v9, %v1219_v59  ;;  %v12031_v59 = vld [vmem:[%s19220_s6 + $0x1e4] ss:$20 sps:$4 sm:$0xff]  }
 0x190   :  { %v1161_v23 = vadd.f32 %v1160_v6, %v13681_v20  ;;  %v1194_v24 = vmul.f32 %v13681_v20, %v13681_v20  ;;  %v13686_v25 = vpop.f32.mrb[5].mxu0 }
 0x191   :  { %v1169_v28 = vadd.f32 %v1168_v10, %v13686_v25  ;;  %v1195_v29 = vmul.f32 %v13686_v25, %v13686_v25  ;;  %v1013_v30 = vpop.f32.mrb[6].mxu0  ;;  %v1222_v21 = vrot.slane %v1221_v17, 1 }
 0x192   :  { %v1162_v31 = vrot.slane %v1161_v23, 4  ;;  %v1198_v32 = vadd.f32 %v1197_v15, %v1194_v24  ;;  %v1014_v33 = vpop.f32.mrb[7].mxu0  ;;  %v11949_v30 = vld [vmem:[%s19217_s3] ss:$12 sps:$4 sm:$0xff]  }
 0x193   :  { %v1170_v34 = vrot.slane %v1169_v28, 4  ;;  %v1206_v35 = vadd.f32 %v1205_v19, %v1195_v29  ;;  %v1186_v19 = vrot.slane %v1185_v16, 1  ;;  %v1223_v24 = vadd.f32 %v1222_v21, %v1221_v17  ;;  %v11951_v29 = vld [vmem:[%s19217_s3 + $0x4] ss:$12 sps:$4 sm:$0xff]   ;;  %v11957_v33 = vld [vmem:[%s19220_s6] ss:$20 sps:$4 sm:$0xff]  }
 0x194   :  { %v1163_v39 = vadd.f32 %v1162_v31, %v1161_v23  ;;  %v1199_v40 = vrot.slane %v1198_v32, 4  ;;  %v11954_v31 = vld [vmem:[%s19217_s3 + $0x1c] ss:$12 sps:$4 sm:$0xff]  }
 0x195   :  { %v1171_v41 = vadd.f32 %v1170_v34, %v1169_v28  ;;  %v1207_v42 = vrot.slane %v1206_v35, 4  ;;  %v1187_v23 = vadd.f32 %v1186_v19, %v1185_v16  ;;  %v11959_v34 = vld [vmem:[%s19220_s6 + $0x4] ss:$20 sps:$4 sm:$0xff]   ;;  %v13072_v19 = vmov 1966171168  }
 0x196   :  { %v1164_v43 = vrot.slane %v1163_v39, 2  ;;  %v1200_v44 = vadd.f32 %v1199_v40, %v1198_v32  ;;  %v11952_v32 = vld [vmem:[%s19217_s3 + $0x18] ss:$12 sps:$4 sm:$0xff]   ;;  %2340 = vmatprep.subr.bf16.mxu0 %v11959_v34  ;;  %v11977_v40 = vld [vmem:[%s19220_s6 + $0x7c] ss:$20 sps:$4 sm:$0xff]   ;;  %v1485_v21 = vunpack.c.l.s4 %v13072_v19 }
 0x197   :  { %v1172_v45 = vrot.slane %v1171_v41, 2  ;;  %v1208_v46 = vadd.f32 %v1207_v42, %v1206_v35  ;;  %v1227_v27 = vsel %vm1224_vm3, %v1187_v23, %v1223_v24  ;;  %v11965_v35 = vld [vmem:[%s19220_s6 + $0x2c] ss:$20 sps:$4 sm:$0xff]   ;;  %2341 = vmatpush1.bf16.msra.mxu0 %v11957_v33  ;;  %v11983_v42 = vld [vmem:[%s19220_s6 + $0xa4] ss:$20 sps:$4 sm:$0xff]  }
 0x198   :  { %v1165_v49 = vadd.f32 %v1164_v43, %v1163_v39  ;;  %v1201_v50 = vrot.slane %v1200_v44, 2  ;;  %v1270_v28 = vpack.c.bf16 %v1227_v27, %v1227_v27  ;;  %2342 = vmatprep.subr.bf16.mxu0 %v11965_v35  ;;  %v11969_v39 = vld [vmem:[%s19220_s6 + $0x50] ss:$20 sps:$4 sm:$0xff]   ;;  %v11981_v43 = vld [vmem:[%s19220_s6 + $0xa0] ss:$20 sps:$4 sm:$0xff]   ;;  %v1486_v23 = vunpack.c.0.s8 %v1485_v21 }
 0x199   :  { %v1173_v51 = vadd.f32 %v1172_v45, %v1171_v41  ;;  %v1209_v52 = vrot.slane %v1208_v46, 2  ;;  %v11975_v41 = vld [vmem:[%s19220_s6 + $0x78] ss:$20 sps:$4 sm:$0xff]   ;;  %v11987_v45 = vld [vmem:[%s19220_s6 + $0xc8] ss:$20 sps:$4 sm:$0xff]  }
 0x19a   :  { %v1166_v53 = vrot.slane %v1165_v49, 1  ;;  %v1202_v54 = vadd.f32 %v1201_v50, %v1200_v44  ;;  %v11989_v44 = vld [vmem:[%s19220_s6 + $0xcc] ss:$20 sps:$4 sm:$0xff]   ;;  %v12007_v50 = vld [vmem:[%s19220_s6 + $0x144] ss:$20 sps:$4 sm:$0xff]  }
 0x19b   :  { %v1174_v55 = vrot.slane %v1173_v51, 1  ;;  %v1210_v56 = vadd.f32 %v1209_v52, %v1208_v46  ;;  %2343 = vmatpush1.bf16.msra.mxu0 %v11963_v36  ;;  %v11995_v46 = vld [vmem:[%s19220_s6 + $0xf4] ss:$20 sps:$4 sm:$0xff]   ;;  %v12013_v52 = vld [vmem:[%s19220_s6 + $0x16c] ss:$20 sps:$4 sm:$0xff]  }
 0x19c   :  { %v1203_v61 = vrot.slane %v1202_v54, 1  ;;  %v1167_v2 = vadd.f32 %v1166_v53, %v1165_v49  ;;  %2344 = vmatprep.subr.bf16.mxu0 %v11971_v38  ;;  %v11999_v49 = vld [vmem:[%s19220_s6 + $0x118] ss:$20 sps:$4 sm:$0xff]   ;;  %v12011_v53 = vld [vmem:[%s19220_s6 + $0x168] ss:$20 sps:$4 sm:$0xff]  }
 0x19d   :  { %v1211_v62 = vrot.slane %v1210_v56, 1  ;;  %v1175_v5 = vadd.f32 %v1174_v55, %v1173_v51  ;;  %v12005_v51 = vld [vmem:[%s19220_s6 + $0x140] ss:$20 sps:$4 sm:$0xff]   ;;  %v12017_v55 = vld [vmem:[%s19220_s6 + $0x190] ss:$20 sps:$4 sm:$0xff]  }
 0x19e   :  { %v1204_v3 = vadd.f32 %v1203_v61, %v1202_v54  ;;  %v12019_v54 = vld [vmem:[%s19220_s6 + $0x194] ss:$20 sps:$4 sm:$0xff]   ;;  %v1501_v33 = vld [vmem:[%s19219_s5] sm:$0x1]  ;;  %v12046_v19 = vld [vmem:[%s19220_s6 + $0x23c] ss:$20 sps:$4 sm:$0xff]  }
 0x19f   :  { %v1212_v6 = vadd.f32 %v1211_v62, %v1210_v56  ;;  %2345 = vmatpush1.bf16.msra.mxu0 %v11969_v39  ;;  %v12025_v56 = vld [vmem:[%s19220_s6 + $0x1bc] ss:$20 sps:$4 sm:$0xff]   ;;  %v12029_v61 = vld [vmem:[%s19220_s6 + $0x1e0] ss:$20 sps:$4 sm:$0xff]   ;;  %v12044_v21 = vld [vmem:[%s19220_s6 + $0x238] ss:$20 sps:$4 sm:$0xff]  }
 0x1a0   :  { %v1225_v10 = vsel %vm1224_vm3, %v1167_v2, %v1204_v3  ;;  %2346 = vmatprep.subr.bf16.mxu0 %v11977_v40  ;;  %v11955_v40 = vld [vmem:[%s19217_s3 + $0x8] ss:$12 sps:$4 sm:$0xff]  }
 0x1a1   :  { %v1226_v11 = vsel %vm1224_vm3, %v1175_v5, %v1212_v6  ;;  %v1268_v15 = vpack.c.bf16 %v1225_v10, %v1225_v10 }
 0x1a2   :  { %v1269_v13 = vpack.c.bf16 %v1226_v11, %v1226_v11 }
 0x1a3   :  { %2347 = vmatpush1.bf16.msra.mxu0 %v11975_v41 }
 0x1a4   :  { %1426 = vmatprep.mubr.bf16.mxu1 %v1269_v13  ;;  %2348 = vmatprep.subr.bf16.mxu0 %v11983_v42  ;;  %v11956_v42 = vld [vmem:[%s19217_s3 + $0x20] ss:$12 sps:$4 sm:$0xff]  }
 0x1a5   :  { %1427 = vmatmul.mubr.bf16.vlgmr.msra.gmra.mrb[20].mxu1 %v1268_v15 }
 0x1a6   :  { %11474 = vmatpush3.bf16.msra.mxu1 %v11945_v14  ;;  %11481 = vmatprep.mubr.msk.bf16.mxu1 %vm13071_vm4, %v13070_v37 }
 0x1a7   :  { %11475 = vmatprep.subr.bf16.mxu1 %v13070_v37  ;;  %2349 = vmatpush1.bf16.msra.mxu0 %v11981_v43  ;;  %v11962_v43 = vld [vmem:[%s19220_s6 + $0xc] ss:$20 sps:$4 sm:$0xff]  }
 0x1a8   :  { %2350 = vmatprep.subr.bf16.mxu0 %v11989_v44  ;;  %v11960_v44 = vld [vmem:[%s19220_s6 + $0x8] ss:$20 sps:$4 sm:$0xff]  }
 0x1aa   :  { %11476 = vmatpush3.bf16.msra.mxu1 %v11946_v18 }
 0x1ab   :  { %11477 = vmatprep.subr.bf16.mxu1 %v13070_v37  ;;  %2351 = vmatpush1.bf16.msra.mxu0 %v11987_v45  ;;  %v11968_v45 = vld [vmem:[%s19220_s6 + $0x34] ss:$20 sps:$4 sm:$0xff]  }
 0x1ac   :  { %2352 = vmatprep.subr.bf16.mxu0 %v11995_v46  ;;  %v11966_v46 = vld [vmem:[%s19220_s6 + $0x30] ss:$20 sps:$4 sm:$0xff]  }
 0x1ae   :  { %11478 = vmatpush3.bf16.msra.mxu1 %v11947_v22  ;;  %v1487_v22 = vlaneseq }
 0x1af   :  { %11479 = vmatprep.subr.bf16.mxu1 %v13070_v37  ;;  %2353 = vmatpush1.bf16.msra.mxu0 %v11993_v47  ;;  %v11974_v47 = vld [vmem:[%s19220_s6 + $0x5c] ss:$20 sps:$4 sm:$0xff]  }
 0x1b0   :  { %2354 = vmatprep.subr.bf16.mxu0 %v12001_v48  ;;  %v13807_v24 = vshrl.u32 %v1487_v22, 7  ;;  %v11972_v48 = vld [vmem:[%s19220_s6 + $0x58] ss:$20 sps:$4 sm:$0xff]   ;;  %v12049_v22 = vld [vmem:[%s19220_s6 + $0x25c] ss:$20 sps:$4 sm:$0xff]  }
 0x1b2   :  { %11480 = vmatpush3.bf16.msra.mxu1 %v11948_v26  ;;  %19506 = vst [vmem:[#allocation5_spill] sm:$0xff] %v13807_v24  ;;  %v13810_v26 = vsub.s32 %v1486_v23, %v13807_v24  ;;  %v13821_v35 = vsub.s32 0, %v13807_v24  ;;  %v12047_v23 = vld [vmem:[%s19220_s6 + $0x258] ss:$20 sps:$4 sm:$0xff]  }
 0x1b3   :  { %1556 = vmatprep.subr.bf16.mxu1 %v11951_v29  ;;  %2355 = vmatpush1.bf16.msra.mxu0 %v11999_v49  ;;  %v11980_v49 = vld [vmem:[%s19220_s6 + $0x84] ss:$20 sps:$4 sm:$0xff]  }
 0x1b4   :  { %2356 = vmatprep.subr.bf16.mxu0 %v12007_v50  ;;  %19507 = vst [vmem:[#allocation6_spill] sm:$0xff] %v13810_v26  ;;  %19508 = vst [vmem:[#allocation7_spill] sm:$0xff] %v13821_v35  ;;  %v11978_v50 = vld [vmem:[%s19220_s6 + $0x80] ss:$20 sps:$4 sm:$0xff]  }
 0x1b5   :  { %11482 = vmatmul.mubr.msk.bf16.vlgmr.msra.gmra.mrb[24].mxu1 %vm1176_vm2, %v1270_v28 }
 0x1b6   :  { %1588 = vmatprep.mubr.bf16.mxu1 %v19234_v12  ;;  %1557 = vmatpush1.bf16.msra.mxu1 %v11949_v30  ;;  %v1480_v30 = vld [vmem:[%s19218_s4] sm:$0x1] }
 0x1b7   :  { %1558 = vmatprep.subr.bf16.mxu1 %v11954_v31  ;;  %2357 = vmatpush1.bf16.msra.mxu0 %v12005_v51  ;;  %v11986_v51 = vld [vmem:[%s19220_s6 + $0xac] ss:$20 sps:$4 sm:$0xff]  }
 0x1b8   :  { %2358 = vmatprep.subr.bf16.mxu0 %v12013_v52  ;;  %v11984_v52 = vld [vmem:[%s19220_s6 + $0xa8] ss:$20 sps:$4 sm:$0xff]  }
 0x1ba   :  { %1559 = vmatpush1.bf16.msra.mxu1 %v11952_v32 }
 0x1bb   :  { %11485 = vmatprep.subr.bf16.mxu1 %v13070_v37  ;;  %2359 = vmatpush1.bf16.msra.mxu0 %v12011_v53  ;;  %v11992_v53 = vld [vmem:[%s19220_s6 + $0xd4] ss:$20 sps:$4 sm:$0xff]  }
 0x1bc   :  { %2360 = vmatprep.subr.bf16.mxu0 %v12019_v54  ;;  %v11990_v54 = vld [vmem:[%s19220_s6 + $0xd0] ss:$20 sps:$4 sm:$0xff]  }
 0x1bf   :  { %2361 = vmatpush1.bf16.msra.mxu0 %v12017_v55  ;;  %v11998_v55 = vld [vmem:[%s19220_s6 + $0xfc] ss:$20 sps:$4 sm:$0xff]  }
 0x1c0   :  { %2362 = vmatprep.subr.bf16.mxu0 %v12025_v56  ;;  %v11996_v56 = vld [vmem:[%s19220_s6 + $0xf8] ss:$20 sps:$4 sm:$0xff]  }
 0x1c3   :  { %2363 = vmatpush1.bf16.msra.mxu0 %v12023_v57  ;;  %v12004_v57 = vld [vmem:[%s19220_s6 + $0x124] ss:$20 sps:$4 sm:$0xff]  }
 0x1c4   :  { %2364 = vmatprep.subr.bf16.mxu0 %v12031_v59  ;;  %v12002_v59 = vld [vmem:[%s19220_s6 + $0x120] ss:$20 sps:$4 sm:$0xff]  }
 0x1c7   :  { %2365 = vmatpush1.bf16.msra.mxu0 %v12029_v61  ;;  %v12010_v61 = vld [vmem:[%s19220_s6 + $0x14c] ss:$20 sps:$4 sm:$0xff]  }
 0x278   :  { %v11176_v62 = vpop.f32.mrb[20].mxu1 }
 0x279   :  { %v11177_v2 = vpop.f32.mrb[21].mxu1 }
 0x27a   :  { %v11178_v3 = vadd.f32 %v11177_v2, %v11176_v62  ;;  %v11179_v5 = vpop.f32.mrb[22].mxu1  ;;  %v12008_v62 = vld [vmem:[%s19220_s6 + $0x148] ss:$20 sps:$4 sm:$0xff]  }
 0x27b   :  { %v11180_v6 = vpop.f32.mrb[23].mxu1  ;;  %v12016_v2 = vld [vmem:[%s19220_s6 + $0x174] ss:$20 sps:$4 sm:$0xff]   ;;  %v12022_v5 = vld [vmem:[%s19220_s6 + $0x19c] ss:$20 sps:$4 sm:$0xff]  }
 0x27c   :  { %v12020_v6 = vld [vmem:[%s19220_s6 + $0x198] ss:$20 sps:$4 sm:$0xff]  }
 0x288   :  { %v1468_v7 = vpop.f32.mrb[24].mxu1 }
 0x289   :  { %v1469_v9 = vadd.f32 %v11178_v3, %v1468_v7  ;;  %v11483_v10 = vpop.f32.mrb[25].mxu1  ;;  %v12014_v3 = vld [vmem:[%s19220_s6 + $0x170] ss:$20 sps:$4 sm:$0xff]  }
 0x28a   :  { %v1471_v11 = vpop.f32.mrb[26].mxu1  ;;  %v12028_v7 = vld [vmem:[%s19220_s6 + $0x1c4] ss:$20 sps:$4 sm:$0xff]   ;;  %v12034_v10 = vld [vmem:[%s19220_s6 + $0x1ec] ss:$20 sps:$4 sm:$0xff]  }
 0x28b   :  { %v1474_v13 = vmul.f32 0.004166667, %v1469_v9  ;;  %v11484_v14 = vpop.f32.mrb[27].mxu1  ;;  %v12026_v9 = vld [vmem:[%s19220_s6 + $0x1c0] ss:$20 sps:$4 sm:$0xff]  }
 0x28c   :  { %v12032_v11 = vld [vmem:[%s19220_s6 + $0x1e8] ss:$20 sps:$4 sm:$0xff]  }
 0x28d   :  { %v1475_v15 = vmul.f32 %v1474_v13, %v1474_v13  ;;  %v12035_v14 = vld [vmem:[%s19220_s6 + $0x208] ss:$20 sps:$4 sm:$0xff]  }
 0x28f   :  { %v1477_v16 = vrot.slane %v1475_v15, 7  ;;  %v12040_v15 = vld [vmem:[%s19220_s6 + $0x214] ss:$20 sps:$4 sm:$0xff]  }
 0x291   :  { %v1479_v17 = vsub.f32 %v1474_v13, %v1477_v16  ;;  %v12038_v16 = vld [vmem:[%s19220_s6 + $0x210] ss:$20 sps:$4 sm:$0xff]  }
 0x293   :  { %v1481_v18 = vadd.f32 1e-05, %v1479_v17  ;;  %v12043_v17 = vld [vmem:[%s19220_s6 + $0x234] ss:$20 sps:$4 sm:$0xff]  }
 0x295   :  { %12674 = vrsqrt.f32 %v1481_v18  ;;  %v12041_v18 = vld [vmem:[%s19220_s6 + $0x230] ss:$20 sps:$4 sm:$0xff]  }
 0x29f   :  { %v12675_v27 = vpop.eup %12674 }
 0x2a0   :  { %v1490_v28 = vrot.slane %v12675_v27, %v13810_v26  ;;  %v12052_v27 = vld [vmem:[%s19220_s6 + $0x264] ss:$20 sps:$4 sm:$0xff]  }
 0x2a2   :  { %v1491_v29 = vcombine.high %v1490_v28, %v1490_v28  ;;  %v12050_v28 = vld [vmem:[%s19220_s6 + $0x260] ss:$20 sps:$4 sm:$0xff]  }
 0x2a4   :  { %v1498_v31 = vrot.slane %v1491_v29, %v13810_v26  ;;  %v12055_v29 = vld [vmem:[%s19220_s6 + $0x284] ss:$20 sps:$4 sm:$0xff]  }
 0x2a6   :  { %v1500_v32 = vmul.f32 %v1498_v31, %v1480_v30  ;;  %v12058_v30 = vld [vmem:[%s19220_s6 + $0x28c] ss:$20 sps:$4 sm:$0xff]   ;;  %v13955_v31 = vsub.s32 1, %v13807_v24  ;;  %v14481_v24 = vld [vmem:[#allocation2 + $0x170] ss:$20 sps:$4 sm:$0xff]  }
 0x2a7   :  { %19528 = vst [vmem:[#allocation27_spill] sm:$0xff] %v14481_v24 }
 0x2a8   :  { %v1502_v34 = vmul.f32 %v1500_v32, %v1474_v13  ;;  %v12037_v13 = vld [vmem:[%s19220_s6 + $0x20c] ss:$20 sps:$4 sm:$0xff]   ;;  %19509 = vst [vmem:[#allocation8_spill] sm:$0xff] %v13955_v31 }
 0x2a9   :  { %2366 = vmatprep.subr.bf16.mxu0 %v12037_v13  ;;  %v12067_v13 = vld [vmem:[%s19220_s6 + $0x2d4] ss:$20 sps:$4 sm:$0xff]  }
 0x2aa   :  { %v1503_v36 = vsub.f32 %v1501_v33, %v1502_v34  ;;  %2367 = vmatpush1.bf16.msra.mxu0 %v12035_v14 }
 0x2ab   :  { %2368 = vmatprep.subr.bf16.mxu0 %v12043_v17 }
 0x2ac   :  { %v1508_v38 = vrot.slane %v1503_v36, %v13821_v35 }
 0x2ae   :  { %v1510_v39 = vsel %vm1224_vm3, %v1500_v32, %v1508_v38  ;;  %2369 = vmatpush1.bf16.msra.mxu0 %v12041_v18 }
 0x2af   :  { %v1519_v41 = vpack.c.bf16 %v1510_v39, %v1510_v39  ;;  %2370 = vmatprep.subr.bf16.mxu0 %v12049_v22  ;;  %v12076_v22 = vld [vmem:[%s19220_s6 + $0x304] ss:$20 sps:$4 sm:$0xff]  }
 0x2b1   :  { %10488 = vmatmul.mubr.msk.bf16.vlgmr.msra.gmra.mrb[28].mxu1 %vm1552_vm5, %v1519_v41 }
 0x2b2   :  { %11486 = vmatpush3.bf16.msra.mxu1 %v11955_v40  ;;  %11489 = vmatprep.mubr.msk.bf16.mxu1 %vm13071_vm4, %v13070_v37 }
 0x2b3   :  { %11487 = vmatprep.subr.bf16.mxu1 %v13070_v37  ;;  %2371 = vmatpush1.bf16.msra.mxu0 %v12047_v23  ;;  %v12071_v23 = vld [vmem:[%s19220_s6 + $0x2f8] ss:$20 sps:$4 sm:$0xff]  }
 0x2b4   :  { %2391 = vmatprep.subr.bf16.mxu0 %v12055_v29 }
 0x2b6   :  { %11488 = vmatpush3.bf16.msra.mxu1 %v11956_v42 }
 0x2b7   :  { %2442 = vmatprep.subr.bf16.mxu1 %v11962_v43 }
 0x2b9   :  { %11490 = vmatmul.mubr.msk.bf16.vlgmr.msra.gmra.mrb[32].mxu1 %vm1552_vm5, %v1519_v41 }
 0x2ba   :  { %2443 = vmatpush1.bf16.msra.mxu1 %v11960_v44 }
 0x2bb   :  { %2444 = vmatprep.subr.bf16.mxu1 %v11968_v45 }
 0x2be   :  { %2445 = vmatpush1.bf16.msra.mxu1 %v11966_v46 }
 0x2bf   :  { %2446 = vmatprep.subr.bf16.mxu1 %v11974_v47 }
 0x2c2   :  { %2447 = vmatpush1.bf16.msra.mxu1 %v11972_v48 }
 0x2c3   :  { %2448 = vmatprep.subr.bf16.mxu1 %v11980_v49 }
 0x2c6   :  { %2449 = vmatpush1.bf16.msra.mxu1 %v11978_v50 }
 0x2c7   :  { %2450 = vmatprep.subr.bf16.mxu1 %v11986_v51 }
 0x2ca   :  { %2451 = vmatpush1.bf16.msra.mxu1 %v11984_v52 }
 0x2cb   :  { %2452 = vmatprep.subr.bf16.mxu1 %v11992_v53 }
 0x2ce   :  { %2453 = vmatpush1.bf16.msra.mxu1 %v11990_v54 }
 0x2cf   :  { %2454 = vmatprep.subr.bf16.mxu1 %v11998_v55 }
 0x2d2   :  { %2455 = vmatpush1.bf16.msra.mxu1 %v11996_v56 }
 0x2d3   :  { %2456 = vmatprep.subr.bf16.mxu1 %v12004_v57 }
 0x2d6   :  { %2457 = vmatpush1.bf16.msra.mxu1 %v12002_v59 }
 0x2d7   :  { %2458 = vmatprep.subr.bf16.mxu1 %v12010_v61 }
 0x2da   :  { %2459 = vmatpush1.bf16.msra.mxu1 %v12008_v62 }
 0x2db   :  { %2460 = vmatprep.subr.bf16.mxu1 %v12016_v2  ;;  %v12056_v2 = vld [vmem:[%s19220_s6 + $0x288] ss:$20 sps:$4 sm:$0xff]  }
 0x2de   :  { %2461 = vmatpush1.bf16.msra.mxu1 %v12014_v3 }
 0x2df   :  { %2462 = vmatprep.subr.bf16.mxu1 %v12022_v5  ;;  %v12061_v5 = vld [vmem:[%s19220_s6 + $0x2ac] ss:$20 sps:$4 sm:$0xff]  }
 0x2e2   :  { %2463 = vmatpush1.bf16.msra.mxu1 %v12020_v6  ;;  %v12064_v6 = vld [vmem:[%s19220_s6 + $0x2b4] ss:$20 sps:$4 sm:$0xff]  }
 0x2e3   :  { %2464 = vmatprep.subr.bf16.mxu1 %v12028_v7  ;;  %v12059_v7 = vld [vmem:[%s19220_s6 + $0x2a8] ss:$20 sps:$4 sm:$0xff]  }
 0x2e6   :  { %2465 = vmatpush1.bf16.msra.mxu1 %v12026_v9 }
 0x2e7   :  { %2466 = vmatprep.subr.bf16.mxu1 %v12034_v10 }
 0x2ea   :  { %2467 = vmatpush1.bf16.msra.mxu1 %v12032_v11  ;;  %v12062_v11 = vld [vmem:[%s19220_s6 + $0x2b0] ss:$20 sps:$4 sm:$0xff]  }
 0x2eb   :  { %2468 = vmatprep.subr.bf16.mxu1 %v12040_v15  ;;  %v12065_v15 = vld [vmem:[%s19220_s6 + $0x2d0] ss:$20 sps:$4 sm:$0xff]  }
 0x2ee   :  { %2469 = vmatpush1.bf16.msra.mxu1 %v12038_v16 }
 0x2ef   :  { %2470 = vmatprep.subr.bf16.mxu1 %v12046_v19  ;;  %v12068_v19 = vld [vmem:[%s19220_s6 + $0x2d8] ss:$20 sps:$4 sm:$0xff]  }
 0x2f2   :  { %2471 = vmatpush1.bf16.msra.mxu1 %v12044_v21  ;;  %v12073_v21 = vld [vmem:[%s19220_s6 + $0x2fc] ss:$20 sps:$4 sm:$0xff]  }
 0x2f3   :  { %2472 = vmatprep.subr.bf16.mxu1 %v12052_v27 }
 0x2f6   :  { %2473 = vmatpush1.bf16.msra.mxu1 %v12050_v28 }
 0x2f7   :  { %2493 = vmatprep.subr.bf16.mxu1 %v12058_v30  ;;  %v12074_v30 = vld [vmem:[%s19220_s6 + $0x300] ss:$20 sps:$4 sm:$0xff]  }
 0x384   :  { %v1590_v32 = vpop.f32.mrb[28].mxu1 }
 0x385   :  { %v1640_v33 = vrot.slane %v1590_v32, %v13821_v35  ;;  %v1592_v34 = vpop.f32.mrb[29].mxu1  ;;  %v1661_v42 = vrot.slane %v1590_v32, %v13955_v31  ;;  %v12077_v32 = vld [vmem:[%s19220_s6 + $0x150] ss:$20 sps:$4 sm:$0xff]  }
 0x386   :  { %v1644_v36 = vrot.slane %v1592_v34, %v13821_v35  ;;  %v1594_v38 = vpop.f32.mrb[30].mxu1  ;;  %v1665_v47 = vrot.slane %v1592_v34, %v13955_v31 }
 0x387   :  { %v1649_v39 = vmul.f32 %v1640_v33, %v13649_v0  ;;  %v1652_v40 = vmul.f32 %v1640_v33, %v13657_v4  ;;  %v1655_v41 = vmul.f32 %v1640_v33, %v13681_v20  ;;  %v1595_v43 = vpop.f32.mrb[31].mxu1  ;;  %v12079_v33 = vld [vmem:[%s19220_s6 + $0x290] ss:$20 sps:$4 sm:$0xff]   ;;  %v12080_v38 = vld [vmem:[%s19220_s6 + $0x178] ss:$20 sps:$4 sm:$0xff]  }
 0x388   :  { %v1650_v44 = vmul.f32 %v1644_v36, %v13651_v1  ;;  %v1653_v45 = vmul.f32 %v1644_v36, %v13665_v8  ;;  %v1656_v46 = vmul.f32 %v1644_v36, %v13686_v25  ;;  %v12053_v25 = vld [vmem:[%s19220_s6 + $0x280] ss:$20 sps:$4 sm:$0xff]  }
 0x389   :  { %v1670_v48 = vadd.f32 %v1661_v42, %v1649_v39  ;;  %v1673_v49 = vadd.f32 %v1661_v42, %v1652_v40  ;;  %v1676_v50 = vadd.f32 %v1661_v42, %v1655_v41  ;;  %v12082_v39 = vld [vmem:[%s19220_s6 + $0x2b8] ss:$20 sps:$4 sm:$0xff]   ;;  %v12083_v42 = vld [vmem:[%s19220_s6 + $0x1a0] ss:$20 sps:$4 sm:$0xff]  }
 0x38a   :  { %v1671_v51 = vadd.f32 %v1665_v47, %v1650_v44  ;;  %v1674_v0 = vadd.f32 %v1665_v47, %v1653_v45  ;;  %v1677_v52 = vadd.f32 %v1665_v47, %v1656_v46  ;;  %v12081_v40 = vld [vmem:[%s19220_s6 + $0x38] ss:$20 sps:$4 sm:$0xff]   ;;  %v12085_v43 = vld [vmem:[%s19220_s6 + $0x2e0] ss:$20 sps:$4 sm:$0xff]   ;;  %v12086_v46 = vld [vmem:[%s19220_s6 + $0x1c8] ss:$20 sps:$4 sm:$0xff]  }
 0x38b   :  { %v1679_v4 = vmax.f32 %v1670_v48, 0.0  ;;  %v1682_v53 = vmax.f32 %v1673_v49, 0.0  ;;  %v1685_v14 = vmax.f32 %v1676_v50, 0.0  ;;  %v12084_v44 = vld [vmem:[%s19220_s6 + $0x60] ss:$20 sps:$4 sm:$0xff]  }
 0x38c   :  { %v1631_v20 = vpop.f32.mrb[32].mxu1  ;;  %v1680_v54 = vmax.f32 %v1671_v51, 0.0  ;;  %v1683_v55 = vmax.f32 %v1674_v0, 0.0  ;;  %v1686_v56 = vmax.f32 %v1677_v52, 0.0  ;;  %v12088_v47 = vld [vmem:[%s19220_s6 + $0x308] ss:$20 sps:$4 sm:$0xff]  }
 0x38d   :  { %v13967_v57 = vpack.c.bf16 %v1682_v53, %v1679_v4  ;;  %v11491_v1 = vpop.f32.mrb[33].mxu1  ;;  %v1648_v61 = vrot.slane %v1631_v20, %v13821_v35  ;;  %v14010_v18 = vpack.c.bf16 %v1685_v14, %v1685_v14  ;;  %v12087_v48 = vld [vmem:[%s19220_s6 + $0x88] ss:$20 sps:$4 sm:$0xff]   ;;  %v12089_v49 = vld [vmem:[%s19220_s6 + $0x1f0] ss:$20 sps:$4 sm:$0xff]  }
 0x38e   :  { %v1634_v8 = vpop.f32.mrb[34].mxu1  ;;  %v13969_v59 = vpack.c.bf16 %v1683_v55, %v1680_v54  ;;  %v13980_v3 = vpack.c.bf16 %v1686_v56, %v1686_v56  ;;  %v12097_v50 = vld [vmem:[%s19221_s7 + $0x40] sm:$0xff]   ;;  %v12091_v0 = vld [vmem:[%s19220_s6 + $0x218] ss:$20 sps:$4 sm:$0xff]   ;;  %v12095_v54 = vld [vmem:[%s19220_s6 + $0x268] ss:$20 sps:$4 sm:$0xff]  }
 0x38f   :  { %v11492_v62 = vpop.f32.mrb[35].mxu1  ;;  %v1651_v9 = vmul.f32 %v1648_v61, %v13645_v60  ;;  %v1654_v10 = vmul.f32 %v1648_v61, %v13647_v63  ;;  %v12070_v60 = vld [vmem:[%s19220_s6 + $0x2dc] ss:$20 sps:$4 sm:$0xff]   ;;  %v1669_v63 = vrot.slane %v1631_v20, %v13955_v31  ;;  %v1657_v27 = vmul.f32 %v1648_v61, %v13643_v58  ;;  %v12099_v52 = vld [vmem:[%s19221_s7] sm:$0xff]   ;;  %v12092_v4 = vld [vmem:[%s19220_s6 + $0xd8] ss:$20 sps:$4 sm:$0xff]  }
 0x390   :  { %2372 = vmatprep.mubr.bf16.mxu0 %v13969_v59  ;;  %2474 = vmatprep.mubr.bf16.mxu1 %v13969_v59  ;;  %v12078_v58 = vld [vmem:[%s19220_s6 + $0x10] ss:$20 sps:$4 sm:$0xff]   ;;  %v12093_v53 = vld [vmem:[%s19220_s6 + $0x240] ss:$20 sps:$4 sm:$0xff]   ;;  %v12096_v55 = vld [vmem:[%s19220_s6 + $0x128] ss:$20 sps:$4 sm:$0xff]  }
 0x391   :  { %2373 = vmatmul.mubr.bf16.vlgmr.msra.gmra.mrb[8].mxu0 %v13967_v57  ;;  %2475 = vmatmul.mubr.bf16.vlgmr.msra.gmra.mrb[36].mxu1 %v13967_v57  ;;  %v1672_v16 = vadd.f32 %v1669_v63, %v1651_v9  ;;  %v1675_v17 = vadd.f32 %v1669_v63, %v1654_v10  ;;  %v1678_v34 = vadd.f32 %v1669_v63, %v1657_v27  ;;  %v12090_v51 = vld [vmem:[%s19220_s6 + $0xb0] ss:$20 sps:$4 sm:$0xff]   ;;  %v12094_v20 = vld [vmem:[%s19220_s6 + $0x100] ss:$20 sps:$4 sm:$0xff]   ;;  %v12101_v8 = vld [vmem:[%s19221_s7 + $0x48] sm:$0xff]  }
 0x392   :  { %2392 = vmatpush1.bf16.msra.mxu0 %v12053_v25  ;;  %2382 = vmatprep.mubr.bf16.mxu0 %v13980_v3  ;;  %v12098_v56 = vld [vmem:[%s19221_s7 + $0xc0] sm:$0xff]   ;;  %v12103_v25 = vld [vmem:[%s19221_s7 + $0x8] sm:$0xff]   ;;  %v12105_v61 = vld [vmem:[%s19221_s7 + $0x50] sm:$0xff]  }
 0x393   :  { %2484 = vmatprep.mubr.bf16.mxu1 %v13980_v3  ;;  %2494 = vmatpush1.bf16.msra.mxu1 %v12056_v2  ;;  %v1681_v28 = vmax.f32 %v1672_v16, 0.0  ;;  %v1684_v29 = vmax.f32 %v1675_v17, 0.0  ;;  %v1687_v41 = vmax.f32 %v1678_v34, 0.0  ;;  %v12100_v1 = vld [vmem:[%s19221_s7 + $0x80] sm:$0xff]   ;;  %v12106_v62 = vld [vmem:[%s19221_s7 + $0xd0] sm:$0xff]   ;;  %v12112_v9 = vld [vmem:[%s19221_s7 + $0x98] sm:$0xff]  }
 0x394   :  { %2393 = vmatprep.subr.bf16.mxu0 %v12061_v5  ;;  %2495 = vmatprep.subr.bf16.mxu1 %v12064_v6  ;;  %v12107_v2 = vld [vmem:[%s19221_s7 + $0x10] sm:$0xff]   ;;  %v12109_v5 = vld [vmem:[%s19221_s7 + $0x58] sm:$0xff]   ;;  %v12113_v10 = vld [vmem:[%s19221_s7 + $0x60] sm:$0xff]  }
 0x395   :  { %v1810_v36 = vpack.c.bf16 %v1684_v29, %v1681_v28  ;;  %v1813_v45 = vpack.c.bf16 %v1687_v41, %v1687_v41  ;;  %v12110_v6 = vld [vmem:[%s19221_s7 + $0xd8] sm:$0xff]   ;;  %v12116_v14 = vld [vmem:[%s19221_s7 + $0xa0] sm:$0xff]   ;;  %v12118_v63 = vld [vmem:[%s19221_s7 + $0xe8] sm:$0xff]  }
 0x396   :  { %2394 = vmatpush1.bf16.msra.mxu0 %v12059_v7  ;;  %v12111_v7 = vld [vmem:[%s19221_s7 + $0x18] sm:$0xff]   ;;  %v12120_v16 = vld [vmem:[%s19221_s7 + $0xa8] sm:$0xff]   ;;  %v12121_v17 = vld [vmem:[%s19221_s7 + $0x70] sm:$0xff]  }
 0x397   :  { %2496 = vmatpush1.bf16.msra.mxu1 %v12062_v11  ;;  %2395 = vmatprep.subr.bf16.mxu0 %v12067_v13  ;;  %v12114_v11 = vld [vmem:[%s19221_s7 + $0xe0] sm:$0xff]   ;;  %v12127_v27 = vld [vmem:[%s19221_s7 + $0x38] sm:$0xff]  }
 0x398   :  { %2497 = vmatprep.subr.bf16.mxu1 %v12070_v60  ;;  %v12115_v13 = vld [vmem:[%s19221_s7 + $0x20] sm:$0xff]   ;;  %v12117_v60 = vld [vmem:[%s19221_s7 + $0x68] sm:$0xff]   ;;  %v12128_v28 = vld [vmem:[%s19221_s7 + $0xb8] sm:$0xff]  }
 0x399   :  { %2383 = vmatmul.mubr.bf16.gmra.mrb[12].mxu0 %v14010_v18  ;;  %2485 = vmatmul.mubr.bf16.gmra.mrb[40].mxu1 %v14010_v18 }
 0x39a   :  { %2396 = vmatpush1.bf16.msra.mxu0 %v12065_v15  ;;  %2423 = vmatprep.mubr.bf16.mxu0 %v19234_v12  ;;  %v12119_v15 = vld [vmem:[%s19221_s7 + $0x28] sm:$0xff]  }
 0x39b   :  { %2498 = vmatpush1.bf16.msra.mxu1 %v12068_v19  ;;  %2397 = vmatprep.subr.bf16.mxu0 %v12073_v21  ;;  %v12123_v19 = vld [vmem:[%s19221_s7 + $0x30] sm:$0xff]  }
 0x39c   :  { %2499 = vmatprep.subr.bf16.mxu1 %v12076_v22  ;;  %2525 = vmatprep.mubr.bf16.mxu1 %v19234_v12  ;;  %v12124_v21 = vld [vmem:[%s19221_s7 + $0xb0] sm:$0xff]   ;;  %v12125_v22 = vld [vmem:[%s19221_s7 + $0x78] sm:$0xff]  }
 0x39e   :  { %2398 = vmatpush1.bf16.msra.mxu0 %v12071_v23  ;;  %v12126_v23 = vld [vmem:[%s19221_s7 + $0xf8] sm:$0xff]  }
 0x39f   :  { %2500 = vmatpush1.bf16.msra.mxu1 %v12074_v30  ;;  %11190 = vmatprep.subr.bf16.mxu0 %v12077_v32 }
 0x3a0   :  { %11493 = vmatprep.subr.bf16.mxu1 %v12079_v33 }
 0x3a1   :  { %10590 = vmatmul.mubr.msk.bf16.vlgmr.msra.gmra.mrb[8].mxu0 %vm1176_vm2, %v1810_v36 }
 0x3a2   :  { %10592 = vmatmul.mubr.msk.bf16.vlgmr.msra.gmra.mrb[36].mxu1 %vm1176_vm2, %v1810_v36  ;;  %11191 = vmatpush3.bf16.msra.mxu0 %v12078_v58 }
 0x3a3   :  { %11494 = vmatpush3.bf16.msra.mxu1 %v12079_v33  ;;  %11192 = vmatprep.subr.bf16.mxu0 %v12080_v38 }
 0x3a4   :  { %11495 = vmatprep.subr.bf16.mxu1 %v12082_v39  ;;  %2433 = vmatprep.mubr.bf16.mxu0 %v19234_v12 }
 0x3a5   :  { %2535 = vmatprep.mubr.bf16.mxu1 %v19234_v12 }
 0x3a6   :  { %11193 = vmatpush3.bf16.msra.mxu0 %v12081_v40 }
 0x3a7   :  { %11496 = vmatpush3.bf16.msra.mxu1 %v12082_v39  ;;  %11194 = vmatprep.subr.bf16.mxu0 %v12083_v42 }
 0x3a8   :  { %11497 = vmatprep.subr.bf16.mxu1 %v12085_v43 }
 0x3a9   :  { %10591 = vmatmul.mubr.msk.bf16.gmra.mrb[12].mxu0 %vm1176_vm2, %v1813_v45 }
 0x3aa   :  { %10593 = vmatmul.mubr.msk.bf16.gmra.mrb[40].mxu1 %vm1176_vm2, %v1813_v45  ;;  %11195 = vmatpush3.bf16.msra.mxu0 %v12084_v44 }
 0x3ab   :  { %2576 = vmatprep.mubr.bf16.mxu0 %v13969_v59  ;;  %11498 = vmatpush3.bf16.msra.mxu1 %v12085_v43  ;;  %v12102_v59 = vld [vmem:[%s19221_s7 + $0xc8] sm:$0xff]  }
 0x3ac   :  { %11501 = vmatprep.mubr.msk.bf16.mxu1 %vm1176_vm2, %v1810_v36  ;;  %11196 = vmatprep.subr.bf16.mxu0 %v12086_v46 }
 0x3ad   :  { %11499 = vmatprep.subr.bf16.mxu1 %v12088_v47 }
 0x3ae   :  { %11197 = vmatpush3.bf16.msra.mxu0 %v12087_v48 }
 0x3af   :  { %11500 = vmatpush3.bf16.msra.mxu1 %v12088_v47  ;;  %11198 = vmatprep.subr.bf16.mxu0 %v12089_v49 }
 0x3b0   :  { %11224 = vmatprep.subr.bf16.mxu1 %v12097_v50 }
 0x3b2   :  { %11199 = vmatpush3.bf16.msra.mxu0 %v12090_v51  ;;  %11502 = vmatmul.mubr.msk.bf16.vlgmr.msra.gmra.mrb[44].mxu1 %vm1176_vm2, %v1813_v45 }
 0x3b3   :  { %11200 = vmatprep.subr.bf16.mxu0 %v12091_v0  ;;  %11225 = vmatpush3.bf16.msra.mxu1 %v12099_v52 }
 0x3b4   :  { %11226 = vmatprep.subr.bf16.mxu1 %v12101_v8 }
 0x3b6   :  { %11201 = vmatpush3.bf16.msra.mxu0 %v12092_v4 }
 0x3b7   :  { %11202 = vmatprep.subr.bf16.mxu0 %v12093_v53  ;;  %11227 = vmatpush3.bf16.msra.mxu1 %v12103_v25 }
 0x3b8   :  { %11228 = vmatprep.subr.bf16.mxu1 %v12105_v61 }
 0x3ba   :  { %11203 = vmatpush3.bf16.msra.mxu0 %v12094_v20 }
 0x3bb   :  { %11204 = vmatprep.subr.bf16.mxu0 %v12095_v54  ;;  %11229 = vmatpush3.bf16.msra.mxu1 %v12107_v2 }
 0x3bc   :  { %11230 = vmatprep.subr.bf16.mxu1 %v12109_v5 }
 0x3be   :  { %11205 = vmatpush3.bf16.msra.mxu0 %v12096_v55 }
 0x3bf   :  { %11246 = vmatprep.subr.bf16.mxu0 %v12098_v56  ;;  %11231 = vmatpush3.bf16.msra.mxu1 %v12111_v7 }
 0x3c0   :  { %11232 = vmatprep.subr.bf16.mxu1 %v12113_v10 }
 0x3c1   :  { %2577 = vmatmul.mubr.bf16.vlgmr.msra.gmra.mrb[16].mxu0 %v13967_v57  ;;  %v12104_v57 = vld [vmem:[%s19221_s7 + $0x88] sm:$0xff]  }
 0x3c2   :  { %2584 = vmatprep.mubr.bf16.mxu0 %v13980_v3  ;;  %11247 = vmatpush3.bf16.msra.mxu0 %v12100_v1  ;;  %v12108_v3 = vld [vmem:[%s19221_s7 + $0x90] sm:$0xff]  }
 0x3c3   :  { %11248 = vmatprep.subr.bf16.mxu0 %v12102_v59  ;;  %11233 = vmatpush3.bf16.msra.mxu1 %v12115_v13 }
 0x3c4   :  { %11234 = vmatprep.subr.bf16.mxu1 %v12117_v60 }
 0x3c6   :  { %11249 = vmatpush3.bf16.msra.mxu0 %v12104_v57 }
 0x3c7   :  { %11250 = vmatprep.subr.bf16.mxu0 %v12106_v62  ;;  %11235 = vmatpush3.bf16.msra.mxu1 %v12119_v15 }
 0x3c8   :  { %11236 = vmatprep.subr.bf16.mxu1 %v12121_v17 }
 0x3c9   :  { %2585 = vmatmul.mubr.bf16.gmra.mrb[20].mxu0 %v14010_v18  ;;  %v12122_v18 = vld [vmem:[%s19221_s7 + $0xf0] sm:$0xff]  }
 0x3ca   :  { %11251 = vmatpush3.bf16.msra.mxu0 %v12108_v3 }
 0x3cb   :  { %11252 = vmatprep.subr.bf16.mxu0 %v12110_v6  ;;  %11237 = vmatpush3.bf16.msra.mxu1 %v12123_v19 }
 0x3cc   :  { %11238 = vmatprep.subr.bf16.mxu1 %v12125_v22 }
 0x3ce   :  { %11253 = vmatpush3.bf16.msra.mxu0 %v12112_v9 }
 0x3cf   :  { %11254 = vmatprep.subr.bf16.mxu0 %v12114_v11  ;;  %11239 = vmatpush3.bf16.msra.mxu1 %v12127_v27 }
 0x3d0   :  { %11505 = vmatprep.subr.bf16.mxu1 %v13070_v37 }
 0x3d2   :  { %11255 = vmatpush3.bf16.msra.mxu0 %v12116_v14 }
 0x3d3   :  { %11256 = vmatprep.subr.bf16.mxu0 %v12118_v63 }
 0x3d6   :  { %11257 = vmatpush3.bf16.msra.mxu0 %v12120_v16 }
 0x3d7   :  { %11258 = vmatprep.subr.bf16.mxu0 %v12122_v18 }
 0x3da   :  { %11259 = vmatpush3.bf16.msra.mxu0 %v12124_v21 }
 0x3db   :  { %11260 = vmatprep.subr.bf16.mxu0 %v12126_v23 }
 0x3de   :  { %11261 = vmatpush3.bf16.msra.mxu0 %v12128_v28 }
 0x474   :  { %v14201_v29 = vpop.f32.mrb[8].mxu0 }
 0x475   :  { %v14203_v30 = vpop.f32.mrb[36].mxu1  ;;  %v14205_v32 = vpop.f32.mrb[9].mxu0  ;;  %v2680_v33 = vmul.f32 %v14201_v29, %v14201_v29 }
 0x476   :  { %v14209_v58 = vpop.f32.mrb[37].mxu1  ;;  %v14211_v34 = vpop.f32.mrb[10].mxu0  ;;  %v2682_v36 = vmul.f32 %v14203_v30, %v14203_v30  ;;  %v2681_v38 = vmul.f32 %v14205_v32, %v14205_v32 }
 0x477   :  { %v2640_v39 = vadd.f32 %v14211_v34, %v14201_v29  ;;  %v2685_v40 = vmul.f32 %v14211_v34, %v14211_v34  ;;  %v14221_v41 = vpop.f32.mrb[38].mxu1  ;;  %v14223_v42 = vpop.f32.mrb[11].mxu0  ;;  %v2683_v48 = vmul.f32 %v14209_v58, %v14209_v58 }
 0x478   :  { %v2656_v43 = vadd.f32 %v14221_v41, %v14203_v30  ;;  %v2687_v44 = vmul.f32 %v14221_v41, %v14221_v41  ;;  %v2648_v45 = vadd.f32 %v14223_v42, %v14205_v32  ;;  %v2686_v46 = vmul.f32 %v14223_v42, %v14223_v42  ;;  %v14233_v47 = vpop.f32.mrb[39].mxu1 }
 0x479   :  { %v2695_v49 = vadd.f32 %v2685_v40, %v2680_v33  ;;  %v2664_v50 = vadd.f32 %v14233_v47, %v14209_v58  ;;  %v2688_v51 = vmul.f32 %v14233_v47, %v14233_v47 }
 0x47a   :  { %v2711_v0 = vadd.f32 %v2687_v44, %v2682_v36  ;;  %v2703_v52 = vadd.f32 %v2686_v46, %v2681_v38 }
 0x47b   :  { %v2719_v4 = vadd.f32 %v2688_v51, %v2683_v48 }
 0x47c   :  { %v14241_v53 = vpop.f32.mrb[12].mxu0 }
 0x47d   :  { %v2641_v20 = vadd.f32 %v2640_v39, %v14241_v53  ;;  %v2690_v54 = vmul.f32 %v14241_v53, %v14241_v53  ;;  %v14246_v55 = vpop.f32.mrb[40].mxu1  ;;  %v14248_v56 = vpop.f32.mrb[13].mxu0 }
 0x47e   :  { %v2657_v1 = vadd.f32 %v2656_v43, %v14246_v55  ;;  %v2692_v8 = vmul.f32 %v14246_v55, %v14246_v55  ;;  %v2649_v59 = vadd.f32 %v2648_v45, %v14248_v56  ;;  %v2691_v25 = vmul.f32 %v14248_v56, %v14248_v56  ;;  %v14256_v57 = vpop.f32.mrb[41].mxu1  ;;  %v2439_v61 = vpop.f32.mrb[14].mxu0 }
 0x47f   :  { %v2642_v62 = vrot.slane %v2641_v20, 4  ;;  %v2696_v2 = vadd.f32 %v2695_v49, %v2690_v54  ;;  %v2665_v3 = vadd.f32 %v2664_v50, %v14256_v57  ;;  %v2693_v5 = vmul.f32 %v14256_v57, %v14256_v57  ;;  %v2541_v6 = vpop.f32.mrb[42].mxu1  ;;  %v2440_v7 = vpop.f32.mrb[15].mxu0 }
 0x480   :  { %v2658_v9 = vrot.slane %v2657_v1, 4  ;;  %v2712_v10 = vadd.f32 %v2711_v0, %v2692_v8  ;;  %v2650_v11 = vrot.slane %v2649_v59, 4  ;;  %v2704_v13 = vadd.f32 %v2703_v52, %v2691_v25  ;;  %v2542_v14 = vpop.f32.mrb[43].mxu1 }
 0x481   :  { %v2643_v60 = vadd.f32 %v2642_v62, %v2641_v20  ;;  %v2697_v63 = vrot.slane %v2696_v2, 4  ;;  %v2666_v15 = vrot.slane %v2665_v3, 4  ;;  %v2720_v16 = vadd.f32 %v2719_v4, %v2693_v5 }
 0x482   :  { %v2659_v17 = vadd.f32 %v2658_v9, %v2657_v1  ;;  %v2713_v18 = vrot.slane %v2712_v10, 4  ;;  %v2651_v19 = vadd.f32 %v2650_v11, %v2649_v59  ;;  %v2705_v21 = vrot.slane %v2704_v13, 4 }
 0x483   :  { %v2644_v22 = vrot.slane %v2643_v60, 2  ;;  %v2698_v23 = vadd.f32 %v2697_v63, %v2696_v2  ;;  %v2667_v27 = vadd.f32 %v2666_v15, %v2665_v3  ;;  %v2721_v28 = vrot.slane %v2720_v16, 4 }
 0x484   :  { %v2660_v33 = vrot.slane %v2659_v17, 2  ;;  %v2714_v36 = vadd.f32 %v2713_v18, %v2712_v10  ;;  %v2652_v38 = vrot.slane %v2651_v19, 2  ;;  %v2706_v39 = vadd.f32 %v2705_v21, %v2704_v13 }
 0x485   :  { %v2645_v40 = vadd.f32 %v2644_v22, %v2643_v60  ;;  %v2699_v43 = vrot.slane %v2698_v23, 2  ;;  %v2668_v44 = vrot.slane %v2667_v27, 2  ;;  %v2722_v45 = vadd.f32 %v2721_v28, %v2720_v16  ;;  %v14261_v46 = vpop.f32.mrb[44].mxu1 }
 0x486   :  { %v2661_v48 = vadd.f32 %v2660_v33, %v2659_v17  ;;  %v2715_v49 = vrot.slane %v2714_v36, 2  ;;  %v2653_v50 = vadd.f32 %v2652_v38, %v2651_v19  ;;  %v2707_v51 = vrot.slane %v2706_v39, 2  ;;  %v2626_v0 = vpop.f32.mrb[45].mxu1 }
 0x487   :  { %v2646_v52 = vrot.slane %v2645_v40, 1  ;;  %v2700_v4 = vadd.f32 %v2699_v43, %v2698_v23  ;;  %v2669_v20 = vadd.f32 %v2668_v44, %v2667_v27  ;;  %v2723_v54 = vrot.slane %v2722_v45, 2  ;;  %v11504_v1 = vpop.f32.mrb[46].mxu1  ;;  %v12129_v23 = vld [vmem:[%s19221_s7 + $0x100] sm:$0xff]  }
 0x488   :  { %v2662_v8 = vrot.slane %v2661_v48, 1  ;;  %v2716_v59 = vadd.f32 %v2715_v49, %v2714_v36  ;;  %v2654_v25 = vrot.slane %v2653_v50, 1  ;;  %v2708_v61 = vadd.f32 %v2707_v51, %v2706_v39  ;;  %v2629_v62 = vpop.f32.mrb[47].mxu1  ;;  %v12130_v36 = vld [vmem:[%s19221_s7 + $0x108] sm:$0xff]   ;;  %v12132_v51 = vld [vmem:[%s19221_s7 + $0x118] sm:$0xff]  }
 0x489   :  { %v2701_v2 = vrot.slane %v2700_v4, 1  ;;  %v2670_v3 = vrot.slane %v2669_v20, 1  ;;  %v2724_v5 = vadd.f32 %v2723_v54, %v2722_v45  ;;  %v2647_v9 = vadd.f32 %v2646_v52, %v2645_v40  ;;  %v12131_v45 = vld [vmem:[%s19221_s7 + $0x110] sm:$0xff]  }
 0x48a   :  { %v2717_v6 = vrot.slane %v2716_v59, 1  ;;  %v2709_v7 = vrot.slane %v2708_v61, 1  ;;  %v2663_v13 = vadd.f32 %v2662_v8, %v2661_v48  ;;  %v2655_v60 = vadd.f32 %v2654_v25, %v2653_v50  ;;  %v12133_v8 = vld [vmem:[%s19221_s7 + $0x120] sm:$0xff]  }
 0x48b   :  { %v2702_v10 = vadd.f32 %v2701_v2, %v2700_v4  ;;  %v2725_v11 = vrot.slane %v2724_v5, 1  ;;  %v2671_v15 = vadd.f32 %v2670_v3, %v2669_v20 }
 0x48c   :  { %v2718_v14 = vadd.f32 %v2717_v6, %v2716_v59  ;;  %v2710_v63 = vadd.f32 %v2709_v7, %v2708_v61 }
 0x48d   :  { %v2726_v16 = vadd.f32 %v2725_v11, %v2724_v5  ;;  %v2735_v17 = vsel %vm1224_vm3, %v2647_v9, %v2702_v10  ;;  %v12134_v5 = vld [vmem:[%s19221_s7 + $0x128] sm:$0xff]   ;;  %v12135_v10 = vld [vmem:[%s19221_s7 + $0x130] sm:$0xff]  }
 0x48e   :  { %v2736_v18 = vsel %vm1224_vm3, %v2655_v60, %v2710_v63  ;;  %v2737_v19 = vsel %vm1224_vm3, %v2663_v13, %v2718_v14  ;;  %v2820_v28 = vpack.c.bf16 %v2735_v17, %v2735_v17  ;;  %v12136_v63 = vld [vmem:[%s19221_s7 + $0x138] sm:$0xff]  }
 0x48f   :  { %v2821_v21 = vpack.c.bf16 %v2736_v18, %v2736_v18  ;;  %v2738_v22 = vsel %vm1224_vm3, %v2671_v15, %v2726_v16  ;;  %v2822_v33 = vpack.c.bf16 %v2737_v19, %v2737_v19 }
 0x490   :  { %v2823_v27 = vpack.c.bf16 %v2738_v22, %v2738_v22 }
 0x491   :  { %3097 = vmatprep.mubr.bf16.mxu1 %v2821_v21 }
 0x492   :  { %3137 = vmatprep.mubr.bf16.mxu0 %v2823_v27  ;;  %3098 = vmatmul.mubr.bf16.vlgmr.msra.gmra.mrb[48].mxu1 %v2820_v28  ;;  %v12137_v27 = vld [vmem:[%s19222_s8] ss:$20 sps:$4 sm:$0xff]  }
 0x493   :  { %3138 = vmatmul.mubr.bf16.vlgmr.msra.gmra.mrb[24].mxu0 %v2822_v33  ;;  %11506 = vmatpush3.bf16.msra.mxu1 %v12129_v23  ;;  %v12139_v23 = vld [vmem:[%s19222_s8 + $0x4] ss:$20 sps:$4 sm:$0xff]   ;;  %v12142_v28 = vld [vmem:[%s19222_s8 + $0xc] ss:$20 sps:$4 sm:$0xff]  }
 0x494   :  { %v11206_v38 = vpop.f32.mrb[16].mxu0  ;;  %11507 = vmatprep.subr.bf16.mxu1 %v13070_v37  ;;  %11521 = vmatprep.mubr.msk.bf16.mxu1 %vm13071_vm4, %v13070_v37  ;;  %v14327_v33 = vld [vmem:[#allocation2] ss:$20 sps:$4 sm:$0xff]  }
 0x495   :  { %v11207_v39 = vpop.f32.mrb[17].mxu0  ;;  %3291 = vmatprep.mubr.bf16.mxu0 %v19234_v12  ;;  %3259 = vmatprep.subr.bf16.mxu0 %v12139_v23 }
 0x496   :  { %v11208_v40 = vadd.f32 %v11207_v39, %v11206_v38  ;;  %v11209_v43 = vpop.f32.mrb[18].mxu0  ;;  %3260 = vmatpush1.bf16.msra.mxu0 %v12137_v27  ;;  %v14331_v38 = vld [vmem:[#allocation2 + $0x2c] ss:$20 sps:$4 sm:$0xff]   ;;  %v14335_v39 = vld [vmem:[#allocation2 + $0x28] ss:$20 sps:$4 sm:$0xff]  }
 0x497   :  { %v11210_v44 = vpop.f32.mrb[19].mxu0  ;;  %11508 = vmatpush3.bf16.msra.mxu1 %v12130_v36  ;;  %3300 = vmatprep.subr.bf16.mxu0 %v12142_v28  ;;  %v14329_v36 = vld [vmem:[#allocation2 + $0x4] ss:$20 sps:$4 sm:$0xff]  }
 0x498   :  { %v14280_v48 = vadd.f32 %v11208_v40, %v2626_v0  ;;  %v11211_v49 = vadd.f32 %v11210_v44, %v11209_v43  ;;  %11509 = vmatprep.subr.bf16.mxu1 %v13070_v37  ;;  %v14338_v40 = vld [vmem:[#allocation2 + $0x54] ss:$20 sps:$4 sm:$0xff]   ;;  %v14341_v43 = vld [vmem:[#allocation2 + $0x50] ss:$20 sps:$4 sm:$0xff]  }
 0x499   :  { %v14344_v44 = vld [vmem:[#allocation2 + $0x7c] ss:$20 sps:$4 sm:$0xff]  }
 0x49a   :  { %v14283_v50 = vadd.f32 %v11211_v49, %v2629_v62  ;;  %v2684_v59 = vmul.f32 %v14280_v48, %v14280_v48  ;;  %v14350_v49 = vld [vmem:[#allocation2 + $0xa4] ss:$20 sps:$4 sm:$0xff]  }
 0x49b   :  { %11510 = vmatpush3.bf16.msra.mxu1 %v12131_v45  ;;  %v14347_v45 = vld [vmem:[#allocation2 + $0x78] ss:$20 sps:$4 sm:$0xff]  }
 0x49c   :  { %v11212_v52 = vpop.f32.mrb[20].mxu0  ;;  %11511 = vmatprep.subr.bf16.mxu1 %v13070_v37  ;;  %v2689_v20 = vmul.f32 %v14283_v50, %v14283_v50  ;;  %v2672_v25 = vadd.f32 %v14283_v50, %v14280_v48 }
 0x49d   :  { %v11213_v4 = vpop.f32.mrb[21].mxu0 }
 0x49e   :  { %v11214_v54 = vadd.f32 %v11213_v4, %v11212_v52  ;;  %v11215_v0 = vpop.f32.mrb[22].mxu0  ;;  %v2727_v62 = vadd.f32 %v2689_v20, %v2684_v59  ;;  %v14356_v52 = vld [vmem:[#allocation2 + $0xcc] ss:$20 sps:$4 sm:$0xff]   ;;  %v14359_v4 = vld [vmem:[#allocation2 + $0xc8] ss:$20 sps:$4 sm:$0xff]  }
 0x49f   :  { %v11216_v1 = vpop.f32.mrb[23].mxu0  ;;  %11512 = vmatpush3.bf16.msra.mxu1 %v12132_v51  ;;  %v14353_v51 = vld [vmem:[#allocation2 + $0xa0] ss:$20 sps:$4 sm:$0xff]   ;;  %v14368_v0 = vld [vmem:[#allocation2 + $0x11c] ss:$20 sps:$4 sm:$0xff]  }
 0x4a0   :  { %v14299_v61 = vadd.f32 %v14261_v46, %v11214_v54  ;;  %11513 = vmatprep.subr.bf16.mxu1 %v13070_v37  ;;  %v14362_v20 = vld [vmem:[#allocation2 + $0xf4] ss:$20 sps:$4 sm:$0xff]   ;;  %v14365_v54 = vld [vmem:[#allocation2 + $0xf0] ss:$20 sps:$4 sm:$0xff]   ;;  %v14371_v1 = vld [vmem:[#allocation2 + $0x118] ss:$20 sps:$4 sm:$0xff]  }
 0x4a1   :  { %v14377_v59 = vld [vmem:[#allocation2 + $0x140] ss:$20 sps:$4 sm:$0xff]  }
 0x4a2   :  { %v2673_v2 = vadd.f32 %v2672_v25, %v14299_v61  ;;  %v2694_v3 = vmul.f32 %v14299_v61, %v14299_v61  ;;  %19510 = vst [vmem:[#allocation9_spill] sm:$0xff] %v14377_v59  ;;  %v14380_v25 = vld [vmem:[#allocation2 + $0x16c] ss:$20 sps:$4 sm:$0xff]  }
 0x4a3   :  { %11514 = vmatpush3.bf16.msra.mxu1 %v12133_v8  ;;  %v14374_v8 = vld [vmem:[#allocation2 + $0x144] ss:$20 sps:$4 sm:$0xff]   ;;  %19511 = vst [vmem:[#allocation10_spill] sm:$0xff] %v14380_v25 }
 0x4a4   :  { %v2674_v6 = vrot.slane %v2673_v2, 4  ;;  %v2728_v7 = vadd.f32 %v2727_v62, %v2694_v3  ;;  %11515 = vmatprep.subr.bf16.mxu1 %v13070_v37  ;;  %v14383_v62 = vld [vmem:[#allocation2 + $0x168] ss:$20 sps:$4 sm:$0xff]  }
 0x4a5   :  { %19512 = vst [vmem:[#allocation11_spill] sm:$0xff] %v14383_v62 }
 0x4a6   :  { %v2675_v9 = vadd.f32 %v2674_v6, %v2673_v2  ;;  %v2729_v46 = vrot.slane %v2728_v7, 4  ;;  %v14386_v6 = vld [vmem:[#allocation2 + $0x194] ss:$20 sps:$4 sm:$0xff]  }
 0x4a7   :  { %11516 = vmatpush3.bf16.msra.mxu1 %v12134_v5  ;;  %19513 = vst [vmem:[#allocation12_spill] sm:$0xff] %v14386_v6 }
 0x4a8   :  { %v2676_v11 = vrot.slane %v2675_v9, 2  ;;  %v2730_v13 = vadd.f32 %v2729_v46, %v2728_v7  ;;  %11517 = vmatprep.subr.bf16.mxu1 %v13070_v37 }
 0x4aa   :  { %v2677_v14 = vadd.f32 %v2676_v11, %v2675_v9  ;;  %v2731_v60 = vrot.slane %v2730_v13, 2 }
 0x4ab   :  { %11518 = vmatpush3.bf16.msra.mxu1 %v12135_v10 }
 0x4ac   :  { %v2678_v15 = vrot.slane %v2677_v14, 1  ;;  %v2732_v16 = vadd.f32 %v2731_v60, %v2730_v13  ;;  %11519 = vmatprep.subr.bf16.mxu1 %v13070_v37 }
 0x4ae   :  { %v2733_v17 = vrot.slane %v2732_v16, 1  ;;  %v2679_v18 = vadd.f32 %v2678_v15, %v2677_v14  ;;  %v14389_v14 = vld [vmem:[#allocation2 + $0x190] ss:$20 sps:$4 sm:$0xff]  }
 0x4af   :  { %11520 = vmatpush3.bf16.msra.mxu1 %v12136_v63  ;;  %19514 = vst [vmem:[#allocation13_spill] sm:$0xff] %v14389_v14  ;;  %v14392_v15 = vld [vmem:[#allocation2 + $0x1bc] ss:$20 sps:$4 sm:$0xff]  }
 0x4b0   :  { %v2734_v19 = vadd.f32 %v2733_v17, %v2732_v16  ;;  %4118 = vmatprep.subr.bf16.mxu1 %v14329_v36  ;;  %19515 = vst [vmem:[#allocation14_spill] sm:$0xff] %v14392_v15  ;;  %v14395_v16 = vld [vmem:[#allocation2 + $0x1b8] ss:$20 sps:$4 sm:$0xff]  }
 0x4b1   :  { %19516 = vst [vmem:[#allocation15_spill] sm:$0xff] %v14395_v16  ;;  %v14398_v17 = vld [vmem:[#allocation2 + $0x1e4] ss:$20 sps:$4 sm:$0xff]  }
 0x4b2   :  { %v2739_v21 = vsel %vm1224_vm3, %v2679_v18, %v2734_v19  ;;  %19517 = vst [vmem:[#allocation16_spill] sm:$0xff] %v14398_v17  ;;  %v14401_v18 = vld [vmem:[#allocation2 + $0x1e0] ss:$20 sps:$4 sm:$0xff]  }
 0x4b3   :  { %v2824_v22 = vpack.c.bf16 %v2739_v21, %v2739_v21  ;;  %19518 = vst [vmem:[#allocation17_spill] sm:$0xff] %v14401_v18 }
 0x4b5   :  { %11522 = vmatmul.mubr.bf16.vlgmr.msra.gmra.mrb[52].mxu1 %v2824_v22 }
 0x4b6   :  { %4119 = vmatpush1.bf16.msra.mxu1 %v14327_v33 }
 0x4b7   :  { %4120 = vmatprep.subr.bf16.mxu1 %v14331_v38 }
 0x4ba   :  { %4121 = vmatpush1.bf16.msra.mxu1 %v14335_v39 }
 0x4bb   :  { %4122 = vmatprep.subr.bf16.mxu1 %v14338_v40 }
 0x4be   :  { %4123 = vmatpush1.bf16.msra.mxu1 %v14341_v43 }
 0x4bf   :  { %4124 = vmatprep.subr.bf16.mxu1 %v14344_v44 }
 0x4c2   :  { %4125 = vmatpush1.bf16.msra.mxu1 %v14347_v45 }
 0x4c3   :  { %4126 = vmatprep.subr.bf16.mxu1 %v14350_v49 }
 0x4c6   :  { %4127 = vmatpush1.bf16.msra.mxu1 %v14353_v51 }
 0x4c7   :  { %4128 = vmatprep.subr.bf16.mxu1 %v14356_v52 }
 0x4ca   :  { %4129 = vmatpush1.bf16.msra.mxu1 %v14359_v4 }
 0x4cb   :  { %4130 = vmatprep.subr.bf16.mxu1 %v14362_v20 }
 0x4ce   :  { %4131 = vmatpush1.bf16.msra.mxu1 %v14365_v54 }
 0x4cf   :  { %4132 = vmatprep.subr.bf16.mxu1 %v14368_v0 }
 0x4d2   :  { %4133 = vmatpush1.bf16.msra.mxu1 %v14371_v1 }
 0x4d3   :  { %4134 = vmatprep.subr.bf16.mxu1 %v14374_v8 }
 0x4d6   :  { %4135 = vmatpush1.bf16.msra.mxu1 %v14377_v59 }
 0x4d7   :  { %4136 = vmatprep.subr.bf16.mxu1 %v14380_v25 }
 0x4da   :  { %4137 = vmatpush1.bf16.msra.mxu1 %v14383_v62 }
 0x4db   :  { %4138 = vmatprep.subr.bf16.mxu1 %v14386_v6 }
 0x4de   :  { %4139 = vmatpush1.bf16.msra.mxu1 %v14389_v14 }
 0x4df   :  { %4140 = vmatprep.subr.bf16.mxu1 %v14392_v15 }
 0x4e2   :  { %4141 = vmatpush1.bf16.msra.mxu1 %v14395_v16  ;;  %v14493_v16 = vld [vmem:[#allocation2 + $0x1c0] ss:$20 sps:$4 sm:$0xff]  }
 0x4e3   :  { %4142 = vmatprep.subr.bf16.mxu1 %v14398_v17  ;;  %v14490_v17 = vld [vmem:[#allocation2 + $0x1c4] ss:$20 sps:$4 sm:$0xff]   ;;  %19532 = vst [vmem:[#allocation31_spill] sm:$0xff] %v14493_v16 }
 0x4e4   :  { %19531 = vst [vmem:[#allocation30_spill] sm:$0xff] %v14490_v17 }
 0x4e6   :  { %4143 = vmatpush1.bf16.msra.mxu1 %v14401_v18  ;;  %v14487_v18 = vld [vmem:[#allocation2 + $0x198] ss:$20 sps:$4 sm:$0xff]  }
 0x4e7   :  { %19530 = vst [vmem:[#allocation29_spill] sm:$0xff] %v14487_v18 }
 0x565   :  { %v11240_v2 = vpop.f32.mrb[48].mxu1 }
 0x566   :  { %v11262_v3 = vpop.f32.mrb[24].mxu0  ;;  %v11241_v5 = vpop.f32.mrb[49].mxu1 }
 0x567   :  { %v11242_v7 = vadd.f32 %v11241_v5, %v11240_v2  ;;  %v11263_v9 = vpop.f32.mrb[25].mxu0  ;;  %v11243_v46 = vpop.f32.mrb[50].mxu1 }
 0x568   :  { %v11264_v10 = vadd.f32 %v11263_v9, %v11262_v3  ;;  %v11265_v11 = vpop.f32.mrb[26].mxu0  ;;  %v11244_v13 = vpop.f32.mrb[51].mxu1 }
 0x569   :  { %v11266_v60 = vpop.f32.mrb[27].mxu0  ;;  %v3191_v11 = vld [vmem:[%s19223_s9] sm:$0x1] }
 0x56a   :  { %v3140_v63 = vadd.f32 %v11264_v10, %v11242_v7 }
 0x588   :  { %v3179_v19 = vpop.f32.mrb[52].mxu1 }
 0x589   :  { %v3180_v21 = vadd.f32 %v3179_v19, %v3140_v63  ;;  %v11523_v22 = vpop.f32.mrb[53].mxu1  ;;  %v3212_v63 = vld [vmem:[%s19224_s10] sm:$0x1] }
 0x58a   :  { %v3182_v23 = vpop.f32.mrb[54].mxu1 }
 0x58b   :  { %v3185_v27 = vmul.f32 0.0010416667, %v3180_v21  ;;  %v11524_v28 = vpop.f32.mrb[55].mxu1 }
 0x58c   :  { %v12140_v28 = vld [vmem:[%s19222_s8 + $0x8] ss:$20 sps:$4 sm:$0xff]  }
 0x58d   :  { %v3186_v2 = vmul.f32 %v3185_v27, %v3185_v27 }
 0x58f   :  { %v3188_v3 = vrot.slane %v3186_v2, 7 }
 0x591   :  { %v3190_v5 = vsub.f32 %v3185_v27, %v3188_v3  ;;  %v14423_v3 = vld [vmem:[#allocation2 + $0xc] ss:$20 sps:$4 sm:$0xff]  }
 0x593   :  { %v3192_v7 = vadd.f32 1e-05, %v3190_v5  ;;  %v14428_v5 = vld [vmem:[#allocation2 + $0x8] ss:$20 sps:$4 sm:$0xff]  }
 0x595   :  { %12676 = vrsqrt.f32 %v3192_v7  ;;  %v14430_v7 = vld [vmem:[#allocation2 + $0x34] ss:$20 sps:$4 sm:$0xff]  }
 0x59f   :  { %v12677_v9 = vpop.eup %12676 }
 0x5a0   :  { %v3201_v46 = vrot.slane %v12677_v9, %v13810_v26  ;;  %v14433_v9 = vld [vmem:[#allocation2 + $0x30] ss:$20 sps:$4 sm:$0xff]  }
 0x5a2   :  { %v3202_v10 = vcombine.high %v3201_v46, %v3201_v46  ;;  %v14436_v46 = vld [vmem:[#allocation2 + $0x5c] ss:$20 sps:$4 sm:$0xff]  }
 0x5a4   :  { %v3209_v13 = vrot.slane %v3202_v10, %v13810_v26  ;;  %v14439_v10 = vld [vmem:[#allocation2 + $0x58] ss:$20 sps:$4 sm:$0xff]   ;;  %v14484_v26 = vld [vmem:[#allocation2 + $0x19c] ss:$20 sps:$4 sm:$0xff]  }
 0x5a5   :  { %19529 = vst [vmem:[#allocation28_spill] sm:$0xff] %v14484_v26 }
 0x5a6   :  { %v3211_v60 = vmul.f32 %v3209_v13, %v3191_v11  ;;  %v14445_v11 = vld [vmem:[#allocation2 + $0x80] ss:$20 sps:$4 sm:$0xff]  }
 0x5a7   :  { %v14448_v13 = vld [vmem:[#allocation2 + $0xac] ss:$20 sps:$4 sm:$0xff]  }
 0x5a8   :  { %v3213_v19 = vmul.f32 %v3211_v60, %v3185_v27  ;;  %v12143_v27 = vld [vmem:[%s19222_s8 + $0x10] ss:$20 sps:$4 sm:$0xff]   ;;  %s13073_s8 = smov 64  }
 0x5aa   :  { %v3214_v21 = vsub.f32 %v3212_v63, %v3213_v19  ;;  %v14454_v63 = vld [vmem:[#allocation2 + $0xd4] ss:$20 sps:$4 sm:$0xff]   ;;  %v14457_v19 = vld [vmem:[#allocation2 + $0xd0] ss:$20 sps:$4 sm:$0xff]  }
 0x5ab   :  { %19519 = vst [vmem:[#allocation18_spill] sm:$0xff] %v14454_v63  ;;  %19520 = vst [vmem:[#allocation19_spill] sm:$0xff] %v14457_v19 }
 0x5ac   :  { %v3219_v22 = vrot.slane %v3214_v21, %v13821_v35  ;;  %v14460_v21 = vld [vmem:[#allocation2 + $0xfc] ss:$20 sps:$4 sm:$0xff]  }
 0x5ad   :  { %19521 = vst [vmem:[#allocation20_spill] sm:$0xff] %v14460_v21 }
 0x5ae   :  { %v3221_v23 = vsel %vm1224_vm3, %v3211_v60, %v3219_v22  ;;  %v14451_v60 = vld [vmem:[#allocation2 + $0xa8] ss:$20 sps:$4 sm:$0xff]   ;;  %v14463_v22 = vld [vmem:[#allocation2 + $0xf8] ss:$20 sps:$4 sm:$0xff]  }
 0x5af   :  { %v3228_v2 = vpack.c.bf16 %v3221_v23, %v3221_v23  ;;  %19522 = vst [vmem:[#allocation21_spill] sm:$0xff] %v14463_v22  ;;  %v14466_v23 = vld [vmem:[#allocation2 + $0x124] ss:$20 sps:$4 sm:$0xff]  }
 0x5b0   :  { %19523 = vst [vmem:[#allocation22_spill] sm:$0xff] %v14466_v23 }
 0x5b1   :  { %10641 = vmatmul.mubr.msk.bf16.vlgmr.msra.gmra.mrb[28].mxu0 %vm3255_vm6, %v3228_v2 }
 0x5b2   :  { %3301 = vmatpush1.bf16.msra.mxu0 %v12140_v28  ;;  %3332 = vmatprep.mubr.bf16.mxu0 %v19234_v12  ;;  %v14469_v28 = vld [vmem:[#allocation2 + $0x120] ss:$20 sps:$4 sm:$0xff]  }
 0x5b3   :  { %11525 = vmatprep.subr.bf16.mxu0 %v13070_v37  ;;  %19524 = vst [vmem:[#allocation23_spill] sm:$0xff] %v14469_v28  ;;  %v14478_v12 = vld [vmem:[#allocation2 + $0x174] ss:$20 sps:$4 sm:$0xff]  }
 0x5b4   :  { %19527 = vst [vmem:[#allocation26_spill] sm:$0xff] %v14478_v12 }
 0x5b9   :  { %10642 = vmatmul.mubr.msk.bf16.vlgmr.msra.gmra.mrb[32].mxu0 %vm3255_vm6, %v3228_v2 }
 0x5ba   :  { %11526 = vmatpush3.bf16.msra.mxu0 %v12143_v27  ;;  %11527 = vmatprep.mubr.msk.bf16.mxu0 %vm13071_vm4, %v13070_v37  ;;  %v14442_v37 = vld [vmem:[#allocation2 + $0x84] ss:$20 sps:$4 sm:$0xff]   ;;  %v14475_v27 = vld [vmem:[#allocation2 + $0x148] ss:$20 sps:$4 sm:$0xff]  }
 0x5bb   :  { %4220 = vmatprep.subr.bf16.mxu0 %v14423_v3  ;;  %19526 = vst [vmem:[#allocation25_spill] sm:$0xff] %v14475_v27 }
 0x5c1   :  { %11528 = vmatmul.mubr.msk.bf16.vlgmr.msra.gmra.mrb[36].mxu0 %vm3255_vm6, %v3228_v2  ;;  %v14472_v2 = vld [vmem:[#allocation2 + $0x14c] ss:$20 sps:$4 sm:$0xff]  }
 0x5c2   :  { %4221 = vmatpush1.bf16.msra.mxu0 %v14428_v5  ;;  %19525 = vst [vmem:[#allocation24_spill] sm:$0xff] %v14472_v2 }
 0x5c3   :  { %4222 = vmatprep.subr.bf16.mxu0 %v14430_v7 }
 0x5c6   :  { %4223 = vmatpush1.bf16.msra.mxu0 %v14433_v9 }
 0x5c7   :  { %4224 = vmatprep.subr.bf16.mxu0 %v14436_v46 }
 0x5ca   :  { %4225 = vmatpush1.bf16.msra.mxu0 %v14439_v10 }
 0x5cb   :  { %4226 = vmatprep.subr.bf16.mxu0 %v14442_v37 }
 0x5ce   :  { %4227 = vmatpush1.bf16.msra.mxu0 %v14445_v11 }
 0x5cf   :  { %4228 = vmatprep.subr.bf16.mxu0 %v14448_v13 }
 0x5d2   :  { %4229 = vmatpush1.bf16.msra.mxu0 %v14451_v60 }
 0x5d3   :  { %4230 = vmatprep.subr.bf16.mxu0 %v14454_v63 }
 0x5d6   :  { %4231 = vmatpush1.bf16.msra.mxu0 %v14457_v19 }
 0x5d7   :  { %4232 = vmatprep.subr.bf16.mxu0 %v14460_v21 }
 0x5da   :  { %4233 = vmatpush1.bf16.msra.mxu0 %v14463_v22 }
 0x5db   :  { %4234 = vmatprep.subr.bf16.mxu0 %v14466_v23 }
 0x5de   :  { %4235 = vmatpush1.bf16.msra.mxu0 %v14469_v28 }
 0x5df   :  { %4236 = vmatprep.subr.bf16.mxu0 %v14472_v2  ;;  %v14507_v2 = vld [vmem:[#allocation2 + $0x214] ss:$20 sps:$4 sm:$0xff]  }
 0x5e0   :  { %19537 = vst [vmem:[#allocation36_spill] sm:$0xff] %v14507_v2 }
 0x5e2   :  { %4237 = vmatpush1.bf16.msra.mxu0 %v14475_v27  ;;  %v14496_v27 = vld [vmem:[#allocation2 + $0x1ec] ss:$20 sps:$4 sm:$0xff]  }
 0x5e3   :  { %4238 = vmatprep.subr.bf16.mxu0 %v14478_v12  ;;  %19533 = vst [vmem:[#allocation32_spill] sm:$0xff] %v14496_v27  ;;  %v14499_v12 = vld [vmem:[#allocation2 + $0x1e8] ss:$20 sps:$4 sm:$0xff]  }
 0x5e4   :  { %19534 = vst [vmem:[#allocation33_spill] sm:$0xff] %v14499_v12 }
 0x5e6   :  { %4239 = vmatpush1.bf16.msra.mxu0 %v14481_v24  ;;  %v14503_v24 = vld [vmem:[#allocation2 + $0x20c] ss:$20 sps:$4 sm:$0xff]  }
 0x5e7   :  { %4240 = vmatprep.subr.bf16.mxu0 %v14484_v26  ;;  %19535 = vst [vmem:[#allocation34_spill] sm:$0xff] %v14503_v24  ;;  %v14505_v26 = vld [vmem:[#allocation2 + $0x208] ss:$20 sps:$4 sm:$0xff]   ;;  %4144 = vmatprep.subr.bf16.mxu1 %v14503_v24  ;;  %v14534_v24 = vld [vmem:[#allocation2 + $0x260] ss:$20 sps:$4 sm:$0xff]  }
 0x5e8   :  { %19536 = vst [vmem:[#allocation35_spill] sm:$0xff] %v14505_v26  ;;  %4145 = vmatpush1.bf16.msra.mxu1 %v14505_v26  ;;  %v14527_v26 = vld [vmem:[#allocation2 + $0x25c] ss:$20 sps:$4 sm:$0xff]   ;;  %19546 = vst [vmem:[#allocation45_spill] sm:$0xff] %v14534_v24 }
 0x5e9   :  { %19543 = vst [vmem:[#allocation42_spill] sm:$0xff] %v14527_v26 }
 0x5ea   :  { %4241 = vmatpush1.bf16.msra.mxu0 %v14487_v18  ;;  %v14510_v18 = vld [vmem:[#allocation2 + $0x210] ss:$20 sps:$4 sm:$0xff]  }
 0x5eb   :  { %4242 = vmatprep.subr.bf16.mxu0 %v14490_v17  ;;  %19538 = vst [vmem:[#allocation37_spill] sm:$0xff] %v14510_v18  ;;  %v14522_v17 = vld [vmem:[#allocation2 + $0x238] ss:$20 sps:$4 sm:$0xff]  }
 0x5ec   :  { %19542 = vst [vmem:[#allocation41_spill] sm:$0xff] %v14522_v17 }
 0x5ee   :  { %4243 = vmatpush1.bf16.msra.mxu0 %v14493_v16  ;;  %v14515_v16 = vld [vmem:[#allocation2 + $0x234] ss:$20 sps:$4 sm:$0xff]  }
 0x5ef   :  { %4244 = vmatprep.subr.bf16.mxu0 %v14496_v27  ;;  %19539 = vst [vmem:[#allocation38_spill] sm:$0xff] %v14515_v16  ;;  %v14517_v27 = vld [vmem:[#allocation2 + $0x230] ss:$20 sps:$4 sm:$0xff]   ;;  %4146 = vmatprep.subr.bf16.mxu1 %v14515_v16 }
 0x5f0   :  { %19540 = vst [vmem:[#allocation39_spill] sm:$0xff] %v14517_v27  ;;  %4147 = vmatpush1.bf16.msra.mxu1 %v14517_v27  ;;  %v14539_v27 = vld [vmem:[#allocation2 + $0x284] ss:$20 sps:$4 sm:$0xff]  }
 0x5f1   :  { %4148 = vmatprep.subr.bf16.mxu1 %v14527_v26  ;;  %19547 = vst [vmem:[#allocation46_spill] sm:$0xff] %v14539_v27 }
 0x5f2   :  { %4245 = vmatpush1.bf16.msra.mxu0 %v14499_v12  ;;  %v14519_v12 = vld [vmem:[#allocation2 + $0x23c] ss:$20 sps:$4 sm:$0xff]  }
 0x5f3   :  { %4246 = vmatprep.subr.bf16.mxu0 %v14507_v2  ;;  %19541 = vst [vmem:[#allocation40_spill] sm:$0xff] %v14519_v12  ;;  %v14529_v2 = vld [vmem:[#allocation2 + $0x258] ss:$20 sps:$4 sm:$0xff]  }
 0x5f4   :  { %19544 = vst [vmem:[#allocation43_spill] sm:$0xff] %v14529_v2  ;;  %4149 = vmatpush1.bf16.msra.mxu1 %v14529_v2 }
 0x5f5   :  { %4169 = vmatprep.subr.bf16.mxu1 %v14539_v27 }
 0x5f6   :  { %4247 = vmatpush1.bf16.msra.mxu0 %v14510_v18  ;;  %v14531_v18 = vld [vmem:[#allocation2 + $0x264] ss:$20 sps:$4 sm:$0xff]  }
 0x5f7   :  { %4248 = vmatprep.subr.bf16.mxu0 %v14519_v12  ;;  %19545 = vst [vmem:[#allocation44_spill] sm:$0xff] %v14531_v18  ;;  %v14541_v12 = vld [vmem:[#allocation2 + $0x28c] ss:$20 sps:$4 sm:$0xff]  }
 0x5f8   :  { %19548 = vst [vmem:[#allocation47_spill] sm:$0xff] %v14541_v12 }
 0x5fa   :  { %4249 = vmatpush1.bf16.msra.mxu0 %v14522_v17 }
 0x5fb   :  { %4250 = vmatprep.subr.bf16.mxu0 %v14531_v18 }
 0x5fe   :  { %4251 = vmatpush1.bf16.msra.mxu0 %v14534_v24 }
 0x5ff   :  { %4271 = vmatprep.subr.bf16.mxu0 %v14541_v12 }
 0x684   :  { %v3293_v17 = vpop.f32.mrb[28].mxu0 }
 0x685   :  { %v3384_v16 = vrot.slane %v3293_v17, %v13821_v35  ;;  %v3295_v26 = vpop.f32.mrb[29].mxu0  ;;  %v3419_v14 = vrot.slane %v3293_v17, %v13955_v31 }
 0x686   :  { %v3388_v28 = vrot.slane %v3295_v26, %v13821_v35  ;;  %v3297_v15 = vpop.f32.mrb[30].mxu0  ;;  %v3423_v6 = vrot.slane %v3295_v26, %v13955_v31 }
 0x687   :  { %v3401_v2 = vmul.f32 %v3384_v16, %v14201_v29  ;;  %v3406_v18 = vmul.f32 %v3384_v16, %v14211_v34  ;;  %v3411_v24 = vmul.f32 %v3384_v16, %v14241_v53  ;;  %v3298_v23 = vpop.f32.mrb[31].mxu0 }
 0x688   :  { %v3402_v27 = vmul.f32 %v3388_v28, %v14205_v32  ;;  %v3407_v12 = vmul.f32 %v3388_v28, %v14223_v42  ;;  %v3412_v22 = vmul.f32 %v3388_v28, %v14248_v56 }
 0x689   :  { %v3436_v62 = vadd.f32 %v3419_v14, %v3401_v2  ;;  %v3441_v21 = vadd.f32 %v3419_v14, %v3406_v18  ;;  %v14555_v15 = vadd.f32 %v3419_v14, %v3411_v24  ;;  %v14577_v2 = vld [vmem:[#allocation2 + $0x2ac] ss:$20 sps:$4 sm:$0xff]  }
 0x68a   :  { %v3437_v29 = vadd.f32 %v3423_v6, %v3402_v27  ;;  %v3442_v19 = vadd.f32 %v3423_v6, %v3407_v12  ;;  %v3447_v34 = vadd.f32 %v3423_v6, %v3412_v22  ;;  %v14579_v27 = vld [vmem:[#allocation2 + $0x2b4] ss:$20 sps:$4 sm:$0xff]  }
 0x68b   :  { %v3451_v25 = vmax.f32 %v3436_v62, 0.0  ;;  %v3456_v53 = vmax.f32 %v3441_v21, 0.0  ;;  %v14565_v62 = vld [vmem:[#allocation2 + $0x280] ss:$20 sps:$4 sm:$0xff]  }
 0x68c   :  { %v3334_v16 = vpop.f32.mrb[32].mxu0  ;;  %v3452_v17 = vmax.f32 %v3437_v29, 0.0  ;;  %v3457_v23 = vmax.f32 %v3442_v19, 0.0  ;;  %v3462_v59 = vmax.f32 %v3447_v34, 0.0 }
 0x68d   :  { %v3392_v32 = vrot.slane %v3334_v16, %v13821_v35  ;;  %v3336_v42 = vpop.f32.mrb[33].mxu0  ;;  %v14558_v63 = vpack.c.bf16 %v3456_v53, %v3451_v25  ;;  %v3427_v26 = vrot.slane %v3334_v16, %v13955_v31  ;;  %v14570_v25 = vld [vmem:[#allocation2 + $0x288] ss:$20 sps:$4 sm:$0xff]  }
 0x68e   :  { %v3396_v56 = vrot.slane %v3336_v42, %v13821_v35  ;;  %v3431_v24 = vrot.slane %v3336_v42, %v13955_v31  ;;  %v3338_v14 = vpop.f32.mrb[34].mxu0  ;;  %v14563_v12 = vpack.c.bf16 %v3457_v23, %v3452_v17  ;;  %v14572_v22 = vpack.c.bf16 %v3462_v59, %v3462_v59  ;;  %v14594_v23 = vld [vmem:[#allocation2 + $0x2b0] ss:$20 sps:$4 sm:$0xff]   ;;  %v14598_v42 = vld [vmem:[#allocation2 + $0x2d4] ss:$20 sps:$4 sm:$0xff]  }
 0x68f   :  { %v3403_v6 = vmul.f32 %v3392_v32, %v14203_v30  ;;  %v3408_v18 = vmul.f32 %v3392_v32, %v14221_v41  ;;  %v3413_v19 = vmul.f32 %v3392_v32, %v14246_v55  ;;  %v3339_v21 = vpop.f32.mrb[35].mxu0 }
 0x690   :  { %v3414_v28 = vmul.f32 %v3396_v56, %v14256_v57  ;;  %4150 = vmatprep.mubr.bf16.mxu1 %v14563_v12  ;;  %4252 = vmatprep.mubr.bf16.mxu0 %v14563_v12  ;;  %v3404_v30 = vmul.f32 %v3396_v56, %v14209_v58  ;;  %v3409_v41 = vmul.f32 %v3396_v56, %v14233_v47  ;;  %v14589_v57 = vld [vmem:[#allocation2 + $0x2a8] ss:$20 sps:$4 sm:$0xff]   ;;  %v3461_v58 = vmax.f32 %v14555_v15, 0.0  ;;  %v14605_v21 = vld [vmem:[#allocation2 + $0x2d0] ss:$20 sps:$4 sm:$0xff]  }
 0x691   :  { %v3438_v55 = vadd.f32 %v3427_v26, %v3403_v6  ;;  %v3443_v29 = vadd.f32 %v3427_v26, %v3408_v18  ;;  %v14583_v34 = vadd.f32 %v3427_v26, %v3413_v19  ;;  %4151 = vmatmul.mubr.bf16.vlgmr.msra.gmra.mrb[56].mxu1 %v14558_v63  ;;  %4253 = vmatmul.mubr.bf16.vlgmr.msra.gmra.mrb[40].mxu0 %v14558_v63 }
 0x692   :  { %4170 = vmatpush1.bf16.msra.mxu1 %v14565_v62  ;;  %4160 = vmatprep.mubr.bf16.mxu1 %v14572_v22  ;;  %v3439_v59 = vadd.f32 %v3431_v24, %v3404_v30  ;;  %v3444_v53 = vadd.f32 %v3431_v24, %v3409_v41  ;;  %v3449_v16 = vadd.f32 %v3431_v24, %v3414_v28  ;;  %v14609_v41 = vld [vmem:[#allocation2 + $0x2dc] ss:$20 sps:$4 sm:$0xff]  }
 0x693   :  { %v3453_v47 = vmax.f32 %v3438_v55, 0.0  ;;  %v3458_v17 = vmax.f32 %v3443_v29, 0.0  ;;  %4262 = vmatprep.mubr.bf16.mxu0 %v14572_v22  ;;  %4272 = vmatpush1.bf16.msra.mxu0 %v14570_v25  ;;  %v14607_v30 = vpack.c.bf16 %v3461_v58, %v3461_v58  ;;  %v14621_v58 = vld [vmem:[#allocation2 + $0x2fc] ss:$20 sps:$4 sm:$0xff]  }
 0x694   :  { %v3375_v32 = vpop.f32.mrb[36].mxu0  ;;  %4171 = vmatprep.subr.bf16.mxu1 %v14577_v2  ;;  %4273 = vmatprep.subr.bf16.mxu0 %v14579_v27  ;;  %v3454_v26 = vmax.f32 %v3439_v59, 0.0  ;;  %v3459_v56 = vmax.f32 %v3444_v53, 0.0  ;;  %v3464_v6 = vmax.f32 %v3449_v16, 0.0  ;;  %v14617_v16 = vld [vmem:[#allocation2 + $0x2d8] ss:$20 sps:$4 sm:$0xff]  }
 0x695   :  { %v3400_v15 = vrot.slane %v3375_v32, %v13821_v35  ;;  %v11529_v24 = vpop.f32.mrb[37].mxu0  ;;  %v14601_v14 = vpack.c.bf16 %v3458_v17, %v3453_v47  ;;  %v3435_v18 = vrot.slane %v3375_v32, %v13955_v31  ;;  %v14630_v32 = vld [vmem:[#allocation2 + $0x2f8] ss:$20 sps:$4 sm:$0xff]   ;;  %v14709_v31 = vld [vmem:[#allocation2 + $0x240] ss:$20 sps:$4 sm:$0xff]  }
 0x696   :  { %4172 = vmatpush1.bf16.msra.mxu1 %v14589_v57  ;;  %v3378_v19 = vpop.f32.mrb[38].mxu0  ;;  %v4418_v28 = vpack.c.bf16 %v3459_v56, %v3454_v26  ;;  %v4420_v17 = vpack.c.bf16 %v3464_v6, %v3464_v6  ;;  %v14634_v56 = vld [vmem:[#allocation2 + $0x300] ss:$20 sps:$4 sm:$0xff]   ;;  %v14638_v24 = vld [vmem:[#allocation2 + $0x150] ss:$20 sps:$4 sm:$0xff]  }
 0x697   :  { %v3405_v55 = vmul.f32 %v3400_v15, %v14280_v48  ;;  %v3410_v29 = vmul.f32 %v3400_v15, %v14283_v50  ;;  %v3415_v59 = vmul.f32 %v3400_v15, %v14299_v61  ;;  %4274 = vmatpush1.bf16.msra.mxu0 %v14594_v23  ;;  %4428 = vrot.lane.b32.xlu1 %v14601_v14, %s13073_s8  ;;  %v11530_v53 = vpop.f32.mrb[39].mxu0  ;;  %v14623_v48 = vld [vmem:[#allocation2 + $0x304] ss:$20 sps:$4 sm:$0xff]   ;;  %v3463_v50 = vmax.f32 %v14583_v34, 0.0  ;;  %v14714_v35 = vld [vmem:[#allocation2 + $0x100] ss:$20 sps:$4 sm:$0xff]  }
 0x698   :  { %4173 = vmatprep.subr.bf16.mxu1 %v14598_v42  ;;  %4430 = vrot.lane.b32.xlu0 %v4418_v28, %s13073_s8  ;;  %v19549_v28 = vmov 0   ;;  %v14653_v53 = vld [vmem:[#allocation2 + $0x2b8] ss:$20 sps:$4 sm:$0xff]  }
 0x699   :  { %v3440_v61 = vadd.f32 %v3435_v18, %v3405_v55  ;;  %v3445_v47 = vadd.f32 %v3435_v18, %v3410_v29  ;;  %4161 = vmatmul.mubr.bf16.gmra.mrb[60].mxu1 %v14607_v30  ;;  %4263 = vmatmul.mubr.bf16.gmra.mrb[44].mxu0 %v14607_v30  ;;  %v3450_v26 = vadd.f32 %v3435_v18, %v3415_v59  ;;  %v14642_v18 = vld [vmem:[#allocation2 + $0x290] ss:$20 sps:$4 sm:$0xff]   ;;  %v14649_v59 = vld [vmem:[#allocation2 + $0x178] ss:$20 sps:$4 sm:$0xff]  }
 0x69a   :  { %4174 = vmatpush1.bf16.msra.mxu1 %v14605_v21  ;;  %4275 = vmatprep.subr.bf16.mxu0 %v14609_v41  ;;  %v3591_v6 = vpack.c.bf16 %v3463_v50, %v3463_v50  ;;  %v14645_v55 = vld [vmem:[#allocation2 + $0x10] ss:$20 sps:$4 sm:$0xff]  }
 0x69b   :  { %4276 = vmatpush1.bf16.msra.mxu0 %v14617_v16  ;;  %4436 = vrot.lane.b32.xlu1 %v4420_v17, %s13073_s8  ;;  %v3455_v34 = vmax.f32 %v3440_v61, 0.0  ;;  %v3460_v15 = vmax.f32 %v3445_v47, 0.0  ;;  %v3465_v29 = vmax.f32 %v3450_v26, 0.0  ;;  %v14661_v61 = vld [vmem:[#allocation2 + $0x38] ss:$20 sps:$4 sm:$0xff]  }
 0x69c   :  { %4175 = vmatprep.subr.bf16.mxu1 %v14621_v58  ;;  %4277 = vmatprep.subr.bf16.mxu0 %v14623_v48  ;;  %v14665_v47 = vld [vmem:[#allocation2 + $0x1a0] ss:$20 sps:$4 sm:$0xff]  }
 0x69d   :  { %v4419_v19 = vpack.c.bf16 %v3460_v15, %v3455_v34  ;;  %4201 = vmatprep.mubr.bf16.mxu1 %v19549_v28  ;;  %4303 = vmatprep.mubr.bf16.mxu0 %v19549_v28  ;;  %v4421_v50 = vpack.c.bf16 %v3465_v29, %v3465_v29  ;;  %v14669_v17 = vld [vmem:[#allocation2 + $0x2e0] ss:$20 sps:$4 sm:$0xff]   ;;  %v14679_v34 = vld [vmem:[#allocation2 + $0x1c8] ss:$20 sps:$4 sm:$0xff]   ;;  %v14690_v29 = vld [vmem:[#allocation2 + $0x1f0] ss:$20 sps:$4 sm:$0xff]  }
 0x69e   :  { %4176 = vmatpush1.bf16.msra.mxu1 %v14630_v32  ;;  %v14674_v26 = vld [vmem:[#allocation2 + $0x60] ss:$20 sps:$4 sm:$0xff]   ;;  %v14682_v15 = vld [vmem:[#allocation2 + $0x308] ss:$20 sps:$4 sm:$0xff]  }
 0x69f   :  { %4278 = vmatpush1.bf16.msra.mxu0 %v14634_v56  ;;  %4434 = vrot.lane.b32.xlu1 %v3591_v6, %s13073_s8 }
 0x6a0   :  { %4432 = vrot.lane.b32.xlu0 %v4419_v19, %s13073_s8  ;;  %11279 = vmatprep.subr.bf16.mxu1 %v14638_v24  ;;  %v14686_v19 = vld [vmem:[#allocation2 + $0x88] ss:$20 sps:$4 sm:$0xff]  }
 0x6a1   :  { %10744 = vmatmul.mubr.msk.bf16.vlgmr.msra.gmra.mrb[56].mxu1 %vm1176_vm2, %v14601_v14  ;;  %11531 = vmatprep.subr.bf16.mxu0 %v14642_v18 }
 0x6a2   :  { %10746 = vmatmul.mubr.msk.bf16.vlgmr.msra.gmra.mrb[40].mxu0 %vm1176_vm2, %v14601_v14  ;;  %11280 = vmatpush3.bf16.msra.mxu1 %v14645_v55 }
 0x6a3   :  { %11532 = vmatpush3.bf16.msra.mxu0 %v14642_v18  ;;  %11281 = vmatprep.subr.bf16.mxu1 %v14649_v59 }
 0x6a4   :  { %4438 = vrot.lane.b32.xlu0 %v4421_v50, %s13073_s8  ;;  %11533 = vmatprep.subr.bf16.mxu0 %v14653_v53  ;;  %v14697_v50 = vld [vmem:[#allocation2 + $0xb0] ss:$20 sps:$4 sm:$0xff]  }
 0x6a5   :  { %4211 = vmatprep.mubr.bf16.mxu1 %v19549_v28  ;;  %4313 = vmatprep.mubr.bf16.mxu0 %v19549_v28 }
 0x6a6   :  { %11282 = vmatpush3.bf16.msra.mxu1 %v14661_v61 }
 0x6a7   :  { %11534 = vmatpush3.bf16.msra.mxu0 %v14653_v53  ;;  %11283 = vmatprep.subr.bf16.mxu1 %v14665_v47 }
 0x6a8   :  { %11535 = vmatprep.subr.bf16.mxu0 %v14669_v17 }
 0x6a9   :  { %10745 = vmatmul.mubr.msk.bf16.gmra.mrb[60].mxu1 %vm1176_vm2, %v3591_v6 }
 0x6aa   :  { %10747 = vmatmul.mubr.msk.bf16.gmra.mrb[44].mxu0 %vm1176_vm2, %v3591_v6  ;;  %11284 = vmatpush3.bf16.msra.mxu1 %v14674_v26 }
 0x6ab   :  { %4354 = vmatprep.mubr.bf16.mxu1 %v14563_v12  ;;  %11536 = vmatpush3.bf16.msra.mxu0 %v14669_v17  ;;  %v14701_v12 = vld [vmem:[#allocation2 + $0x218] ss:$20 sps:$4 sm:$0xff]  }
 0x6ac   :  { %11539 = vmatprep.mubr.msk.bf16.mxu0 %vm1176_vm2, %v14601_v14  ;;  %11285 = vmatprep.subr.bf16.mxu1 %v14679_v34  ;;  %v14706_v14 = vld [vmem:[#allocation2 + $0xd8] ss:$20 sps:$4 sm:$0xff]  }
 0x6ad   :  { %11537 = vmatprep.subr.bf16.mxu0 %v14682_v15 }
 0x6ae   :  { %11286 = vmatpush3.bf16.msra.mxu1 %v14686_v19 }
 0x6af   :  { %11538 = vmatpush3.bf16.msra.mxu0 %v14682_v15  ;;  %11287 = vmatprep.subr.bf16.mxu1 %v14690_v29 }
 0x6b0   :  { %4455 = vmatprep.subr.bf16.mxu0 %v14329_v36  ;;  %v14717_v36 = vld [vmem:[#allocation2 + $0x268] ss:$20 sps:$4 sm:$0xff]  }
 0x6b2   :  { %11288 = vmatpush3.bf16.msra.mxu1 %v14697_v50  ;;  %11540 = vmatmul.mubr.msk.bf16.vlgmr.msra.gmra.mrb[48].mxu0 %vm1176_vm2, %v3591_v6  ;;  %v14722_v6 = vld [vmem:[#allocation2 + $0x128] ss:$20 sps:$4 sm:$0xff]  }
 0x6b3   :  { %11289 = vmatprep.subr.bf16.mxu1 %v14701_v12  ;;  %4456 = vmatpush1.bf16.msra.mxu0 %v14327_v33  ;;  %v19550_v33 = vld [vmem:[#allocation18_spill] sm:$0xff] }
 0x6b4   :  { %4457 = vmatprep.subr.bf16.mxu0 %v14331_v38  ;;  %v19551_v38 = vld [vmem:[#allocation9_spill] sm:$0xff] }
 0x6b6   :  { %11290 = vmatpush3.bf16.msra.mxu1 %v14706_v14 }
 0x6b7   :  { %11291 = vmatprep.subr.bf16.mxu1 %v14709_v31  ;;  %4458 = vmatpush1.bf16.msra.mxu0 %v14335_v39  ;;  %v19552_v39 = vld [vmem:[#allocation10_spill] sm:$0xff] }
 0x6b8   :  { %4459 = vmatprep.subr.bf16.mxu0 %v14338_v40  ;;  %v19553_v40 = vld [vmem:[#allocation19_spill] sm:$0xff] }
 0x6ba   :  { %11292 = vmatpush3.bf16.msra.mxu1 %v14714_v35 }
 0x6bb   :  { %11293 = vmatprep.subr.bf16.mxu1 %v14717_v36  ;;  %4460 = vmatpush1.bf16.msra.mxu0 %v14341_v43  ;;  %v19554_v43 = vld [vmem:[#allocation20_spill] sm:$0xff] }
 0x6bc   :  { %4461 = vmatprep.subr.bf16.mxu0 %v14344_v44  ;;  %v19555_v44 = vld [vmem:[#allocation11_spill] sm:$0xff] }
 0x6be   :  { %11294 = vmatpush3.bf16.msra.mxu1 %v14722_v6 }
 0x6bf   :  { %4557 = vmatprep.subr.bf16.mxu1 %v14423_v3  ;;  %4462 = vmatpush1.bf16.msra.mxu0 %v14347_v45  ;;  %v19556_v45 = vld [vmem:[#allocation12_spill] sm:$0xff]  ;;  %v19566_v3 = vld [vmem:[#allocation26_spill] sm:$0xff] }
 0x6c0   :  { %4463 = vmatprep.subr.bf16.mxu0 %v14350_v49  ;;  %v19557_v49 = vld [vmem:[#allocation21_spill] sm:$0xff] }
 0x6c1   :  { %4355 = vmatmul.mubr.bf16.vlgmr.msra.gmra.mrb[64].mxu1 %v14558_v63  ;;  %v19576_v63 = vld [vmem:[#allocation42_spill] sm:$0xff] }
 0x6c2   :  { %4362 = vmatprep.mubr.bf16.mxu1 %v14572_v22  ;;  %4558 = vmatpush1.bf16.msra.mxu1 %v14428_v5  ;;  %v19567_v5 = vld [vmem:[#allocation17_spill] sm:$0xff]  ;;  %v19577_v22 = vld [vmem:[#allocation31_spill] sm:$0xff] }
 0x6c3   :  { %4559 = vmatprep.subr.bf16.mxu1 %v14430_v7  ;;  %4464 = vmatpush1.bf16.msra.mxu0 %v14353_v51  ;;  %v19558_v51 = vld [vmem:[#allocation22_spill] sm:$0xff] }
 0x6c4   :  { %4465 = vmatprep.subr.bf16.mxu0 %v14356_v52  ;;  %v19559_v52 = vld [vmem:[#allocation13_spill] sm:$0xff]  ;;  %v19568_v7 = vld [vmem:[#allocation34_spill] sm:$0xff] }
 0x6c6   :  { %4560 = vmatpush1.bf16.msra.mxu1 %v14433_v9  ;;  %v19569_v9 = vld [vmem:[#allocation27_spill] sm:$0xff] }
 0x6c7   :  { %4561 = vmatprep.subr.bf16.mxu1 %v14436_v46  ;;  %4466 = vmatpush1.bf16.msra.mxu0 %v14359_v4  ;;  %v19560_v4 = vld [vmem:[#allocation14_spill] sm:$0xff]  ;;  %v19570_v46 = vld [vmem:[#allocation28_spill] sm:$0xff] }
 0x6c8   :  { %4467 = vmatprep.subr.bf16.mxu0 %v14362_v20  ;;  %v19561_v20 = vld [vmem:[#allocation23_spill] sm:$0xff] }
 0x6c9   :  { %4363 = vmatmul.mubr.bf16.gmra.mrb[68].mxu1 %v14607_v30  ;;  %v19578_v30 = vld [vmem:[#allocation32_spill] sm:$0xff] }
 0x6ca   :  { %4562 = vmatpush1.bf16.msra.mxu1 %v14439_v10  ;;  %v19571_v10 = vld [vmem:[#allocation35_spill] sm:$0xff] }
 0x6cb   :  { %4563 = vmatprep.subr.bf16.mxu1 %v14442_v37  ;;  %4468 = vmatpush1.bf16.msra.mxu0 %v14365_v54  ;;  %v19562_v54 = vld [vmem:[#allocation24_spill] sm:$0xff]  ;;  %v19572_v37 = vld [vmem:[#allocation38_spill] sm:$0xff] }
 0x6cc   :  { %4469 = vmatprep.subr.bf16.mxu0 %v14368_v0  ;;  %v19563_v0 = vld [vmem:[#allocation15_spill] sm:$0xff] }
 0x6ce   :  { %4564 = vmatpush1.bf16.msra.mxu1 %v14445_v11  ;;  %v19573_v11 = vld [vmem:[#allocation29_spill] sm:$0xff] }
 0x6cf   :  { %4565 = vmatprep.subr.bf16.mxu1 %v14448_v13  ;;  %4470 = vmatpush1.bf16.msra.mxu0 %v14371_v1  ;;  %v19564_v1 = vld [vmem:[#allocation16_spill] sm:$0xff]  ;;  %v19574_v13 = vld [vmem:[#allocation30_spill] sm:$0xff] }
 0x6d0   :  { %4471 = vmatprep.subr.bf16.mxu0 %v14374_v8  ;;  %v19565_v8 = vld [vmem:[#allocation25_spill] sm:$0xff] }
 0x6d2   :  { %4566 = vmatpush1.bf16.msra.mxu1 %v14451_v60  ;;  %v19575_v60 = vld [vmem:[#allocation39_spill] sm:$0xff] }
 0x6d3   :  { %4567 = vmatprep.subr.bf16.mxu1 %v19550_v33  ;;  %4472 = vmatpush1.bf16.msra.mxu0 %v19551_v38  ;;  %v19579_v33 = vld [vmem:[#allocation43_spill] sm:$0xff]  ;;  %v19580_v38 = vld [vmem:[#allocation46_spill] sm:$0xff] }
 0x6d4   :  { %4473 = vmatprep.subr.bf16.mxu0 %v19552_v39  ;;  %v19581_v39 = vld [vmem:[#allocation33_spill] sm:$0xff] }
 0x6d6   :  { %4568 = vmatpush1.bf16.msra.mxu1 %v19553_v40  ;;  %v19582_v40 = vld [vmem:[#allocation36_spill] sm:$0xff] }
 0x6d7   :  { %4569 = vmatprep.subr.bf16.mxu1 %v19554_v43  ;;  %4474 = vmatpush1.bf16.msra.mxu0 %v19555_v44  ;;  %v19583_v43 = vld [vmem:[#allocation37_spill] sm:$0xff]  ;;  %v19584_v44 = vld [vmem:[#allocation40_spill] sm:$0xff] }
 0x6d8   :  { %4475 = vmatprep.subr.bf16.mxu0 %v19556_v45  ;;  %v19585_v45 = vld [vmem:[#allocation41_spill] sm:$0xff] }
 0x6da   :  { %4570 = vmatpush1.bf16.msra.mxu1 %v19557_v49  ;;  %v19586_v49 = vld [vmem:[#allocation44_spill] sm:$0xff] }
 0x6db   :  { %4571 = vmatprep.subr.bf16.mxu1 %v19558_v51  ;;  %4476 = vmatpush1.bf16.msra.mxu0 %v19559_v52  ;;  %v19587_v51 = vld [vmem:[#allocation45_spill] sm:$0xff]  ;;  %v19588_v52 = vld [vmem:[#allocation47_spill] sm:$0xff] }
 0x6dc   :  { %4477 = vmatprep.subr.bf16.mxu0 %v19560_v4 }
 0x6de   :  { %4572 = vmatpush1.bf16.msra.mxu1 %v19561_v20 }
 0x6df   :  { %4573 = vmatprep.subr.bf16.mxu1 %v19562_v54  ;;  %4478 = vmatpush1.bf16.msra.mxu0 %v19563_v0 }
 0x6e0   :  { %4479 = vmatprep.subr.bf16.mxu0 %v19564_v1 }
 0x6e2   :  { %4574 = vmatpush1.bf16.msra.mxu1 %v19565_v8 }
 0x6e3   :  { %4575 = vmatprep.subr.bf16.mxu1 %v19566_v3  ;;  %4480 = vmatpush1.bf16.msra.mxu0 %v19567_v5 }
 0x6e4   :  { %4481 = vmatprep.subr.bf16.mxu0 %v19568_v7 }
 0x6e6   :  { %4576 = vmatpush1.bf16.msra.mxu1 %v19569_v9  ;;  %v12317_v9 = vld [vmem:[%s19226_s12 + $0x1c0] sm:$0xff]  }
 0x6e7   :  { %4577 = vmatprep.subr.bf16.mxu1 %v19570_v46  ;;  %4482 = vmatpush1.bf16.msra.mxu0 %v19571_v10 }
 0x6e8   :  { %4483 = vmatprep.subr.bf16.mxu0 %v19572_v37 }
 0x6ea   :  { %4578 = vmatpush1.bf16.msra.mxu1 %v19573_v11 }
 0x6eb   :  { %4579 = vmatprep.subr.bf16.mxu1 %v19574_v13  ;;  %4484 = vmatpush1.bf16.msra.mxu0 %v19575_v60 }
 0x6ec   :  { %4485 = vmatprep.subr.bf16.mxu0 %v19576_v63 }
 0x6ee   :  { %4580 = vmatpush1.bf16.msra.mxu1 %v19577_v22 }
 0x6ef   :  { %4581 = vmatprep.subr.bf16.mxu1 %v19578_v30  ;;  %4486 = vmatpush1.bf16.msra.mxu0 %v19579_v33 }
 0x6f0   :  { %4506 = vmatprep.subr.bf16.mxu0 %v19580_v38 }
 0x6f2   :  { %4582 = vmatpush1.bf16.msra.mxu1 %v19581_v39 }
 0x6f3   :  { %4583 = vmatprep.subr.bf16.mxu1 %v19582_v40 }
 0x6f6   :  { %4584 = vmatpush1.bf16.msra.mxu1 %v19583_v43 }
 0x6f7   :  { %4585 = vmatprep.subr.bf16.mxu1 %v19584_v44 }
 0x6fa   :  { %4586 = vmatpush1.bf16.msra.mxu1 %v19585_v45 }
 0x6fb   :  { %4587 = vmatprep.subr.bf16.mxu1 %v19586_v49 }
 0x6fe   :  { %4588 = vmatpush1.bf16.msra.mxu1 %v19587_v51 }
 0x6ff   :  { %4608 = vmatprep.subr.bf16.mxu1 %v19588_v52 }
 0x709   :  { %v4429_v4 = vpop.permute.xlu1 %4428 }
 0x70a   :  { %v4431_v20 = vpop.permute.xlu0 %4430 }
 0x70b   :  { %v14792_v8 = vsel %vm1176_vm2, %v4429_v4, %v4431_v20 }
 0x70d   :  { %v4437_v0 = vpop.permute.xlu1 %4436 }
 0x711   :  { %v4435_v7 = vpop.permute.xlu1 %4434 }
 0x712   :  { %v4433_v54 = vpop.permute.xlu0 %4432 }
 0x713   :  { %v4442_v1 = vsel %vm1176_vm2, %v4431_v20, %v4433_v54 }
 0x714   :  { %4487 = vmatprep.mubr.bf16.mxu0 %v4442_v1  ;;  %4589 = vmatprep.mubr.bf16.mxu1 %v4442_v1 }
 0x715   :  { %4488 = vmatmul.mubr.bf16.vlgmr.msra.gmra.mrb[52].mxu0 %v14792_v8  ;;  %4590 = vmatmul.mubr.bf16.vlgmr.msra.gmra.mrb[72].mxu1 %v14792_v8 }
 0x716   :  { %4507 = vmatpush1.bf16.msra.mxu0 %v14565_v62  ;;  %4609 = vmatpush1.bf16.msra.mxu1 %v14570_v25  ;;  %v4439_v3 = vpop.permute.xlu0 %4438  ;;  %v14810_v62 = vsel %vm1176_vm2, %v4435_v7, %v4437_v0  ;;  %v12284_v25 = vld [vmem:[%s19226_s12 + $0x40] sm:$0xff]  }
 0x717   :  { %v14799_v5 = vsel %vm1176_vm2, %v4437_v0, %v4439_v3  ;;  %4508 = vmatprep.subr.bf16.mxu0 %v14577_v2  ;;  %4610 = vmatprep.subr.bf16.mxu1 %v14579_v27  ;;  %v12286_v2 = vld [vmem:[%s19226_s12] sm:$0xff]   ;;  %v12288_v27 = vld [vmem:[%s19226_s12 + $0x48] sm:$0xff]  }
 0x718   :  { %4497 = vmatprep.mubr.bf16.mxu0 %v14799_v5  ;;  %4599 = vmatprep.mubr.bf16.mxu1 %v14799_v5 }
 0x71a   :  { %4509 = vmatpush1.bf16.msra.mxu0 %v14589_v57  ;;  %4611 = vmatpush1.bf16.msra.mxu1 %v14594_v23  ;;  %v12290_v57 = vld [vmem:[%s19226_s12 + $0x8] sm:$0xff]   ;;  %v12292_v23 = vld [vmem:[%s19226_s12 + $0x50] sm:$0xff]  }
 0x71b   :  { %4510 = vmatprep.subr.bf16.mxu0 %v14598_v42  ;;  %4612 = vmatprep.subr.bf16.mxu1 %v14609_v41  ;;  %v12294_v42 = vld [vmem:[%s19226_s12 + $0x10] sm:$0xff]   ;;  %v12285_v41 = vld [vmem:[%s19226_s12 + $0xc0] sm:$0xff]  }
 0x71d   :  { %4498 = vmatmul.mubr.bf16.gmra.mrb[56].mxu0 %v14810_v62  ;;  %4600 = vmatmul.mubr.bf16.gmra.mrb[76].mxu1 %v14810_v62 }
 0x71e   :  { %4511 = vmatpush1.bf16.msra.mxu0 %v14605_v21  ;;  %4613 = vmatpush1.bf16.msra.mxu1 %v14617_v16  ;;  %v12296_v21 = vld [vmem:[%s19226_s12 + $0x58] sm:$0xff]   ;;  %v12300_v16 = vld [vmem:[%s19226_s12 + $0x60] sm:$0xff]  }
 0x71f   :  { %4512 = vmatprep.subr.bf16.mxu0 %v14621_v58  ;;  %4614 = vmatprep.subr.bf16.mxu1 %v14623_v48  ;;  %v12289_v58 = vld [vmem:[%s19226_s12 + $0xc8] sm:$0xff]   ;;  %v12302_v48 = vld [vmem:[%s19226_s12 + $0x20] sm:$0xff]  }
 0x720   :  { %4538 = vmatprep.mubr.bf16.mxu0 %v19549_v28  ;;  %4640 = vmatprep.mubr.bf16.mxu1 %v19549_v28 }
 0x722   :  { %4513 = vmatpush1.bf16.msra.mxu0 %v14630_v32  ;;  %4615 = vmatpush1.bf16.msra.mxu1 %v14634_v56  ;;  %v12304_v32 = vld [vmem:[%s19226_s12 + $0x68] sm:$0xff]  }
 0x723   :  { %11313 = vmatprep.subr.bf16.mxu0 %v14638_v24  ;;  %11543 = vmatprep.subr.bf16.mxu1 %v14642_v18  ;;  %v12291_v56 = vld [vmem:[%s19226_s12 + $0x88] sm:$0xff]   ;;  %v12293_v24 = vld [vmem:[%s19226_s12 + $0xd0] sm:$0xff]  }
 0x725   :  { %10750 = vmatmul.mubr.msk.bf16.vlgmr.msra.gmra.mrb[52].mxu0 %vm1176_vm2, %v4433_v54  ;;  %10752 = vmatmul.mubr.msk.bf16.vlgmr.msra.gmra.mrb[72].mxu1 %vm1176_vm2, %v4433_v54 }
 0x726   :  { %11314 = vmatpush3.bf16.msra.mxu0 %v14645_v55  ;;  %11544 = vmatpush3.bf16.msra.mxu1 %v14642_v18  ;;  %v12306_v18 = vld [vmem:[%s19226_s12 + $0x28] sm:$0xff]   ;;  %v12308_v55 = vld [vmem:[%s19226_s12 + $0x70] sm:$0xff]  }
 0x727   :  { %11315 = vmatprep.subr.bf16.mxu0 %v14649_v59  ;;  %11545 = vmatprep.subr.bf16.mxu1 %v14653_v53  ;;  %v12295_v59 = vld [vmem:[%s19226_s12 + $0x90] sm:$0xff]  }
 0x728   :  { %4548 = vmatprep.mubr.bf16.mxu0 %v19549_v28  ;;  %4650 = vmatprep.mubr.bf16.mxu1 %v19549_v28 }
 0x72a   :  { %11316 = vmatpush3.bf16.msra.mxu0 %v14661_v61  ;;  %11546 = vmatpush3.bf16.msra.mxu1 %v14653_v53  ;;  %v12297_v53 = vld [vmem:[%s19226_s12 + $0xd8] sm:$0xff]   ;;  %v12310_v61 = vld [vmem:[%s19226_s12 + $0x30] sm:$0xff]  }
 0x72b   :  { %11317 = vmatprep.subr.bf16.mxu0 %v14665_v47  ;;  %11547 = vmatprep.subr.bf16.mxu1 %v14669_v17  ;;  %v12312_v47 = vld [vmem:[%s19226_s12 + $0x78] sm:$0xff]  }
 0x72d   :  { %10751 = vmatmul.mubr.msk.bf16.gmra.mrb[56].mxu0 %vm1176_vm2, %v4439_v3  ;;  %10753 = vmatmul.mubr.msk.bf16.gmra.mrb[76].mxu1 %vm1176_vm2, %v4439_v3 }
 0x72e   :  { %11318 = vmatpush3.bf16.msra.mxu0 %v14674_v26  ;;  %4691 = vmatprep.mubr.bf16.mxu0 %v4442_v1  ;;  %v12301_v26 = vld [vmem:[%s19226_s12 + $0xe0] sm:$0xff]  }
 0x72f   :  { %11548 = vmatpush3.bf16.msra.mxu1 %v14669_v17  ;;  %11551 = vmatprep.mubr.msk.bf16.mxu1 %vm1176_vm2, %v4433_v54  ;;  %v12299_v17 = vld [vmem:[%s19226_s12 + $0x98] sm:$0xff]  }
 0x730   :  { %11319 = vmatprep.subr.bf16.mxu0 %v14679_v34  ;;  %11549 = vmatprep.subr.bf16.mxu1 %v14682_v15  ;;  %v12314_v34 = vld [vmem:[%s19226_s12 + $0x38] sm:$0xff]  }
 0x732   :  { %11320 = vmatpush3.bf16.msra.mxu0 %v14686_v19  ;;  %v12303_v19 = vld [vmem:[%s19226_s12 + $0xa0] sm:$0xff]  }
 0x733   :  { %11550 = vmatpush3.bf16.msra.mxu1 %v14682_v15  ;;  %11321 = vmatprep.subr.bf16.mxu0 %v14690_v29  ;;  %v12316_v15 = vld [vmem:[%s19226_s12 + $0x140] sm:$0xff]   ;;  %v12305_v29 = vld [vmem:[%s19226_s12 + $0xe8] sm:$0xff]  }
 0x734   :  { %11347 = vmatprep.subr.bf16.mxu1 %v12284_v25 }
 0x736   :  { %11322 = vmatpush3.bf16.msra.mxu0 %v14697_v50  ;;  %11552 = vmatmul.mubr.msk.bf16.vlgmr.msra.gmra.mrb[80].mxu1 %vm1176_vm2, %v4439_v3  ;;  %v12307_v50 = vld [vmem:[%s19226_s12 + $0xa8] sm:$0xff]  }
 0x737   :  { %11323 = vmatprep.subr.bf16.mxu0 %v14701_v12  ;;  %11348 = vmatpush3.bf16.msra.mxu1 %v12286_v2  ;;  %v12309_v12 = vld [vmem:[%s19226_s12 + $0xf0] sm:$0xff]  }
 0x738   :  { %11349 = vmatprep.subr.bf16.mxu1 %v12288_v27 }
 0x73a   :  { %11324 = vmatpush3.bf16.msra.mxu0 %v14706_v14  ;;  %v12311_v14 = vld [vmem:[%s19226_s12 + $0xb0] sm:$0xff]  }
 0x73b   :  { %11325 = vmatprep.subr.bf16.mxu0 %v14709_v31  ;;  %11350 = vmatpush3.bf16.msra.mxu1 %v12290_v57  ;;  %v12298_v31 = vld [vmem:[%s19226_s12 + $0x18] sm:$0xff]  }
 0x73c   :  { %11351 = vmatprep.subr.bf16.mxu1 %v12292_v23 }
 0x73e   :  { %11326 = vmatpush3.bf16.msra.mxu0 %v14714_v35  ;;  %v12287_v35 = vld [vmem:[%s19226_s12 + $0x80] sm:$0xff]  }
 0x73f   :  { %11327 = vmatprep.subr.bf16.mxu0 %v14717_v36  ;;  %11352 = vmatpush3.bf16.msra.mxu1 %v12294_v42  ;;  %v12313_v36 = vld [vmem:[%s19226_s12 + $0xf8] sm:$0xff]  }
 0x740   :  { %11353 = vmatprep.subr.bf16.mxu1 %v12296_v21 }
 0x742   :  { %11328 = vmatpush3.bf16.msra.mxu0 %v14722_v6  ;;  %v12315_v6 = vld [vmem:[%s19226_s12 + $0xb8] sm:$0xff]  }
 0x743   :  { %11369 = vmatprep.subr.bf16.mxu0 %v12285_v41  ;;  %11354 = vmatpush3.bf16.msra.mxu1 %v12298_v31 }
 0x744   :  { %11355 = vmatprep.subr.bf16.mxu1 %v12300_v16 }
 0x745   :  { %4692 = vmatmul.mubr.bf16.vlgmr.msra.gmra.mrb[60].mxu0 %v14792_v8 }
 0x746   :  { %4699 = vmatprep.mubr.bf16.mxu0 %v14799_v5  ;;  %11370 = vmatpush3.bf16.msra.mxu0 %v12287_v35 }
 0x747   :  { %11371 = vmatprep.subr.bf16.mxu0 %v12289_v58  ;;  %11356 = vmatpush3.bf16.msra.mxu1 %v12302_v48 }
 0x748   :  { %11357 = vmatprep.subr.bf16.mxu1 %v12304_v32 }
 0x74a   :  { %11372 = vmatpush3.bf16.msra.mxu0 %v12291_v56 }
 0x74b   :  { %11373 = vmatprep.subr.bf16.mxu0 %v12293_v24  ;;  %11358 = vmatpush3.bf16.msra.mxu1 %v12306_v18 }
 0x74c   :  { %11359 = vmatprep.subr.bf16.mxu1 %v12308_v55 }
 0x74d   :  { %4700 = vmatmul.mubr.bf16.gmra.mrb[64].mxu0 %v14810_v62 }
 0x74e   :  { %11374 = vmatpush3.bf16.msra.mxu0 %v12295_v59 }
 0x74f   :  { %11375 = vmatprep.subr.bf16.mxu0 %v12297_v53  ;;  %11360 = vmatpush3.bf16.msra.mxu1 %v12310_v61 }
 0x750   :  { %11361 = vmatprep.subr.bf16.mxu1 %v12312_v47 }
 0x752   :  { %11376 = vmatpush3.bf16.msra.mxu0 %v12299_v17 }
 0x753   :  { %11377 = vmatprep.subr.bf16.mxu0 %v12301_v26  ;;  %11362 = vmatpush3.bf16.msra.mxu1 %v12314_v34 }
 0x754   :  { %11391 = vmatprep.subr.bf16.mxu1 %v12316_v15 }
 0x756   :  { %11378 = vmatpush3.bf16.msra.mxu0 %v12303_v19 }
 0x757   :  { %11379 = vmatprep.subr.bf16.mxu0 %v12305_v29 }
 0x75a   :  { %11380 = vmatpush3.bf16.msra.mxu0 %v12307_v50 }
 0x75b   :  { %11381 = vmatprep.subr.bf16.mxu0 %v12309_v12 }
 0x75e   :  { %11382 = vmatpush3.bf16.msra.mxu0 %v12311_v14 }
 0x75f   :  { %11383 = vmatprep.subr.bf16.mxu0 %v12313_v36 }
 0x762   :  { %11384 = vmatpush3.bf16.msra.mxu0 %v12315_v6 }
 0x763   :  { %11413 = vmatprep.subr.bf16.mxu0 %v12317_v9 }
 0x774   :  { %v14959_v46 = vpop.f32.mrb[56].mxu1 }
 0x775   :  { %v14961_v10 = vpop.f32.mrb[40].mxu0  ;;  %v14963_v37 = vpop.f32.mrb[57].mxu1  ;;  %v4835_v11 = vmul.f32 %v14959_v46, %v14959_v46 }
 0x776   :  { %v14967_v13 = vpop.f32.mrb[41].mxu0  ;;  %v14969_v60 = vpop.f32.mrb[58].mxu1  ;;  %v4837_v63 = vmul.f32 %v14961_v10, %v14961_v10  ;;  %v4836_v22 = vmul.f32 %v14963_v37, %v14963_v37 }
 0x777   :  { %v4755_v30 = vadd.f32 %v14969_v60, %v14959_v46  ;;  %v4845_v33 = vmul.f32 %v14969_v60, %v14969_v60  ;;  %v14979_v38 = vpop.f32.mrb[42].mxu0  ;;  %v14981_v39 = vpop.f32.mrb[59].mxu1  ;;  %v4838_v51 = vmul.f32 %v14967_v13, %v14967_v13 }
 0x778   :  { %v4771_v40 = vadd.f32 %v14979_v38, %v14961_v10  ;;  %v4847_v43 = vmul.f32 %v14979_v38, %v14979_v38  ;;  %v4763_v44 = vadd.f32 %v14981_v39, %v14963_v37  ;;  %v4846_v45 = vmul.f32 %v14981_v39, %v14981_v39  ;;  %v14991_v49 = vpop.f32.mrb[43].mxu0 }
 0x779   :  { %v4865_v52 = vadd.f32 %v4845_v33, %v4835_v11  ;;  %v4779_v4 = vadd.f32 %v14991_v49, %v14967_v13  ;;  %v4848_v20 = vmul.f32 %v14991_v49, %v14991_v49 }
 0x77a   :  { %v4881_v54 = vadd.f32 %v4847_v43, %v4837_v63  ;;  %v4873_v0 = vadd.f32 %v4846_v45, %v4836_v22 }
 0x77b   :  { %v4889_v1 = vadd.f32 %v4848_v20, %v4838_v51 }
 0x77c   :  { %v14999_v8 = vpop.f32.mrb[60].mxu1 }
 0x77d   :  { %v4756_v3 = vadd.f32 %v4755_v30, %v14999_v8  ;;  %v4855_v5 = vmul.f32 %v14999_v8, %v14999_v8  ;;  %v15004_v7 = vpop.f32.mrb[44].mxu0  ;;  %v15006_v62 = vpop.f32.mrb[61].mxu1 }
 0x77e   :  { %v4772_v25 = vadd.f32 %v4771_v40, %v15004_v7  ;;  %v4857_v2 = vmul.f32 %v15004_v7, %v15004_v7  ;;  %v4764_v27 = vadd.f32 %v4763_v44, %v15006_v62  ;;  %v4856_v57 = vmul.f32 %v15006_v62, %v15006_v62  ;;  %v15014_v23 = vpop.f32.mrb[45].mxu0  ;;  %v4217_v42 = vpop.f32.mrb[62].mxu1 }
 0x77f   :  { %v4757_v21 = vrot.slane %v4756_v3, 4  ;;  %v4866_v41 = vadd.f32 %v4865_v52, %v4855_v5  ;;  %v4780_v31 = vadd.f32 %v4779_v4, %v15014_v23  ;;  %v4858_v16 = vmul.f32 %v15014_v23, %v15014_v23  ;;  %v4319_v35 = vpop.f32.mrb[46].mxu0  ;;  %v4218_v58 = vpop.f32.mrb[63].mxu1 }
 0x780   :  { %v4773_v48 = vrot.slane %v4772_v25, 4  ;;  %v4882_v32 = vadd.f32 %v4881_v54, %v4857_v2  ;;  %v4765_v56 = vrot.slane %v4764_v27, 4  ;;  %v4874_v24 = vadd.f32 %v4873_v0, %v4856_v57  ;;  %v4320_v18 = vpop.f32.mrb[47].mxu0 }
 0x781   :  { %v4758_v55 = vadd.f32 %v4757_v21, %v4756_v3  ;;  %v4867_v59 = vrot.slane %v4866_v41, 4  ;;  %v4781_v53 = vrot.slane %v4780_v31, 4  ;;  %v4890_v61 = vadd.f32 %v4889_v1, %v4858_v16 }
 0x782   :  { %v4774_v47 = vadd.f32 %v4773_v48, %v4772_v25  ;;  %v4883_v17 = vrot.slane %v4882_v32, 4  ;;  %v4766_v26 = vadd.f32 %v4765_v56, %v4764_v27  ;;  %v4875_v34 = vrot.slane %v4874_v24, 4 }
 0x783   :  { %v4759_v15 = vrot.slane %v4758_v55, 2  ;;  %v4868_v19 = vadd.f32 %v4867_v59, %v4866_v41  ;;  %v4782_v29 = vadd.f32 %v4781_v53, %v4780_v31  ;;  %v4891_v50 = vrot.slane %v4890_v61, 4 }
 0x784   :  { %v4775_v12 = vrot.slane %v4774_v47, 2  ;;  %v4884_v14 = vadd.f32 %v4883_v17, %v4882_v32  ;;  %v4767_v36 = vrot.slane %v4766_v26, 2  ;;  %v4876_v6 = vadd.f32 %v4875_v34, %v4874_v24  ;;  %v12319_v34 = vld [vmem:[%s19226_s12 + $0x180] sm:$0xff]  }
 0x785   :  { %v4760_v9 = vadd.f32 %v4759_v15, %v4758_v55  ;;  %v4869_v11 = vrot.slane %v4868_v19, 2  ;;  %v4783_v63 = vrot.slane %v4782_v29, 2  ;;  %v4892_v22 = vadd.f32 %v4891_v50, %v4890_v61  ;;  %v15019_v30 = vpop.f32.mrb[48].mxu0  ;;  %v12320_v15 = vld [vmem:[%s19226_s12 + $0x148] sm:$0xff]  }
 0x786   :  { %v4776_v33 = vadd.f32 %v4775_v12, %v4774_v47  ;;  %v4885_v40 = vrot.slane %v4884_v14, 2  ;;  %v4768_v43 = vadd.f32 %v4767_v36, %v4766_v26  ;;  %v4877_v44 = vrot.slane %v4876_v6, 2  ;;  %v4404_v45 = vpop.f32.mrb[49].mxu0  ;;  %v12318_v47 = vld [vmem:[%s19226_s12 + $0x100] sm:$0xff]   ;;  %v12322_v50 = vld [vmem:[%s19226_s12 + $0x108] sm:$0xff]   ;;  %v12324_v36 = vld [vmem:[%s19226_s12 + $0x150] sm:$0xff]  }
 0x787   :  { %v4761_v51 = vrot.slane %v4760_v9, 1  ;;  %v4870_v52 = vadd.f32 %v4869_v11, %v4868_v19  ;;  %v4784_v4 = vadd.f32 %v4783_v63, %v4782_v29  ;;  %v4893_v20 = vrot.slane %v4892_v22, 2  ;;  %v11542_v54 = vpop.f32.mrb[50].mxu0  ;;  %v12321_v29 = vld [vmem:[%s19226_s12 + $0x1c8] sm:$0xff]  }
 0x788   :  { %v4777_v0 = vrot.slane %v4776_v33, 1  ;;  %v4886_v1 = vadd.f32 %v4885_v40, %v4884_v14  ;;  %v4769_v3 = vrot.slane %v4768_v43, 1  ;;  %v4878_v5 = vadd.f32 %v4877_v44, %v4876_v6  ;;  %v4407_v25 = vpop.f32.mrb[51].mxu0  ;;  %v12323_v14 = vld [vmem:[%s19226_s12 + $0x188] sm:$0xff]   ;;  %v12327_v44 = vld [vmem:[%s19226_s12 + $0x190] sm:$0xff]   ;;  %v12331_v54 = vld [vmem:[%s19226_s12 + $0x198] sm:$0xff]  }
 0x789   :  { %v4871_v2 = vrot.slane %v4870_v52, 1  ;;  %v4785_v27 = vrot.slane %v4784_v4, 1  ;;  %v4894_v57 = vadd.f32 %v4893_v20, %v4892_v22  ;;  %v4762_v41 = vadd.f32 %v4761_v51, %v4760_v9  ;;  %v12325_v9 = vld [vmem:[%s19226_s12 + $0x1d0] sm:$0xff]   ;;  %v12328_v51 = vld [vmem:[%s19226_s12 + $0x158] sm:$0xff]  }
 0x78a   :  { %v4887_v42 = vrot.slane %v4886_v1, 1  ;;  %v4879_v21 = vrot.slane %v4878_v5, 1  ;;  %v4778_v35 = vadd.f32 %v4777_v0, %v4776_v33  ;;  %v4770_v48 = vadd.f32 %v4769_v3, %v4768_v43  ;;  %v12326_v33 = vld [vmem:[%s19226_s12 + $0x110] sm:$0xff]   ;;  %v12332_v0 = vld [vmem:[%s19226_s12 + $0x160] sm:$0xff]  }
 0x78b   :  { %v4872_v31 = vadd.f32 %v4871_v2, %v4870_v52  ;;  %v4895_v16 = vrot.slane %v4894_v57, 1  ;;  %v4786_v56 = vadd.f32 %v4785_v27, %v4784_v4  ;;  %v12329_v52 = vld [vmem:[%s19226_s12 + $0x1d8] sm:$0xff]   ;;  %v12333_v3 = vld [vmem:[%s19226_s12 + $0x1e0] sm:$0xff]  }
 0x78c   :  { %v4888_v58 = vadd.f32 %v4887_v42, %v4886_v1  ;;  %v4880_v32 = vadd.f32 %v4879_v21, %v4878_v5  ;;  %v12334_v27 = vld [vmem:[%s19226_s12 + $0x120] sm:$0xff]   ;;  %v12336_v21 = vld [vmem:[%s19226_s12 + $0x168] sm:$0xff]  }
 0x78d   :  { %v4896_v24 = vadd.f32 %v4895_v16, %v4894_v57  ;;  %v4945_v18 = vsel %vm1224_vm3, %v4762_v41, %v4872_v31  ;;  %v12335_v42 = vld [vmem:[%s19226_s12 + $0x1a0] sm:$0xff]   ;;  %v12337_v41 = vld [vmem:[%s19226_s12 + $0x1e8] sm:$0xff]   ;;  %v12340_v16 = vld [vmem:[%s19226_s12 + $0x170] sm:$0xff]  }
 0x78e   :  { %v4946_v55 = vsel %vm1224_vm3, %v4770_v48, %v4880_v32  ;;  %v4947_v59 = vsel %vm1224_vm3, %v4778_v35, %v4888_v58  ;;  %v5115_v26 = vpack.c.bf16 %v4945_v18, %v4945_v18  ;;  %v12339_v31 = vld [vmem:[%s19226_s12 + $0x1a8] sm:$0xff]   ;;  %v12341_v35 = vld [vmem:[%s19226_s12 + $0x1f0] sm:$0xff]   ;;  %v12344_v32 = vld [vmem:[%s19226_s12 + $0x178] sm:$0xff]  }
 0x78f   :  { %v5116_v53 = vpack.c.bf16 %v4946_v55, %v4946_v55  ;;  %v4948_v61 = vsel %vm1224_vm3, %v4786_v56, %v4896_v24  ;;  %v5117_v19 = vpack.c.bf16 %v4947_v59, %v4947_v59  ;;  %v12342_v58 = vld [vmem:[%s19226_s12 + $0x130] sm:$0xff]   ;;  %v12345_v56 = vld [vmem:[%s19226_s12 + $0x1f8] sm:$0xff]   ;;  %v12348_v55 = vld [vmem:[%s19226_s12 + $0x240] sm:$0xff]  }
 0x790   :  { %v5118_v17 = vpack.c.bf16 %v4948_v61, %v4948_v61  ;;  %v12343_v48 = vld [vmem:[%s19226_s12 + $0x1b0] sm:$0xff]   ;;  %v12346_v24 = vld [vmem:[%s19226_s12 + $0x138] sm:$0xff]  }
 0x791   :  { %5637 = vmatprep.mubr.bf16.mxu1 %v5116_v53  ;;  %v12347_v18 = vld [vmem:[%s19226_s12 + $0x1b8] sm:$0xff]  }
 0x792   :  { %5677 = vmatprep.mubr.bf16.mxu0 %v5118_v17  ;;  %5638 = vmatmul.mubr.bf16.vlgmr.msra.gmra.mrb[84].mxu1 %v5115_v26 }
 0x793   :  { %5678 = vmatmul.mubr.bf16.vlgmr.msra.gmra.mrb[68].mxu0 %v5117_v19  ;;  %11392 = vmatpush3.bf16.msra.mxu1 %v12318_v47 }
 0x794   :  { %v11295_v12 = vpop.f32.mrb[64].mxu1  ;;  %11414 = vmatpush3.bf16.msra.mxu0 %v12319_v34  ;;  %11393 = vmatprep.subr.bf16.mxu1 %v12320_v15 }
 0x795   :  { %v11296_v6 = vpop.f32.mrb[65].mxu1  ;;  %11415 = vmatprep.subr.bf16.mxu0 %v12321_v29 }
 0x796   :  { %v11297_v11 = vadd.f32 %v11296_v6, %v11295_v12  ;;  %v11298_v63 = vpop.f32.mrb[66].mxu1 }
 0x797   :  { %v11299_v22 = vpop.f32.mrb[67].mxu1  ;;  %11394 = vmatpush3.bf16.msra.mxu1 %v12322_v50 }
 0x798   :  { %v15052_v40 = vadd.f32 %v11297_v11, %v4404_v45  ;;  %v11300_v43 = vadd.f32 %v11299_v22, %v11298_v63  ;;  %11416 = vmatpush3.bf16.msra.mxu0 %v12323_v14  ;;  %11395 = vmatprep.subr.bf16.mxu1 %v12324_v36  ;;  %v12330_v45 = vld [vmem:[%s19226_s12 + $0x118] sm:$0xff]  }
 0x799   :  { %11417 = vmatprep.subr.bf16.mxu0 %v12325_v9 }
 0x79a   :  { %v15063_v4 = vadd.f32 %v11300_v43, %v4407_v25  ;;  %v4839_v53 = vmul.f32 %v15052_v40, %v15052_v40 }
 0x79b   :  { %11396 = vmatpush3.bf16.msra.mxu1 %v12326_v33 }
 0x79c   :  { %v11301_v20 = vpop.f32.mrb[68].mxu1  ;;  %11418 = vmatpush3.bf16.msra.mxu0 %v12327_v44  ;;  %11397 = vmatprep.subr.bf16.mxu1 %v12328_v51  ;;  %v4849_v59 = vmul.f32 %v15063_v4, %v15063_v4  ;;  %v4787_v47 = vadd.f32 %v15063_v4, %v15052_v40 }
 0x79d   :  { %v11302_v1 = vpop.f32.mrb[69].mxu1  ;;  %11419 = vmatprep.subr.bf16.mxu0 %v12329_v52 }
 0x79e   :  { %v11303_v5 = vadd.f32 %v11302_v1, %v11301_v20  ;;  %v11304_v25 = vpop.f32.mrb[70].mxu1  ;;  %v4897_v17 = vadd.f32 %v4849_v59, %v4839_v53 }
 0x79f   :  { %v11305_v2 = vpop.f32.mrb[71].mxu1  ;;  %11398 = vmatpush3.bf16.msra.mxu1 %v12330_v45 }
 0x7a0   :  { %v15081_v57 = vadd.f32 %v15019_v30, %v11303_v5  ;;  %11420 = vmatpush3.bf16.msra.mxu0 %v12331_v54  ;;  %11399 = vmatprep.subr.bf16.mxu1 %v12332_v0  ;;  %v12338_v30 = vld [vmem:[%s19226_s12 + $0x128] sm:$0xff]  }
 0x7a1   :  { %11421 = vmatprep.subr.bf16.mxu0 %v12333_v3 }
 0x7a2   :  { %v4859_v61 = vmul.f32 %v15081_v57, %v15081_v57  ;;  %v4788_v26 = vadd.f32 %v4787_v47, %v15081_v57 }
 0x7a3   :  { %11400 = vmatpush3.bf16.msra.mxu1 %v12334_v27 }
 0x7a4   :  { %11422 = vmatpush3.bf16.msra.mxu0 %v12335_v42  ;;  %11401 = vmatprep.subr.bf16.mxu1 %v12336_v21  ;;  %v4898_v34 = vadd.f32 %v4897_v17, %v4859_v61  ;;  %v4789_v15 = vrot.slane %v4788_v26, 4 }
 0x7a5   :  { %11423 = vmatprep.subr.bf16.mxu0 %v12337_v41 }
 0x7a6   :  { %v4899_v19 = vrot.slane %v4898_v34, 4  ;;  %v4790_v29 = vadd.f32 %v4789_v15, %v4788_v26 }
 0x7a7   :  { %11402 = vmatpush3.bf16.msra.mxu1 %v12338_v30 }
 0x7a8   :  { %11424 = vmatpush3.bf16.msra.mxu0 %v12339_v31  ;;  %11403 = vmatprep.subr.bf16.mxu1 %v12340_v16  ;;  %v4900_v50 = vadd.f32 %v4899_v19, %v4898_v34  ;;  %v4791_v12 = vrot.slane %v4790_v29, 2 }
 0x7a9   :  { %11425 = vmatprep.subr.bf16.mxu0 %v12341_v35 }
 0x7aa   :  { %v4901_v14 = vrot.slane %v4900_v50, 2  ;;  %v4792_v36 = vadd.f32 %v4791_v12, %v4790_v29 }
 0x7ab   :  { %11404 = vmatpush3.bf16.msra.mxu1 %v12342_v58 }
 0x7ac   :  { %11426 = vmatpush3.bf16.msra.mxu0 %v12343_v48  ;;  %11405 = vmatprep.subr.bf16.mxu1 %v12344_v32  ;;  %v4902_v6 = vadd.f32 %v4901_v14, %v4900_v50  ;;  %v4793_v63 = vrot.slane %v4792_v36, 1 }
 0x7ad   :  { %11427 = vmatprep.subr.bf16.mxu0 %v12345_v56 }
 0x7ae   :  { %v4903_v43 = vrot.slane %v4902_v6, 1  ;;  %v15178_v32 = vadd.f32 %v4793_v63, %v4792_v36 }
 0x7af   :  { %11406 = vmatpush3.bf16.msra.mxu1 %v12346_v24 }
 0x7b0   :  { %11428 = vmatpush3.bf16.msra.mxu0 %v12347_v18  ;;  %11435 = vmatprep.subr.bf16.mxu1 %v12348_v55  ;;  %v15180_v56 = vadd.f32 %v4903_v43, %v4902_v6 }
 0x7f8   :  { %v15134_v9 = vpop.f32.mrb[52].mxu0  ;;  %v15136_v11 = vpop.f32.mrb[72].mxu1 }
 0x7f9   :  { %v15138_v22 = vpop.f32.mrb[53].mxu0  ;;  %v15140_v33 = vpop.f32.mrb[73].mxu1  ;;  %v4840_v44 = vmul.f32 %v15134_v9, %v15134_v9  ;;  %v4842_v51 = vmul.f32 %v15136_v11, %v15136_v11 }
 0x7fa   :  { %v4841_v52 = vmul.f32 %v15138_v22, %v15138_v22  ;;  %v4843_v45 = vmul.f32 %v15140_v33, %v15140_v33  ;;  %v15150_v20 = vpop.f32.mrb[54].mxu0  ;;  %v15152_v54 = vpop.f32.mrb[74].mxu1 }
 0x7fb   :  { %v4795_v0 = vadd.f32 %v15150_v20, %v15134_v9  ;;  %v4850_v1 = vmul.f32 %v15150_v20, %v15150_v20  ;;  %v4811_v3 = vadd.f32 %v15152_v54, %v15136_v11  ;;  %v4852_v5 = vmul.f32 %v15152_v54, %v15152_v54  ;;  %v15162_v25 = vpop.f32.mrb[55].mxu0  ;;  %v15164_v2 = vpop.f32.mrb[75].mxu1 }
 0x7fc   :  { %v4803_v27 = vadd.f32 %v15162_v25, %v15138_v22  ;;  %v4851_v42 = vmul.f32 %v15162_v25, %v15162_v25  ;;  %v4819_v21 = vadd.f32 %v15164_v2, %v15140_v33  ;;  %v4853_v41 = vmul.f32 %v15164_v2, %v15164_v2 }
 0x7fd   :  { %v4905_v30 = vadd.f32 %v4850_v1, %v4840_v44  ;;  %v4921_v31 = vadd.f32 %v4852_v5, %v4842_v51 }
 0x7fe   :  { %v4913_v16 = vadd.f32 %v4851_v42, %v4841_v52  ;;  %v4929_v35 = vadd.f32 %v4853_v41, %v4843_v45 }
 0x800   :  { %v15174_v58 = vpop.f32.mrb[56].mxu0  ;;  %v15176_v48 = vpop.f32.mrb[76].mxu1 }
 0x801   :  { %v4796_v24 = vadd.f32 %v4795_v0, %v15174_v58  ;;  %v4860_v18 = vmul.f32 %v15174_v58, %v15174_v58  ;;  %v4812_v55 = vadd.f32 %v4811_v3, %v15176_v48  ;;  %v4862_v59 = vmul.f32 %v15176_v48, %v15176_v48  ;;  %v15188_v53 = vpop.f32.mrb[57].mxu0  ;;  %v15190_v61 = vpop.f32.mrb[77].mxu1 }
 0x802   :  { %v4804_v47 = vadd.f32 %v4803_v27, %v15188_v53  ;;  %v4861_v17 = vmul.f32 %v15188_v53, %v15188_v53  ;;  %v4820_v26 = vadd.f32 %v4819_v21, %v15190_v61  ;;  %v4863_v34 = vmul.f32 %v15190_v61, %v15190_v61  ;;  %v4554_v15 = vpop.f32.mrb[58].mxu0  ;;  %v4656_v19 = vpop.f32.mrb[78].mxu1 }
 0x803   :  { %v4797_v29 = vrot.slane %v4796_v24, 4  ;;  %v4906_v50 = vadd.f32 %v4905_v30, %v4860_v18  ;;  %v4813_v12 = vrot.slane %v4812_v55, 4  ;;  %v4922_v14 = vadd.f32 %v4921_v31, %v4862_v59  ;;  %v4555_v36 = vpop.f32.mrb[59].mxu0  ;;  %v4657_v6 = vpop.f32.mrb[79].mxu1 }
 0x804   :  { %v4805_v63 = vrot.slane %v4804_v47, 4  ;;  %v4914_v43 = vadd.f32 %v4913_v16, %v4861_v17  ;;  %v4821_v44 = vrot.slane %v4820_v26, 4  ;;  %v4930_v51 = vadd.f32 %v4929_v35, %v4863_v34 }
 0x805   :  { %v4798_v52 = vadd.f32 %v4797_v29, %v4796_v24  ;;  %v4907_v45 = vrot.slane %v4906_v50, 4  ;;  %v4814_v0 = vadd.f32 %v4813_v12, %v4812_v55  ;;  %v4923_v1 = vrot.slane %v4922_v14, 4 }
 0x806   :  { %v4806_v3 = vadd.f32 %v4805_v63, %v4804_v47  ;;  %v4915_v5 = vrot.slane %v4914_v43, 4  ;;  %v4822_v27 = vadd.f32 %v4821_v44, %v4820_v26  ;;  %v4931_v42 = vrot.slane %v4930_v51, 4 }
 0x807   :  { %v4799_v21 = vrot.slane %v4798_v52, 2  ;;  %v4908_v41 = vadd.f32 %v4907_v45, %v4906_v50  ;;  %v4815_v15 = vrot.slane %v4814_v0, 2  ;;  %v4924_v30 = vadd.f32 %v4923_v1, %v4922_v14 }
 0x808   :  { %v4807_v18 = vrot.slane %v4806_v3, 2  ;;  %v4916_v31 = vadd.f32 %v4915_v5, %v4914_v43  ;;  %v4823_v59 = vrot.slane %v4822_v27, 2  ;;  %v4932_v19 = vadd.f32 %v4931_v42, %v4930_v51 }
 0x809   :  { %v4800_v36 = vadd.f32 %v4799_v21, %v4798_v52  ;;  %v4909_v16 = vrot.slane %v4908_v41, 2  ;;  %v4816_v17 = vadd.f32 %v4815_v15, %v4814_v0  ;;  %v4925_v35 = vrot.slane %v4924_v30, 2  ;;  %v15198_v24 = vpop.f32.mrb[80].mxu1 }
 0x80a   :  { %v4808_v55 = vadd.f32 %v4807_v18, %v4806_v3  ;;  %v4917_v34 = vrot.slane %v4916_v31, 2  ;;  %v4824_v47 = vadd.f32 %v4823_v59, %v4822_v27  ;;  %v4933_v29 = vrot.slane %v4932_v19, 2  ;;  %v4741_v26 = vpop.f32.mrb[81].mxu1 }
 0x80b   :  { %v4801_v12 = vrot.slane %v4800_v36, 1  ;;  %v4910_v6 = vadd.f32 %v4909_v16, %v4908_v41  ;;  %v4817_v50 = vrot.slane %v4816_v17, 1  ;;  %v4926_v63 = vadd.f32 %v4925_v35, %v4924_v30  ;;  %v11554_v14 = vpop.f32.mrb[82].mxu1 }
 0x80c   :  { %v4809_v44 = vrot.slane %v4808_v55, 1  ;;  %v4918_v43 = vadd.f32 %v4917_v34, %v4916_v31  ;;  %v4825_v45 = vrot.slane %v4824_v47, 1  ;;  %v4934_v51 = vadd.f32 %v4933_v29, %v4932_v19  ;;  %v4744_v52 = vpop.f32.mrb[83].mxu1 }
 0x80d   :  { %v4911_v1 = vrot.slane %v4910_v6, 1  ;;  %v4927_v0 = vrot.slane %v4926_v63, 1  ;;  %v4949_v3 = vsel %vm1224_vm3, %v15178_v32, %v15180_v56  ;;  %v4802_v27 = vadd.f32 %v4801_v12, %v4800_v36  ;;  %v12349_v32 = vld [vmem:[%s19226_s12 + $0x200] sm:$0xff]   ;;  %v12352_v12 = vld [vmem:[%s19226_s12 + $0x250] sm:$0xff]  }
 0x80e   :  { %v4919_v5 = vrot.slane %v4918_v43, 1  ;;  %v4935_v42 = vrot.slane %v4934_v51, 1  ;;  %v4818_v15 = vadd.f32 %v4817_v50, %v4816_v17  ;;  %v4810_v18 = vadd.f32 %v4809_v44, %v4808_v55  ;;  %v12350_v55 = vld [vmem:[%s19226_s12 + $0x248] sm:$0xff]   ;;  %v12353_v44 = vld [vmem:[%s19226_s12 + $0x210] sm:$0xff]  }
 0x80f   :  { %v4912_v21 = vadd.f32 %v4911_v1, %v4910_v6  ;;  %v4928_v41 = vadd.f32 %v4927_v0, %v4926_v63  ;;  %v4826_v59 = vadd.f32 %v4825_v45, %v4824_v47  ;;  %v5119_v36 = vpack.c.bf16 %v4949_v3, %v4949_v3  ;;  %v12351_v47 = vld [vmem:[%s19226_s12 + $0x208] sm:$0xff]   ;;  %v12354_v45 = vld [vmem:[%s19226_s12 + $0x258] sm:$0xff]  }
 0x810   :  { %v4920_v30 = vadd.f32 %v4919_v5, %v4918_v43  ;;  %v4936_v16 = vadd.f32 %v4935_v42, %v4934_v51  ;;  %v12355_v5 = vld [vmem:[%s19226_s12 + $0x218] sm:$0xff]   ;;  %v12356_v42 = vld [vmem:[%s19226_s12 + $0x260] sm:$0xff]  }
 0x811   :  { %v4950_v31 = vsel %vm1224_vm3, %v4802_v27, %v4912_v21  ;;  %v4952_v19 = vsel %vm1224_vm3, %v4818_v15, %v4928_v41 }
 0x812   :  { %v5120_v35 = vpack.c.bf16 %v4950_v31, %v4950_v31  ;;  %v5122_v34 = vpack.c.bf16 %v4952_v19, %v4952_v19  ;;  %v4951_v29 = vsel %vm1224_vm3, %v4810_v18, %v4920_v30  ;;  %v15210_v56 = vsel %vm1224_vm3, %v4826_v59, %v4936_v16  ;;  %v12358_v18 = vld [vmem:[%s19226_s12 + $0x268] sm:$0xff]  }
 0x813   :  { %v5121_v17 = vpack.c.bf16 %v4951_v29, %v4951_v29  ;;  %v12360_v29 = vld [vmem:[%s19226_s12 + $0x270] sm:$0xff]  }
 0x814   :  { %5717 = vmatprep.mubr.bf16.mxu1 %v5120_v35  ;;  %5757 = vmatprep.mubr.bf16.mxu0 %v5122_v34  ;;  %v12359_v34 = vld [vmem:[%s19226_s12 + $0x228] sm:$0xff]  }
 0x815   :  { %5718 = vmatmul.mubr.bf16.vlgmr.msra.gmra.mrb[88].mxu1 %v5119_v36  ;;  %5758 = vmatmul.mubr.bf16.vlgmr.msra.gmra.mrb[72].mxu0 %v5121_v17 }
 0x816   :  { %11436 = vmatpush3.bf16.msra.mxu1 %v12349_v32  ;;  %5939 = vmatprep.mubr.bf16.mxu0 %v19549_v28 }
 0x817   :  { %11437 = vmatprep.subr.bf16.mxu1 %v12350_v55  ;;  %v12361_v55 = vld [vmem:[%s19226_s12 + $0x230] sm:$0xff]  }
 0x818   :  { %v11329_v6 = vpop.f32.mrb[60].mxu0 }
 0x819   :  { %v11330_v50 = vpop.f32.mrb[61].mxu0 }
 0x81a   :  { %v11331_v63 = vadd.f32 %v11330_v50, %v11329_v6  ;;  %v11332_v14 = vpop.f32.mrb[62].mxu0  ;;  %11438 = vmatpush3.bf16.msra.mxu1 %v12351_v47  ;;  %v12362_v47 = vld [vmem:[%s19226_s12 + $0x278] sm:$0xff]  }
 0x81b   :  { %v11333_v43 = vpop.f32.mrb[63].mxu0  ;;  %11439 = vmatprep.subr.bf16.mxu1 %v12352_v12  ;;  %v12363_v50 = vld [vmem:[%s19226_s12 + $0x238] sm:$0xff]  }
 0x81c   :  { %v15228_v51 = vadd.f32 %v11331_v63, %v4741_v26  ;;  %v11334_v1 = vadd.f32 %v11333_v43, %v11332_v14 }
 0x81e   :  { %v15230_v0 = vadd.f32 %v11334_v1, %v4744_v52  ;;  %11440 = vmatpush3.bf16.msra.mxu1 %v12353_v44  ;;  %v12357_v52 = vld [vmem:[%s19226_s12 + $0x220] sm:$0xff]   ;;  %v4844_v30 = vmul.f32 %v15228_v51, %v15228_v51 }
 0x81f   :  { %11441 = vmatprep.subr.bf16.mxu1 %v12354_v45 }
 0x820   :  { %v11335_v3 = vpop.f32.mrb[64].mxu0  ;;  %v4854_v21 = vmul.f32 %v15230_v0, %v15230_v0  ;;  %v4827_v59 = vadd.f32 %v15230_v0, %v15228_v51 }
 0x821   :  { %v11336_v27 = vpop.f32.mrb[65].mxu0 }
 0x822   :  { %v11337_v26 = vadd.f32 %v11336_v27, %v11335_v3  ;;  %v11338_v15 = vpop.f32.mrb[66].mxu0  ;;  %11442 = vmatpush3.bf16.msra.mxu1 %v12355_v5  ;;  %v4937_v31 = vadd.f32 %v4854_v21, %v4844_v30  ;;  %v5123_v27 = vpack.c.bf16 %v15210_v56, %v15210_v56  ;;  %v5846_v56 = vld [vmem:[%s19227_s13 + $0x20] sm:$0xff] }
 0x823   :  { %v11339_v41 = vpop.f32.mrb[67].mxu0  ;;  %11443 = vmatprep.subr.bf16.mxu1 %v12356_v42 }
 0x824   :  { %v15251_v16 = vadd.f32 %v15198_v24, %v11337_v26 }
 0x826   :  { %v4828_v19 = vadd.f32 %v4827_v59, %v15251_v16  ;;  %v4864_v35 = vmul.f32 %v15251_v16, %v15251_v16  ;;  %11444 = vmatpush3.bf16.msra.mxu1 %v12357_v52 }
 0x827   :  { %11445 = vmatprep.subr.bf16.mxu1 %v12358_v18 }
 0x828   :  { %v4829_v32 = vrot.slane %v4828_v19, 4  ;;  %v4938_v36 = vadd.f32 %v4937_v31, %v4864_v35 }
 0x82a   :  { %v4830_v24 = vadd.f32 %v4829_v32, %v4828_v19  ;;  %v4939_v17 = vrot.slane %v4938_v36, 4  ;;  %11446 = vmatpush3.bf16.msra.mxu1 %v12359_v34  ;;  %v5842_v34 = vld [vmem:[%s19227_s13] sm:$0xff] }
 0x82b   :  { %11447 = vmatprep.subr.bf16.mxu1 %v12360_v29  ;;  %v10837_v29 = vcombine.high %v5842_v34, %v5842_v34  ;;  %v10836_v32 = vcombine.low %v5842_v34, %v5842_v34 }
 0x82c   :  { %v4831_v12 = vrot.slane %v4830_v24, 2  ;;  %v4940_v6 = vadd.f32 %v4939_v17, %v4938_v36  ;;  %v10845_v36 = vcombine.high %v5846_v56, %v5846_v56 }
 0x82d   :  { %10846 = vmatprep.subr.msk.bf16.mxu0 %vm853_vm1, %v10837_v29  ;;  %v5878_v17 = vsel %vm853_vm1, %v10836_v32, 0  ;;  %v19589_v32 = vld [vmem:[#allocation6_spill] sm:$0xff] }
 0x82e   :  { %11448 = vmatpush3.bf16.msra.mxu1 %v12361_v55  ;;  %v4832_v63 = vadd.f32 %v4831_v12, %v4830_v24  ;;  %v4941_v14 = vrot.slane %v4940_v6, 2  ;;  %v10844_v24 = vcombine.low %v5846_v56, %v5846_v56  ;;  %5908 = vmatpush1.bf16.msra.mxu0 %v5878_v17 }
 0x82f   :  { %11449 = vmatprep.subr.bf16.mxu1 %v12362_v47  ;;  %v5843_v47 = vld [vmem:[%s19227_s13 + $0x8] sm:$0xff] }
 0x830   :  { %v4833_v44 = vrot.slane %v4832_v63, 1  ;;  %v4942_v43 = vadd.f32 %v4941_v14, %v4940_v6  ;;  %v5902_v55 = vsel %vm853_vm1, %v10844_v24, 0  ;;  %v10839_v12 = vcombine.high %v5843_v47, %v5843_v47  ;;  %v12376_v6 = vld [vmem:[%s19230_s16 + $0xc] ss:$40 sps:$4 sm:$0xff]  }
 0x832   :  { %11450 = vmatpush3.bf16.msra.mxu1 %v12363_v50  ;;  %v4943_v45 = vrot.slane %v4942_v43, 1  ;;  %v4834_v1 = vadd.f32 %v4833_v44, %v4832_v63  ;;  %10848 = vmatprep.subr.msk.bf16.mxu0 %vm853_vm1, %v10839_v12  ;;  %v5832_v12 = vld [vmem:[%s19229_s15] sm:$0x1] }
 0x833   :  { %10854 = vmatprep.subr.msk.bf16.mxu1 %vm853_vm1, %v10845_v36 }
 0x834   :  { %v4944_v5 = vadd.f32 %v4943_v45, %v4942_v43 }
 0x836   :  { %v4954_v42 = vsel %vm1224_vm3, %v4834_v1, %v4944_v5 }
 0x837   :  { %v5124_v3 = vpack.c.bf16 %v4954_v42, %v4954_v42 }
 0x839   :  { %5797 = vmatprep.mubr.bf16.mxu1 %v5124_v3 }
 0x83a   :  { %5798 = vmatmul.mubr.bf16.vlgmr.msra.gmra.mrb[92].mxu1 %v5123_v27 }
 0x83b   :  { %6103 = vmatprep.mubr.bf16.mxu1 %v19549_v28  ;;  %6072 = vmatpush1.bf16.msra.mxu1 %v5902_v55 }
 0x83c   :  { %7596 = vmatprep.subr.bf16.mxu1 %v12376_v6 }
 0x865   :  { %v11363_v21 = vpop.f32.mrb[84].mxu1 }
 0x866   :  { %v11385_v26 = vpop.f32.mrb[68].mxu0  ;;  %v11364_v15 = vpop.f32.mrb[85].mxu1 }
 0x867   :  { %v11365_v52 = vadd.f32 %v11364_v15, %v11363_v21  ;;  %v11386_v41 = vpop.f32.mrb[69].mxu0  ;;  %v11366_v18 = vpop.f32.mrb[86].mxu1 }
 0x868   :  { %v11387_v30 = vadd.f32 %v11386_v41, %v11385_v26  ;;  %v11388_v59 = vpop.f32.mrb[70].mxu0  ;;  %v11367_v31 = vpop.f32.mrb[87].mxu1 }
 0x869   :  { %v11389_v19 = vpop.f32.mrb[71].mxu0 }
 0x86a   :  { %v5680_v35 = vadd.f32 %v11387_v30, %v11365_v52 }
 0x8e8   :  { %v11407_v50 = vpop.f32.mrb[88].mxu1  ;;  %v11429_v63 = vpop.f32.mrb[72].mxu0 }
 0x8e9   :  { %v11408_v14 = vpop.f32.mrb[89].mxu1  ;;  %v11430_v44 = vpop.f32.mrb[73].mxu0 }
 0x8ea   :  { %v11409_v43 = vadd.f32 %v11408_v14, %v11407_v50  ;;  %v11431_v45 = vadd.f32 %v11430_v44, %v11429_v63  ;;  %v11410_v1 = vpop.f32.mrb[90].mxu1  ;;  %v11432_v5 = vpop.f32.mrb[74].mxu0  ;;  %v10838_v63 = vcombine.low %v5843_v47, %v5843_v47  ;;  %v19590_v14 = vld [vmem:[#allocation7_spill] sm:$0xff]  ;;  %v12382_v47 = vld [vmem:[%s19230_s16 + $0x5c] ss:$40 sps:$4 sm:$0xff]  }
 0x8eb   :  { %v11411_v42 = vpop.f32.mrb[91].mxu1  ;;  %v11433_v3 = vpop.f32.mrb[75].mxu0 }
 0x8ec   :  { %v5720_v27 = vadd.f32 %v11409_v43, %v5680_v35  ;;  %v5811_v35 = vld [vmem:[%s19228_s14] sm:$0x1]  ;;  %v5844_v43 = vld [vmem:[%s19227_s13 + $0x10] sm:$0xff]  ;;  %v5884_v5 = vsel %vm853_vm1, %v10838_v63, 0 }
 0x8ed   :  { %v10841_v42 = vcombine.high %v5844_v43, %v5844_v43  ;;  %v12379_v3 = vld [vmem:[%s19230_s16 + $0x8] ss:$40 sps:$4 sm:$0xff]   ;;  %v12421_v63 = vld [vmem:[%s19230_s16 + $0x238] ss:$40 sps:$4 sm:$0xff]  }
 0x8ee   :  { %v5760_v21 = vadd.f32 %v11431_v45, %v5720_v27  ;;  %v10840_v27 = vcombine.low %v5844_v43, %v5844_v43  ;;  %v15401_v43 = vld [vmem:[%s19230_s16 + $0xa0] ss:$40 sps:$4 sm:$0xff]  }
 0x90d   :  { %v11451_v26 = vpop.f32.mrb[92].mxu1 }
 0x90e   :  { %v11452_v15 = vpop.f32.mrb[93].mxu1 }
 0x90f   :  { %v11453_v52 = vadd.f32 %v11452_v15, %v11451_v26  ;;  %v11454_v41 = vpop.f32.mrb[94].mxu1  ;;  %v5845_v26 = vld [vmem:[%s19227_s13 + $0x18] sm:$0xff]  ;;  %v12388_v15 = vld [vmem:[%s19230_s16 + $0xac] ss:$40 sps:$4 sm:$0xff]  }
 0x910   :  { %v11455_v18 = vpop.f32.mrb[95].mxu1  ;;  %v10843_v41 = vcombine.high %v5845_v26, %v5845_v26 }
 0x911   :  { %v5800_v30 = vadd.f32 %v11453_v52, %v5760_v21  ;;  %v12385_v21 = vld [vmem:[%s19230_s16 + $0x58] ss:$40 sps:$4 sm:$0xff]   ;;  %v5890_v52 = vsel %vm853_vm1, %v10840_v27, 0  ;;  %v12391_v18 = vld [vmem:[%s19230_s16 + $0xa8] ss:$40 sps:$4 sm:$0xff]  }
 0x912   :  { %v12436_v27 = vld [vmem:[%s19230_s16 + $0x32c] ss:$40 sps:$4 sm:$0xff]  }
 0x913   :  { %v5805_v59 = vmul.f32 0.00026041668, %v5800_v30  ;;  %v12394_v30 = vld [vmem:[%s19230_s16 + $0xfc] ss:$40 sps:$4 sm:$0xff]  }
 0x915   :  { %v5806_v31 = vmul.f32 %v5805_v59, %v5805_v59 }
 0x917   :  { %v5808_v19 = vrot.slane %v5806_v31, 7  ;;  %v12397_v31 = vld [vmem:[%s19230_s16 + $0xf8] ss:$40 sps:$4 sm:$0xff]  }
 0x919   :  { %v5810_v34 = vsub.f32 %v5805_v59, %v5808_v19  ;;  %v12400_v19 = vld [vmem:[%s19230_s16 + $0x14c] ss:$40 sps:$4 sm:$0xff]  }
 0x91b   :  { %v5812_v56 = vadd.f32 1e-05, %v5810_v34 }
 0x91d   :  { %12678 = vrsqrt.f32 %v5812_v56  ;;  %v15345_v56 = vld [vmem:[%s19230_s16 + $0x4] ss:$40 sps:$4 sm:$0xff]  }
 0x927   :  { %v12679_v29 = vpop.eup %12678 }
 0x928   :  { %v5821_v36 = vrot.slane %v12679_v29, %v19589_v32  ;;  %v12403_v29 = vld [vmem:[%s19230_s16 + $0x148] ss:$40 sps:$4 sm:$0xff]  }
 0x92a   :  { %v5822_v24 = vcombine.high %v5821_v36, %v5821_v36  ;;  %v12409_v36 = vld [vmem:[%s19230_s16 + $0x198] ss:$40 sps:$4 sm:$0xff]  }
 0x92c   :  { %v5829_v17 = vrot.slane %v5822_v24, %v19589_v32  ;;  %v12406_v32 = vld [vmem:[%s19230_s16 + $0x19c] ss:$40 sps:$4 sm:$0xff]   ;;  %v12412_v24 = vld [vmem:[%s19230_s16 + $0x1ec] ss:$40 sps:$4 sm:$0xff]  }
 0x92e   :  { %v5831_v55 = vmul.f32 %v5829_v17, %v5811_v35  ;;  %v15365_v35 = vld [vmem:[%s19230_s16] ss:$40 sps:$4 sm:$0xff]   ;;  %v15370_v17 = vld [vmem:[%s19230_s16 + $0x54] ss:$40 sps:$4 sm:$0xff]  }
 0x930   :  { %v5833_v6 = vmul.f32 %v5831_v55, %v5805_v59  ;;  %v10842_v59 = vcombine.low %v5845_v26, %v5845_v26  ;;  %v15443_v26 = vld [vmem:[%s19230_s16 + $0x194] ss:$40 sps:$4 sm:$0xff]  }
 0x931   :  { %19591 = vst [vmem:[#allocation18_spill] sm:$0xff] %v15443_v26 }
 0x932   :  { %v5834_v50 = vsub.f32 %v5832_v12, %v5833_v6  ;;  %v5896_v34 = vsel %vm853_vm1, %v10842_v59, 0  ;;  %v12418_v12 = vld [vmem:[%s19230_s16 + $0x23c] ss:$40 sps:$4 sm:$0xff]   ;;  %v15383_v6 = vld [vmem:[%s19230_s16 + $0x50] ss:$40 sps:$4 sm:$0xff]  }
 0x933   :  { %v12448_v59 = vld [vmem:[%s19230_s16 + $0x3cc] ss:$40 sps:$4 sm:$0xff]  }
 0x934   :  { %v5839_v44 = vrot.slane %v5834_v50, %v19590_v14  ;;  %v15389_v50 = vld [vmem:[%s19230_s16 + $0xa4] ss:$40 sps:$4 sm:$0xff]  }
 0x936   :  { %v5841_v45 = vsel %vm1224_vm3, %v5831_v55, %v5839_v44  ;;  %v12415_v55 = vld [vmem:[%s19230_s16 + $0x1e8] ss:$40 sps:$4 sm:$0xff]   ;;  %v12424_v44 = vld [vmem:[%s19230_s16 + $0x28c] ss:$40 sps:$4 sm:$0xff]  }
 0x937   :  { %v5847_v1 = vpack.c.bf16 %v5841_v45, %v5841_v45  ;;  %v15407_v45 = vld [vmem:[%s19230_s16 + $0xf4] ss:$40 sps:$4 sm:$0xff]  }
 0x939   :  { %10847 = vmatmul.mubr.msk.bf16.vlgmr.msra.gmra.mrb[76].mxu0 %vm5873_vm7, %v5847_v1  ;;  %10855 = vmatmul.mubr.msk.bf16.vlgmr.msra.gmra.mrb[96].mxu1 %vm5873_vm7, %v5847_v1 }
 0x93a   :  { %5949 = vmatpush1.bf16.msra.mxu0 %v5884_v5  ;;  %5980 = vmatprep.mubr.bf16.mxu0 %v19549_v28  ;;  %v12430_v5 = vld [vmem:[%s19230_s16 + $0x2dc] ss:$40 sps:$4 sm:$0xff]  }
 0x93b   :  { %10850 = vmatprep.subr.msk.bf16.mxu0 %vm853_vm1, %v10841_v42  ;;  %7597 = vmatpush1.bf16.msra.mxu1 %v12379_v3  ;;  %v15419_v42 = vld [vmem:[%s19230_s16 + $0xf0] ss:$40 sps:$4 sm:$0xff]   ;;  %v15425_v3 = vld [vmem:[%s19230_s16 + $0x144] ss:$40 sps:$4 sm:$0xff]  }
 0x93c   :  { %7598 = vmatprep.subr.bf16.mxu1 %v12382_v47  ;;  %v12433_v47 = vld [vmem:[%s19230_s16 + $0x2d8] ss:$40 sps:$4 sm:$0xff]  }
 0x93f   :  { %7599 = vmatpush1.bf16.msra.mxu1 %v12385_v21  ;;  %v15437_v21 = vld [vmem:[%s19230_s16 + $0x140] ss:$40 sps:$4 sm:$0xff]  }
 0x940   :  { %7600 = vmatprep.subr.bf16.mxu1 %v12388_v15  ;;  %v12439_v15 = vld [vmem:[%s19230_s16 + $0x328] ss:$40 sps:$4 sm:$0xff]  }
 0x941   :  { %10849 = vmatmul.mubr.msk.bf16.vlgmr.msra.gmra.mrb[80].mxu0 %vm5873_vm7, %v5847_v1 }
 0x942   :  { %5990 = vmatpush1.bf16.msra.mxu0 %v5890_v52  ;;  %6021 = vmatprep.mubr.bf16.mxu0 %v19549_v28  ;;  %v12442_v52 = vld [vmem:[%s19230_s16 + $0x37c] ss:$40 sps:$4 sm:$0xff]  }
 0x943   :  { %10852 = vmatprep.subr.msk.bf16.mxu0 %vm853_vm1, %v10843_v41  ;;  %7601 = vmatpush1.bf16.msra.mxu1 %v12391_v18  ;;  %v15455_v41 = vld [vmem:[%s19230_s16 + $0x190] ss:$40 sps:$4 sm:$0xff]   ;;  %v15461_v18 = vld [vmem:[%s19230_s16 + $0x1e4] ss:$40 sps:$4 sm:$0xff]  }
 0x944   :  { %7602 = vmatprep.subr.bf16.mxu1 %v12394_v30  ;;  %19592 = vst [vmem:[#allocation9_spill] sm:$0xff] %v15455_v41  ;;  %19593 = vst [vmem:[#allocation10_spill] sm:$0xff] %v15461_v18  ;;  %v12445_v30 = vld [vmem:[%s19230_s16 + $0x378] ss:$40 sps:$4 sm:$0xff]  }
 0x947   :  { %7603 = vmatpush1.bf16.msra.mxu1 %v12397_v31  ;;  %v15473_v31 = vld [vmem:[%s19230_s16 + $0x1e0] ss:$40 sps:$4 sm:$0xff]  }
 0x948   :  { %7604 = vmatprep.subr.bf16.mxu1 %v12400_v19  ;;  %19594 = vst [vmem:[#allocation19_spill] sm:$0xff] %v15473_v31  ;;  %v15479_v19 = vld [vmem:[%s19230_s16 + $0x234] ss:$40 sps:$4 sm:$0xff]  }
 0x949   :  { %10851 = vmatmul.mubr.msk.bf16.vlgmr.msra.gmra.mrb[84].mxu0 %vm5873_vm7, %v5847_v1  ;;  %19595 = vst [vmem:[#allocation20_spill] sm:$0xff] %v15479_v19 }
 0x94a   :  { %6031 = vmatpush1.bf16.msra.mxu0 %v5896_v34  ;;  %6062 = vmatprep.mubr.bf16.mxu0 %v19549_v28  ;;  %v12451_v34 = vld [vmem:[%s19230_s16 + $0x3c8] ss:$40 sps:$4 sm:$0xff]  }
 0x94b   :  { %7494 = vmatprep.subr.bf16.mxu0 %v15345_v56  ;;  %7605 = vmatpush1.bf16.msra.mxu1 %v12403_v29  ;;  %v15488_v29 = vld [vmem:[%s19230_s16 + $0x230] ss:$40 sps:$4 sm:$0xff]  }
 0x94c   :  { %7606 = vmatprep.subr.bf16.mxu1 %v12406_v32  ;;  %19596 = vst [vmem:[#allocation11_spill] sm:$0xff] %v15488_v29  ;;  %v15494_v32 = vld [vmem:[%s19230_s16 + $0x284] ss:$40 sps:$4 sm:$0xff]  }
 0x94d   :  { %19597 = vst [vmem:[#allocation12_spill] sm:$0xff] %v15494_v32 }
 0x94f   :  { %7607 = vmatpush1.bf16.msra.mxu1 %v12409_v36  ;;  %v15500_v36 = vld [vmem:[%s19230_s16 + $0x280] ss:$40 sps:$4 sm:$0xff]  }
 0x950   :  { %7608 = vmatprep.subr.bf16.mxu1 %v12412_v24  ;;  %19598 = vst [vmem:[#allocation21_spill] sm:$0xff] %v15500_v36  ;;  %v15506_v24 = vld [vmem:[%s19230_s16 + $0x2d4] ss:$40 sps:$4 sm:$0xff]  }
 0x951   :  { %10853 = vmatmul.mubr.msk.bf16.vlgmr.msra.gmra.mrb[88].mxu0 %vm5873_vm7, %v5847_v1  ;;  %v12427_v1 = vld [vmem:[%s19230_s16 + $0x288] ss:$40 sps:$4 sm:$0xff]   ;;  %19599 = vst [vmem:[#allocation22_spill] sm:$0xff] %v15506_v24 }
 0x952   :  { %7495 = vmatpush1.bf16.msra.mxu0 %v15365_v35 }
 0x953   :  { %7496 = vmatprep.subr.bf16.mxu0 %v15370_v17  ;;  %7609 = vmatpush1.bf16.msra.mxu1 %v12415_v55  ;;  %v15512_v55 = vld [vmem:[%s19230_s16 + $0x2d0] ss:$40 sps:$4 sm:$0xff]  }
 0x954   :  { %7610 = vmatprep.subr.bf16.mxu1 %v12418_v12  ;;  %19600 = vst [vmem:[#allocation13_spill] sm:$0xff] %v15512_v55  ;;  %v15518_v12 = vld [vmem:[%s19230_s16 + $0x324] ss:$40 sps:$4 sm:$0xff]  }
 0x955   :  { %19601 = vst [vmem:[#allocation14_spill] sm:$0xff] %v15518_v12 }
 0x956   :  { %7497 = vmatpush1.bf16.msra.mxu0 %v15383_v6 }
 0x957   :  { %7498 = vmatprep.subr.bf16.mxu0 %v15389_v50  ;;  %7611 = vmatpush1.bf16.msra.mxu1 %v12421_v63  ;;  %v15524_v63 = vld [vmem:[%s19230_s16 + $0x320] ss:$40 sps:$4 sm:$0xff]  }
 0x958   :  { %7612 = vmatprep.subr.bf16.mxu1 %v12424_v44  ;;  %19602 = vst [vmem:[#allocation23_spill] sm:$0xff] %v15524_v63  ;;  %v15530_v44 = vld [vmem:[%s19230_s16 + $0x374] ss:$40 sps:$4 sm:$0xff]  }
 0x959   :  { %19603 = vst [vmem:[#allocation24_spill] sm:$0xff] %v15530_v44 }
 0x95a   :  { %7499 = vmatpush1.bf16.msra.mxu0 %v15401_v43 }
 0x95b   :  { %7500 = vmatprep.subr.bf16.mxu0 %v15407_v45  ;;  %7613 = vmatpush1.bf16.msra.mxu1 %v12427_v1  ;;  %v15536_v1 = vld [vmem:[%s19230_s16 + $0x370] ss:$40 sps:$4 sm:$0xff]  }
 0x95c   :  { %7614 = vmatprep.subr.bf16.mxu1 %v12430_v5  ;;  %19604 = vst [vmem:[#allocation15_spill] sm:$0xff] %v15536_v1  ;;  %v15542_v5 = vld [vmem:[%s19230_s16 + $0x3c4] ss:$40 sps:$4 sm:$0xff]  }
 0x95d   :  { %19605 = vst [vmem:[#allocation16_spill] sm:$0xff] %v15542_v5 }
 0x95e   :  { %7501 = vmatpush1.bf16.msra.mxu0 %v15419_v42 }
 0x95f   :  { %7502 = vmatprep.subr.bf16.mxu0 %v15425_v3  ;;  %7615 = vmatpush1.bf16.msra.mxu1 %v12433_v47  ;;  %v15548_v47 = vld [vmem:[%s19230_s16 + $0x3c0] ss:$40 sps:$4 sm:$0xff]  }
 0x960   :  { %7616 = vmatprep.subr.bf16.mxu1 %v12436_v27  ;;  %19606 = vst [vmem:[#allocation25_spill] sm:$0xff] %v15548_v47  ;;  %v15555_v27 = vld [vmem:[%s19230_s16 + $0x414] ss:$40 sps:$4 sm:$0xff]  }
 0x961   :  { %19607 = vst [vmem:[#allocation26_spill] sm:$0xff] %v15555_v27 }
 0x962   :  { %7503 = vmatpush1.bf16.msra.mxu0 %v15437_v21 }
 0x963   :  { %7504 = vmatprep.subr.bf16.mxu0 %v15443_v26  ;;  %7617 = vmatpush1.bf16.msra.mxu1 %v12439_v15  ;;  %v12454_v15 = vld [vmem:[%s19230_s16 + $0x41c] ss:$40 sps:$4 sm:$0xff]  }
 0x964   :  { %7618 = vmatprep.subr.bf16.mxu1 %v12442_v52  ;;  %v15564_v52 = vld [vmem:[%s19230_s16 + $0x410] ss:$40 sps:$4 sm:$0xff]  }
 0x965   :  { %19608 = vst [vmem:[#allocation17_spill] sm:$0xff] %v15564_v52 }
 0x966   :  { %7505 = vmatpush1.bf16.msra.mxu0 %v15455_v41 }
 0x967   :  { %7506 = vmatprep.subr.bf16.mxu0 %v15461_v18  ;;  %7619 = vmatpush1.bf16.msra.mxu1 %v12445_v30  ;;  %v12457_v30 = vld [vmem:[%s19230_s16 + $0x418] ss:$40 sps:$4 sm:$0xff]  }
 0x968   :  { %7620 = vmatprep.subr.bf16.mxu1 %v12448_v59  ;;  %v15573_v59 = vld [vmem:[%s19230_s16 + $0x464] ss:$40 sps:$4 sm:$0xff]  }
 0x969   :  { %19609 = vst [vmem:[#allocation34_spill] sm:$0xff] %v15573_v59 }
 0x96a   :  { %7507 = vmatpush1.bf16.msra.mxu0 %v15473_v31 }
 0x96b   :  { %7508 = vmatprep.subr.bf16.mxu0 %v15479_v19  ;;  %7621 = vmatpush1.bf16.msra.mxu1 %v12451_v34  ;;  %v12460_v34 = vld [vmem:[%s19230_s16 + $0x46c] ss:$40 sps:$4 sm:$0xff]  }
 0x96c   :  { %7622 = vmatprep.subr.bf16.mxu1 %v12454_v15  ;;  %v15581_v15 = vld [vmem:[%s19230_s16 + $0x460] ss:$40 sps:$4 sm:$0xff]  }
 0x96d   :  { %19610 = vst [vmem:[#allocation27_spill] sm:$0xff] %v15581_v15 }
 0x96e   :  { %7509 = vmatpush1.bf16.msra.mxu0 %v15488_v29 }
 0x96f   :  { %7510 = vmatprep.subr.bf16.mxu0 %v15494_v32  ;;  %7623 = vmatpush1.bf16.msra.mxu1 %v12457_v30  ;;  %v15591_v30 = vld [vmem:[%s19230_s16 + $0x4b4] ss:$40 sps:$4 sm:$0xff]  }
 0x970   :  { %7624 = vmatprep.subr.bf16.mxu1 %v12460_v34  ;;  %19611 = vst [vmem:[#allocation28_spill] sm:$0xff] %v15591_v30  ;;  %v12469_v34 = vld [vmem:[%s19230_s16 + $0x4b8] ss:$40 sps:$4 sm:$0xff]  }
 0x972   :  { %7511 = vmatpush1.bf16.msra.mxu0 %v15500_v36 }
 0x973   :  { %7512 = vmatprep.subr.bf16.mxu0 %v15506_v24 }
 0x976   :  { %7513 = vmatpush1.bf16.msra.mxu0 %v15512_v55 }
 0x977   :  { %7514 = vmatprep.subr.bf16.mxu0 %v15518_v12 }
 0x97a   :  { %7515 = vmatpush1.bf16.msra.mxu0 %v15524_v63 }
 0x97b   :  { %7516 = vmatprep.subr.bf16.mxu0 %v15530_v44 }
 0x97e   :  { %7517 = vmatpush1.bf16.msra.mxu0 %v15536_v1  ;;  %v19614_v1 = vld [vmem:[#allocation8_spill] sm:$0xff] }
 0x97f   :  { %7518 = vmatprep.subr.bf16.mxu0 %v15542_v5 }
 0x982   :  { %7519 = vmatpush1.bf16.msra.mxu0 %v15548_v47  ;;  %v15599_v47 = vld [vmem:[%s19230_s16 + $0x4b0] ss:$40 sps:$4 sm:$0xff]  }
 0x983   :  { %7520 = vmatprep.subr.bf16.mxu0 %v15555_v27  ;;  %v12463_v27 = vld [vmem:[%s19230_s16 + $0x468] ss:$40 sps:$4 sm:$0xff]   ;;  %19612 = vst [vmem:[#allocation35_spill] sm:$0xff] %v15599_v47 }
 0x984   :  { %7625 = vmatpush1.bf16.msra.mxu1 %v12463_v27  ;;  %v15609_v27 = vld [vmem:[%s19230_s16 + $0x504] ss:$40 sps:$4 sm:$0xff]  }
 0x985   :  { %19613 = vst [vmem:[#allocation38_spill] sm:$0xff] %v15609_v27 }
 0x986   :  { %7521 = vmatpush1.bf16.msra.mxu0 %v15564_v52  ;;  %v12466_v52 = vld [vmem:[%s19230_s16 + $0x4bc] ss:$40 sps:$4 sm:$0xff]  }
 0x987   :  { %7522 = vmatprep.subr.bf16.mxu0 %v15573_v59  ;;  %7626 = vmatprep.subr.bf16.mxu1 %v12466_v52 }
 0x988   :  { %7627 = vmatpush1.bf16.msra.mxu1 %v12469_v34 }
 0x98a   :  { %7523 = vmatpush1.bf16.msra.mxu0 %v15581_v15  ;;  %v12472_v15 = vld [vmem:[%s19230_s16 + $0x50c] ss:$40 sps:$4 sm:$0xff]  }
 0x98b   :  { %7524 = vmatprep.subr.bf16.mxu0 %v15591_v30  ;;  %7647 = vmatprep.subr.bf16.mxu1 %v12472_v15 }
 0x98e   :  { %7525 = vmatpush1.bf16.msra.mxu0 %v15599_v47 }
 0x98f   :  { %7545 = vmatprep.subr.bf16.mxu0 %v15609_v27 }
 0xa0c   :  { %v5941_v59 = vpop.f32.mrb[76].mxu0  ;;  %v6105_v5 = vpop.f32.mrb[96].mxu1 }
 0xa0d   :  { %v6115_v30 = vrot.slane %v5941_v59, %v19590_v14  ;;  %v6147_v52 = vrot.slane %v6105_v5, %v19590_v14  ;;  %v5943_v47 = vpop.f32.mrb[77].mxu0  ;;  %v15617_v34 = vpop.f32.mrb[97].mxu1  ;;  %v6185_v44 = vrot.slane %v5941_v59, %v19614_v1  ;;  %v15621_v63 = vrot.slane %v6105_v5, %v19614_v1 }
 0xa0e   :  { %v6119_v12 = vrot.slane %v5943_v47, %v19590_v14  ;;  %v6189_v55 = vrot.slane %v5943_v47, %v19614_v1  ;;  %v5945_v27 = vpop.f32.mrb[78].mxu0  ;;  %v6109_v15 = vpop.f32.mrb[98].mxu1 }
 0xa0f   :  { %v6152_v24 = vmul.f32 %v6115_v30, %v14959_v46  ;;  %v6162_v36 = vmul.f32 %v6115_v30, %v14969_v60  ;;  %v6172_v32 = vmul.f32 %v6115_v30, %v14999_v8  ;;  %v6160_v29 = vmul.f32 %v6147_v52, %v15140_v33  ;;  %v5946_v19 = vpop.f32.mrb[79].mxu0  ;;  %v6110_v31 = vpop.f32.mrb[99].mxu1 }
 0xa10   :  { %v6170_v59 = vmul.f32 %v6147_v52, %v15164_v2  ;;  %v15631_v5 = vmul.f32 %v6147_v52, %v15190_v61  ;;  %v6153_v18 = vmul.f32 %v6119_v12, %v14963_v37  ;;  %v6163_v47 = vmul.f32 %v6119_v12, %v14981_v39 }
 0xa11   :  { %v6222_v27 = vadd.f32 %v6185_v44, %v6152_v24  ;;  %v6232_v15 = vadd.f32 %v6185_v44, %v6162_v36  ;;  %v6242_v46 = vadd.f32 %v6185_v44, %v6172_v32  ;;  %v6230_v60 = vadd.f32 %v15621_v63, %v6160_v29 }
 0xa12   :  { %v6240_v8 = vadd.f32 %v15621_v63, %v6170_v59  ;;  %v6173_v33 = vmul.f32 %v6119_v12, %v15006_v62  ;;  %v6223_v19 = vadd.f32 %v6189_v55, %v6153_v18  ;;  %v6233_v31 = vadd.f32 %v6189_v55, %v6163_v47  ;;  %v15646_v62 = vld [vmem:[%s19230_s16 + $0x500] ss:$40 sps:$4 sm:$0xff]  }
 0xa13   :  { %v6252_v30 = vmax.f32 %v6222_v27, 0.0  ;;  %v6262_v2 = vmax.f32 %v6232_v15, 0.0  ;;  %v6272_v24 = vmax.f32 %v6242_v46, 0.0  ;;  %v6260_v47 = vmax.f32 %v6230_v60, 0.0 }
 0xa14   :  { %v6243_v41 = vadd.f32 %v6189_v55, %v6173_v33  ;;  %v6253_v61 = vmax.f32 %v6223_v19, 0.0  ;;  %v6263_v52 = vmax.f32 %v6233_v31, 0.0  ;;  %v5982_v26 = vpop.f32.mrb[80].mxu0 }
 0xa15   :  { %v15638_v37 = vpack.c.bf16 %v6262_v2, %v6252_v30  ;;  %v5984_v39 = vpop.f32.mrb[81].mxu0  ;;  %v6123_v29 = vrot.slane %v5982_v26, %v19590_v14  ;;  %v6193_v18 = vrot.slane %v5982_v26, %v19614_v1  ;;  %v15663_v26 = vld [vmem:[%s19230_s16 + $0x554] ss:$40 sps:$4 sm:$0xff]  }
 0xa16   :  { %v6273_v36 = vmax.f32 %v6243_v41, 0.0  ;;  %v15640_v32 = vpack.c.bf16 %v6263_v52, %v6253_v61  ;;  %v5986_v44 = vpop.f32.mrb[82].mxu0  ;;  %v6127_v55 = vrot.slane %v5984_v39, %v19590_v14  ;;  %v6197_v12 = vrot.slane %v5984_v39, %v19614_v1  ;;  %v12475_v41 = vld [vmem:[%s19230_s16 + $0x508] ss:$40 sps:$4 sm:$0xff]   ;;  %v15689_v61 = vld [vmem:[%s19230_s16 + $0x5a4] ss:$40 sps:$4 sm:$0xff]  }
 0xa17   :  { %v5987_v59 = vpop.f32.mrb[83].mxu0  ;;  %v6154_v15 = vmul.f32 %v6123_v29, %v14961_v10  ;;  %v6164_v46 = vmul.f32 %v6123_v29, %v14979_v38  ;;  %v6174_v33 = vmul.f32 %v6123_v29, %v15004_v7  ;;  %v12478_v10 = vld [vmem:[%s19230_s16 + $0x55c] ss:$40 sps:$4 sm:$0xff]   ;;  %v6270_v38 = vmax.f32 %v6240_v8, 0.0  ;;  %v12481_v8 = vld [vmem:[%s19230_s16 + $0x558] ss:$40 sps:$4 sm:$0xff]  }
 0xa18   :  { %v15654_v27 = vpack.c.bf16 %v6273_v36, %v6273_v36  ;;  %7526 = vmatprep.mubr.bf16.mxu0 %v15640_v32  ;;  %v6155_v19 = vmul.f32 %v6127_v55, %v14967_v13  ;;  %v6165_v31 = vmul.f32 %v6127_v55, %v14991_v49  ;;  %v6175_v60 = vmul.f32 %v6127_v55, %v15014_v23  ;;  %v15680_v13 = vld [vmem:[%s19230_s16 + $0x550] ss:$40 sps:$4 sm:$0xff]  }
 0xa19   :  { %7628 = vmatprep.mubr.bf16.mxu1 %v15640_v32  ;;  %7527 = vmatmul.mubr.bf16.vlgmr.msra.gmra.mrb[92].mxu0 %v15638_v37  ;;  %v6224_v7 = vadd.f32 %v6193_v18, %v6154_v15  ;;  %v6234_v30 = vadd.f32 %v6193_v18, %v6164_v46  ;;  %v15673_v2 = vadd.f32 %v6193_v18, %v6174_v33  ;;  %v12484_v18 = vld [vmem:[%s19230_s16 + $0x5ac] ss:$40 sps:$4 sm:$0xff]  }
 0xa1a   :  { %7546 = vmatpush1.bf16.msra.mxu0 %v15646_v62  ;;  %7629 = vmatmul.mubr.bf16.vlgmr.msra.gmra.mrb[100].mxu1 %v15638_v37  ;;  %v6225_v49 = vadd.f32 %v6197_v12, %v6155_v19  ;;  %v6235_v23 = vadd.f32 %v6197_v12, %v6165_v31  ;;  %v15691_v52 = vadd.f32 %v6197_v12, %v6175_v60 }
 0xa1b   :  { %7648 = vmatpush1.bf16.msra.mxu1 %v12475_v41  ;;  %7536 = vmatprep.mubr.bf16.mxu0 %v15654_v27  ;;  %v6151_v39 = vrot.slane %v15617_v34, %v19590_v14  ;;  %v6254_v36 = vmax.f32 %v6224_v7, 0.0  ;;  %v6264_v29 = vmax.f32 %v6234_v30, 0.0  ;;  %v15700_v55 = vpack.c.bf16 %v6270_v38, %v6260_v47 }
 0xa1c   :  { %7638 = vmatprep.mubr.bf16.mxu1 %v15654_v27  ;;  %v6023_v44 = vpop.f32.mrb[84].mxu0  ;;  %7547 = vmatprep.subr.bf16.mxu0 %v15663_v26  ;;  %v15702_v59 = vpack.c.bf16 %v6272_v24, %v6272_v24  ;;  %v6255_v15 = vmax.f32 %v6225_v49, 0.0  ;;  %v6265_v46 = vmax.f32 %v6235_v23, 0.0  ;;  %v15714_v24 = vld [vmem:[%s19230_s16 + $0x5a0] ss:$40 sps:$4 sm:$0xff]  }
 0xa1d   :  { %v6131_v12 = vrot.slane %v6023_v44, %v19590_v14  ;;  %7649 = vmatprep.subr.bf16.mxu1 %v12478_v10  ;;  %v6025_v41 = vpop.f32.mrb[85].mxu0  ;;  %v15705_v33 = vpack.c.bf16 %v6264_v29, %v6254_v36  ;;  %v6201_v19 = vrot.slane %v6023_v44, %v19614_v1  ;;  %v15723_v49 = vld [vmem:[%s19230_s16 + $0x5f4] ss:$40 sps:$4 sm:$0xff]  }
 0xa1e   :  { %v6135_v31 = vrot.slane %v6025_v41, %v19590_v14  ;;  %v6205_v60 = vrot.slane %v6025_v41, %v19614_v1  ;;  %7548 = vmatpush1.bf16.msra.mxu0 %v15680_v13  ;;  %v6027_v47 = vpop.f32.mrb[86].mxu0  ;;  %v12490_v44 = vld [vmem:[%s19230_s16 + $0x5fc] ss:$40 sps:$4 sm:$0xff]  }
 0xa1f   :  { %v6156_v10 = vmul.f32 %v6131_v12, %v15052_v40  ;;  %v6166_v38 = vmul.f32 %v6131_v12, %v15063_v4  ;;  %v6176_v7 = vmul.f32 %v6131_v12, %v15081_v57  ;;  %7650 = vmatpush1.bf16.msra.mxu1 %v12481_v8  ;;  %v6028_v30 = vpop.f32.mrb[87].mxu0  ;;  %7549 = vmatprep.subr.bf16.mxu0 %v15689_v61  ;;  %v12487_v4 = vld [vmem:[%s19230_s16 + $0x5a8] ss:$40 sps:$4 sm:$0xff]  }
 0xa20   :  { %v6157_v23 = vmul.f32 %v6135_v31, %v15134_v9  ;;  %v6167_v36 = vmul.f32 %v6135_v31, %v15150_v20  ;;  %v6177_v29 = vmul.f32 %v6135_v31, %v15174_v58  ;;  %7651 = vmatprep.subr.bf16.mxu1 %v12484_v18  ;;  %v8004_v40 = vpack.c.bf16 %v6265_v46, %v6255_v15  ;;  %v15748_v18 = vld [vmem:[%s19230_s16 + $0x5f0] ss:$40 sps:$4 sm:$0xff]  }
 0xa21   :  { %v6226_v57 = vadd.f32 %v6201_v19, %v6156_v10  ;;  %v6236_v8 = vadd.f32 %v6201_v19, %v6166_v38  ;;  %7537 = vmatmul.mubr.bf16.gmra.mrb[96].mxu0 %v15702_v59  ;;  %v6246_v12 = vadd.f32 %v6201_v19, %v6176_v7  ;;  %v15741_v58 = vrot.slane %v15617_v34, %v19614_v1  ;;  %v12493_v15 = vld [vmem:[%s19230_s16 + $0x5f8] ss:$40 sps:$4 sm:$0xff]   ;;  %v15759_v38 = vld [vmem:[%s19230_s16 + $0x14] ss:$40 sps:$4 sm:$0xff]  }
 0xa22   :  { %v6227_v9 = vadd.f32 %v6205_v60, %v6157_v23  ;;  %v6237_v41 = vadd.f32 %v6205_v60, %v6167_v36  ;;  %v15735_v20 = vadd.f32 %v6205_v60, %v6177_v29  ;;  %8016 = vrot.lane.b32.xlu0 %v8004_v40, %s13073_s8  ;;  %7550 = vmatpush1.bf16.msra.mxu0 %v15714_v24 }
 0xa23   :  { %7639 = vmatmul.mubr.bf16.gmra.mrb[104].mxu1 %v15702_v59  ;;  %7551 = vmatprep.subr.bf16.mxu0 %v15723_v49  ;;  %v6256_v46 = vmax.f32 %v6226_v57, 0.0  ;;  %v6266_v19 = vmax.f32 %v6236_v8, 0.0  ;;  %v6161_v31 = vmul.f32 %v6151_v39, %v15228_v51  ;;  %v6171_v34 = vmul.f32 %v6151_v39, %v15230_v0  ;;  %v12496_v0 = vld [vmem:[%s19230_s16 + $0x1c] ss:$40 sps:$4 sm:$0xff]  }
 0xa24   :  { %19615 = vst [vmem:[#allocation29_spill] sm:$0xff] %v15735_v20  ;;  %v6257_v60 = vmax.f32 %v6227_v9, 0.0  ;;  %v6267_v47 = vmax.f32 %v6237_v41, 0.0  ;;  %7652 = vmatpush1.bf16.msra.mxu1 %v12487_v4  ;;  %v6064_v10 = vpop.f32.mrb[88].mxu0  ;;  %7577 = vmatprep.mubr.bf16.mxu0 %v19549_v28  ;;  %v6181_v7 = vmul.f32 %v6151_v39, %v15251_v16  ;;  %v6276_v36 = vmax.f32 %v6246_v12, 0.0 }
 0xa25   :  { %7653 = vmatprep.subr.bf16.mxu1 %v12490_v44  ;;  %v6139_v30 = vrot.slane %v6064_v10, %v19590_v14  ;;  %v6066_v23 = vpop.f32.mrb[89].mxu0  ;;  %v8005_v51 = vpack.c.bf16 %v6266_v19, %v6256_v46  ;;  %7679 = vmatprep.mubr.bf16.mxu1 %v19549_v28  ;;  %v6209_v40 = vrot.slane %v6064_v10, %v19614_v1  ;;  %v6275_v9 = vmax.f32 %v15691_v52, 0.0  ;;  %v16042_v20 = vld [vmem:[%s19230_s16 + $0x2e0] ss:$40 sps:$4 sm:$0xff]  }
 0xa26   :  { %v15767_v29 = vpack.c.bf16 %v6267_v47, %v6257_v60  ;;  %8014 = vrot.lane.b32.xlu0 %v15705_v33, %s13073_s8  ;;  %v6143_v16 = vrot.slane %v6066_v23, %v19590_v14  ;;  %v6213_v39 = vrot.slane %v6066_v23, %v19614_v1  ;;  %v6068_v4 = vpop.f32.mrb[90].mxu0  ;;  %7552 = vmatpush1.bf16.msra.mxu0 %v15748_v18  ;;  %v15807_v47 = vld [vmem:[%s19230_s16 + $0x6c] ss:$40 sps:$4 sm:$0xff]  }
 0xa27   :  { %v6158_v57 = vmul.f32 %v6139_v30, %v15138_v22  ;;  %v6168_v8 = vmul.f32 %v6139_v30, %v15162_v25  ;;  %v6178_v44 = vmul.f32 %v6139_v30, %v15188_v53  ;;  %8018 = vrot.lane.b32.xlu1 %v8005_v51, %s13073_s8  ;;  %v6069_v12 = vpop.f32.mrb[91].mxu0  ;;  %7698 = vmatprep.subr.bf16.mxu0 %v15759_v38  ;;  %v15787_v22 = vld [vmem:[%s19230_s16 + $0x10] ss:$40 sps:$4 sm:$0xff]   ;;  %v15844_v4 = vld [vmem:[%s19230_s16 + $0xbc] ss:$40 sps:$4 sm:$0xff]  }
 0xa28   :  { %19616 = vst [vmem:[#allocation30_spill] sm:$0xff] %v15767_v29  ;;  %v6159_v41 = vmul.f32 %v6143_v16, %v15136_v11  ;;  %v6169_v14 = vmul.f32 %v6143_v16, %v15152_v54  ;;  %v6179_v1 = vmul.f32 %v6143_v16, %v15176_v48  ;;  %7654 = vmatpush1.bf16.msra.mxu1 %v12493_v15  ;;  %v12499_v25 = vld [vmem:[%s19230_s16 + $0x18] ss:$40 sps:$4 sm:$0xff]   ;;  %v15797_v54 = vld [vmem:[%s19230_s16 + $0x64] ss:$40 sps:$4 sm:$0xff]   ;;  %v6274_v48 = vmax.f32 %v15673_v2, 0.0 }
 0xa29   :  { %v6228_v53 = vadd.f32 %v6209_v40, %v6158_v57  ;;  %v6238_v52 = vadd.f32 %v6209_v40, %v6168_v8  ;;  %v15792_v46 = vadd.f32 %v6209_v40, %v6178_v44  ;;  %7800 = vmatprep.subr.bf16.mxu1 %v12496_v0  ;;  %v8007_v11 = vpack.c.bf16 %v6276_v36, %v6276_v36  ;;  %v15820_v16 = vld [vmem:[%s19230_s16 + $0x60] ss:$40 sps:$4 sm:$0xff]   ;;  %v15872_v12 = vld [vmem:[%s19230_s16 + $0x104] ss:$40 sps:$4 sm:$0xff]  }
 0xa2a   :  { %v6229_v15 = vadd.f32 %v6213_v39, %v6159_v41  ;;  %v6239_v19 = vadd.f32 %v6213_v39, %v6169_v14  ;;  %v15800_v60 = vadd.f32 %v6213_v39, %v6179_v1  ;;  %11056 = vmatmul.mubr.msk.bf16.vlgmr.msra.gmra.mrb[92].mxu0 %vm1176_vm2, %v15705_v33  ;;  %19618 = vst [vmem:[#allocation42_spill] sm:$0xff] %v15807_v47  ;;  %v15825_v39 = vld [vmem:[%s19230_s16 + $0x68] ss:$40 sps:$4 sm:$0xff]   ;;  %19622 = vst [vmem:[#allocation46_spill] sm:$0xff] %v15844_v4 }
 0xa2b   :  { %19617 = vst [vmem:[#allocation39_spill] sm:$0xff] %v15792_v46  ;;  %v6258_v10 = vmax.f32 %v6228_v53, 0.0  ;;  %v6268_v30 = vmax.f32 %v6238_v52, 0.0  ;;  %8024 = vrot.lane.b32.xlu0 %v8007_v11, %s13073_s8  ;;  %11058 = vmatmul.mubr.msk.bf16.vlgmr.msra.gmra.mrb[100].mxu1 %vm1176_vm2, %v15705_v33  ;;  %v8006_v2 = vpack.c.bf16 %v6275_v9, %v6275_v9  ;;  %v6250_v23 = vadd.f32 %v15621_v63, %v15631_v5  ;;  %v15834_v5 = vld [vmem:[%s19230_s16 + $0xb4] ss:$40 sps:$4 sm:$0xff]  }
 0xa2c   :  { %v6231_v51 = vadd.f32 %v15741_v58, %v6161_v31  ;;  %v6241_v0 = vadd.f32 %v15741_v58, %v6171_v34  ;;  %v6259_v36 = vmax.f32 %v6229_v15, 0.0  ;;  %v6269_v40 = vmax.f32 %v6239_v19, 0.0  ;;  %7699 = vmatpush1.bf16.msra.mxu0 %v15787_v22  ;;  %7801 = vmatpush1.bf16.msra.mxu1 %v12499_v25  ;;  %19619 = vst [vmem:[#allocation31_spill] sm:$0xff] %v15825_v39  ;;  %v15881_v9 = vld [vmem:[%s19230_s16 + $0x10c] ss:$40 sps:$4 sm:$0xff]  }
 0xa2d   :  { %v15827_v63 = vpack.c.bf16 %v6268_v30, %v6258_v10  ;;  %8022 = vrot.lane.b32.xlu1 %v8006_v2, %s13073_s8  ;;  %7700 = vmatprep.subr.bf16.mxu0 %v15797_v54  ;;  %v6251_v31 = vadd.f32 %v15741_v58, %v6181_v7  ;;  %v15846_v57 = vpack.c.bf16 %v6274_v48, %v6274_v48  ;;  %v15856_v58 = vld [vmem:[%s19230_s16 + $0xb0] ss:$40 sps:$4 sm:$0xff]   ;;  %v15888_v14 = vld [vmem:[%s19230_s16 + $0x100] ss:$40 sps:$4 sm:$0xff]   ;;  %v6280_v25 = vmax.f32 %v6250_v23, 0.0 }
 0xa2e   :  { %v15837_v34 = vpack.c.bf16 %v6269_v40, %v6259_v36  ;;  %7802 = vmatprep.subr.bf16.mxu1 %v15807_v47  ;;  %7587 = vmatprep.mubr.bf16.mxu0 %v19549_v28  ;;  %v15861_v7 = vld [vmem:[%s19230_s16 + $0xb8] ss:$40 sps:$4 sm:$0xff]   ;;  %v6261_v8 = vmax.f32 %v6231_v51, 0.0  ;;  %v6271_v44 = vmax.f32 %v6241_v0, 0.0  ;;  %19624 = vst [vmem:[#allocation36_spill] sm:$0xff] %v15881_v9  ;;  %v6279_v48 = vmax.f32 %v15800_v60, 0.0 }
 0xa2f   :  { %19620 = vst [vmem:[#allocation32_spill] sm:$0xff] %v15827_v63  ;;  %9084 = vrot.lane.b32.xlu0 %v15700_v55, %s13073_s8  ;;  %7689 = vmatprep.mubr.bf16.mxu1 %v19549_v28  ;;  %19623 = vst [vmem:[#allocation33_spill] sm:$0xff] %v15861_v7  ;;  %v6281_v55 = vmax.f32 %v6251_v31, 0.0  ;;  %v15893_v1 = vld [vmem:[%s19230_s16 + $0x108] ss:$40 sps:$4 sm:$0xff]   ;;  %v9074_v15 = vpack.c.bf16 %v6280_v25, %v6280_v25 }
 0xa30   :  { %19621 = vst [vmem:[#allocation43_spill] sm:$0xff] %v15837_v34  ;;  %7701 = vmatpush1.bf16.msra.mxu0 %v15820_v16  ;;  %7803 = vmatpush1.bf16.msra.mxu1 %v15825_v39  ;;  %v9073_v41 = vpack.c.bf16 %v6271_v44, %v6261_v8  ;;  %19625 = vst [vmem:[#allocation37_spill] sm:$0xff] %v15893_v1  ;;  %v15900_v52 = vld [vmem:[%s19230_s16 + $0x154] ss:$40 sps:$4 sm:$0xff]   ;;  %v15917_v19 = vld [vmem:[%s19230_s16 + $0x150] ss:$40 sps:$4 sm:$0xff]   ;;  %v15937_v2 = vpack.c.bf16 %v6279_v48, %v6279_v48 }
 0xa31   :  { %8020 = vrot.lane.b32.xlu1 %v15846_v57, %s13073_s8  ;;  %7702 = vmatprep.subr.bf16.mxu0 %v15834_v5  ;;  %v9075_v53 = vpack.c.bf16 %v6281_v55, %v6281_v55  ;;  %v15905_v11 = vld [vmem:[%s19230_s16 + $0x15c] ss:$40 sps:$4 sm:$0xff]   ;;  %v15922_v10 = vld [vmem:[%s19230_s16 + $0x158] ss:$40 sps:$4 sm:$0xff]   ;;  %v15934_v30 = vld [vmem:[%s19230_s16 + $0x1ac] ss:$40 sps:$4 sm:$0xff]  }
 0xa32   :  { %7804 = vmatprep.subr.bf16.mxu1 %v15844_v4  ;;  %11057 = vmatmul.mubr.msk.bf16.gmra.mrb[96].mxu0 %vm1176_vm2, %v15846_v57  ;;  %19626 = vst [vmem:[#allocation40_spill] sm:$0xff] %v15905_v11  ;;  %19627 = vst [vmem:[#allocation41_spill] sm:$0xff] %v15922_v10  ;;  %v15929_v60 = vld [vmem:[%s19230_s16 + $0x1a4] ss:$40 sps:$4 sm:$0xff]   ;;  %v15944_v23 = vld [vmem:[%s19230_s16 + $0x1a0] ss:$40 sps:$4 sm:$0xff]  }
 0xa33   :  { %9082 = vrot.lane.b32.xlu0 %v15837_v34, %s13073_s8  ;;  %11059 = vmatmul.mubr.msk.bf16.gmra.mrb[108].mxu1 %vm1176_vm2, %v15846_v57  ;;  %19628 = vst [vmem:[#allocation44_spill] sm:$0xff] %v15934_v30  ;;  %19629 = vst [vmem:[#allocation45_spill] sm:$0xff] %v15937_v2  ;;  %v15949_v51 = vld [vmem:[%s19230_s16 + $0x1a8] ss:$40 sps:$4 sm:$0xff]   ;;  %v15956_v0 = vld [vmem:[%s19230_s16 + $0x1f4] ss:$40 sps:$4 sm:$0xff]  }
 0xa34   :  { %7703 = vmatpush1.bf16.msra.mxu0 %v15856_v58  ;;  %7805 = vmatpush1.bf16.msra.mxu1 %v15861_v7  ;;  %19630 = vst [vmem:[#allocation47_spill] sm:$0xff] %v15949_v51  ;;  %v15961_v36 = vld [vmem:[%s19230_s16 + $0x1fc] ss:$40 sps:$4 sm:$0xff]   ;;  %v15970_v40 = vld [vmem:[%s19230_s16 + $0x1f0] ss:$40 sps:$4 sm:$0xff]  }
 0xa35   :  { %7730 = vmatprep.mubr.bf16.mxu0 %v15640_v32  ;;  %7832 = vmatprep.mubr.bf16.mxu1 %v15640_v32  ;;  %19631 = vst [vmem:[#allocation6_spill] sm:$0xff] %v15961_v36  ;;  %v15975_v31 = vld [vmem:[%s19230_s16 + $0x1f8] ss:$40 sps:$4 sm:$0xff]   ;;  %v15982_v8 = vld [vmem:[%s19230_s16 + $0x244] ss:$40 sps:$4 sm:$0xff]  }
 0xa36   :  { %9086 = vrot.lane.b32.xlu1 %v9073_v41, %s13073_s8  ;;  %7704 = vmatprep.subr.bf16.mxu0 %v15872_v12  ;;  %19632 = vst [vmem:[#allocation7_spill] sm:$0xff] %v15975_v31  ;;  %v15987_v44 = vld [vmem:[%s19230_s16 + $0x24c] ss:$40 sps:$4 sm:$0xff]   ;;  %v15994_v55 = vld [vmem:[%s19230_s16 + $0x240] ss:$40 sps:$4 sm:$0xff]  }
 0xa37   :  { %7806 = vmatprep.subr.bf16.mxu1 %v15881_v9  ;;  %9092 = vrot.lane.b32.xlu0 %v9075_v53, %s13073_s8  ;;  %19633 = vst [vmem:[#allocation8_spill] sm:$0xff] %v15987_v44  ;;  %v15999_v41 = vld [vmem:[%s19230_s16 + $0x248] ss:$40 sps:$4 sm:$0xff]   ;;  %v16006_v25 = vld [vmem:[%s19230_s16 + $0x294] ss:$40 sps:$4 sm:$0xff]  }
 0xa38   :  { %7705 = vmatpush1.bf16.msra.mxu0 %v15888_v14  ;;  %7807 = vmatpush1.bf16.msra.mxu1 %v15893_v1  ;;  %19634 = vst [vmem:[#allocation48_spill] sm:$0xff] %v15999_v41  ;;  %v16011_v53 = vld [vmem:[%s19230_s16 + $0x29c] ss:$40 sps:$4 sm:$0xff]   ;;  %v16018_v48 = vld [vmem:[%s19230_s16 + $0x290] ss:$40 sps:$4 sm:$0xff]  }
 0xa39   :  { %7706 = vmatprep.subr.bf16.mxu0 %v15900_v52  ;;  %7808 = vmatprep.subr.bf16.mxu1 %v15905_v11  ;;  %19635 = vst [vmem:[#allocation49_spill] sm:$0xff] %v16011_v53  ;;  %v16035_v34 = vld [vmem:[%s19230_s16 + $0x2ec] ss:$40 sps:$4 sm:$0xff]   ;;  %v16047_v29 = vld [vmem:[%s19230_s16 + $0x2e8] ss:$40 sps:$4 sm:$0xff]  }
 0xa3a   :  { %9090 = vrot.lane.b32.xlu1 %v9074_v15, %s13073_s8  ;;  %v16023_v15 = vld [vmem:[%s19230_s16 + $0x298] ss:$40 sps:$4 sm:$0xff]   ;;  %19637 = vst [vmem:[#allocation51_spill] sm:$0xff] %v16035_v34  ;;  %19638 = vst [vmem:[#allocation52_spill] sm:$0xff] %v16047_v29  ;;  %v16054_v46 = vld [vmem:[%s19230_s16 + $0x334] ss:$40 sps:$4 sm:$0xff]  }
 0xa3b   :  { %19636 = vst [vmem:[#allocation50_spill] sm:$0xff] %v16023_v15  ;;  %v16059_v63 = vld [vmem:[%s19230_s16 + $0x33c] ss:$40 sps:$4 sm:$0xff]   ;;  %v16186_v1 = vld [vmem:[%s19230_s16 + $0x4c0] ss:$40 sps:$4 sm:$0xff]  }
 0xa3c   :  { %7707 = vmatpush1.bf16.msra.mxu0 %v15917_v19  ;;  %7809 = vmatpush1.bf16.msra.mxu1 %v15922_v10  ;;  %19639 = vst [vmem:[#allocation53_spill] sm:$0xff] %v16059_v63  ;;  %v16162_v10 = vld [vmem:[%s19230_s16 + $0x470] ss:$40 sps:$4 sm:$0xff]   ;;  %v16174_v11 = vld [vmem:[%s19230_s16 + $0x4c4] ss:$40 sps:$4 sm:$0xff]  }
 0xa3d   :  { %7708 = vmatprep.subr.bf16.mxu0 %v15929_v60  ;;  %7810 = vmatprep.subr.bf16.mxu1 %v15934_v30  ;;  %v16150_v30 = vld [vmem:[%s19230_s16 + $0x474] ss:$40 sps:$4 sm:$0xff]   ;;  %v16210_v7 = vld [vmem:[%s19230_s16 + $0x510] ss:$40 sps:$4 sm:$0xff]   ;;  %v16222_v4 = vld [vmem:[%s19230_s16 + $0x564] ss:$40 sps:$4 sm:$0xff]  }
 0xa3e   :  { %9088 = vrot.lane.b32.xlu1 %v15937_v2, %s13073_s8  ;;  %v16030_v2 = vld [vmem:[%s19230_s16 + $0x2e4] ss:$40 sps:$4 sm:$0xff]   ;;  %v16198_v9 = vld [vmem:[%s19230_s16 + $0x514] ss:$40 sps:$4 sm:$0xff]   ;;  %19652 = vst [vmem:[#allocation66_spill] sm:$0xff] %v16210_v7  ;;  %19654 = vst [vmem:[#allocation68_spill] sm:$0xff] %v16222_v4 }
 0xa3f   :  { %v16243_v39 = vld [vmem:[%s19230_s16 + $0x568] ss:$40 sps:$4 sm:$0xff]   ;;  %v16248_v47 = vld [vmem:[%s19230_s16 + $0x5b4] ss:$40 sps:$4 sm:$0xff]  }
 0xa40   :  { %7709 = vmatpush1.bf16.msra.mxu0 %v15944_v23  ;;  %7811 = vmatpush1.bf16.msra.mxu1 %v15949_v51  ;;  %v16138_v51 = vld [vmem:[%s19230_s16 + $0x420] ss:$40 sps:$4 sm:$0xff]   ;;  %19657 = vst [vmem:[#allocation71_spill] sm:$0xff] %v16243_v39 }
 0xa41   :  { %7710 = vmatprep.subr.bf16.mxu0 %v15956_v0  ;;  %7812 = vmatprep.subr.bf16.mxu1 %v15961_v36  ;;  %v16126_v36 = vld [vmem:[%s19230_s16 + $0x424] ss:$40 sps:$4 sm:$0xff]  }
 0xa44   :  { %7711 = vmatpush1.bf16.msra.mxu0 %v15970_v40  ;;  %7813 = vmatpush1.bf16.msra.mxu1 %v15975_v31  ;;  %v16114_v31 = vld [vmem:[%s19230_s16 + $0x3d0] ss:$40 sps:$4 sm:$0xff]  }
 0xa45   :  { %7712 = vmatprep.subr.bf16.mxu0 %v15982_v8  ;;  %7814 = vmatprep.subr.bf16.mxu1 %v15987_v44  ;;  %v16102_v44 = vld [vmem:[%s19230_s16 + $0x3d4] ss:$40 sps:$4 sm:$0xff]  }
 0xa48   :  { %7713 = vmatpush1.bf16.msra.mxu0 %v15994_v55  ;;  %7815 = vmatpush1.bf16.msra.mxu1 %v15999_v41  ;;  %v16090_v41 = vld [vmem:[%s19230_s16 + $0x380] ss:$40 sps:$4 sm:$0xff]  }
 0xa49   :  { %7714 = vmatprep.subr.bf16.mxu0 %v16006_v25  ;;  %7816 = vmatprep.subr.bf16.mxu1 %v16011_v53  ;;  %v16078_v53 = vld [vmem:[%s19230_s16 + $0x384] ss:$40 sps:$4 sm:$0xff]  }
 0xa4c   :  { %7715 = vmatpush1.bf16.msra.mxu0 %v16018_v48  ;;  %7817 = vmatpush1.bf16.msra.mxu1 %v16023_v15  ;;  %v16066_v15 = vld [vmem:[%s19230_s16 + $0x330] ss:$40 sps:$4 sm:$0xff]  }
 0xa4d   :  { %7716 = vmatprep.subr.bf16.mxu0 %v16030_v2  ;;  %7818 = vmatprep.subr.bf16.mxu1 %v16035_v34  ;;  %v16071_v34 = vld [vmem:[%s19230_s16 + $0x338] ss:$40 sps:$4 sm:$0xff]  }
 0xa4e   :  { %19640 = vst [vmem:[#allocation54_spill] sm:$0xff] %v16071_v34 }
 0xa50   :  { %7717 = vmatpush1.bf16.msra.mxu0 %v16042_v20  ;;  %7819 = vmatpush1.bf16.msra.mxu1 %v16047_v29  ;;  %v16083_v29 = vld [vmem:[%s19230_s16 + $0x38c] ss:$40 sps:$4 sm:$0xff]  }
 0xa51   :  { %7718 = vmatprep.subr.bf16.mxu0 %v16054_v46  ;;  %7820 = vmatprep.subr.bf16.mxu1 %v16059_v63  ;;  %19641 = vst [vmem:[#allocation55_spill] sm:$0xff] %v16083_v29  ;;  %v16095_v63 = vld [vmem:[%s19230_s16 + $0x388] ss:$40 sps:$4 sm:$0xff]  }
 0xa52   :  { %19642 = vst [vmem:[#allocation56_spill] sm:$0xff] %v16095_v63 }
 0xa54   :  { %7719 = vmatpush1.bf16.msra.mxu0 %v16066_v15  ;;  %7821 = vmatpush1.bf16.msra.mxu1 %v16071_v34  ;;  %v16107_v34 = vld [vmem:[%s19230_s16 + $0x3dc] ss:$40 sps:$4 sm:$0xff]  }
 0xa55   :  { %7720 = vmatprep.subr.bf16.mxu0 %v16078_v53  ;;  %7822 = vmatprep.subr.bf16.mxu1 %v16083_v29  ;;  %19643 = vst [vmem:[#allocation57_spill] sm:$0xff] %v16107_v34  ;;  %v16119_v29 = vld [vmem:[%s19230_s16 + $0x3d8] ss:$40 sps:$4 sm:$0xff]  }
 0xa56   :  { %19644 = vst [vmem:[#allocation58_spill] sm:$0xff] %v16119_v29 }
 0xa58   :  { %7721 = vmatpush1.bf16.msra.mxu0 %v16090_v41  ;;  %7823 = vmatpush1.bf16.msra.mxu1 %v16095_v63  ;;  %v16131_v63 = vld [vmem:[%s19230_s16 + $0x42c] ss:$40 sps:$4 sm:$0xff]  }
 0xa59   :  { %7722 = vmatprep.subr.bf16.mxu0 %v16102_v44  ;;  %7824 = vmatprep.subr.bf16.mxu1 %v16107_v34  ;;  %19645 = vst [vmem:[#allocation59_spill] sm:$0xff] %v16131_v63  ;;  %v16143_v34 = vld [vmem:[%s19230_s16 + $0x428] ss:$40 sps:$4 sm:$0xff]  }
 0xa5a   :  { %19646 = vst [vmem:[#allocation60_spill] sm:$0xff] %v16143_v34 }
 0xa5c   :  { %7723 = vmatpush1.bf16.msra.mxu0 %v16114_v31  ;;  %7825 = vmatpush1.bf16.msra.mxu1 %v16119_v29  ;;  %v16155_v29 = vld [vmem:[%s19230_s16 + $0x47c] ss:$40 sps:$4 sm:$0xff]  }
 0xa5d   :  { %7724 = vmatprep.subr.bf16.mxu0 %v16126_v36  ;;  %7826 = vmatprep.subr.bf16.mxu1 %v16131_v63  ;;  %19647 = vst [vmem:[#allocation61_spill] sm:$0xff] %v16155_v29  ;;  %v16167_v63 = vld [vmem:[%s19230_s16 + $0x478] ss:$40 sps:$4 sm:$0xff]  }
 0xa5e   :  { %19648 = vst [vmem:[#allocation62_spill] sm:$0xff] %v16167_v63 }
 0xa60   :  { %7725 = vmatpush1.bf16.msra.mxu0 %v16138_v51  ;;  %7827 = vmatpush1.bf16.msra.mxu1 %v16143_v34  ;;  %v16179_v34 = vld [vmem:[%s19230_s16 + $0x4cc] ss:$40 sps:$4 sm:$0xff]  }
 0xa61   :  { %7726 = vmatprep.subr.bf16.mxu0 %v16150_v30  ;;  %7828 = vmatprep.subr.bf16.mxu1 %v16155_v29  ;;  %19649 = vst [vmem:[#allocation63_spill] sm:$0xff] %v16179_v34  ;;  %v16191_v29 = vld [vmem:[%s19230_s16 + $0x4c8] ss:$40 sps:$4 sm:$0xff]  }
 0xa62   :  { %19650 = vst [vmem:[#allocation64_spill] sm:$0xff] %v16191_v29 }
 0xa64   :  { %7727 = vmatpush1.bf16.msra.mxu0 %v16162_v10  ;;  %7829 = vmatpush1.bf16.msra.mxu1 %v16167_v63  ;;  %v16203_v63 = vld [vmem:[%s19230_s16 + $0x51c] ss:$40 sps:$4 sm:$0xff]  }
 0xa65   :  { %7728 = vmatprep.subr.bf16.mxu0 %v16174_v11  ;;  %7830 = vmatprep.subr.bf16.mxu1 %v16179_v34  ;;  %19651 = vst [vmem:[#allocation65_spill] sm:$0xff] %v16203_v63  ;;  %v16217_v34 = vld [vmem:[%s19230_s16 + $0x518] ss:$40 sps:$4 sm:$0xff]  }
 0xa66   :  { %19653 = vst [vmem:[#allocation67_spill] sm:$0xff] %v16217_v34 }
 0xa68   :  { %7729 = vmatpush1.bf16.msra.mxu0 %v16186_v1  ;;  %7831 = vmatpush1.bf16.msra.mxu1 %v16191_v29  ;;  %v16227_v29 = vld [vmem:[%s19230_s16 + $0x56c] ss:$40 sps:$4 sm:$0xff]  }
 0xa69   :  { %7749 = vmatprep.subr.bf16.mxu0 %v16198_v9  ;;  %7851 = vmatprep.subr.bf16.mxu1 %v16203_v63  ;;  %19655 = vst [vmem:[#allocation69_spill] sm:$0xff] %v16227_v29  ;;  %v16236_v63 = vld [vmem:[%s19230_s16 + $0x560] ss:$40 sps:$4 sm:$0xff]  }
 0xa6a   :  { %19656 = vst [vmem:[#allocation70_spill] sm:$0xff] %v16236_v63 }
 0xa6b   :  { %7731 = vmatmul.mubr.bf16.vlgmr.msra.gmra.mrb[100].mxu0 %v15638_v37  ;;  %7833 = vmatmul.mubr.bf16.vlgmr.msra.gmra.mrb[112].mxu1 %v15638_v37 }
 0xa6c   :  { %7740 = vmatprep.mubr.bf16.mxu0 %v15654_v27  ;;  %7750 = vmatpush1.bf16.msra.mxu0 %v16210_v7  ;;  %v16255_v7 = vld [vmem:[%s19230_s16 + $0x5bc] ss:$40 sps:$4 sm:$0xff]  }
 0xa6d   :  { %7842 = vmatprep.mubr.bf16.mxu1 %v15654_v27  ;;  %7852 = vmatpush1.bf16.msra.mxu1 %v16217_v34  ;;  %19658 = vst [vmem:[#allocation72_spill] sm:$0xff] %v16255_v7  ;;  %v16261_v34 = vld [vmem:[%s19230_s16 + $0x5b0] ss:$40 sps:$4 sm:$0xff]  }
 0xa6e   :  { %7751 = vmatprep.subr.bf16.mxu0 %v16222_v4  ;;  %7853 = vmatprep.subr.bf16.mxu1 %v16227_v29  ;;  %19659 = vst [vmem:[#allocation73_spill] sm:$0xff] %v16261_v34  ;;  %v16268_v29 = vld [vmem:[%s19230_s16 + $0x5b8] ss:$40 sps:$4 sm:$0xff]   ;;  %v16273_v4 = vld [vmem:[%s19230_s16 + $0x604] ss:$40 sps:$4 sm:$0xff]  }
 0xa6f   :  { %19660 = vst [vmem:[#allocation74_spill] sm:$0xff] %v16268_v29  ;;  %19661 = vst [vmem:[#allocation75_spill] sm:$0xff] %v16273_v4 }
 0xa70   :  { %7752 = vmatpush1.bf16.msra.mxu0 %v16236_v63  ;;  %v16279_v63 = vld [vmem:[%s19230_s16 + $0x60c] ss:$40 sps:$4 sm:$0xff]  }
 0xa71   :  { %7854 = vmatpush1.bf16.msra.mxu1 %v16243_v39  ;;  %7753 = vmatprep.subr.bf16.mxu0 %v16248_v47  ;;  %19662 = vst [vmem:[#allocation76_spill] sm:$0xff] %v16279_v63  ;;  %v16287_v39 = vld [vmem:[%s19230_s16 + $0x600] ss:$40 sps:$4 sm:$0xff]  }
 0xa72   :  { %7855 = vmatprep.subr.bf16.mxu1 %v16255_v7  ;;  %v16295_v7 = vld [vmem:[%s19230_s16 + $0x608] ss:$40 sps:$4 sm:$0xff]  }
 0xa73   :  { %7741 = vmatmul.mubr.bf16.gmra.mrb[104].mxu0 %v15702_v59  ;;  %7843 = vmatmul.mubr.bf16.gmra.mrb[116].mxu1 %v15702_v59  ;;  %19663 = vst [vmem:[#allocation77_spill] sm:$0xff] %v16295_v7 }
 0xa74   :  { %7754 = vmatpush1.bf16.msra.mxu0 %v16261_v34  ;;  %7781 = vmatprep.mubr.bf16.mxu0 %v19549_v28  ;;  %v16300_v34 = vld [vmem:[%s19230_s16 + $0x24] ss:$40 sps:$4 sm:$0xff]  }
 0xa75   :  { %7856 = vmatpush1.bf16.msra.mxu1 %v16268_v29  ;;  %7755 = vmatprep.subr.bf16.mxu0 %v16273_v4  ;;  %v16308_v29 = vld [vmem:[%s19230_s16 + $0x20] ss:$40 sps:$4 sm:$0xff]   ;;  %v16315_v4 = vld [vmem:[%s19230_s16 + $0x74] ss:$40 sps:$4 sm:$0xff]  }
 0xa76   :  { %7857 = vmatprep.subr.bf16.mxu1 %v16279_v63  ;;  %7883 = vmatprep.mubr.bf16.mxu1 %v19549_v28  ;;  %19664 = vst [vmem:[#allocation78_spill] sm:$0xff] %v16315_v4  ;;  %v16342_v63 = vld [vmem:[%s19230_s16 + $0xc0] ss:$40 sps:$4 sm:$0xff]  }
 0xa77   :  { %19667 = vst [vmem:[#allocation81_spill] sm:$0xff] %v16342_v63 }
 0xa78   :  { %7756 = vmatpush1.bf16.msra.mxu0 %v16287_v39 }
 0xa79   :  { %7858 = vmatpush1.bf16.msra.mxu1 %v16295_v7  ;;  %7902 = vmatprep.subr.bf16.mxu0 %v16300_v34  ;;  %v16326_v7 = vld [vmem:[%s19230_s16 + $0x70] ss:$40 sps:$4 sm:$0xff]  }
 0xa7a   :  { %8040 = vmatprep.subr.bf16.mxu1 %v15345_v56  ;;  %19665 = vst [vmem:[#allocation79_spill] sm:$0xff] %v16326_v7  ;;  %v16333_v56 = vld [vmem:[%s19230_s16 + $0xc4] ss:$40 sps:$4 sm:$0xff]  }
 0xa7b   :  { %11060 = vmatmul.mubr.msk.bf16.vlgmr.msra.gmra.mrb[100].mxu0 %vm1176_vm2, %v15705_v33  ;;  %19666 = vst [vmem:[#allocation80_spill] sm:$0xff] %v16333_v56 }
 0xa7c   :  { %11062 = vmatmul.mubr.msk.bf16.vlgmr.msra.gmra.mrb[112].mxu1 %vm1176_vm2, %v15705_v33  ;;  %7903 = vmatpush1.bf16.msra.mxu0 %v16308_v29 }
 0xa7d   :  { %8041 = vmatpush1.bf16.msra.mxu1 %v15365_v35  ;;  %7904 = vmatprep.subr.bf16.mxu0 %v16315_v4  ;;  %v16350_v35 = vld [vmem:[%s19230_s16 + $0x114] ss:$40 sps:$4 sm:$0xff]  }
 0xa7e   :  { %8042 = vmatprep.subr.bf16.mxu1 %v15370_v17  ;;  %7791 = vmatprep.mubr.bf16.mxu0 %v19549_v28  ;;  %19668 = vst [vmem:[#allocation82_spill] sm:$0xff] %v16350_v35  ;;  %v16360_v17 = vld [vmem:[%s19230_s16 + $0x110] ss:$40 sps:$4 sm:$0xff]  }
 0xa7f   :  { %7893 = vmatprep.mubr.bf16.mxu1 %v19549_v28  ;;  %19669 = vst [vmem:[#allocation83_spill] sm:$0xff] %v16360_v17  ;;  %v19702_v4 = vld [vmem:[#allocation15_spill] sm:$0xff] }
 0xa80   :  { %7905 = vmatpush1.bf16.msra.mxu0 %v16326_v7  ;;  %v19696_v7 = vld [vmem:[#allocation14_spill] sm:$0xff] }
 0xa81   :  { %8043 = vmatpush1.bf16.msra.mxu1 %v15383_v6  ;;  %7906 = vmatprep.subr.bf16.mxu0 %v16333_v56  ;;  %v16367_v6 = vld [vmem:[%s19230_s16 + $0x164] ss:$40 sps:$4 sm:$0xff]  }
 0xa82   :  { %8044 = vmatprep.subr.bf16.mxu1 %v15389_v50  ;;  %19670 = vst [vmem:[#allocation84_spill] sm:$0xff] %v16367_v6  ;;  %v16375_v50 = vld [vmem:[%s19230_s16 + $0x160] ss:$40 sps:$4 sm:$0xff]  }
 0xa83   :  { %11061 = vmatmul.mubr.msk.bf16.gmra.mrb[108].mxu0 %vm1176_vm2, %v15846_v57  ;;  %19671 = vst [vmem:[#allocation85_spill] sm:$0xff] %v16375_v50  ;;  %v19693_v56 = vld [vmem:[#allocation13_spill] sm:$0xff] }
 0xa84   :  { %11063 = vmatmul.mubr.msk.bf16.gmra.mrb[116].mxu1 %vm1176_vm2, %v15846_v57  ;;  %7907 = vmatpush1.bf16.msra.mxu0 %v16342_v63  ;;  %v19691_v63 = vld [vmem:[#allocation22_spill] sm:$0xff] }
 0xa85   :  { %7934 = vmatprep.mubr.bf16.mxu0 %v15640_v32  ;;  %8045 = vmatpush1.bf16.msra.mxu1 %v15401_v43  ;;  %v16382_v43 = vld [vmem:[%s19230_s16 + $0x1b4] ss:$40 sps:$4 sm:$0xff]   ;;  %v19675_v32 = vld [vmem:[#allocation18_spill] sm:$0xff] }
 0xa86   :  { %7908 = vmatprep.subr.bf16.mxu0 %v16350_v35  ;;  %8046 = vmatprep.subr.bf16.mxu1 %v15407_v45  ;;  %19672 = vst [vmem:[#allocation86_spill] sm:$0xff] %v16382_v43  ;;  %v16389_v45 = vld [vmem:[%s19230_s16 + $0x1b0] ss:$40 sps:$4 sm:$0xff]  }
 0xa87   :  { %19673 = vst [vmem:[#allocation87_spill] sm:$0xff] %v16389_v45 }
 0xa88   :  { %7909 = vmatpush1.bf16.msra.mxu0 %v16360_v17  ;;  %v19685_v17 = vld [vmem:[#allocation11_spill] sm:$0xff] }
 0xa89   :  { %8047 = vmatpush1.bf16.msra.mxu1 %v15419_v42  ;;  %7910 = vmatprep.subr.bf16.mxu0 %v16367_v6  ;;  %v16396_v42 = vld [vmem:[%s19230_s16 + $0x204] ss:$40 sps:$4 sm:$0xff]   ;;  %v19681_v6 = vld [vmem:[#allocation19_spill] sm:$0xff] }
 0xa8a   :  { %8048 = vmatprep.subr.bf16.mxu1 %v15425_v3  ;;  %19674 = vst [vmem:[#allocation88_spill] sm:$0xff] %v16396_v42  ;;  %v16403_v3 = vld [vmem:[%s19230_s16 + $0x200] ss:$40 sps:$4 sm:$0xff]  }
 0xa8b   :  { %19676 = vst [vmem:[#allocation18_spill] sm:$0xff] %v16403_v3 }
 0xa8c   :  { %7911 = vmatpush1.bf16.msra.mxu0 %v16375_v50  ;;  %v19677_v50 = vld [vmem:[#allocation9_spill] sm:$0xff] }
 0xa8d   :  { %8049 = vmatpush1.bf16.msra.mxu1 %v15437_v21  ;;  %7912 = vmatprep.subr.bf16.mxu0 %v16382_v43  ;;  %v16410_v21 = vld [vmem:[%s19230_s16 + $0x254] ss:$40 sps:$4 sm:$0xff]   ;;  %v19679_v43 = vld [vmem:[#allocation10_spill] sm:$0xff] }
 0xa8e   :  { %8050 = vmatprep.subr.bf16.mxu1 %v19675_v32  ;;  %19678 = vst [vmem:[#allocation9_spill] sm:$0xff] %v16410_v21 }
 0xa90   :  { %7913 = vmatpush1.bf16.msra.mxu0 %v16389_v45  ;;  %v16419_v45 = vld [vmem:[%s19230_s16 + $0x250] ss:$40 sps:$4 sm:$0xff]  }
 0xa91   :  { %8051 = vmatpush1.bf16.msra.mxu1 %v19677_v50  ;;  %7914 = vmatprep.subr.bf16.mxu0 %v16396_v42  ;;  %19680 = vst [vmem:[#allocation10_spill] sm:$0xff] %v16419_v45  ;;  %v16426_v50 = vld [vmem:[%s19230_s16 + $0x2a4] ss:$40 sps:$4 sm:$0xff]   ;;  %v19683_v42 = vld [vmem:[#allocation20_spill] sm:$0xff] }
 0xa92   :  { %8052 = vmatprep.subr.bf16.mxu1 %v19679_v43  ;;  %19682 = vst [vmem:[#allocation19_spill] sm:$0xff] %v16426_v50 }
 0xa94   :  { %7915 = vmatpush1.bf16.msra.mxu0 %v16403_v3  ;;  %v16414_v32 = vpop.permute.xlu0 %8016  ;;  %v16435_v3 = vld [vmem:[%s19230_s16 + $0x2a0] ss:$40 sps:$4 sm:$0xff]  }
 0xa95   :  { %8053 = vmatpush1.bf16.msra.mxu1 %v19681_v6  ;;  %7916 = vmatprep.subr.bf16.mxu0 %v16410_v21  ;;  %19684 = vst [vmem:[#allocation20_spill] sm:$0xff] %v16435_v3  ;;  %v16444_v21 = vld [vmem:[%s19230_s16 + $0x2f4] ss:$40 sps:$4 sm:$0xff]  }
 0xa96   :  { %8054 = vmatprep.subr.bf16.mxu1 %v19683_v42  ;;  %19686 = vst [vmem:[#allocation11_spill] sm:$0xff] %v16444_v21  ;;  %v19687_v42 = vld [vmem:[#allocation12_spill] sm:$0xff] }
 0xa98   :  { %7917 = vmatpush1.bf16.msra.mxu0 %v16419_v45  ;;  %v16430_v43 = vpop.permute.xlu0 %8014 }
 0xa99   :  { %8055 = vmatpush1.bf16.msra.mxu1 %v19685_v17  ;;  %7918 = vmatprep.subr.bf16.mxu0 %v16426_v50  ;;  %v16439_v6 = vpop.permute.xlu1 %8018  ;;  %v16457_v17 = vld [vmem:[%s19230_s16 + $0x2f0] ss:$40 sps:$4 sm:$0xff]   ;;  %v19689_v50 = vld [vmem:[#allocation21_spill] sm:$0xff] }
 0xa9a   :  { %8056 = vmatprep.subr.bf16.mxu1 %v19687_v42  ;;  %v16450_v45 = vsel %vm1176_vm2, %v16414_v32, %v16439_v6  ;;  %19688 = vst [vmem:[#allocation12_spill] sm:$0xff] %v16457_v17  ;;  %v16466_v42 = vld [vmem:[%s19230_s16 + $0x344] ss:$40 sps:$4 sm:$0xff]  }
 0xa9b   :  { %8072 = vmatprep.mubr.bf16.mxu1 %v16450_v45  ;;  %19690 = vst [vmem:[#allocation21_spill] sm:$0xff] %v16466_v42 }
 0xa9c   :  { %7919 = vmatpush1.bf16.msra.mxu0 %v16435_v3  ;;  %v16473_v3 = vld [vmem:[%s19230_s16 + $0x340] ss:$40 sps:$4 sm:$0xff]  }
 0xa9d   :  { %8057 = vmatpush1.bf16.msra.mxu1 %v19689_v50  ;;  %v16460_v35 = vpop.permute.xlu0 %8024  ;;  %7920 = vmatprep.subr.bf16.mxu0 %v16444_v21  ;;  %19692 = vst [vmem:[#allocation22_spill] sm:$0xff] %v16473_v3  ;;  %v16482_v21 = vld [vmem:[%s19230_s16 + $0x394] ss:$40 sps:$4 sm:$0xff]  }
 0xa9e   :  { %8058 = vmatprep.subr.bf16.mxu1 %v19691_v63  ;;  %19695 = vst [vmem:[#allocation89_spill] sm:$0xff] %v16482_v21  ;;  %v16489_v63 = vld [vmem:[%s19230_s16 + $0x390] ss:$40 sps:$4 sm:$0xff]  }
 0xaa0   :  { %7921 = vmatpush1.bf16.msra.mxu0 %v16457_v17  ;;  %v19697_v17 = vld [vmem:[#allocation23_spill] sm:$0xff] }
 0xaa1   :  { %8059 = vmatpush1.bf16.msra.mxu1 %v19693_v56  ;;  %v16476_v50 = vpop.permute.xlu0 %9084  ;;  %7922 = vmatprep.subr.bf16.mxu0 %v16466_v42  ;;  %v16496_v42 = vld [vmem:[%s19230_s16 + $0x3e4] ss:$40 sps:$4 sm:$0xff]  }
 0xaa2   :  { %19694 = vst [vmem:[#allocation13_spill] sm:$0xff] %v16476_v50  ;;  %8060 = vmatprep.subr.bf16.mxu1 %v19696_v7  ;;  %19698 = vst [vmem:[#allocation14_spill] sm:$0xff] %v16496_v42 }
 0xaa4   :  { %7923 = vmatpush1.bf16.msra.mxu0 %v16473_v3  ;;  %v19700_v3 = vld [vmem:[#allocation24_spill] sm:$0xff] }
 0xaa5   :  { %8061 = vmatpush1.bf16.msra.mxu1 %v19697_v17  ;;  %v9083_v56 = vpop.permute.xlu0 %9082  ;;  %7924 = vmatprep.subr.bf16.mxu0 %v16482_v21  ;;  %v16507_v17 = vld [vmem:[%s19230_s16 + $0x3e0] ss:$40 sps:$4 sm:$0xff]   ;;  %v16514_v21 = vld [vmem:[%s19230_s16 + $0x434] ss:$40 sps:$4 sm:$0xff]  }
 0xaa6   :  { %v16500_v7 = vsel %vm1176_vm2, %v9083_v56, %v16476_v50  ;;  %8062 = vmatprep.subr.bf16.mxu1 %v19700_v3  ;;  %19701 = vst [vmem:[#allocation24_spill] sm:$0xff] %v16507_v17  ;;  %19703 = vst [vmem:[#allocation15_spill] sm:$0xff] %v16514_v21  ;;  %v19704_v56 = vld [vmem:[#allocation16_spill] sm:$0xff]  ;;  %v19708_v50 = vld [vmem:[#allocation26_spill] sm:$0xff] }
 0xaa7   :  { %19699 = vst [vmem:[#allocation23_spill] sm:$0xff] %v16500_v7  ;;  %v16521_v3 = vld [vmem:[%s19230_s16 + $0x430] ss:$40 sps:$4 sm:$0xff]   ;;  %v19706_v7 = vld [vmem:[#allocation25_spill] sm:$0xff] }
 0xaa8   :  { %7925 = vmatpush1.bf16.msra.mxu0 %v16489_v63  ;;  %19705 = vst [vmem:[#allocation16_spill] sm:$0xff] %v16521_v3 }
 0xaa9   :  { %8063 = vmatpush1.bf16.msra.mxu1 %v19702_v4  ;;  %7926 = vmatprep.subr.bf16.mxu0 %v16496_v42  ;;  %v16528_v4 = vld [vmem:[%s19230_s16 + $0x484] ss:$40 sps:$4 sm:$0xff]   ;;  %v16571_v42 = vld [vmem:[%s19230_s16 + $0x574] ss:$40 sps:$4 sm:$0xff]  }
 0xaaa   :  { %8064 = vmatprep.subr.bf16.mxu1 %v19704_v56  ;;  %19707 = vst [vmem:[#allocation25_spill] sm:$0xff] %v16528_v4  ;;  %v16535_v56 = vld [vmem:[%s19230_s16 + $0x480] ss:$40 sps:$4 sm:$0xff]  }
 0xaab   :  { %19709 = vst [vmem:[#allocation26_spill] sm:$0xff] %v16535_v56 }
 0xaac   :  { %7927 = vmatpush1.bf16.msra.mxu0 %v16507_v17  ;;  %v19710_v17 = vld [vmem:[#allocation17_spill] sm:$0xff] }
 0xaad   :  { %8065 = vmatpush1.bf16.msra.mxu1 %v19706_v7  ;;  %7928 = vmatprep.subr.bf16.mxu0 %v16514_v21  ;;  %v16542_v7 = vld [vmem:[%s19230_s16 + $0x4d4] ss:$40 sps:$4 sm:$0xff]   ;;  %v19712_v21 = vld [vmem:[#allocation34_spill] sm:$0xff] }
 0xaae   :  { %8066 = vmatprep.subr.bf16.mxu1 %v19708_v50  ;;  %19711 = vst [vmem:[#allocation17_spill] sm:$0xff] %v16542_v7  ;;  %v16549_v50 = vld [vmem:[%s19230_s16 + $0x4d0] ss:$40 sps:$4 sm:$0xff]  }
 0xab0   :  { %7929 = vmatpush1.bf16.msra.mxu0 %v16521_v3  ;;  %v19713_v3 = vld [vmem:[#allocation27_spill] sm:$0xff] }
 0xab1   :  { %8067 = vmatpush1.bf16.msra.mxu1 %v19710_v17  ;;  %7930 = vmatprep.subr.bf16.mxu0 %v16528_v4  ;;  %v16556_v17 = vld [vmem:[%s19230_s16 + $0x524] ss:$40 sps:$4 sm:$0xff]   ;;  %v19714_v4 = vld [vmem:[#allocation28_spill] sm:$0xff] }
 0xab2   :  { %8068 = vmatprep.subr.bf16.mxu1 %v19712_v21  ;;  %v8023_v21 = vpop.permute.xlu1 %8022 }
 0xab4   :  { %7931 = vmatpush1.bf16.msra.mxu0 %v16535_v56  ;;  %v19715_v56 = vld [vmem:[#allocation35_spill] sm:$0xff] }
 0xab5   :  { %8069 = vmatpush1.bf16.msra.mxu1 %v19713_v3  ;;  %7932 = vmatprep.subr.bf16.mxu0 %v16542_v7  ;;  %v16565_v3 = vld [vmem:[%s19230_s16 + $0x520] ss:$40 sps:$4 sm:$0xff]  }
 0xab6   :  { %8070 = vmatprep.subr.bf16.mxu1 %v19714_v4  ;;  %v19716_v7 = vld [vmem:[#allocation38_spill] sm:$0xff]  ;;  %v16576_v4 = vsel %vm1176_vm2, %v16430_v43, %v16414_v32 }
 0xab7   :  { %v16604_v32 = vld [vmem:[%s19230_s16 + $0x5c0] ss:$40 sps:$4 sm:$0xff]  }
 0xab8   :  { %7933 = vmatpush1.bf16.msra.mxu0 %v16549_v50 }
 0xab9   :  { %8071 = vmatpush1.bf16.msra.mxu1 %v19715_v56  ;;  %7953 = vmatprep.subr.bf16.mxu0 %v16556_v17  ;;  %v16581_v56 = vsel %vm1176_vm2, %v8023_v21, %v16460_v35 }
 0xaba   :  { %8091 = vmatprep.subr.bf16.mxu1 %v19716_v7  ;;  %v16590_v7 = vld [vmem:[%s19230_s16 + $0x570] ss:$40 sps:$4 sm:$0xff]  }
 0xabb   :  { %7935 = vmatmul.mubr.bf16.vlgmr.msra.gmra.mrb[112].mxu0 %v15638_v37  ;;  %v16597_v37 = vld [vmem:[%s19230_s16 + $0x5c4] ss:$40 sps:$4 sm:$0xff]  }
 0xabc   :  { %8073 = vmatmul.mubr.bf16.vlgmr.msra.gmra.mrb[120].mxu1 %v16576_v4  ;;  %7944 = vmatprep.mubr.bf16.mxu0 %v15654_v27  ;;  %v8021_v27 = vpop.permute.xlu1 %8020 }
 0xabd   :  { %7954 = vmatpush1.bf16.msra.mxu0 %v16565_v3  ;;  %8082 = vmatprep.mubr.bf16.mxu1 %v16581_v56  ;;  %v16614_v43 = vsel %vm1176_vm2, %v8021_v27, %v8023_v21  ;;  %v16806_v21 = vld [vmem:[%s19230_s16 + $0x37c] ss:$40 sps:$4 sm:$0xff]  }
 0xabe   :  { %8092 = vmatpush1.bf16.msra.mxu1 %v15646_v62  ;;  %7955 = vmatprep.subr.bf16.mxu0 %v16571_v42  ;;  %v16611_v62 = vld [vmem:[%s19230_s16 + $0x614] ss:$40 sps:$4 sm:$0xff]   ;;  %19721 = vst [vmem:[#allocation35_spill] sm:$0xff] %v16806_v21 }
 0xabf   :  { %8093 = vmatprep.subr.bf16.mxu1 %v15663_v26  ;;  %v16624_v26 = vld [vmem:[%s19230_s16 + $0x610] ss:$40 sps:$4 sm:$0xff]  }
 0xac1   :  { %7956 = vmatpush1.bf16.msra.mxu0 %v16590_v7 }
 0xac2   :  { %8094 = vmatpush1.bf16.msra.mxu1 %v15680_v13  ;;  %7957 = vmatprep.subr.bf16.mxu0 %v16597_v37  ;;  %v16635_v13 = vld [vmem:[%s19230_s16 + $0xc] ss:$40 sps:$4 sm:$0xff]  }
 0xac3   :  { %7945 = vmatmul.mubr.bf16.gmra.mrb[116].mxu0 %v15702_v59  ;;  %8095 = vmatprep.subr.bf16.mxu1 %v15689_v61  ;;  %v16646_v61 = vld [vmem:[%s19230_s16 + $0x8] ss:$40 sps:$4 sm:$0xff]   ;;  %v16653_v59 = vld [vmem:[%s19230_s16 + $0x5c] ss:$40 sps:$4 sm:$0xff]  }
 0xac4   :  { %8083 = vmatmul.mubr.bf16.gmra.mrb[124].mxu1 %v16614_v43  ;;  %7985 = vmatprep.mubr.bf16.mxu0 %v19549_v28 }
 0xac5   :  { %7958 = vmatpush1.bf16.msra.mxu0 %v16604_v32  ;;  %8123 = vmatprep.mubr.bf16.mxu1 %v19549_v28 }
 0xac6   :  { %8096 = vmatpush1.bf16.msra.mxu1 %v15714_v24  ;;  %7959 = vmatprep.subr.bf16.mxu0 %v16611_v62  ;;  %v16669_v24 = vld [vmem:[%s19230_s16 + $0xac] ss:$40 sps:$4 sm:$0xff]  }
 0xac7   :  { %8097 = vmatprep.subr.bf16.mxu1 %v15723_v49  ;;  %v16680_v49 = vld [vmem:[%s19230_s16 + $0xa8] ss:$40 sps:$4 sm:$0xff]  }
 0xac9   :  { %7960 = vmatpush1.bf16.msra.mxu0 %v16624_v26 }
 0xaca   :  { %8098 = vmatpush1.bf16.msra.mxu1 %v15748_v18  ;;  %8142 = vmatprep.subr.bf16.mxu0 %v16635_v13  ;;  %v16689_v18 = vld [vmem:[%s19230_s16 + $0xfc] ss:$40 sps:$4 sm:$0xff]  }
 0xacb   :  { %8244 = vmatprep.subr.bf16.mxu1 %v15759_v38  ;;  %v16696_v38 = vld [vmem:[%s19230_s16 + $0xf8] ss:$40 sps:$4 sm:$0xff]  }
 0xacc   :  { %11064 = vmatmul.mubr.msk.bf16.vlgmr.msra.gmra.mrb[112].mxu0 %vm1176_vm2, %v15705_v33  ;;  %v16662_v33 = vld [vmem:[%s19230_s16 + $0x58] ss:$40 sps:$4 sm:$0xff]  }
 0xacd   :  { %11066 = vmatmul.mubr.msk.bf16.vlgmr.msra.gmra.mrb[120].mxu1 %vm1176_vm2, %v16439_v6  ;;  %8143 = vmatpush1.bf16.msra.mxu0 %v16646_v61 }
 0xace   :  { %8245 = vmatpush1.bf16.msra.mxu1 %v15787_v22  ;;  %8144 = vmatprep.subr.bf16.mxu0 %v16653_v59  ;;  %v16703_v22 = vld [vmem:[%s19230_s16 + $0x14c] ss:$40 sps:$4 sm:$0xff]  }
 0xacf   :  { %8246 = vmatprep.subr.bf16.mxu1 %v15797_v54  ;;  %7995 = vmatprep.mubr.bf16.mxu0 %v19549_v28  ;;  %v16710_v54 = vld [vmem:[%s19230_s16 + $0x148] ss:$40 sps:$4 sm:$0xff]  }
 0xad0   :  { %8133 = vmatprep.mubr.bf16.mxu1 %v19549_v28 }
 0xad1   :  { %8145 = vmatpush1.bf16.msra.mxu0 %v16662_v33 }
 0xad2   :  { %8247 = vmatpush1.bf16.msra.mxu1 %v15820_v16  ;;  %8146 = vmatprep.subr.bf16.mxu0 %v16669_v24  ;;  %v16717_v16 = vld [vmem:[%s19230_s16 + $0x19c] ss:$40 sps:$4 sm:$0xff]  }
 0xad3   :  { %8248 = vmatprep.subr.bf16.mxu1 %v15834_v5  ;;  %v16724_v5 = vld [vmem:[%s19230_s16 + $0x198] ss:$40 sps:$4 sm:$0xff]  }
 0xad4   :  { %11065 = vmatmul.mubr.msk.bf16.gmra.mrb[116].mxu0 %vm1176_vm2, %v15846_v57  ;;  %v16731_v57 = vld [vmem:[%s19230_s16 + $0x1ec] ss:$40 sps:$4 sm:$0xff]  }
 0xad5   :  { %11067 = vmatmul.mubr.msk.bf16.gmra.mrb[124].mxu1 %vm1176_vm2, %v16460_v35  ;;  %8147 = vmatpush1.bf16.msra.mxu0 %v16680_v49 }
 0xad6   :  { %8174 = vmatprep.mubr.bf16.mxu0 %v16450_v45  ;;  %8249 = vmatpush1.bf16.msra.mxu1 %v15856_v58  ;;  %v16738_v58 = vld [vmem:[%s19230_s16 + $0x1e8] ss:$40 sps:$4 sm:$0xff]  }
 0xad7   :  { %8276 = vmatprep.mubr.bf16.mxu1 %v16450_v45  ;;  %8148 = vmatprep.subr.bf16.mxu0 %v16689_v18 }
 0xad8   :  { %8250 = vmatprep.subr.bf16.mxu1 %v15872_v12  ;;  %v16745_v12 = vld [vmem:[%s19230_s16 + $0x23c] ss:$40 sps:$4 sm:$0xff]  }
 0xad9   :  { %8149 = vmatpush1.bf16.msra.mxu0 %v16696_v38 }
 0xada   :  { %8251 = vmatpush1.bf16.msra.mxu1 %v15888_v14  ;;  %8150 = vmatprep.subr.bf16.mxu0 %v16703_v22  ;;  %v19717_v14 = vld [vmem:[#allocation5_spill] sm:$0xff] }
 0xadb   :  { %8252 = vmatprep.subr.bf16.mxu1 %v15900_v52  ;;  %v9718_v52 = vadd.s32 16, %v19717_v14  ;;  %v16820_v14 = vld [vmem:[%s19230_s16 + $0x3cc] ss:$40 sps:$4 sm:$0xff]  }
 0xadc   :  { %19723 = vst [vmem:[#allocation90_spill] sm:$0xff] %v16820_v14 }
 0xadd   :  { %8151 = vmatpush1.bf16.msra.mxu0 %v16710_v54 }
 0xade   :  { %8253 = vmatpush1.bf16.msra.mxu1 %v15917_v19  ;;  %8152 = vmatprep.subr.bf16.mxu0 %v16717_v16  ;;  %v16753_v19 = vld [vmem:[%s19230_s16 + $0x238] ss:$40 sps:$4 sm:$0xff]  }
 0xadf   :  { %8254 = vmatprep.subr.bf16.mxu1 %v15929_v60  ;;  %v16760_v60 = vld [vmem:[%s19230_s16 + $0x28c] ss:$40 sps:$4 sm:$0xff]  }
 0xae1   :  { %8153 = vmatpush1.bf16.msra.mxu0 %v16724_v5 }
 0xae2   :  { %8255 = vmatpush1.bf16.msra.mxu1 %v15944_v23  ;;  %8154 = vmatprep.subr.bf16.mxu0 %v16731_v57 }
 0xae3   :  { %8256 = vmatprep.subr.bf16.mxu1 %v15956_v0  ;;  %v16763_v23 = vmul.u32.u64.low 2863311531, %v9718_v52  ;;  %v16764_v0 = vmul.u32.u64.high 2863311531, %v9718_v52, %v16763_v23 }
 0xae5   :  { %8155 = vmatpush1.bf16.msra.mxu0 %v16738_v58 }
 0xae6   :  { %8257 = vmatpush1.bf16.msra.mxu1 %v15970_v40  ;;  %8156 = vmatprep.subr.bf16.mxu0 %v16745_v12  ;;  %v16770_v40 = vld [vmem:[%s19230_s16 + $0x288] ss:$40 sps:$4 sm:$0xff]  }
 0xae7   :  { %8258 = vmatprep.subr.bf16.mxu1 %v15982_v8  ;;  %v16777_v8 = vld [vmem:[%s19230_s16 + $0x2dc] ss:$40 sps:$4 sm:$0xff]  }
 0xae9   :  { %8157 = vmatpush1.bf16.msra.mxu0 %v16753_v19 }
 0xaea   :  { %8259 = vmatpush1.bf16.msra.mxu1 %v15994_v55  ;;  %8158 = vmatprep.subr.bf16.mxu0 %v16760_v60  ;;  %v16784_v55 = vld [vmem:[%s19230_s16 + $0x2d8] ss:$40 sps:$4 sm:$0xff]  }
 0xaeb   :  { %8260 = vmatprep.subr.bf16.mxu1 %v16006_v25  ;;  %19718 = vst [vmem:[#allocation34_spill] sm:$0xff] %v16784_v55  ;;  %v16791_v25 = vld [vmem:[%s19230_s16 + $0x32c] ss:$40 sps:$4 sm:$0xff]  }
 0xaec   :  { %19719 = vst [vmem:[#allocation27_spill] sm:$0xff] %v16791_v25 }
 0xaed   :  { %8159 = vmatpush1.bf16.msra.mxu0 %v16770_v40 }
 0xaee   :  { %8261 = vmatpush1.bf16.msra.mxu1 %v16018_v48  ;;  %8160 = vmatprep.subr.bf16.mxu0 %v16777_v8  ;;  %v9747_v48 = vshrl.u32 %v16764_v0, 3  ;;  %v16813_v0 = vld [vmem:[%s19230_s16 + $0x378] ss:$40 sps:$4 sm:$0xff]  }
 0xaef   :  { %8262 = vmatprep.subr.bf16.mxu1 %v16030_v2  ;;  %v16799_v2 = vld [vmem:[%s19230_s16 + $0x328] ss:$40 sps:$4 sm:$0xff]   ;;  %19722 = vst [vmem:[#allocation38_spill] sm:$0xff] %v16813_v0 }
 0xaf0   :  { %19720 = vst [vmem:[#allocation28_spill] sm:$0xff] %v16799_v2  ;;  %v9748_v27 = vmul.u32 12, %v9747_v48  ;;  %v16827_v48 = vld [vmem:[%s19230_s16 + $0x3c8] ss:$40 sps:$4 sm:$0xff]  }
 0xaf1   :  { %8161 = vmatpush1.bf16.msra.mxu0 %v16784_v55  ;;  %19724 = vst [vmem:[#allocation91_spill] sm:$0xff] %v16827_v48 }
 0xaf2   :  { %8263 = vmatpush1.bf16.msra.mxu1 %v16042_v20  ;;  %8162 = vmatprep.subr.bf16.mxu0 %v16791_v25 }
 0xaf3   :  { %8264 = vmatprep.subr.bf16.mxu1 %v16054_v46 }
 0xaf5   :  { %8163 = vmatpush1.bf16.msra.mxu0 %v16799_v2 }
 0xaf6   :  { %8265 = vmatpush1.bf16.msra.mxu1 %v16066_v15  ;;  %v7640_v20 = vpop.f32.mrb[104].mxu1  ;;  %8164 = vmatprep.subr.bf16.mxu0 %v16806_v21 }
 0xaf7   :  { %8266 = vmatprep.subr.bf16.mxu1 %v16078_v53  ;;  %v7642_v46 = vpop.f32.mrb[105].mxu1  ;;  %v9749_v53 = vsub.s32 %v9718_v52, %v9748_v27 }
 0xaf8   :  { %v7644_v23 = vpop.f32.mrb[106].mxu1 }
 0xaf9   :  { %8165 = vmatpush1.bf16.msra.mxu0 %v16813_v0  ;;  %v7645_v15 = vpop.f32.mrb[107].mxu1  ;;  %vm9754_vm8 = vcmp.ne.s32.totalorder %v9749_v53, 0  ;;  %vm9757_vm9 = vcmp.lt.s32.totalorder %v9749_v53, 0  ;;  %v9763_v21 = vadd.s32 12, %v9749_v53 }
 0xafa   :  { %8267 = vmatpush1.bf16.msra.mxu1 %v16090_v41  ;;  %8166 = vmatprep.subr.bf16.mxu0 %v16820_v14  ;;  %v16836_v15 = vld [vmem:[%s19230_s16 + $0x41c] ss:$40 sps:$4 sm:$0xff]   ;;  %vm9760_vm11 = vmand %vm9757_vm9, %vm9754_vm8 }
 0xafb   :  { %8268 = vmatprep.subr.bf16.mxu1 %v16102_v44  ;;  %19726 = vst [vmem:[#allocation93_spill] sm:$0xff] %v16836_v15 }
 0xafd   :  { %8167 = vmatpush1.bf16.msra.mxu0 %v16827_v48  ;;  %v7579_v23 = vpop.f32.mrb[92].mxu0 }
 0xafe   :  { %8269 = vmatpush1.bf16.msra.mxu1 %v16114_v31  ;;  %v16831_v41 = vpop.f32.mrb[100].mxu1  ;;  %8168 = vmatprep.subr.bf16.mxu0 %v16836_v15  ;;  %v7581_v44 = vpop.f32.mrb[93].mxu0  ;;  %v9628_v48 = vrot.slane %v7579_v23, 1  ;;  %v16848_v15 = vld [vmem:[%s19230_s16 + $0x418] ss:$40 sps:$4 sm:$0xff]  }
 0xaff   :  { %19725 = vst [vmem:[#allocation92_spill] sm:$0xff] %v16831_v41  ;;  %8270 = vmatprep.subr.bf16.mxu1 %v16126_v36  ;;  %v16840_v52 = vpop.f32.mrb[101].mxu1  ;;  %v7583_v27 = vpop.f32.mrb[94].mxu0  ;;  %v9634_v2 = vrot.slane %v16831_v41, 1  ;;  %v9631_v25 = vrot.slane %v7581_v44, 1 }
 0xb00   :  { %19727 = vst [vmem:[#allocation94_spill] sm:$0xff] %v16840_v52  ;;  %v9629_v31 = vrot.slane %v7583_v27, 1  ;;  %v16842_v14 = vpop.f32.mrb[102].mxu1  ;;  %v7585_v0 = vpop.f32.mrb[95].mxu0  ;;  %v16860_v23 = vld [vmem:[%s19230_s16 + $0x46c] ss:$40 sps:$4 sm:$0xff]  }
 0xb01   :  { %19728 = vst [vmem:[#allocation95_spill] sm:$0xff] %v16842_v14  ;;  %8169 = vmatpush1.bf16.msra.mxu0 %v16848_v15  ;;  %v19393_v36 = vrot.slane %v16842_v14, 1  ;;  %v9632_v52 = vrot.slane %v7585_v0, 1  ;;  %v16852_v55 = vpop.f32.mrb[103].mxu1 }
 0xb02   :  { %19729 = vst [vmem:[#allocation96_spill] sm:$0xff] %v16852_v55  ;;  %8271 = vmatpush1.bf16.msra.mxu1 %v16138_v51  ;;  %8170 = vmatprep.subr.bf16.mxu0 %v16860_v23  ;;  %v16864_v44 = vsel %vm9627_vm10, %v9628_v48, %v9629_v31  ;;  %v16875_v51 = vsel %vm9760_vm11, %v9763_v21, %v9749_v53  ;;  %v16880_v55 = vld [vmem:[%s19230_s16 + $0x468] ss:$40 sps:$4 sm:$0xff]  }
 0xb03   :  { %19730 = vst [vmem:[#allocation97_spill] sm:$0xff] %v16864_v44  ;;  %8272 = vmatprep.subr.bf16.mxu1 %v16150_v30  ;;  %v16868_v0 = vsel %vm9627_vm10, %v9631_v25, %v9632_v52  ;;  %v16873_v27 = vsel %vm9627_vm10, %v9634_v2, %v19393_v36  ;;  %19733 = vst [vmem:[#allocation100_spill] sm:$0xff] %v16875_v51  ;;  %v16890_v2 = vld [vmem:[%s19230_s16 + $0x4bc] ss:$40 sps:$4 sm:$0xff]   ;;  %vm9769_vm12 = vcmp.ne.s32.totalorder %v16875_v51, 11 }
 0xb04   :  { %19731 = vst [vmem:[#allocation98_spill] sm:$0xff] %v16868_v0  ;;  %19732 = vst [vmem:[#allocation99_spill] sm:$0xff] %v16873_v27  ;;  %v19794_v51 = vld [vmem:[#allocation56_spill] sm:$0xff] }
 0xb05   :  { %8171 = vmatpush1.bf16.msra.mxu0 %v16880_v55  ;;  %v16883_v48 = vpop.f32.mrb[96].mxu0  ;;  %19735 = vst [vmem:[#allocation102_spill] sm:$0xff] %v16890_v2 }
 0xb06   :  { %19734 = vst [vmem:[#allocation101_spill] sm:$0xff] %v16883_v48  ;;  %8273 = vmatpush1.bf16.msra.mxu1 %v16162_v10  ;;  %v7691_v25 = vpop.f32.mrb[108].mxu1  ;;  %8172 = vmatprep.subr.bf16.mxu0 %v16890_v2  ;;  %v7591_v21 = vpop.f32.mrb[97].mxu0  ;;  %v19738_v0 = vrot.slane %v16883_v48, 1  ;;  %v19808_v48 = vld [vmem:[#allocation25_spill] sm:$0xff] }
 0xb07   :  { %v16893_v53 = vadd.f32 %v7691_v25, %v7640_v20  ;;  %8274 = vmatprep.subr.bf16.mxu1 %v16174_v11  ;;  %v9639_v36 = vrot.slane %v7591_v21, 1  ;;  %v7693_v41 = vpop.f32.mrb[109].mxu1  ;;  %v7593_v27 = vpop.f32.mrb[98].mxu0  ;;  %v16909_v11 = vld [vmem:[%s19230_s16 + $0x4b8] ss:$40 sps:$4 sm:$0xff]   ;;  %v19745_v25 = vld [vmem:[#allocation70_spill] sm:$0xff] }
 0xb08   :  { %v16897_v10 = vadd.f32 %v7693_v41, %v7642_v46  ;;  %v7695_v30 = vpop.f32.mrb[110].mxu1  ;;  %v7594_v14 = vpop.f32.mrb[99].mxu0  ;;  %v16902_v44 = vsel %vm9627_vm10, %v9629_v31, %v19738_v0  ;;  %v19744_v27 = vld [vmem:[#allocation68_spill] sm:$0xff]  ;;  %v16962_v21 = vld [vmem:[%s19230_s16 + $0x5ac] ss:$40 sps:$4 sm:$0xff]  }
 0xb09   :  { %19736 = vst [vmem:[#allocation103_spill] sm:$0xff] %v16893_v53  ;;  %19739 = vst [vmem:[#allocation105_spill] sm:$0xff] %v16902_v44  ;;  %v19398_v2 = vrot.slane %v16893_v53, 1  ;;  %v9653_v20 = vsel %vm9627_vm10, %v9639_v36, 0.0  ;;  %8173 = vmatpush1.bf16.msra.mxu0 %v16909_v11  ;;  %v7696_v46 = vpop.f32.mrb[111].mxu1  ;;  %v16920_v41 = vsel %vm9627_vm10, %v9632_v52, %v9639_v36  ;;  %v19792_v53 = vld [vmem:[#allocation55_spill] sm:$0xff] }
 0xb0a   :  { %19737 = vst [vmem:[#allocation104_spill] sm:$0xff] %v16897_v10  ;;  %8275 = vmatpush1.bf16.msra.mxu1 %v16186_v1  ;;  %v16916_v14 = vld [vmem:[%s19230_s16 + $0x50c] ss:$40 sps:$4 sm:$0xff]   ;;  %19740 = vst [vmem:[#allocation106_spill] sm:$0xff] %v16920_v41  ;;  %v16924_v31 = vsel %vm9769_vm12, %v9653_v20, 0.0  ;;  %v19746_v46 = vld [vmem:[#allocation73_spill] sm:$0xff] }
 0xb0b   :  { %8193 = vmatprep.subr.bf16.mxu0 %v16916_v14  ;;  %19741 = vst [vmem:[#allocation107_spill] sm:$0xff] %v16924_v31  ;;  %8295 = vmatprep.subr.bf16.mxu1 %v16198_v9  ;;  %v9654_v1 = vsel %vm9627_vm10, %v19398_v2, 0.0  ;;  %v16940_v52 = vld [vmem:[%s19230_s16 + $0x508] ss:$40 sps:$4 sm:$0xff]   ;;  %v16948_v36 = vld [vmem:[%s19230_s16 + $0x55c] ss:$40 sps:$4 sm:$0xff]  }
 0xb0c   :  { %8175 = vmatmul.mubr.bf16.vlgmr.msra.gmra.mrb[120].mxu0 %v16576_v4  ;;  %v16933_v0 = vsel %vm9769_vm12, %v9654_v1, 0.0  ;;  %v19743_v9 = vld [vmem:[#allocation66_spill] sm:$0xff]  ;;  %v16955_v30 = vld [vmem:[%s19230_s16 + $0x558] ss:$40 sps:$4 sm:$0xff]   ;;  %v16980_v1 = vld [vmem:[%s19230_s16 + $0x5fc] ss:$40 sps:$4 sm:$0xff]  }
 0xb0d   :  { %19742 = vst [vmem:[#allocation108_spill] sm:$0xff] %v16933_v0  ;;  %8277 = vmatmul.mubr.bf16.vlgmr.msra.gmra.mrb[128].mxu1 %v16576_v4  ;;  %8184 = vmatprep.mubr.bf16.mxu0 %v16581_v56  ;;  %v16972_v20 = vld [vmem:[%s19230_s16 + $0x5a8] ss:$40 sps:$4 sm:$0xff]   ;;  %19747 = vst [vmem:[#allocation66_spill] sm:$0xff] %v16980_v1  ;;  %v19757_v10 = vld [vmem:[#allocation80_spill] sm:$0xff] }
 0xb0e   :  { %8194 = vmatpush1.bf16.msra.mxu0 %v16940_v52  ;;  %8286 = vmatprep.mubr.bf16.mxu1 %v16581_v56  ;;  %v19756_v2 = vld [vmem:[#allocation46_spill] sm:$0xff]  ;;  %v19765_v0 = vld [vmem:[#allocation84_spill] sm:$0xff]  ;;  %v19766_v31 = vld [vmem:[#allocation41_spill] sm:$0xff] }
 0xb0f   :  { %8296 = vmatpush1.bf16.msra.mxu1 %v19743_v9  ;;  %8195 = vmatprep.subr.bf16.mxu0 %v16948_v36  ;;  %v16987_v9 = vld [vmem:[%s19230_s16 + $0x5f8] ss:$40 sps:$4 sm:$0xff]  }
 0xb10   :  { %8297 = vmatprep.subr.bf16.mxu1 %v19744_v27  ;;  %19749 = vst [vmem:[#allocation68_spill] sm:$0xff] %v16987_v9  ;;  %v16994_v27 = vld [vmem:[%s19230_s16 + $0x1c] ss:$40 sps:$4 sm:$0xff]  }
 0xb11   :  { %19750 = vst [vmem:[#allocation70_spill] sm:$0xff] %v16994_v27  ;;  %v19768_v41 = vld [vmem:[#allocation44_spill] sm:$0xff] }
 0xb12   :  { %8196 = vmatpush1.bf16.msra.mxu0 %v16955_v30 }
 0xb13   :  { %8298 = vmatpush1.bf16.msra.mxu1 %v19745_v25  ;;  %8197 = vmatprep.subr.bf16.mxu0 %v16962_v21  ;;  %v17005_v25 = vld [vmem:[%s19230_s16 + $0x18] ss:$40 sps:$4 sm:$0xff]  }
 0xb14   :  { %8185 = vmatmul.mubr.bf16.gmra.mrb[124].mxu0 %v16614_v43  ;;  %8299 = vmatprep.subr.bf16.mxu1 %v16248_v47  ;;  %v19748_v47 = vld [vmem:[#allocation75_spill] sm:$0xff]  ;;  %19751 = vst [vmem:[#allocation73_spill] sm:$0xff] %v17005_v25 }
 0xb15   :  { %8287 = vmatmul.mubr.bf16.gmra.mrb[132].mxu1 %v16614_v43  ;;  %8225 = vmatprep.mubr.bf16.mxu0 %v19549_v28 }
 0xb16   :  { %8198 = vmatpush1.bf16.msra.mxu0 %v16972_v20  ;;  %8327 = vmatprep.mubr.bf16.mxu1 %v19549_v28 }
 0xb17   :  { %8300 = vmatpush1.bf16.msra.mxu1 %v19746_v46  ;;  %8199 = vmatprep.subr.bf16.mxu0 %v16980_v1  ;;  %v19753_v46 = vld [vmem:[#allocation78_spill] sm:$0xff] }
 0xb18   :  { %8301 = vmatprep.subr.bf16.mxu1 %v19748_v47  ;;  %v19755_v47 = vld [vmem:[#allocation79_spill] sm:$0xff] }
 0xb1a   :  { %8200 = vmatpush1.bf16.msra.mxu0 %v16987_v9 }
 0xb1b   :  { %8302 = vmatpush1.bf16.msra.mxu1 %v16287_v39  ;;  %8346 = vmatprep.subr.bf16.mxu0 %v16994_v27  ;;  %v19752_v39 = vld [vmem:[#allocation42_spill] sm:$0xff]  ;;  %v19812_v27 = vld [vmem:[#allocation63_spill] sm:$0xff] }
 0xb1c   :  { %8448 = vmatprep.subr.bf16.mxu1 %v16300_v34  ;;  %v19754_v34 = vld [vmem:[#allocation31_spill] sm:$0xff] }
 0xb1d   :  { %11068 = vmatmul.mubr.msk.bf16.vlgmr.msra.gmra.mrb[120].mxu0 %vm1176_vm2, %v16439_v6 }
 0xb1e   :  { %11070 = vmatmul.mubr.msk.bf16.vlgmr.msra.gmra.mrb[128].mxu1 %vm1176_vm2, %v16439_v6  ;;  %8347 = vmatpush1.bf16.msra.mxu0 %v17005_v25 }
 0xb1f   :  { %8449 = vmatpush1.bf16.msra.mxu1 %v16308_v29  ;;  %8348 = vmatprep.subr.bf16.mxu0 %v19752_v39  ;;  %v19758_v29 = vld [vmem:[#allocation33_spill] sm:$0xff] }
 0xb20   :  { %8450 = vmatprep.subr.bf16.mxu1 %v19753_v46  ;;  %8235 = vmatprep.mubr.bf16.mxu0 %v19549_v28  ;;  %v19759_v39 = vld [vmem:[#allocation81_spill] sm:$0xff]  ;;  %v19760_v46 = vld [vmem:[#allocation36_spill] sm:$0xff] }
 0xb21   :  { %8337 = vmatprep.mubr.bf16.mxu1 %v19549_v28 }
 0xb22   :  { %8349 = vmatpush1.bf16.msra.mxu0 %v19754_v34  ;;  %v19761_v34 = vld [vmem:[#allocation82_spill] sm:$0xff] }
 0xb23   :  { %8451 = vmatpush1.bf16.msra.mxu1 %v19755_v47  ;;  %8350 = vmatprep.subr.bf16.mxu0 %v19756_v2  ;;  %v19762_v2 = vld [vmem:[#allocation37_spill] sm:$0xff]  ;;  %v19764_v47 = vld [vmem:[#allocation40_spill] sm:$0xff] }
 0xb24   :  { %8452 = vmatprep.subr.bf16.mxu1 %v19757_v10  ;;  %v19763_v10 = vld [vmem:[#allocation83_spill] sm:$0xff] }
 0xb25   :  { %11069 = vmatmul.mubr.msk.bf16.gmra.mrb[124].mxu0 %vm1176_vm2, %v16460_v35 }
 0xb26   :  { %11071 = vmatmul.mubr.msk.bf16.gmra.mrb[132].mxu1 %vm1176_vm2, %v16460_v35  ;;  %8351 = vmatpush1.bf16.msra.mxu0 %v19758_v29  ;;  %v19767_v29 = vld [vmem:[#allocation85_spill] sm:$0xff] }
 0xb27   :  { %8378 = vmatprep.mubr.bf16.mxu0 %v16450_v45  ;;  %8453 = vmatpush1.bf16.msra.mxu1 %v19759_v39  ;;  %v19769_v39 = vld [vmem:[#allocation86_spill] sm:$0xff] }
 0xb28   :  { %8480 = vmatprep.mubr.bf16.mxu1 %v16450_v45  ;;  %8352 = vmatprep.subr.bf16.mxu0 %v19760_v46  ;;  %v19770_v45 = vld [vmem:[#allocation47_spill] sm:$0xff] }
 0xb29   :  { %8454 = vmatprep.subr.bf16.mxu1 %v19761_v34  ;;  %v19771_v46 = vld [vmem:[#allocation87_spill] sm:$0xff]  ;;  %v19772_v34 = vld [vmem:[#allocation6_spill] sm:$0xff] }
 0xb2a   :  { %8353 = vmatpush1.bf16.msra.mxu0 %v19762_v2  ;;  %v19773_v2 = vld [vmem:[#allocation88_spill] sm:$0xff] }
 0xb2b   :  { %8455 = vmatpush1.bf16.msra.mxu1 %v19763_v10  ;;  %8354 = vmatprep.subr.bf16.mxu0 %v19764_v47  ;;  %v19774_v10 = vld [vmem:[#allocation7_spill] sm:$0xff]  ;;  %v19775_v47 = vld [vmem:[#allocation18_spill] sm:$0xff] }
 0xb2c   :  { %8456 = vmatprep.subr.bf16.mxu1 %v19765_v0  ;;  %v19776_v0 = vld [vmem:[#allocation8_spill] sm:$0xff] }
 0xb2e   :  { %8355 = vmatpush1.bf16.msra.mxu0 %v19766_v31  ;;  %v19777_v31 = vld [vmem:[#allocation9_spill] sm:$0xff] }
 0xb2f   :  { %8457 = vmatpush1.bf16.msra.mxu1 %v19767_v29  ;;  %8356 = vmatprep.subr.bf16.mxu0 %v19768_v41  ;;  %v19778_v29 = vld [vmem:[#allocation48_spill] sm:$0xff]  ;;  %v19779_v41 = vld [vmem:[#allocation10_spill] sm:$0xff] }
 0xb30   :  { %8458 = vmatprep.subr.bf16.mxu1 %v19769_v39  ;;  %v19780_v39 = vld [vmem:[#allocation49_spill] sm:$0xff] }
 0xb32   :  { %8357 = vmatpush1.bf16.msra.mxu0 %v19770_v45  ;;  %v19781_v45 = vld [vmem:[#allocation19_spill] sm:$0xff] }
 0xb33   :  { %8459 = vmatpush1.bf16.msra.mxu1 %v19771_v46  ;;  %8358 = vmatprep.subr.bf16.mxu0 %v19772_v34  ;;  %v19782_v46 = vld [vmem:[#allocation50_spill] sm:$0xff]  ;;  %v19783_v34 = vld [vmem:[#allocation20_spill] sm:$0xff] }
 0xb34   :  { %8460 = vmatprep.subr.bf16.mxu1 %v19773_v2  ;;  %v19784_v2 = vld [vmem:[#allocation51_spill] sm:$0xff] }
 0xb36   :  { %8359 = vmatpush1.bf16.msra.mxu0 %v19774_v10  ;;  %v19785_v10 = vld [vmem:[#allocation11_spill] sm:$0xff] }
 0xb37   :  { %8461 = vmatpush1.bf16.msra.mxu1 %v19775_v47  ;;  %8360 = vmatprep.subr.bf16.mxu0 %v19776_v0  ;;  %v19786_v47 = vld [vmem:[#allocation52_spill] sm:$0xff] }
 0xb38   :  { %8462 = vmatprep.subr.bf16.mxu1 %v19777_v31  ;;  %v19787_v0 = vld [vmem:[#allocation12_spill] sm:$0xff]  ;;  %v19788_v31 = vld [vmem:[#allocation53_spill] sm:$0xff] }
 0xb3a   :  { %8361 = vmatpush1.bf16.msra.mxu0 %v19778_v29  ;;  %v19789_v29 = vld [vmem:[#allocation21_spill] sm:$0xff] }
 0xb3b   :  { %8463 = vmatpush1.bf16.msra.mxu1 %v19779_v41  ;;  %8362 = vmatprep.subr.bf16.mxu0 %v19780_v39  ;;  %v19790_v41 = vld [vmem:[#allocation54_spill] sm:$0xff] }
 0xb3c   :  { %8464 = vmatprep.subr.bf16.mxu1 %v19781_v45  ;;  %v19791_v45 = vld [vmem:[#allocation22_spill] sm:$0xff] }
 0xb3e   :  { %8363 = vmatpush1.bf16.msra.mxu0 %v19782_v46 }
 0xb3f   :  { %8465 = vmatpush1.bf16.msra.mxu1 %v19783_v34  ;;  %8364 = vmatprep.subr.bf16.mxu0 %v19784_v2  ;;  %v19793_v34 = vld [vmem:[#allocation89_spill] sm:$0xff] }
 0xb40   :  { %8466 = vmatprep.subr.bf16.mxu1 %v19785_v10 }
 0xb42   :  { %8365 = vmatpush1.bf16.msra.mxu0 %v19786_v47  ;;  %v19795_v47 = vld [vmem:[#allocation57_spill] sm:$0xff] }
 0xb43   :  { %8467 = vmatpush1.bf16.msra.mxu1 %v19787_v0  ;;  %8366 = vmatprep.subr.bf16.mxu0 %v19788_v31  ;;  %v19796_v0 = vld [vmem:[#allocation14_spill] sm:$0xff] }
 0xb44   :  { %8468 = vmatprep.subr.bf16.mxu1 %v19789_v29  ;;  %v19797_v31 = vld [vmem:[#allocation58_spill] sm:$0xff] }
 0xb46   :  { %8367 = vmatpush1.bf16.msra.mxu0 %v19790_v41  ;;  %v7742_v39 = vpop.f32.mrb[104].mxu0  ;;  %v19799_v41 = vld [vmem:[#allocation24_spill] sm:$0xff] }
 0xb47   :  { %8469 = vmatpush1.bf16.msra.mxu1 %v19791_v45  ;;  %v7744_v46 = vpop.f32.mrb[105].mxu0  ;;  %8368 = vmatprep.subr.bf16.mxu0 %v19792_v53 }
 0xb48   :  { %8470 = vmatprep.subr.bf16.mxu1 %v19793_v34  ;;  %v7746_v2 = vpop.f32.mrb[106].mxu0  ;;  %v19800_v34 = vld [vmem:[#allocation59_spill] sm:$0xff] }
 0xb49   :  { %v7747_v10 = vpop.f32.mrb[107].mxu0 }
 0xb4a   :  { %8369 = vmatpush1.bf16.msra.mxu0 %v19794_v51  ;;  %v19802_v51 = vld [vmem:[#allocation15_spill] sm:$0xff] }
 0xb4b   :  { %8471 = vmatpush1.bf16.msra.mxu1 %v16489_v63  ;;  %8370 = vmatprep.subr.bf16.mxu0 %v19795_v47 }
 0xb4c   :  { %8472 = vmatprep.subr.bf16.mxu1 %v19796_v0  ;;  %v19804_v0 = vld [vmem:[#allocation60_spill] sm:$0xff] }
 0xb4e   :  { %8371 = vmatpush1.bf16.msra.mxu0 %v19797_v31  ;;  %v17064_v29 = vpop.f32.mrb[100].mxu0 }
 0xb4f   :  { %19798 = vst [vmem:[#allocation75_spill] sm:$0xff] %v17064_v29  ;;  %8473 = vmatpush1.bf16.msra.mxu1 %v19799_v41  ;;  %v17067_v45 = vpop.f32.mrb[112].mxu1  ;;  %v17069_v53 = vpop.f32.mrb[101].mxu0  ;;  %8372 = vmatprep.subr.bf16.mxu0 %v19800_v34  ;;  %v19806_v41 = vld [vmem:[#allocation16_spill] sm:$0xff]  ;;  %v19807_v29 = vld [vmem:[#allocation61_spill] sm:$0xff]  ;;  %v19809_v34 = vld [vmem:[#allocation62_spill] sm:$0xff] }
 0xb50   :  { %v17072_v2 = vpop.f32.mrb[113].mxu1  ;;  %8474 = vmatprep.subr.bf16.mxu1 %v19802_v51  ;;  %v17075_v63 = vpop.f32.mrb[102].mxu0  ;;  %v19810_v51 = vld [vmem:[#allocation26_spill] sm:$0xff] }
 0xb51   :  { %19801 = vst [vmem:[#allocation42_spill] sm:$0xff] %v17072_v2  ;;  %19803 = vst [vmem:[#allocation78_spill] sm:$0xff] %v17075_v63  ;;  %v17077_v10 = vpop.f32.mrb[114].mxu1  ;;  %v17079_v47 = vpop.f32.mrb[103].mxu0 }
 0xb52   :  { %8373 = vmatpush1.bf16.msra.mxu0 %v19804_v0  ;;  %v17082_v31 = vpop.f32.mrb[115].mxu1 }
 0xb53   :  { %19805 = vst [vmem:[#allocation31_spill] sm:$0xff] %v17082_v31  ;;  %8475 = vmatpush1.bf16.msra.mxu1 %v19806_v41  ;;  %8374 = vmatprep.subr.bf16.mxu0 %v19807_v29  ;;  %v19813_v41 = vld [vmem:[#allocation17_spill] sm:$0xff] }
 0xb54   :  { %8476 = vmatprep.subr.bf16.mxu1 %v19808_v48 }
 0xb56   :  { %8375 = vmatpush1.bf16.msra.mxu0 %v19809_v34  ;;  %v7793_v44 = vpop.f32.mrb[108].mxu0  ;;  %v19814_v34 = vld [vmem:[#allocation64_spill] sm:$0xff] }
 0xb57   :  { %8477 = vmatpush1.bf16.msra.mxu1 %v19810_v51  ;;  %v17089_v63 = vadd.f32 %v7793_v44, %v7742_v39  ;;  %v17091_v2 = vpop.f32.mrb[116].mxu1  ;;  %v7795_v25 = vpop.f32.mrb[109].mxu0  ;;  %8376 = vmatprep.subr.bf16.mxu0 %v19812_v27  ;;  %v19815_v44 = vld [vmem:[#allocation65_spill] sm:$0xff]  ;;  %v19816_v27 = vld [vmem:[#allocation67_spill] sm:$0xff] }
 0xb58   :  { %v17094_v0 = vadd.f32 %v7795_v25, %v7744_v46  ;;  %v17096_v31 = vpop.f32.mrb[117].mxu1  ;;  %8478 = vmatprep.subr.bf16.mxu1 %v19813_v41  ;;  %v7797_v29 = vpop.f32.mrb[110].mxu0  ;;  %v19828_v25 = vld [vmem:[#allocation38_spill] sm:$0xff] }
 0xb59   :  { %19811 = vst [vmem:[#allocation79_spill] sm:$0xff] %v17089_v63  ;;  %v7899_v48 = vpop.f32.mrb[118].mxu1  ;;  %v7798_v9 = vpop.f32.mrb[111].mxu0  ;;  %v17308_v39 = vld [vmem:[%s19230_s16 + $0x3c4] ss:$40 sps:$4 sm:$0xff]   ;;  %v19830_v29 = vld [vmem:[#allocation91_spill] sm:$0xff] }
 0xb5a   :  { %8377 = vmatpush1.bf16.msra.mxu0 %v19814_v34  ;;  %v7900_v1 = vpop.f32.mrb[119].mxu1  ;;  %v19817_v9 = vld [vmem:[#allocation69_spill] sm:$0xff]  ;;  %v19829_v46 = vld [vmem:[#allocation90_spill] sm:$0xff] }
 0xb5b   :  { %8479 = vmatpush1.bf16.msra.mxu1 %v16549_v50  ;;  %8397 = vmatprep.subr.bf16.mxu0 %v19815_v44  ;;  %v19818_v50 = vld [vmem:[#allocation71_spill] sm:$0xff]  ;;  %v17315_v51 = vld [vmem:[%s19230_s16 + $0x3c0] ss:$40 sps:$4 sm:$0xff]  }
 0xb5c   :  { %8499 = vmatprep.subr.bf16.mxu1 %v16556_v17  ;;  %v19819_v17 = vld [vmem:[#allocation72_spill] sm:$0xff] }
 0xb5d   :  { %8379 = vmatmul.mubr.bf16.vlgmr.msra.gmra.mrb[128].mxu0 %v16576_v4  ;;  %v17301_v1 = vld [vmem:[%s19230_s16 + $0x370] ss:$40 sps:$4 sm:$0xff]   ;;  %v17326_v44 = vld [vmem:[%s19230_s16 + $0x414] ss:$40 sps:$4 sm:$0xff]  }
 0xb5e   :  { %8481 = vmatmul.mubr.bf16.vlgmr.msra.gmra.mrb[136].mxu1 %v16576_v4  ;;  %8388 = vmatprep.mubr.bf16.mxu0 %v16581_v56  ;;  %v19820_v4 = vld [vmem:[#allocation74_spill] sm:$0xff]  ;;  %v17525_v63 = vld [vmem:[%s19230_s16 + $0xb8] ss:$40 sps:$4 sm:$0xff]  }
 0xb5f   :  { %8398 = vmatpush1.bf16.msra.mxu0 %v19816_v27  ;;  %8490 = vmatprep.mubr.bf16.mxu1 %v16581_v56  ;;  %v17128_v56 = vld [vmem:[%s19230_s16 + $0x4] ss:$40 sps:$4 sm:$0xff]   ;;  %19854 = vst [vmem:[#allocation44_spill] sm:$0xff] %v17525_v63 }
 0xb60   :  { %8500 = vmatpush1.bf16.msra.mxu1 %v16565_v3  ;;  %8399 = vmatprep.subr.bf16.mxu0 %v19817_v9  ;;  %v19822_v3 = vld [vmem:[#allocation77_spill] sm:$0xff] }
 0xb61   :  { %8501 = vmatprep.subr.bf16.mxu1 %v16571_v42  ;;  %v19821_v42 = vld [vmem:[#allocation76_spill] sm:$0xff] }
 0xb63   :  { %8400 = vmatpush1.bf16.msra.mxu0 %v19818_v50  ;;  %v19831_v50 = vld [vmem:[#allocation93_spill] sm:$0xff] }
 0xb64   :  { %8502 = vmatpush1.bf16.msra.mxu1 %v16590_v7  ;;  %8401 = vmatprep.subr.bf16.mxu0 %v19819_v17  ;;  %v17139_v7 = vld [vmem:[%s19230_s16] ss:$40 sps:$4 sm:$0xff]  }
 0xb65   :  { %8389 = vmatmul.mubr.bf16.gmra.mrb[132].mxu0 %v16614_v43  ;;  %8503 = vmatprep.subr.bf16.mxu1 %v16597_v37  ;;  %v17146_v37 = vld [vmem:[%s19230_s16 + $0x54] ss:$40 sps:$4 sm:$0xff]  }
 0xb66   :  { %8491 = vmatmul.mubr.bf16.gmra.mrb[140].mxu1 %v16614_v43  ;;  %8429 = vmatprep.mubr.bf16.mxu0 %v19549_v28  ;;  %v19823_v43 = vld [vmem:[#allocation32_spill] sm:$0xff] }
 0xb67   :  { %8402 = vmatpush1.bf16.msra.mxu0 %v19820_v4  ;;  %8531 = vmatprep.mubr.bf16.mxu1 %v19549_v28 }
 0xb68   :  { %8504 = vmatpush1.bf16.msra.mxu1 %v16604_v32  ;;  %8403 = vmatprep.subr.bf16.mxu0 %v19821_v42  ;;  %v17162_v32 = vld [vmem:[%s19230_s16 + $0xa4] ss:$40 sps:$4 sm:$0xff]  }
 0xb69   :  { %8505 = vmatprep.subr.bf16.mxu1 %v16611_v62  ;;  %v17173_v62 = vld [vmem:[%s19230_s16 + $0xa0] ss:$40 sps:$4 sm:$0xff]  }
 0xb6b   :  { %8404 = vmatpush1.bf16.msra.mxu0 %v19822_v3 }
 0xb6c   :  { %8506 = vmatpush1.bf16.msra.mxu1 %v16624_v26  ;;  %8562 = vmatprep.subr.bf16.mxu0 %v17128_v56  ;;  %v17182_v26 = vld [vmem:[%s19230_s16 + $0xf4] ss:$40 sps:$4 sm:$0xff]  }
 0xb6d   :  { %8664 = vmatprep.subr.bf16.mxu1 %v16635_v13  ;;  %v17196_v13 = vld [vmem:[%s19230_s16 + $0x144] ss:$40 sps:$4 sm:$0xff]  }
 0xb6e   :  { %11072 = vmatmul.mubr.msk.bf16.vlgmr.msra.gmra.mrb[128].mxu0 %vm1176_vm2, %v16439_v6 }
 0xb6f   :  { %11074 = vmatmul.mubr.msk.bf16.vlgmr.msra.gmra.mrb[136].mxu1 %vm1176_vm2, %v16439_v6  ;;  %8563 = vmatpush1.bf16.msra.mxu0 %v17139_v7  ;;  %v17155_v6 = vld [vmem:[%s19230_s16 + $0x50] ss:$40 sps:$4 sm:$0xff]  }
 0xb70   :  { %8665 = vmatpush1.bf16.msra.mxu1 %v16646_v61  ;;  %8564 = vmatprep.subr.bf16.mxu0 %v17146_v37  ;;  %v17203_v61 = vld [vmem:[%s19230_s16 + $0x140] ss:$40 sps:$4 sm:$0xff]  }
 0xb71   :  { %8666 = vmatprep.subr.bf16.mxu1 %v16653_v59  ;;  %8439 = vmatprep.mubr.bf16.mxu0 %v19549_v28  ;;  %v17210_v59 = vld [vmem:[%s19230_s16 + $0x194] ss:$40 sps:$4 sm:$0xff]  }
 0xb72   :  { %8541 = vmatprep.mubr.bf16.mxu1 %v19549_v28 }
 0xb73   :  { %8565 = vmatpush1.bf16.msra.mxu0 %v17155_v6 }
 0xb74   :  { %8667 = vmatpush1.bf16.msra.mxu1 %v16662_v33  ;;  %8566 = vmatprep.subr.bf16.mxu0 %v17162_v32  ;;  %v17217_v33 = vld [vmem:[%s19230_s16 + $0x190] ss:$40 sps:$4 sm:$0xff]  }
 0xb75   :  { %8668 = vmatprep.subr.bf16.mxu1 %v16669_v24  ;;  %v17224_v24 = vld [vmem:[%s19230_s16 + $0x1e4] ss:$40 sps:$4 sm:$0xff]  }
 0xb76   :  { %11073 = vmatmul.mubr.msk.bf16.gmra.mrb[132].mxu0 %vm1176_vm2, %v16460_v35 }
 0xb77   :  { %11075 = vmatmul.mubr.msk.bf16.gmra.mrb[140].mxu1 %vm1176_vm2, %v16460_v35  ;;  %8567 = vmatpush1.bf16.msra.mxu0 %v17173_v62  ;;  %v17189_v35 = vld [vmem:[%s19230_s16 + $0xf0] ss:$40 sps:$4 sm:$0xff]  }
 0xb78   :  { %8594 = vmatprep.mubr.bf16.mxu0 %v19823_v43  ;;  %8669 = vmatpush1.bf16.msra.mxu1 %v16680_v49  ;;  %v17231_v49 = vld [vmem:[%s19230_s16 + $0x1e0] ss:$40 sps:$4 sm:$0xff]  }
 0xb79   :  { %8696 = vmatprep.mubr.bf16.mxu1 %v19823_v43  ;;  %8568 = vmatprep.subr.bf16.mxu0 %v17182_v26 }
 0xb7a   :  { %8670 = vmatprep.subr.bf16.mxu1 %v16689_v18  ;;  %v17238_v18 = vld [vmem:[%s19230_s16 + $0x234] ss:$40 sps:$4 sm:$0xff]  }
 0xb7b   :  { %8569 = vmatpush1.bf16.msra.mxu0 %v17189_v35 }
 0xb7c   :  { %8671 = vmatpush1.bf16.msra.mxu1 %v16696_v38  ;;  %8570 = vmatprep.subr.bf16.mxu0 %v17196_v13  ;;  %v17245_v38 = vld [vmem:[%s19230_s16 + $0x230] ss:$40 sps:$4 sm:$0xff]  }
 0xb7d   :  { %8672 = vmatprep.subr.bf16.mxu1 %v16703_v22  ;;  %v17252_v22 = vld [vmem:[%s19230_s16 + $0x284] ss:$40 sps:$4 sm:$0xff]  }
 0xb7f   :  { %8571 = vmatpush1.bf16.msra.mxu0 %v17203_v61 }
 0xb80   :  { %8673 = vmatpush1.bf16.msra.mxu1 %v16710_v54  ;;  %8572 = vmatprep.subr.bf16.mxu0 %v17210_v59  ;;  %v17259_v54 = vld [vmem:[%s19230_s16 + $0x280] ss:$40 sps:$4 sm:$0xff]  }
 0xb81   :  { %8674 = vmatprep.subr.bf16.mxu1 %v16717_v16  ;;  %v17266_v16 = vld [vmem:[%s19230_s16 + $0x2d4] ss:$40 sps:$4 sm:$0xff]  }
 0xb83   :  { %8573 = vmatpush1.bf16.msra.mxu0 %v17217_v33 }
 0xb84   :  { %8675 = vmatpush1.bf16.msra.mxu1 %v16724_v5  ;;  %8574 = vmatprep.subr.bf16.mxu0 %v17224_v24  ;;  %v17273_v5 = vld [vmem:[%s19230_s16 + $0x2d0] ss:$40 sps:$4 sm:$0xff]  }
 0xb85   :  { %8676 = vmatprep.subr.bf16.mxu1 %v16731_v57  ;;  %v19824_v57 = vld [vmem:[#allocation34_spill] sm:$0xff] }
 0xb87   :  { %8575 = vmatpush1.bf16.msra.mxu0 %v17231_v49 }
 0xb88   :  { %8677 = vmatpush1.bf16.msra.mxu1 %v16738_v58  ;;  %8576 = vmatprep.subr.bf16.mxu0 %v17238_v18  ;;  %v17280_v58 = vld [vmem:[%s19230_s16 + $0x324] ss:$40 sps:$4 sm:$0xff]  }
 0xb89   :  { %8678 = vmatprep.subr.bf16.mxu1 %v16745_v12  ;;  %v19825_v12 = vld [vmem:[#allocation27_spill] sm:$0xff] }
 0xb8b   :  { %8577 = vmatpush1.bf16.msra.mxu0 %v17245_v38 }
 0xb8c   :  { %8679 = vmatpush1.bf16.msra.mxu1 %v16753_v19  ;;  %8578 = vmatprep.subr.bf16.mxu0 %v17252_v22  ;;  %v17287_v19 = vld [vmem:[%s19230_s16 + $0x320] ss:$40 sps:$4 sm:$0xff]  }
 0xb8d   :  { %8680 = vmatprep.subr.bf16.mxu1 %v16760_v60  ;;  %v19826_v60 = vld [vmem:[#allocation28_spill] sm:$0xff] }
 0xb8f   :  { %8579 = vmatpush1.bf16.msra.mxu0 %v17259_v54 }
 0xb90   :  { %8681 = vmatpush1.bf16.msra.mxu1 %v16770_v40  ;;  %8580 = vmatprep.subr.bf16.mxu0 %v17266_v16  ;;  %v17294_v40 = vld [vmem:[%s19230_s16 + $0x374] ss:$40 sps:$4 sm:$0xff]  }
 0xb91   :  { %8682 = vmatprep.subr.bf16.mxu1 %v16777_v8  ;;  %v19827_v8 = vld [vmem:[#allocation35_spill] sm:$0xff] }
 0xb93   :  { %8581 = vmatpush1.bf16.msra.mxu0 %v17273_v5 }
 0xb94   :  { %8683 = vmatpush1.bf16.msra.mxu1 %v19824_v57  ;;  %8582 = vmatprep.subr.bf16.mxu0 %v17280_v58 }
 0xb95   :  { %8684 = vmatprep.subr.bf16.mxu1 %v19825_v12  ;;  %v17340_v12 = vld [vmem:[%s19230_s16 + $0x410] ss:$40 sps:$4 sm:$0xff]  }
 0xb97   :  { %8583 = vmatpush1.bf16.msra.mxu0 %v17287_v19 }
 0xb98   :  { %8685 = vmatpush1.bf16.msra.mxu1 %v19826_v60  ;;  %8584 = vmatprep.subr.bf16.mxu0 %v17294_v40 }
 0xb99   :  { %8686 = vmatprep.subr.bf16.mxu1 %v19827_v8 }
 0xb9b   :  { %8585 = vmatpush1.bf16.msra.mxu0 %v17301_v1 }
 0xb9c   :  { %8687 = vmatpush1.bf16.msra.mxu1 %v19828_v25  ;;  %8586 = vmatprep.subr.bf16.mxu0 %v17308_v39  ;;  %v19832_v25 = vld [vmem:[#allocation39_spill] sm:$0xff] }
 0xb9d   :  { %8688 = vmatprep.subr.bf16.mxu1 %v19829_v46 }
 0xb9f   :  { %8587 = vmatpush1.bf16.msra.mxu0 %v17315_v51  ;;  %v17318_v41 = vpop.f32.mrb[112].mxu0 }
 0xba0   :  { %8689 = vmatpush1.bf16.msra.mxu1 %v19830_v29  ;;  %v8125_v48 = vpop.f32.mrb[120].mxu1  ;;  %v17321_v34 = vpop.f32.mrb[113].mxu0  ;;  %8588 = vmatprep.subr.bf16.mxu0 %v17326_v44 }
 0xba1   :  { %v9842_v27 = vadd.f32 %v8125_v48, %v17069_v53  ;;  %v8127_v9 = vpop.f32.mrb[121].mxu1  ;;  %8690 = vmatprep.subr.bf16.mxu1 %v19831_v50  ;;  %v17331_v17 = vpop.f32.mrb[114].mxu0  ;;  %v17372_v48 = vld [vmem:[%s19230_s16 + $0x4b4] ss:$40 sps:$4 sm:$0xff]  }
 0xba2   :  { %v9843_v4 = vadd.f32 %v8127_v9, %v17067_v45  ;;  %v8129_v42 = vpop.f32.mrb[122].mxu1  ;;  %v17334_v3 = vpop.f32.mrb[115].mxu0  ;;  %v17350_v45 = vld [vmem:[%s19230_s16 + $0x464] ss:$40 sps:$4 sm:$0xff]  }
 0xba3   :  { %v9845_v57 = vadd.f32 %v8129_v42, %v17079_v47  ;;  %8589 = vmatpush1.bf16.msra.mxu0 %v17340_v12  ;;  %v8131_v53 = vpop.f32.mrb[123].mxu1  ;;  %9947 = vrot.lane.b32.xlu1 %v9842_v27, %s13073_s8  ;;  %v17357_v47 = vld [vmem:[%s19230_s16 + $0x460] ss:$40 sps:$4 sm:$0xff]   ;;  %v17380_v42 = vld [vmem:[%s19230_s16 + $0x4b0] ss:$40 sps:$4 sm:$0xff]  }
 0xba4   :  { %8691 = vmatpush1.bf16.msra.mxu1 %v16848_v15  ;;  %v9846_v60 = vadd.f32 %v8131_v53, %v17077_v10  ;;  %9949 = vrot.lane.b32.xlu0 %v9843_v4, %s13073_s8  ;;  %v19833_v27 = vld [vmem:[#allocation102_spill] sm:$0xff] }
 0xba5   :  { %8590 = vmatprep.subr.bf16.mxu0 %v17350_v45  ;;  %8692 = vmatprep.subr.bf16.mxu1 %v16860_v23  ;;  %v6278_v23 = vmax.f32 %v19832_v25, 0.0  ;;  %v19834_v53 = vld [vmem:[#allocation30_spill] sm:$0xff] }
 0xba7   :  { %8591 = vmatpush1.bf16.msra.mxu0 %v17357_v47  ;;  %9955 = vrot.lane.b32.xlu1 %v9846_v60, %s13073_s8  ;;  %v17361_v15 = vpop.f32.mrb[116].mxu0 }
 0xba8   :  { %8693 = vmatpush1.bf16.msra.mxu1 %v16880_v55  ;;  %v8135_v10 = vpop.f32.mrb[124].mxu1  ;;  %9953 = vrot.lane.b32.xlu0 %v9845_v57, %s13073_s8  ;;  %v17365_v8 = vpop.f32.mrb[117].mxu0  ;;  %v17386_v57 = vpack.c.bf16 %v6278_v23, %v6278_v23  ;;  %v17419_v23 = vld [vmem:[%s19230_s16 + $0x550] ss:$40 sps:$4 sm:$0xff]  }
 0xba9   :  { %v9848_v46 = vadd.f32 %v8135_v10, %v17094_v0  ;;  %v8137_v29 = vpop.f32.mrb[125].mxu1  ;;  %8592 = vmatprep.subr.bf16.mxu0 %v17372_v48  ;;  %8694 = vmatprep.subr.bf16.mxu1 %v19833_v27  ;;  %v8001_v55 = vpop.f32.mrb[118].mxu0  ;;  %v17402_v10 = vld [vmem:[%s19230_s16 + $0x500] ss:$40 sps:$4 sm:$0xff]  }
 0xbaa   :  { %v9849_v9 = vadd.f32 %v8137_v29, %v17091_v2  ;;  %v8139_v50 = vpop.f32.mrb[126].mxu1  ;;  %v8002_v4 = vpop.f32.mrb[119].mxu0  ;;  %v17391_v2 = vld [vmem:[%s19230_s16 + $0x504] ss:$40 sps:$4 sm:$0xff]   ;;  %v19840_v29 = vld [vmem:[#allocation68_spill] sm:$0xff]  ;;  %v19843_v55 = vld [vmem:[#allocation43_spill] sm:$0xff] }
 0xbab   :  { %8593 = vmatpush1.bf16.msra.mxu0 %v17380_v42  ;;  %v8140_v0 = vpop.f32.mrb[127].mxu1  ;;  %9959 = vrot.lane.b32.xlu1 %v9848_v46, %s13073_s8  ;;  %v17451_v46 = vld [vmem:[%s19230_s16 + $0x5f0] ss:$40 sps:$4 sm:$0xff]   ;;  %v19842_v27 = vld [vmem:[#allocation70_spill] sm:$0xff]  ;;  %v19845_v50 = vld [vmem:[#allocation73_spill] sm:$0xff] }
 0xbac   :  { %8695 = vmatpush1.bf16.msra.mxu1 %v16909_v11  ;;  %9961 = vrot.lane.b32.xlu0 %v9849_v9, %s13073_s8  ;;  %v19835_v11 = vld [vmem:[#allocation29_spill] sm:$0xff]  ;;  %19839 = vst [vmem:[#allocation33_spill] sm:$0xff] %v17451_v46  ;;  %v17469_v9 = vld [vmem:[%s19230_s16 + $0x10] ss:$40 sps:$4 sm:$0xff]   ;;  %v17482_v0 = vld [vmem:[%s19230_s16 + $0x6c] ss:$40 sps:$4 sm:$0xff]  }
 0xbad   :  { %8613 = vmatprep.subr.bf16.mxu0 %v17391_v2  ;;  %8715 = vmatprep.subr.bf16.mxu1 %v16916_v14  ;;  %v6277_v60 = vmax.f32 %v19835_v11, 0.0  ;;  %v17410_v14 = vld [vmem:[%s19230_s16 + $0x554] ss:$40 sps:$4 sm:$0xff]   ;;  %19844 = vst [vmem:[#allocation36_spill] sm:$0xff] %v17469_v9  ;;  %v17476_v4 = vld [vmem:[%s19230_s16 + $0x64] ss:$40 sps:$4 sm:$0xff]  }
 0xbae   :  { %8595 = vmatmul.mubr.bf16.vlgmr.msra.gmra.mrb[136].mxu0 %v19834_v53  ;;  %19846 = vst [vmem:[#allocation82_spill] sm:$0xff] %v17476_v4  ;;  %19847 = vst [vmem:[#allocation37_spill] sm:$0xff] %v17482_v0  ;;  %v17490_v11 = vld [vmem:[%s19230_s16 + $0x60] ss:$40 sps:$4 sm:$0xff]  }
 0xbaf   :  { %8697 = vmatmul.mubr.bf16.vlgmr.msra.gmra.mrb[144].mxu1 %v19834_v53  ;;  %8604 = vmatprep.mubr.bf16.mxu0 %v17386_v57  ;;  %v17414_v25 = vpack.c.bf16 %v6277_v60, %v6277_v60  ;;  %19848 = vst [vmem:[#allocation83_spill] sm:$0xff] %v17490_v11  ;;  %v17496_v60 = vld [vmem:[%s19230_s16 + $0x68] ss:$40 sps:$4 sm:$0xff]  }
 0xbb0   :  { %8614 = vmatpush1.bf16.msra.mxu0 %v17402_v10  ;;  %8706 = vmatprep.mubr.bf16.mxu1 %v17386_v57  ;;  %19849 = vst [vmem:[#allocation40_spill] sm:$0xff] %v17496_v60 }
 0xbb1   :  { %8716 = vmatpush1.bf16.msra.mxu1 %v16940_v52  ;;  %8615 = vmatprep.subr.bf16.mxu0 %v17410_v14  ;;  %v17426_v52 = vld [vmem:[%s19230_s16 + $0x5a4] ss:$40 sps:$4 sm:$0xff]  }
 0xbb2   :  { %8717 = vmatprep.subr.bf16.mxu1 %v16948_v36  ;;  %v17436_v36 = vld [vmem:[%s19230_s16 + $0x5a0] ss:$40 sps:$4 sm:$0xff]  }
 0xbb3   :  { %19836 = vst [vmem:[#allocation46_spill] sm:$0xff] %v17436_v36 }
 0xbb4   :  { %8616 = vmatpush1.bf16.msra.mxu0 %v17419_v23 }
 0xbb5   :  { %8718 = vmatpush1.bf16.msra.mxu1 %v16955_v30  ;;  %8617 = vmatprep.subr.bf16.mxu0 %v17426_v52  ;;  %v17444_v30 = vld [vmem:[%s19230_s16 + $0x5f4] ss:$40 sps:$4 sm:$0xff]  }
 0xbb6   :  { %8605 = vmatmul.mubr.bf16.gmra.mrb[140].mxu0 %v17414_v25  ;;  %8719 = vmatprep.subr.bf16.mxu1 %v16962_v21  ;;  %19837 = vst [vmem:[#allocation80_spill] sm:$0xff] %v17444_v30  ;;  %v19838_v21 = vld [vmem:[#allocation66_spill] sm:$0xff] }
 0xbb7   :  { %8707 = vmatmul.mubr.bf16.gmra.mrb[148].mxu1 %v17414_v25  ;;  %8645 = vmatprep.mubr.bf16.mxu0 %v19549_v28 }
 0xbb8   :  { %8618 = vmatpush1.bf16.msra.mxu0 %v17436_v36  ;;  %8747 = vmatprep.mubr.bf16.mxu1 %v19549_v28 }
 0xbb9   :  { %8720 = vmatpush1.bf16.msra.mxu1 %v16972_v20  ;;  %8619 = vmatprep.subr.bf16.mxu0 %v17444_v30  ;;  %v17458_v20 = vld [vmem:[%s19230_s16 + $0x14] ss:$40 sps:$4 sm:$0xff]  }
 0xbba   :  { %8721 = vmatprep.subr.bf16.mxu1 %v19838_v21  ;;  %19841 = vst [vmem:[#allocation81_spill] sm:$0xff] %v17458_v20  ;;  %v17502_v21 = vld [vmem:[%s19230_s16 + $0xb4] ss:$40 sps:$4 sm:$0xff]  }
 0xbbb   :  { %19850 = vst [vmem:[#allocation84_spill] sm:$0xff] %v17502_v21 }
 0xbbc   :  { %8620 = vmatpush1.bf16.msra.mxu0 %v17451_v46 }
 0xbbd   :  { %8722 = vmatpush1.bf16.msra.mxu1 %v19840_v29  ;;  %8766 = vmatprep.subr.bf16.mxu0 %v17458_v20  ;;  %v17508_v29 = vld [vmem:[%s19230_s16 + $0xbc] ss:$40 sps:$4 sm:$0xff]  }
 0xbbe   :  { %8868 = vmatprep.subr.bf16.mxu1 %v19842_v27  ;;  %19851 = vst [vmem:[#allocation41_spill] sm:$0xff] %v17508_v29  ;;  %v19852_v27 = vld [vmem:[#allocation45_spill] sm:$0xff] }
 0xbbf   :  { %11076 = vmatmul.mubr.msk.bf16.vlgmr.msra.gmra.mrb[136].mxu0 %vm1176_vm2, %v19843_v55 }
 0xbc0   :  { %11078 = vmatmul.mubr.msk.bf16.vlgmr.msra.gmra.mrb[144].mxu1 %vm1176_vm2, %v19843_v55  ;;  %8767 = vmatpush1.bf16.msra.mxu0 %v17469_v9 }
 0xbc1   :  { %8869 = vmatpush1.bf16.msra.mxu1 %v19845_v50  ;;  %8768 = vmatprep.subr.bf16.mxu0 %v17476_v4  ;;  %v17518_v50 = vld [vmem:[%s19230_s16 + $0xb0] ss:$40 sps:$4 sm:$0xff]  }
 0xbc2   :  { %8870 = vmatprep.subr.bf16.mxu1 %v17482_v0  ;;  %8655 = vmatprep.mubr.bf16.mxu0 %v19549_v28  ;;  %19853 = vst [vmem:[#allocation85_spill] sm:$0xff] %v17518_v50  ;;  %v17550_v0 = vld [vmem:[%s19230_s16 + $0x108] ss:$40 sps:$4 sm:$0xff]  }
 0xbc3   :  { %8757 = vmatprep.mubr.bf16.mxu1 %v19549_v28  ;;  %19858 = vst [vmem:[#allocation6_spill] sm:$0xff] %v17550_v0 }
 0xbc4   :  { %8769 = vmatpush1.bf16.msra.mxu0 %v17490_v11 }
 0xbc5   :  { %8871 = vmatpush1.bf16.msra.mxu1 %v17496_v60  ;;  %8770 = vmatprep.subr.bf16.mxu0 %v17502_v21  ;;  %v17538_v60 = vld [vmem:[%s19230_s16 + $0x10c] ss:$40 sps:$4 sm:$0xff]  }
 0xbc6   :  { %8872 = vmatprep.subr.bf16.mxu1 %v17508_v29  ;;  %v17532_v29 = vld [vmem:[%s19230_s16 + $0x104] ss:$40 sps:$4 sm:$0xff]   ;;  %19856 = vst [vmem:[#allocation47_spill] sm:$0xff] %v17538_v60 }
 0xbc7   :  { %11077 = vmatmul.mubr.msk.bf16.gmra.mrb[140].mxu0 %vm1176_vm2, %v19852_v27  ;;  %19855 = vst [vmem:[#allocation86_spill] sm:$0xff] %v17532_v29 }
 0xbc8   :  { %11079 = vmatmul.mubr.msk.bf16.gmra.mrb[148].mxu1 %vm1176_vm2, %v19852_v27  ;;  %8771 = vmatpush1.bf16.msra.mxu0 %v17518_v50  ;;  %v17766_v50 = vld [vmem:[%s19230_s16 + $0x3d8] ss:$40 sps:$4 sm:$0xff]  }
 0xbc9   :  { %8798 = vmatprep.mubr.bf16.mxu0 %v19823_v43  ;;  %8873 = vmatpush1.bf16.msra.mxu1 %v17525_v63  ;;  %v17544_v63 = vld [vmem:[%s19230_s16 + $0x100] ss:$40 sps:$4 sm:$0xff]   ;;  %19894 = vst [vmem:[#allocation17_spill] sm:$0xff] %v17766_v50 }
 0xbca   :  { %8900 = vmatprep.mubr.bf16.mxu1 %v19823_v43  ;;  %8772 = vmatprep.subr.bf16.mxu0 %v17532_v29  ;;  %19857 = vst [vmem:[#allocation87_spill] sm:$0xff] %v17544_v63  ;;  %v17556_v29 = vld [vmem:[%s19230_s16 + $0x154] ss:$40 sps:$4 sm:$0xff]  }
 0xbcb   :  { %8874 = vmatprep.subr.bf16.mxu1 %v17538_v60  ;;  %19859 = vst [vmem:[#allocation88_spill] sm:$0xff] %v17556_v29  ;;  %v17562_v60 = vld [vmem:[%s19230_s16 + $0x15c] ss:$40 sps:$4 sm:$0xff]  }
 0xbcc   :  { %8773 = vmatpush1.bf16.msra.mxu0 %v17544_v63  ;;  %19860 = vst [vmem:[#allocation7_spill] sm:$0xff] %v17562_v60  ;;  %v17568_v63 = vld [vmem:[%s19230_s16 + $0x150] ss:$40 sps:$4 sm:$0xff]  }
 0xbcd   :  { %8875 = vmatpush1.bf16.msra.mxu1 %v17550_v0  ;;  %8774 = vmatprep.subr.bf16.mxu0 %v17556_v29  ;;  %19861 = vst [vmem:[#allocation18_spill] sm:$0xff] %v17568_v63  ;;  %v17574_v0 = vld [vmem:[%s19230_s16 + $0x158] ss:$40 sps:$4 sm:$0xff]   ;;  %v17580_v29 = vld [vmem:[%s19230_s16 + $0x1a4] ss:$40 sps:$4 sm:$0xff]  }
 0xbce   :  { %8876 = vmatprep.subr.bf16.mxu1 %v17562_v60  ;;  %19862 = vst [vmem:[#allocation8_spill] sm:$0xff] %v17574_v0  ;;  %19863 = vst [vmem:[#allocation9_spill] sm:$0xff] %v17580_v29  ;;  %v17586_v60 = vld [vmem:[%s19230_s16 + $0x1ac] ss:$40 sps:$4 sm:$0xff]  }
 0xbcf   :  { %19864 = vst [vmem:[#allocation48_spill] sm:$0xff] %v17586_v60 }
 0xbd0   :  { %8775 = vmatpush1.bf16.msra.mxu0 %v17568_v63  ;;  %v17592_v63 = vld [vmem:[%s19230_s16 + $0x1a0] ss:$40 sps:$4 sm:$0xff]  }
 0xbd1   :  { %8877 = vmatpush1.bf16.msra.mxu1 %v17574_v0  ;;  %8776 = vmatprep.subr.bf16.mxu0 %v17580_v29  ;;  %19865 = vst [vmem:[#allocation10_spill] sm:$0xff] %v17592_v63  ;;  %v17598_v0 = vld [vmem:[%s19230_s16 + $0x1a8] ss:$40 sps:$4 sm:$0xff]   ;;  %v17604_v29 = vld [vmem:[%s19230_s16 + $0x1f4] ss:$40 sps:$4 sm:$0xff]  }
 0xbd2   :  { %8878 = vmatprep.subr.bf16.mxu1 %v17586_v60  ;;  %19866 = vst [vmem:[#allocation49_spill] sm:$0xff] %v17598_v0  ;;  %19867 = vst [vmem:[#allocation19_spill] sm:$0xff] %v17604_v29  ;;  %v17610_v60 = vld [vmem:[%s19230_s16 + $0x1fc] ss:$40 sps:$4 sm:$0xff]  }
 0xbd3   :  { %19868 = vst [vmem:[#allocation50_spill] sm:$0xff] %v17610_v60 }
 0xbd4   :  { %8777 = vmatpush1.bf16.msra.mxu0 %v17592_v63  ;;  %v17616_v63 = vld [vmem:[%s19230_s16 + $0x1f0] ss:$40 sps:$4 sm:$0xff]  }
 0xbd5   :  { %8879 = vmatpush1.bf16.msra.mxu1 %v17598_v0  ;;  %8778 = vmatprep.subr.bf16.mxu0 %v17604_v29  ;;  %19869 = vst [vmem:[#allocation20_spill] sm:$0xff] %v17616_v63  ;;  %v17622_v0 = vld [vmem:[%s19230_s16 + $0x1f8] ss:$40 sps:$4 sm:$0xff]   ;;  %v17628_v29 = vld [vmem:[%s19230_s16 + $0x244] ss:$40 sps:$4 sm:$0xff]  }
 0xbd6   :  { %8880 = vmatprep.subr.bf16.mxu1 %v17610_v60  ;;  %19870 = vst [vmem:[#allocation51_spill] sm:$0xff] %v17622_v0  ;;  %19871 = vst [vmem:[#allocation11_spill] sm:$0xff] %v17628_v29  ;;  %v17634_v60 = vld [vmem:[%s19230_s16 + $0x24c] ss:$40 sps:$4 sm:$0xff]  }
 0xbd7   :  { %19872 = vst [vmem:[#allocation52_spill] sm:$0xff] %v17634_v60 }
 0xbd8   :  { %8779 = vmatpush1.bf16.msra.mxu0 %v17616_v63  ;;  %v17640_v63 = vld [vmem:[%s19230_s16 + $0x240] ss:$40 sps:$4 sm:$0xff]  }
 0xbd9   :  { %8881 = vmatpush1.bf16.msra.mxu1 %v17622_v0  ;;  %8780 = vmatprep.subr.bf16.mxu0 %v17628_v29  ;;  %19873 = vst [vmem:[#allocation12_spill] sm:$0xff] %v17640_v63  ;;  %v17646_v0 = vld [vmem:[%s19230_s16 + $0x248] ss:$40 sps:$4 sm:$0xff]   ;;  %v17652_v29 = vld [vmem:[%s19230_s16 + $0x294] ss:$40 sps:$4 sm:$0xff]  }
 0xbda   :  { %8882 = vmatprep.subr.bf16.mxu1 %v17634_v60  ;;  %19874 = vst [vmem:[#allocation53_spill] sm:$0xff] %v17646_v0  ;;  %19875 = vst [vmem:[#allocation21_spill] sm:$0xff] %v17652_v29  ;;  %v17658_v60 = vld [vmem:[%s19230_s16 + $0x29c] ss:$40 sps:$4 sm:$0xff]  }
 0xbdb   :  { %19876 = vst [vmem:[#allocation54_spill] sm:$0xff] %v17658_v60 }
 0xbdc   :  { %8781 = vmatpush1.bf16.msra.mxu0 %v17640_v63  ;;  %v17664_v63 = vld [vmem:[%s19230_s16 + $0x290] ss:$40 sps:$4 sm:$0xff]  }
 0xbdd   :  { %8883 = vmatpush1.bf16.msra.mxu1 %v17646_v0  ;;  %8782 = vmatprep.subr.bf16.mxu0 %v17652_v29  ;;  %19877 = vst [vmem:[#allocation22_spill] sm:$0xff] %v17664_v63  ;;  %v17670_v0 = vld [vmem:[%s19230_s16 + $0x298] ss:$40 sps:$4 sm:$0xff]   ;;  %v17676_v29 = vld [vmem:[%s19230_s16 + $0x2e4] ss:$40 sps:$4 sm:$0xff]  }
 0xbde   :  { %8884 = vmatprep.subr.bf16.mxu1 %v17658_v60  ;;  %19878 = vst [vmem:[#allocation55_spill] sm:$0xff] %v17670_v0  ;;  %19879 = vst [vmem:[#allocation89_spill] sm:$0xff] %v17676_v29  ;;  %v17682_v60 = vld [vmem:[%s19230_s16 + $0x2ec] ss:$40 sps:$4 sm:$0xff]  }
 0xbdf   :  { %19880 = vst [vmem:[#allocation56_spill] sm:$0xff] %v17682_v60 }
 0xbe0   :  { %8783 = vmatpush1.bf16.msra.mxu0 %v17664_v63  ;;  %v17688_v63 = vld [vmem:[%s19230_s16 + $0x2e0] ss:$40 sps:$4 sm:$0xff]  }
 0xbe1   :  { %8885 = vmatpush1.bf16.msra.mxu1 %v17670_v0  ;;  %8784 = vmatprep.subr.bf16.mxu0 %v17676_v29  ;;  %19881 = vst [vmem:[#allocation57_spill] sm:$0xff] %v17688_v63  ;;  %v17694_v0 = vld [vmem:[%s19230_s16 + $0x2e8] ss:$40 sps:$4 sm:$0xff]   ;;  %v17700_v29 = vld [vmem:[%s19230_s16 + $0x334] ss:$40 sps:$4 sm:$0xff]  }
 0xbe2   :  { %8886 = vmatprep.subr.bf16.mxu1 %v17682_v60  ;;  %19882 = vst [vmem:[#allocation14_spill] sm:$0xff] %v17694_v0  ;;  %19883 = vst [vmem:[#allocation58_spill] sm:$0xff] %v17700_v29  ;;  %v17706_v60 = vld [vmem:[%s19230_s16 + $0x33c] ss:$40 sps:$4 sm:$0xff]  }
 0xbe3   :  { %19884 = vst [vmem:[#allocation24_spill] sm:$0xff] %v17706_v60 }
 0xbe4   :  { %8785 = vmatpush1.bf16.msra.mxu0 %v17688_v63  ;;  %v17712_v63 = vld [vmem:[%s19230_s16 + $0x330] ss:$40 sps:$4 sm:$0xff]  }
 0xbe5   :  { %8887 = vmatpush1.bf16.msra.mxu1 %v17694_v0  ;;  %8786 = vmatprep.subr.bf16.mxu0 %v17700_v29  ;;  %19885 = vst [vmem:[#allocation59_spill] sm:$0xff] %v17712_v63  ;;  %v17718_v0 = vld [vmem:[%s19230_s16 + $0x338] ss:$40 sps:$4 sm:$0xff]   ;;  %v17724_v29 = vld [vmem:[%s19230_s16 + $0x384] ss:$40 sps:$4 sm:$0xff]  }
 0xbe6   :  { %8888 = vmatprep.subr.bf16.mxu1 %v17706_v60  ;;  %19886 = vst [vmem:[#allocation15_spill] sm:$0xff] %v17718_v0  ;;  %19887 = vst [vmem:[#allocation60_spill] sm:$0xff] %v17724_v29  ;;  %v17730_v60 = vld [vmem:[%s19230_s16 + $0x38c] ss:$40 sps:$4 sm:$0xff]  }
 0xbe7   :  { %19888 = vst [vmem:[#allocation16_spill] sm:$0xff] %v17730_v60 }
 0xbe8   :  { %8787 = vmatpush1.bf16.msra.mxu0 %v17712_v63  ;;  %v17736_v63 = vld [vmem:[%s19230_s16 + $0x380] ss:$40 sps:$4 sm:$0xff]  }
 0xbe9   :  { %8889 = vmatpush1.bf16.msra.mxu1 %v17718_v0  ;;  %8788 = vmatprep.subr.bf16.mxu0 %v17724_v29  ;;  %19889 = vst [vmem:[#allocation61_spill] sm:$0xff] %v17736_v63  ;;  %v17742_v0 = vld [vmem:[%s19230_s16 + $0x388] ss:$40 sps:$4 sm:$0xff]   ;;  %v17748_v29 = vld [vmem:[%s19230_s16 + $0x3d4] ss:$40 sps:$4 sm:$0xff]  }
 0xbea   :  { %8890 = vmatprep.subr.bf16.mxu1 %v17730_v60  ;;  %19890 = vst [vmem:[#allocation25_spill] sm:$0xff] %v17742_v0  ;;  %19891 = vst [vmem:[#allocation62_spill] sm:$0xff] %v17748_v29  ;;  %v17754_v60 = vld [vmem:[%s19230_s16 + $0x3dc] ss:$40 sps:$4 sm:$0xff]  }
 0xbeb   :  { %19892 = vst [vmem:[#allocation26_spill] sm:$0xff] %v17754_v60 }
 0xbec   :  { %8789 = vmatpush1.bf16.msra.mxu0 %v17736_v63  ;;  %v17760_v63 = vld [vmem:[%s19230_s16 + $0x3d0] ss:$40 sps:$4 sm:$0xff]  }
 0xbed   :  { %8891 = vmatpush1.bf16.msra.mxu1 %v17742_v0  ;;  %8790 = vmatprep.subr.bf16.mxu0 %v17748_v29  ;;  %19893 = vst [vmem:[#allocation63_spill] sm:$0xff] %v17760_v63  ;;  %v19895_v29 = vld [vmem:[#allocation42_spill] sm:$0xff] }
 0xbee   :  { %8892 = vmatprep.subr.bf16.mxu1 %v17754_v60  ;;  %v17773_v60 = vld [vmem:[%s19230_s16 + $0x424] ss:$40 sps:$4 sm:$0xff]  }
 0xbf0   :  { %8791 = vmatpush1.bf16.msra.mxu0 %v17760_v63  ;;  %v8227_v0 = vpop.f32.mrb[120].mxu0 }
 0xbf1   :  { %8893 = vmatpush1.bf16.msra.mxu1 %v17766_v50  ;;  %v9844_v21 = vadd.f32 %v8227_v0, %v19895_v29  ;;  %v8329_v11 = vpop.f32.mrb[128].mxu1  ;;  %v8229_v4 = vpop.f32.mrb[121].mxu0  ;;  %8792 = vmatprep.subr.bf16.mxu0 %v17773_v60  ;;  %v17785_v0 = vld [vmem:[%s19230_s16 + $0x42c] ss:$40 sps:$4 sm:$0xff]  }
 0xbf2   :  { %v17777_v63 = vadd.f32 %v8329_v11, %v17321_v34  ;;  %v9851_v9 = vadd.f32 %v8229_v4, %v17318_v41  ;;  %v17780_v20 = vpop.f32.mrb[129].mxu1  ;;  %19897 = vst [vmem:[#allocation65_spill] sm:$0xff] %v17785_v0  ;;  %8894 = vmatprep.subr.bf16.mxu1 %v17785_v0  ;;  %v8231_v29 = vpop.f32.mrb[122].mxu0  ;;  %v19898_v50 = vld [vmem:[#allocation31_spill] sm:$0xff]  ;;  %v17796_v41 = vld [vmem:[%s19230_s16 + $0x420] ss:$40 sps:$4 sm:$0xff]  }
 0xbf3   :  { %v9847_v46 = vadd.f32 %v8231_v29, %v19898_v50  ;;  %v8333_v30 = vpop.f32.mrb[130].mxu1  ;;  %v8233_v36 = vpop.f32.mrb[123].mxu0  ;;  %9951 = vrot.lane.b32.xlu1 %v9844_v21, %s13073_s8  ;;  %v17808_v21 = vld [vmem:[%s19230_s16 + $0x428] ss:$40 sps:$4 sm:$0xff]   ;;  %v17963_v0 = vld [vmem:[%s19230_s16 + $0x60c] ss:$40 sps:$4 sm:$0xff]  }
 0xbf4   :  { %19896 = vst [vmem:[#allocation64_spill] sm:$0xff] %v17777_v63  ;;  %v17791_v34 = vadd.f32 %v8333_v30, %v17334_v3  ;;  %8793 = vmatpush1.bf16.msra.mxu0 %v17796_v41  ;;  %v17800_v4 = vadd.f32 %v8233_v36, %v17331_v17  ;;  %v17802_v11 = vpop.f32.mrb[131].mxu1  ;;  %9986 = vrot.lane.b32.xlu0 %v9851_v9, %s13073_s8  ;;  %19901 = vst [vmem:[#allocation71_spill] sm:$0xff] %v17808_v21  ;;  %v17814_v3 = vld [vmem:[%s19230_s16 + $0x474] ss:$40 sps:$4 sm:$0xff]  }
 0xbf5   :  { %8895 = vmatpush1.bf16.msra.mxu1 %v17808_v21  ;;  %8794 = vmatprep.subr.bf16.mxu0 %v17814_v3  ;;  %v17820_v17 = vld [vmem:[%s19230_s16 + $0x47c] ss:$40 sps:$4 sm:$0xff]   ;;  %v17826_v36 = vld [vmem:[%s19230_s16 + $0x470] ss:$40 sps:$4 sm:$0xff]   ;;  %19916 = vst [vmem:[#allocation102_spill] sm:$0xff] %v17963_v0 }
 0xbf6   :  { %19899 = vst [vmem:[#allocation67_spill] sm:$0xff] %v17791_v34  ;;  %19900 = vst [vmem:[#allocation69_spill] sm:$0xff] %v17800_v4  ;;  %8896 = vmatprep.subr.bf16.mxu1 %v17820_v17  ;;  %v17833_v9 = vld [vmem:[%s19230_s16 + $0x478] ss:$40 sps:$4 sm:$0xff]   ;;  %v17840_v34 = vld [vmem:[%s19230_s16 + $0x4c4] ss:$40 sps:$4 sm:$0xff]  }
 0xbf7   :  { %19902 = vst [vmem:[#allocation72_spill] sm:$0xff] %v17820_v17  ;;  %19903 = vst [vmem:[#allocation74_spill] sm:$0xff] %v17833_v9 }
 0xbf8   :  { %8795 = vmatpush1.bf16.msra.mxu0 %v17826_v36  ;;  %9957 = vrot.lane.b32.xlu0 %v9847_v46, %s13073_s8  ;;  %v8237_v30 = vpop.f32.mrb[124].mxu0 }
 0xbf9   :  { %8897 = vmatpush1.bf16.msra.mxu1 %v17833_v9  ;;  %v8339_v50 = vpop.f32.mrb[132].mxu1  ;;  %v9850_v29 = vadd.f32 %v8237_v30, %v17096_v31  ;;  %v8239_v4 = vpop.f32.mrb[125].mxu0  ;;  %8796 = vmatprep.subr.bf16.mxu0 %v17840_v34  ;;  %v17854_v31 = vld [vmem:[%s19230_s16 + $0x4cc] ss:$40 sps:$4 sm:$0xff]  }
 0xbfa   :  { %v17844_v46 = vadd.f32 %v8339_v50, %v17365_v8  ;;  %v17847_v63 = vadd.f32 %v8239_v4, %v17361_v15  ;;  %v17849_v17 = vpop.f32.mrb[133].mxu1  ;;  %19906 = vst [vmem:[#allocation32_spill] sm:$0xff] %v17854_v31  ;;  %8898 = vmatprep.subr.bf16.mxu1 %v17854_v31  ;;  %v8241_v30 = vpop.f32.mrb[126].mxu0  ;;  %v17861_v8 = vld [vmem:[%s19230_s16 + $0x4c0] ss:$40 sps:$4 sm:$0xff]  }
 0xbfb   :  { %v8343_v9 = vpop.f32.mrb[134].mxu1  ;;  %v8242_v21 = vpop.f32.mrb[127].mxu0  ;;  %9963 = vrot.lane.b32.xlu1 %v9850_v29, %s13073_s8  ;;  %v17867_v4 = vld [vmem:[%s19230_s16 + $0x4c8] ss:$40 sps:$4 sm:$0xff]   ;;  %v17895_v29 = vld [vmem:[%s19230_s16 + $0x518] ss:$40 sps:$4 sm:$0xff]  }
 0xbfc   :  { %19904 = vst [vmem:[#allocation76_spill] sm:$0xff] %v17844_v46  ;;  %19905 = vst [vmem:[#allocation77_spill] sm:$0xff] %v17847_v63  ;;  %8797 = vmatpush1.bf16.msra.mxu0 %v17861_v8  ;;  %v8344_v15 = vpop.f32.mrb[135].mxu1  ;;  %v17873_v21 = vld [vmem:[%s19230_s16 + $0x514] ss:$40 sps:$4 sm:$0xff]   ;;  %v17910_v63 = vpop.permute.xlu1 %9086 }
 0xbfd   :  { %19907 = vst [vmem:[#allocation34_spill] sm:$0xff] %v17867_v4  ;;  %8899 = vmatpush1.bf16.msra.mxu1 %v17867_v4  ;;  %8817 = vmatprep.subr.bf16.mxu0 %v17873_v21  ;;  %v17879_v9 = vld [vmem:[%s19230_s16 + $0x51c] ss:$40 sps:$4 sm:$0xff]   ;;  %v17888_v50 = vld [vmem:[%s19230_s16 + $0x510] ss:$40 sps:$4 sm:$0xff]   ;;  %19909 = vst [vmem:[#allocation28_spill] sm:$0xff] %v17895_v29 }
 0xbfe   :  { %19908 = vst [vmem:[#allocation27_spill] sm:$0xff] %v17879_v9  ;;  %8919 = vmatprep.subr.bf16.mxu1 %v17879_v9  ;;  %v17901_v30 = vld [vmem:[%s19230_s16 + $0x564] ss:$40 sps:$4 sm:$0xff]   ;;  %v17915_v46 = vld [vmem:[%s19230_s16 + $0x560] ss:$40 sps:$4 sm:$0xff]  }
 0xbff   :  { %8799 = vmatmul.mubr.bf16.vlgmr.msra.gmra.mrb[144].mxu0 %v19834_v53  ;;  %v17907_v15 = vld [vmem:[%s19230_s16 + $0x56c] ss:$40 sps:$4 sm:$0xff]   ;;  %v17934_v9 = vld [vmem:[%s19230_s16 + $0x5bc] ss:$40 sps:$4 sm:$0xff]   ;;  %v17949_v4 = vld [vmem:[%s19230_s16 + $0x5b8] ss:$40 sps:$4 sm:$0xff]  }
 0xc00   :  { %8901 = vmatmul.mubr.bf16.vlgmr.msra.gmra.mrb[152].mxu1 %v19834_v53  ;;  %8808 = vmatprep.mubr.bf16.mxu0 %v17386_v57  ;;  %19910 = vst [vmem:[#allocation35_spill] sm:$0xff] %v17907_v15  ;;  %19912 = vst [vmem:[#allocation90_spill] sm:$0xff] %v17934_v9  ;;  %v17958_v31 = vpop.permute.xlu1 %9090 }
 0xc01   :  { %8818 = vmatpush1.bf16.msra.mxu0 %v17888_v50  ;;  %8910 = vmatprep.mubr.bf16.mxu1 %v17386_v57  ;;  %19914 = vst [vmem:[#allocation93_spill] sm:$0xff] %v17949_v4 }
 0xc02   :  { %8920 = vmatpush1.bf16.msra.mxu1 %v17895_v29  ;;  %8819 = vmatprep.subr.bf16.mxu0 %v17901_v30  ;;  %v17921_v29 = vld [vmem:[%s19230_s16 + $0x568] ss:$40 sps:$4 sm:$0xff]  }
 0xc03   :  { %8921 = vmatprep.subr.bf16.mxu1 %v17907_v15  ;;  %19911 = vst [vmem:[#allocation38_spill] sm:$0xff] %v17921_v29  ;;  %v17927_v15 = vld [vmem:[%s19230_s16 + $0x5b4] ss:$40 sps:$4 sm:$0xff]  }
 0xc05   :  { %8820 = vmatpush1.bf16.msra.mxu0 %v17915_v46 }
 0xc06   :  { %8922 = vmatpush1.bf16.msra.mxu1 %v17921_v29  ;;  %8821 = vmatprep.subr.bf16.mxu0 %v17927_v15  ;;  %v17942_v29 = vld [vmem:[%s19230_s16 + $0x5b0] ss:$40 sps:$4 sm:$0xff]  }
 0xc07   :  { %8809 = vmatmul.mubr.bf16.gmra.mrb[148].mxu0 %v17414_v25  ;;  %8923 = vmatprep.subr.bf16.mxu1 %v17934_v9  ;;  %19913 = vst [vmem:[#allocation91_spill] sm:$0xff] %v17942_v29  ;;  %v17955_v9 = vld [vmem:[%s19230_s16 + $0x604] ss:$40 sps:$4 sm:$0xff]  }
 0xc08   :  { %8911 = vmatmul.mubr.bf16.gmra.mrb[156].mxu1 %v17414_v25  ;;  %8849 = vmatprep.mubr.bf16.mxu0 %v19549_v28  ;;  %19915 = vst [vmem:[#allocation39_spill] sm:$0xff] %v17955_v9 }
 0xc09   :  { %8822 = vmatpush1.bf16.msra.mxu0 %v17942_v29  ;;  %8951 = vmatprep.mubr.bf16.mxu1 %v19549_v28  ;;  %v17981_v29 = vld [vmem:[%s19230_s16 + $0x24] ss:$40 sps:$4 sm:$0xff]  }
 0xc0a   :  { %8924 = vmatpush1.bf16.msra.mxu1 %v17949_v4  ;;  %8823 = vmatprep.subr.bf16.mxu0 %v17955_v9  ;;  %v17969_v4 = vld [vmem:[%s19230_s16 + $0x600] ss:$40 sps:$4 sm:$0xff]   ;;  %19919 = vst [vmem:[#allocation66_spill] sm:$0xff] %v17981_v29 }
 0xc0b   :  { %8925 = vmatprep.subr.bf16.mxu1 %v17963_v0  ;;  %19917 = vst [vmem:[#allocation30_spill] sm:$0xff] %v17969_v4  ;;  %v17975_v9 = vld [vmem:[%s19230_s16 + $0x608] ss:$40 sps:$4 sm:$0xff]   ;;  %v17987_v0 = vpop.permute.xlu1 %9088 }
 0xc0c   :  { %19918 = vst [vmem:[#allocation29_spill] sm:$0xff] %v17975_v9 }
 0xc0d   :  { %8824 = vmatpush1.bf16.msra.mxu0 %v17969_v4  ;;  %v17997_v4 = vpop.permute.xlu0 %9092 }
 0xc0e   :  { %8926 = vmatpush1.bf16.msra.mxu1 %v17975_v9  ;;  %8970 = vmatprep.subr.bf16.mxu0 %v17981_v29  ;;  %v17994_v9 = vld [vmem:[%s19230_s16 + $0x20] ss:$40 sps:$4 sm:$0xff]  }
 0xc0f   :  { %9108 = vmatprep.subr.bf16.mxu1 %v17128_v56  ;;  %19920 = vst [vmem:[#allocation68_spill] sm:$0xff] %v17994_v9  ;;  %v18003_v56 = vld [vmem:[%s19230_s16 + $0x74] ss:$40 sps:$4 sm:$0xff]  }
 0xc10   :  { %11080 = vmatmul.mubr.msk.bf16.vlgmr.msra.gmra.mrb[144].mxu0 %vm1176_vm2, %v19843_v55  ;;  %19921 = vst [vmem:[#allocation70_spill] sm:$0xff] %v18003_v56 }
 0xc11   :  { %11082 = vmatmul.mubr.msk.bf16.vlgmr.msra.gmra.mrb[152].mxu1 %vm1176_vm2, %v19843_v55  ;;  %8971 = vmatpush1.bf16.msra.mxu0 %v17994_v9  ;;  %v18012_v9 = vld [vmem:[%s19230_s16 + $0x70] ss:$40 sps:$4 sm:$0xff]  }
 0xc12   :  { %9109 = vmatpush1.bf16.msra.mxu1 %v17139_v7  ;;  %8972 = vmatprep.subr.bf16.mxu0 %v18003_v56  ;;  %19922 = vst [vmem:[#allocation43_spill] sm:$0xff] %v18012_v9  ;;  %v18021_v56 = vld [vmem:[%s19230_s16 + $0xc4] ss:$40 sps:$4 sm:$0xff]  }
 0xc13   :  { %9110 = vmatprep.subr.bf16.mxu1 %v17146_v37  ;;  %8859 = vmatprep.mubr.bf16.mxu0 %v19549_v28  ;;  %19924 = vst [vmem:[#allocation45_spill] sm:$0xff] %v18021_v56 }
 0xc14   :  { %8961 = vmatprep.mubr.bf16.mxu1 %v19549_v28 }
 0xc15   :  { %8973 = vmatpush1.bf16.msra.mxu0 %v18012_v9  ;;  %v18015_v7 = vpop.permute.xlu1 %9947  ;;  %v18055_v9 = vld [vmem:[%s19230_s16 + $0x114] ss:$40 sps:$4 sm:$0xff]  }
 0xc16   :  { %19923 = vst [vmem:[#allocation73_spill] sm:$0xff] %v18015_v7  ;;  %9111 = vmatpush1.bf16.msra.mxu1 %v17155_v6  ;;  %8974 = vmatprep.subr.bf16.mxu0 %v18021_v56  ;;  %v18024_v37 = vpop.permute.xlu0 %9949  ;;  %v18037_v6 = vld [vmem:[%s19230_s16 + $0xc0] ss:$40 sps:$4 sm:$0xff]   ;;  %19927 = vst [vmem:[#allocation31_spill] sm:$0xff] %v18055_v9 }
 0xc17   :  { %9112 = vmatprep.subr.bf16.mxu1 %v17162_v32  ;;  %v9965_v29 = vsel %vm1176_vm2, %v18015_v7, %v18024_v37  ;;  %v19925_v32 = vld [vmem:[#allocation13_spill] sm:$0xff] }
 0xc18   :  { %11081 = vmatmul.mubr.msk.bf16.gmra.mrb[148].mxu0 %vm1176_vm2, %v19852_v27  ;;  %12680 = vtanh.f32 %v9965_v29  ;;  %v18047_v29 = vsel %vm1176_vm2, %v19925_v32, %v17910_v63 }
 0xc19   :  { %11083 = vmatmul.mubr.msk.bf16.gmra.mrb[156].mxu1 %vm1176_vm2, %v19852_v27  ;;  %8975 = vmatpush1.bf16.msra.mxu0 %v18037_v6  ;;  %v18040_v56 = vpop.permute.xlu1 %9955 }
 0xc1a   :  { %9002 = vmatprep.mubr.bf16.mxu0 %v19823_v43  ;;  %9113 = vmatpush1.bf16.msra.mxu1 %v17173_v62  ;;  %v18049_v7 = vpop.permute.xlu0 %9953  ;;  %v18065_v43 = vld [vmem:[%s19230_s16 + $0x110] ss:$40 sps:$4 sm:$0xff]  }
 0xc1b   :  { %19926 = vst [vmem:[#allocation42_spill] sm:$0xff] %v18049_v7  ;;  %9140 = vmatprep.mubr.bf16.mxu1 %v18047_v29  ;;  %8976 = vmatprep.subr.bf16.mxu0 %v18055_v9  ;;  %v9967_v62 = vsel %vm1176_vm2, %v18049_v7, %v18040_v56  ;;  %v18074_v9 = vld [vmem:[%s19230_s16 + $0x164] ss:$40 sps:$4 sm:$0xff]  }
 0xc1c   :  { %9114 = vmatprep.subr.bf16.mxu1 %v17182_v26  ;;  %12682 = vtanh.f32 %v9967_v62  ;;  %19929 = vst [vmem:[#allocation109_spill] sm:$0xff] %v18074_v9 }
 0xc1d   :  { %8977 = vmatpush1.bf16.msra.mxu0 %v18065_v43  ;;  %v18068_v32 = vpop.permute.xlu1 %9959 }
 0xc1e   :  { %19928 = vst [vmem:[#allocation13_spill] sm:$0xff] %v18068_v32  ;;  %9115 = vmatpush1.bf16.msra.mxu1 %v17189_v35  ;;  %8978 = vmatprep.subr.bf16.mxu0 %v18074_v9  ;;  %v18077_v26 = vpop.permute.xlu0 %9961  ;;  %v18086_v35 = vld [vmem:[%s19230_s16 + $0x160] ss:$40 sps:$4 sm:$0xff]   ;;  %v18093_v9 = vld [vmem:[%s19230_s16 + $0x1b4] ss:$40 sps:$4 sm:$0xff]  }
 0xc1f   :  { %9116 = vmatprep.subr.bf16.mxu1 %v17196_v13  ;;  %v9969_v62 = vsel %vm1176_vm2, %v18068_v32, %v18077_v26  ;;  %v18103_v13 = vld [vmem:[%s19230_s16 + $0x1b0] ss:$40 sps:$4 sm:$0xff]   ;;  %v18220_v32 = vld [vmem:[%s19230_s16 + $0x434] ss:$40 sps:$4 sm:$0xff]  }
 0xc20   :  { %12684 = vtanh.f32 %v9969_v62  ;;  %v18110_v62 = vld [vmem:[%s19230_s16 + $0x204] ss:$40 sps:$4 sm:$0xff]   ;;  %19936 = vst [vmem:[#allocation116_spill] sm:$0xff] %v18220_v32 }
 0xc21   :  { %8979 = vmatpush1.bf16.msra.mxu0 %v18086_v35 }
 0xc22   :  { %v12681_v7 = vpop.eup %12680  ;;  %9117 = vmatpush1.bf16.msra.mxu1 %v17203_v61  ;;  %8980 = vmatprep.subr.bf16.mxu0 %v18093_v9 }
 0xc23   :  { %10280 = vst [vmem:[%s19231_s17 + $0x18] sm:$0xff] %v12681_v7  ;;  %9118 = vmatprep.subr.bf16.mxu1 %v17210_v59  ;;  %v18120_v59 = vld [vmem:[%s19230_s16 + $0x200] ss:$40 sps:$4 sm:$0xff]   ;;  %v18127_v7 = vld [vmem:[%s19230_s16 + $0x254] ss:$40 sps:$4 sm:$0xff]  }
 0xc25   :  { %8981 = vmatpush1.bf16.msra.mxu0 %v18103_v13 }
 0xc26   :  { %v12683_v61 = vpop.eup %12682  ;;  %9119 = vmatpush1.bf16.msra.mxu1 %v17217_v33  ;;  %8982 = vmatprep.subr.bf16.mxu0 %v18110_v62 }
 0xc27   :  { %10300 = vst [vmem:[%s19231_s17 + $0xb8] sm:$0xff] %v12683_v61  ;;  %9120 = vmatprep.subr.bf16.mxu1 %v17224_v24  ;;  %v18137_v24 = vld [vmem:[%s19230_s16 + $0x250] ss:$40 sps:$4 sm:$0xff]  }
 0xc29   :  { %8983 = vmatpush1.bf16.msra.mxu0 %v18120_v59 }
 0xc2a   :  { %v12685_v33 = vpop.eup %12684  ;;  %9121 = vmatpush1.bf16.msra.mxu1 %v17231_v49  ;;  %8984 = vmatprep.subr.bf16.mxu0 %v18127_v7  ;;  %v18144_v49 = vld [vmem:[%s19230_s16 + $0x2a4] ss:$40 sps:$4 sm:$0xff]  }
 0xc2b   :  { %10320 = vst [vmem:[%s19231_s17 + $0x158] sm:$0xff] %v12685_v33  ;;  %9122 = vmatprep.subr.bf16.mxu1 %v17238_v18  ;;  %v18151_v18 = vld [vmem:[%s19230_s16 + $0x2a0] ss:$40 sps:$4 sm:$0xff]  }
 0xc2d   :  { %8985 = vmatpush1.bf16.msra.mxu0 %v18137_v24 }
 0xc2e   :  { %9123 = vmatpush1.bf16.msra.mxu1 %v17245_v38  ;;  %8986 = vmatprep.subr.bf16.mxu0 %v18144_v49  ;;  %v18158_v38 = vld [vmem:[%s19230_s16 + $0x2f4] ss:$40 sps:$4 sm:$0xff]  }
 0xc2f   :  { %9124 = vmatprep.subr.bf16.mxu1 %v17252_v22  ;;  %v18165_v22 = vld [vmem:[%s19230_s16 + $0x2f0] ss:$40 sps:$4 sm:$0xff]  }
 0xc31   :  { %8987 = vmatpush1.bf16.msra.mxu0 %v18151_v18 }
 0xc32   :  { %9125 = vmatpush1.bf16.msra.mxu1 %v17259_v54  ;;  %8988 = vmatprep.subr.bf16.mxu0 %v18158_v38  ;;  %v18172_v54 = vld [vmem:[%s19230_s16 + $0x344] ss:$40 sps:$4 sm:$0xff]  }
 0xc33   :  { %9126 = vmatprep.subr.bf16.mxu1 %v17266_v16  ;;  %19930 = vst [vmem:[#allocation110_spill] sm:$0xff] %v18172_v54  ;;  %v18179_v16 = vld [vmem:[%s19230_s16 + $0x340] ss:$40 sps:$4 sm:$0xff]  }
 0xc34   :  { %19931 = vst [vmem:[#allocation111_spill] sm:$0xff] %v18179_v16 }
 0xc35   :  { %8989 = vmatpush1.bf16.msra.mxu0 %v18165_v22 }
 0xc36   :  { %9127 = vmatpush1.bf16.msra.mxu1 %v17273_v5  ;;  %8990 = vmatprep.subr.bf16.mxu0 %v18172_v54  ;;  %v18186_v5 = vld [vmem:[%s19230_s16 + $0x394] ss:$40 sps:$4 sm:$0xff]  }
 0xc37   :  { %9128 = vmatprep.subr.bf16.mxu1 %v17280_v58  ;;  %19932 = vst [vmem:[#allocation112_spill] sm:$0xff] %v18186_v5  ;;  %v18193_v58 = vld [vmem:[%s19230_s16 + $0x390] ss:$40 sps:$4 sm:$0xff]  }
 0xc38   :  { %19933 = vst [vmem:[#allocation113_spill] sm:$0xff] %v18193_v58 }
 0xc39   :  { %8991 = vmatpush1.bf16.msra.mxu0 %v18179_v16 }
 0xc3a   :  { %9129 = vmatpush1.bf16.msra.mxu1 %v17287_v19  ;;  %8992 = vmatprep.subr.bf16.mxu0 %v18186_v5  ;;  %v18200_v19 = vld [vmem:[%s19230_s16 + $0x3e4] ss:$40 sps:$4 sm:$0xff]  }
 0xc3b   :  { %9130 = vmatprep.subr.bf16.mxu1 %v17294_v40  ;;  %19934 = vst [vmem:[#allocation114_spill] sm:$0xff] %v18200_v19  ;;  %v18207_v40 = vld [vmem:[%s19230_s16 + $0x3e0] ss:$40 sps:$4 sm:$0xff]  }
 0xc3c   :  { %19935 = vst [vmem:[#allocation115_spill] sm:$0xff] %v18207_v40 }
 0xc3d   :  { %8993 = vmatpush1.bf16.msra.mxu0 %v18193_v58  ;;  %v18235_v58 = vld [vmem:[%s19230_s16 + $0x430] ss:$40 sps:$4 sm:$0xff]  }
 0xc3e   :  { %9131 = vmatpush1.bf16.msra.mxu1 %v17301_v1  ;;  %8994 = vmatprep.subr.bf16.mxu0 %v18200_v19  ;;  %19938 = vst [vmem:[#allocation118_spill] sm:$0xff] %v18235_v58 }
 0xc3f   :  { %9132 = vmatprep.subr.bf16.mxu1 %v17308_v39 }
 0xc41   :  { %8995 = vmatpush1.bf16.msra.mxu0 %v18207_v40  ;;  %v18210_v61 = vpop.f32.mrb[128].mxu0 }
 0xc42   :  { %9133 = vmatpush1.bf16.msra.mxu1 %v17315_v51  ;;  %v18213_v1 = vpop.f32.mrb[136].mxu1  ;;  %v18215_v33 = vpop.f32.mrb[129].mxu0  ;;  %8996 = vmatprep.subr.bf16.mxu0 %v18220_v32  ;;  %v18251_v32 = vld [vmem:[%s19230_s16 + $0x480] ss:$40 sps:$4 sm:$0xff]  }
 0xc43   :  { %v18223_v39 = vpop.f32.mrb[137].mxu1  ;;  %9134 = vmatprep.subr.bf16.mxu1 %v17326_v44  ;;  %v18226_v40 = vpop.f32.mrb[130].mxu0  ;;  %v18244_v44 = vld [vmem:[%s19230_s16 + $0x484] ss:$40 sps:$4 sm:$0xff]   ;;  %19941 = vst [vmem:[#allocation121_spill] sm:$0xff] %v18251_v32 }
 0xc44   :  { %19937 = vst [vmem:[#allocation117_spill] sm:$0xff] %v18223_v39  ;;  %v18228_v19 = vpop.f32.mrb[138].mxu1  ;;  %v18230_v51 = vpop.f32.mrb[131].mxu0  ;;  %19940 = vst [vmem:[#allocation120_spill] sm:$0xff] %v18244_v44 }
 0xc45   :  { %8997 = vmatpush1.bf16.msra.mxu0 %v18235_v58  ;;  %v18238_v5 = vpop.f32.mrb[139].mxu1 }
 0xc46   :  { %19939 = vst [vmem:[#allocation119_spill] sm:$0xff] %v18238_v5  ;;  %9135 = vmatpush1.bf16.msra.mxu1 %v17340_v12  ;;  %8998 = vmatprep.subr.bf16.mxu0 %v18244_v44  ;;  %v18264_v44 = vld [vmem:[%s19230_s16 + $0x4d4] ss:$40 sps:$4 sm:$0xff]  }
 0xc47   :  { %9136 = vmatprep.subr.bf16.mxu1 %v17350_v45  ;;  %19942 = vst [vmem:[#allocation122_spill] sm:$0xff] %v18264_v44 }
 0xc49   :  { %8999 = vmatpush1.bf16.msra.mxu0 %v18251_v32  ;;  %v18254_v58 = vpop.f32.mrb[132].mxu0 }
 0xc4a   :  { %9137 = vmatpush1.bf16.msra.mxu1 %v17357_v47  ;;  %v18257_v12 = vpop.f32.mrb[140].mxu1  ;;  %v18259_v5 = vpop.f32.mrb[133].mxu0  ;;  %9000 = vmatprep.subr.bf16.mxu0 %v18264_v44  ;;  %v18273_v47 = vld [vmem:[%s19230_s16 + $0x4d0] ss:$40 sps:$4 sm:$0xff]   ;;  %v18280_v44 = vld [vmem:[%s19230_s16 + $0x524] ss:$40 sps:$4 sm:$0xff]  }
 0xc4b   :  { %v18267_v45 = vpop.f32.mrb[141].mxu1  ;;  %9138 = vmatprep.subr.bf16.mxu1 %v17372_v48  ;;  %v8445_v32 = vpop.f32.mrb[134].mxu0  ;;  %v18288_v48 = vsel %vm1176_vm2, %v17958_v31, %v17997_v4 }
 0xc4c   :  { %v8547_v39 = vpop.f32.mrb[142].mxu1  ;;  %v8446_v16 = vpop.f32.mrb[135].mxu0  ;;  %v19943_v32 = vld [vmem:[#allocation23_spill] sm:$0xff] }
 0xc4d   :  { %9001 = vmatpush1.bf16.msra.mxu0 %v18273_v47  ;;  %v8548_v54 = vpop.f32.mrb[143].mxu1  ;;  %v19948_v16 = vld [vmem:[#allocation81_spill] sm:$0xff]  ;;  %v13001_v39 = vld [vmem:[%s19230_s16 + $0x8] ss:$40 sps:$4 sm:$0xff]  }
 0xc4e   :  { %9139 = vmatpush1.bf16.msra.mxu1 %v17380_v42  ;;  %9021 = vmatprep.subr.bf16.mxu0 %v18280_v44  ;;  %v18295_v42 = vld [vmem:[%s19230_s16 + $0x520] ss:$40 sps:$4 sm:$0xff]   ;;  %v13000_v54 = vld [vmem:[%s19230_s16 + $0xc] ss:$40 sps:$4 sm:$0xff]  }
 0xc4f   :  { %9159 = vmatprep.subr.bf16.mxu1 %v17391_v2  ;;  %v18303_v2 = vld [vmem:[%s19230_s16 + $0x574] ss:$40 sps:$4 sm:$0xff]  }
 0xc50   :  { %9003 = vmatmul.mubr.bf16.vlgmr.msra.gmra.mrb[152].mxu0 %v19834_v53  ;;  %v18317_v53 = vld [vmem:[%s19230_s16 + $0x5c4] ss:$40 sps:$4 sm:$0xff]  }
 0xc51   :  { %9141 = vmatmul.mubr.bf16.vlgmr.msra.gmra.mrb[160].mxu1 %v19943_v32  ;;  %9012 = vmatprep.mubr.bf16.mxu0 %v17386_v57  ;;  %v18310_v57 = vld [vmem:[%s19230_s16 + $0x570] ss:$40 sps:$4 sm:$0xff]  }
 0xc52   :  { %9022 = vmatpush1.bf16.msra.mxu0 %v18295_v42  ;;  %9150 = vmatprep.mubr.bf16.mxu1 %v18288_v48 }
 0xc53   :  { %9160 = vmatpush1.bf16.msra.mxu1 %v17402_v10  ;;  %9023 = vmatprep.subr.bf16.mxu0 %v18303_v2  ;;  %v18323_v10 = vsel %vm1176_vm2, %v17987_v0, %v17958_v31  ;;  %v18347_v0 = vld [vmem:[%s19230_s16 + $0x610] ss:$40 sps:$4 sm:$0xff]   ;;  %v19947_v31 = vld [vmem:[#allocation33_spill] sm:$0xff] }
 0xc54   :  { %9161 = vmatprep.subr.bf16.mxu1 %v17410_v14  ;;  %v18332_v14 = vld [vmem:[%s19230_s16 + $0x5c0] ss:$40 sps:$4 sm:$0xff]   ;;  %19946 = vst [vmem:[#allocation23_spill] sm:$0xff] %v18347_v0 }
 0xc56   :  { %9024 = vmatpush1.bf16.msra.mxu0 %v18310_v57 }
 0xc57   :  { %9162 = vmatpush1.bf16.msra.mxu1 %v17419_v23  ;;  %9025 = vmatprep.subr.bf16.mxu0 %v18317_v53  ;;  %v19944_v23 = vld [vmem:[#allocation46_spill] sm:$0xff] }
 0xc58   :  { %9013 = vmatmul.mubr.bf16.gmra.mrb[156].mxu0 %v17414_v25  ;;  %9163 = vmatprep.subr.bf16.mxu1 %v17426_v52  ;;  %v18340_v25 = vld [vmem:[%s19230_s16 + $0x614] ss:$40 sps:$4 sm:$0xff]  }
 0xc59   :  { %9151 = vmatmul.mubr.bf16.gmra.mrb[164].mxu1 %v18323_v10  ;;  %9053 = vmatprep.mubr.bf16.mxu0 %v19549_v28  ;;  %v19945_v52 = vld [vmem:[#allocation80_spill] sm:$0xff] }
 0xc5a   :  { %9026 = vmatpush1.bf16.msra.mxu0 %v18332_v14  ;;  %9191 = vmatprep.mubr.bf16.mxu1 %v19549_v28 }
 0xc5b   :  { %9164 = vmatpush1.bf16.msra.mxu1 %v19944_v23  ;;  %9027 = vmatprep.subr.bf16.mxu0 %v18340_v25  ;;  %v19949_v23 = vld [vmem:[#allocation36_spill] sm:$0xff] }
 0xc5c   :  { %9165 = vmatprep.subr.bf16.mxu1 %v19945_v52  ;;  %v13002_v52 = vld [vmem:[%s19230_s16 + $0x5c] ss:$40 sps:$4 sm:$0xff]  }
 0xc5e   :  { %9028 = vmatpush1.bf16.msra.mxu0 %v18347_v0  ;;  %v19952_v0 = vld [vmem:[#allocation84_spill] sm:$0xff] }
 0xc5f   :  { %9166 = vmatpush1.bf16.msra.mxu1 %v19947_v31  ;;  %9210 = vmatprep.subr.bf16.mxu0 %v13000_v54  ;;  %v19950_v31 = vld [vmem:[#allocation82_spill] sm:$0xff]  ;;  %v13003_v54 = vld [vmem:[%s19230_s16 + $0x58] ss:$40 sps:$4 sm:$0xff]  }
 0xc60   :  { %9312 = vmatprep.subr.bf16.mxu1 %v19948_v16 }
 0xc61   :  { %11084 = vmatmul.mubr.msk.bf16.vlgmr.msra.gmra.mrb[152].mxu0 %vm1176_vm2, %v19843_v55 }
 0xc62   :  { %11086 = vmatmul.mubr.msk.bf16.vlgmr.msra.gmra.mrb[160].mxu1 %vm1176_vm2, %v17910_v63  ;;  %9211 = vmatpush1.bf16.msra.mxu0 %v13001_v39 }
 0xc63   :  { %9313 = vmatpush1.bf16.msra.mxu1 %v19949_v23  ;;  %9212 = vmatprep.subr.bf16.mxu0 %v13002_v52  ;;  %v19951_v23 = vld [vmem:[#allocation83_spill] sm:$0xff] }
 0xc64   :  { %9314 = vmatprep.subr.bf16.mxu1 %v19950_v31  ;;  %9063 = vmatprep.mubr.bf16.mxu0 %v19549_v28  ;;  %v13004_v52 = vld [vmem:[%s19230_s16 + $0xac] ss:$40 sps:$4 sm:$0xff]  }
 0xc65   :  { %9201 = vmatprep.mubr.bf16.mxu1 %v19549_v28  ;;  %v9952_v55 = vpop.permute.xlu1 %9951 }
 0xc66   :  { %9213 = vmatpush1.bf16.msra.mxu0 %v13003_v54  ;;  %v9966_v16 = vsel %vm1176_vm2, %v18024_v37, %v9952_v55  ;;  %v18374_v39 = vpop.permute.xlu0 %9986  ;;  %v13005_v37 = vld [vmem:[%s19230_s16 + $0xa8] ss:$40 sps:$4 sm:$0xff]  }
 0xc67   :  { %9315 = vmatpush1.bf16.msra.mxu1 %v19951_v23  ;;  %9214 = vmatprep.subr.bf16.mxu0 %v13004_v52  ;;  %12686 = vtanh.f32 %v9966_v16  ;;  %v9998_v31 = vsel %vm1176_vm2, %v9952_v55, %v18374_v39  ;;  %v19954_v16 = vld [vmem:[#allocation85_spill] sm:$0xff]  ;;  %v19955_v55 = vld [vmem:[#allocation86_spill] sm:$0xff] }
 0xc68   :  { %9316 = vmatprep.subr.bf16.mxu1 %v19952_v0  ;;  %12688 = vtanh.f32 %v9998_v31  ;;  %v13007_v52 = vld [vmem:[%s19230_s16 + $0xf8] ss:$40 sps:$4 sm:$0xff]   ;;  %v19957_v31 = vld [vmem:[#allocation87_spill] sm:$0xff] }
 0xc69   :  { %11085 = vmatmul.mubr.msk.bf16.gmra.mrb[156].mxu0 %vm1176_vm2, %v19852_v27  ;;  %v13006_v27 = vld [vmem:[%s19230_s16 + $0xfc] ss:$40 sps:$4 sm:$0xff]  }
 0xc6a   :  { %11087 = vmatmul.mubr.msk.bf16.gmra.mrb[164].mxu1 %vm1176_vm2, %v17997_v4  ;;  %9215 = vmatpush1.bf16.msra.mxu0 %v13005_v37  ;;  %v18390_v54 = vpop.permute.xlu0 %9957  ;;  %v13008_v37 = vld [vmem:[%s19230_s16 + $0x14c] ss:$40 sps:$4 sm:$0xff]  }
 0xc6b   :  { %19953 = vst [vmem:[#allocation46_spill] sm:$0xff] %v18390_v54  ;;  %9242 = vmatprep.mubr.bf16.mxu0 %v18047_v29  ;;  %9317 = vmatpush1.bf16.msra.mxu1 %v19954_v16  ;;  %v9968_v0 = vsel %vm1176_vm2, %v18040_v56, %v18390_v54  ;;  %v19958_v16 = vld [vmem:[#allocation88_spill] sm:$0xff] }
 0xc6c   :  { %9344 = vmatprep.mubr.bf16.mxu1 %v18047_v29  ;;  %9216 = vmatprep.subr.bf16.mxu0 %v13006_v27  ;;  %12690 = vtanh.f32 %v9968_v0 }
 0xc6d   :  { %9318 = vmatprep.subr.bf16.mxu1 %v19955_v55  ;;  %v18402_v23 = vpop.permute.xlu1 %9963  ;;  %v19959_v55 = vld [vmem:[#allocation18_spill] sm:$0xff] }
 0xc6e   :  { %19956 = vst [vmem:[#allocation80_spill] sm:$0xff] %v18402_v23  ;;  %9217 = vmatpush1.bf16.msra.mxu0 %v13007_v52  ;;  %v9970_v56 = vsel %vm1176_vm2, %v18077_v26, %v18402_v23  ;;  %v13009_v26 = vld [vmem:[%s19230_s16 + $0x148] ss:$40 sps:$4 sm:$0xff]   ;;  %v13010_v52 = vld [vmem:[%s19230_s16 + $0x19c] ss:$40 sps:$4 sm:$0xff]  }
 0xc6f   :  { %9319 = vmatpush1.bf16.msra.mxu1 %v19957_v31  ;;  %9218 = vmatprep.subr.bf16.mxu0 %v13008_v37  ;;  %12692 = vtanh.f32 %v9970_v56  ;;  %v19960_v56 = vld [vmem:[#allocation9_spill] sm:$0xff] }
 0xc70   :  { %9320 = vmatprep.subr.bf16.mxu1 %v19958_v16  ;;  %v13011_v37 = vld [vmem:[%s19230_s16 + $0x198] ss:$40 sps:$4 sm:$0xff]   ;;  %v19961_v16 = vld [vmem:[#allocation10_spill] sm:$0xff] }
 0xc71   :  { %v12687_v0 = vpop.eup %12686 }
 0xc72   :  { %v12689_v27 = vpop.eup %12688  ;;  %10281 = vst [vmem:[%s19231_s17 + $0x20] sm:$0xff] %v12687_v0  ;;  %9219 = vmatpush1.bf16.msra.mxu0 %v13009_v26  ;;  %v13012_v0 = vld [vmem:[%s19230_s16 + $0x1ec] ss:$40 sps:$4 sm:$0xff]  }
 0xc73   :  { %10282 = vst [vmem:[%s19231_s17 + $0x28] sm:$0xff] %v12689_v27  ;;  %9321 = vmatpush1.bf16.msra.mxu1 %v19959_v55  ;;  %9220 = vmatprep.subr.bf16.mxu0 %v13010_v52  ;;  %v19962_v27 = vld [vmem:[#allocation19_spill] sm:$0xff]  ;;  %v19963_v52 = vld [vmem:[#allocation20_spill] sm:$0xff] }
 0xc74   :  { %9322 = vmatprep.subr.bf16.mxu1 %v19960_v56  ;;  %v13013_v55 = vld [vmem:[%s19230_s16 + $0x1e8] ss:$40 sps:$4 sm:$0xff]   ;;  %v13014_v56 = vld [vmem:[%s19230_s16 + $0x23c] ss:$40 sps:$4 sm:$0xff]  }
 0xc76   :  { %v12691_v31 = vpop.eup %12690  ;;  %9221 = vmatpush1.bf16.msra.mxu0 %v13011_v37  ;;  %v13015_v37 = vld [vmem:[%s19230_s16 + $0x238] ss:$40 sps:$4 sm:$0xff]  }
 0xc77   :  { %10301 = vst [vmem:[%s19231_s17 + $0xc0] sm:$0xff] %v12691_v31  ;;  %9323 = vmatpush1.bf16.msra.mxu1 %v19961_v16  ;;  %9222 = vmatprep.subr.bf16.mxu0 %v13012_v0  ;;  %v19964_v31 = vld [vmem:[#allocation11_spill] sm:$0xff]  ;;  %v19965_v16 = vld [vmem:[#allocation12_spill] sm:$0xff] }
 0xc78   :  { %9324 = vmatprep.subr.bf16.mxu1 %v19962_v27  ;;  %v13016_v0 = vld [vmem:[%s19230_s16 + $0x28c] ss:$40 sps:$4 sm:$0xff]   ;;  %v19966_v27 = vld [vmem:[#allocation21_spill] sm:$0xff] }
 0xc79   :  { %v12693_v26 = vpop.eup %12692 }
 0xc7a   :  { %10321 = vst [vmem:[%s19231_s17 + $0x160] sm:$0xff] %v12693_v26  ;;  %9223 = vmatpush1.bf16.msra.mxu0 %v13013_v55  ;;  %v13017_v26 = vld [vmem:[%s19230_s16 + $0x288] ss:$40 sps:$4 sm:$0xff]  }
 0xc7b   :  { %9325 = vmatpush1.bf16.msra.mxu1 %v19963_v52  ;;  %9224 = vmatprep.subr.bf16.mxu0 %v13014_v56  ;;  %v19967_v55 = vld [vmem:[#allocation22_spill] sm:$0xff]  ;;  %v13018_v52 = vld [vmem:[%s19230_s16 + $0x2dc] ss:$40 sps:$4 sm:$0xff]  }
 0xc7c   :  { %9326 = vmatprep.subr.bf16.mxu1 %v19964_v31  ;;  %v19968_v56 = vld [vmem:[#allocation89_spill] sm:$0xff] }
 0xc7d   :  { %v13019_v31 = vld [vmem:[%s19230_s16 + $0x2d8] ss:$40 sps:$4 sm:$0xff]  }
 0xc7e   :  { %9225 = vmatpush1.bf16.msra.mxu0 %v13015_v37  ;;  %v19969_v37 = vld [vmem:[#allocation57_spill] sm:$0xff] }
 0xc7f   :  { %9327 = vmatpush1.bf16.msra.mxu1 %v19965_v16  ;;  %9226 = vmatprep.subr.bf16.mxu0 %v13016_v0  ;;  %v13020_v16 = vld [vmem:[%s19230_s16 + $0x32c] ss:$40 sps:$4 sm:$0xff]  }
 0xc80   :  { %9328 = vmatprep.subr.bf16.mxu1 %v19966_v27  ;;  %v19970_v0 = vld [vmem:[#allocation58_spill] sm:$0xff] }
 0xc81   :  { %v13021_v27 = vld [vmem:[%s19230_s16 + $0x328] ss:$40 sps:$4 sm:$0xff]  }
 0xc82   :  { %9227 = vmatpush1.bf16.msra.mxu0 %v13017_v26  ;;  %v19971_v26 = vld [vmem:[#allocation59_spill] sm:$0xff] }
 0xc83   :  { %9329 = vmatpush1.bf16.msra.mxu1 %v19967_v55  ;;  %9228 = vmatprep.subr.bf16.mxu0 %v13018_v52  ;;  %v13022_v55 = vld [vmem:[%s19230_s16 + $0x37c] ss:$40 sps:$4 sm:$0xff]  }
 0xc84   :  { %9330 = vmatprep.subr.bf16.mxu1 %v19968_v56  ;;  %v19972_v52 = vld [vmem:[#allocation60_spill] sm:$0xff] }
 0xc85   :  { %v13023_v56 = vld [vmem:[%s19230_s16 + $0x378] ss:$40 sps:$4 sm:$0xff]  }
 0xc86   :  { %9229 = vmatpush1.bf16.msra.mxu0 %v13019_v31  ;;  %v19973_v31 = vld [vmem:[#allocation61_spill] sm:$0xff] }
 0xc87   :  { %9331 = vmatpush1.bf16.msra.mxu1 %v19969_v37  ;;  %9230 = vmatprep.subr.bf16.mxu0 %v13020_v16  ;;  %v13024_v37 = vld [vmem:[%s19230_s16 + $0x3cc] ss:$40 sps:$4 sm:$0xff]  }
 0xc88   :  { %9332 = vmatprep.subr.bf16.mxu1 %v19970_v0  ;;  %v19974_v16 = vld [vmem:[#allocation62_spill] sm:$0xff] }
 0xc89   :  { %v13025_v0 = vld [vmem:[%s19230_s16 + $0x3c8] ss:$40 sps:$4 sm:$0xff]  }
 0xc8a   :  { %9231 = vmatpush1.bf16.msra.mxu0 %v13021_v27 }
 0xc8b   :  { %9333 = vmatpush1.bf16.msra.mxu1 %v19971_v26  ;;  %9232 = vmatprep.subr.bf16.mxu0 %v13022_v55  ;;  %v19975_v26 = vld [vmem:[#allocation63_spill] sm:$0xff] }
 0xc8c   :  { %9334 = vmatprep.subr.bf16.mxu1 %v19972_v52 }
 0xc8e   :  { %9233 = vmatpush1.bf16.msra.mxu0 %v13023_v56 }
 0xc8f   :  { %9335 = vmatpush1.bf16.msra.mxu1 %v19973_v31  ;;  %9234 = vmatprep.subr.bf16.mxu0 %v13024_v37  ;;  %v13026_v31 = vld [vmem:[%s19230_s16 + $0x41c] ss:$40 sps:$4 sm:$0xff]  }
 0xc90   :  { %9336 = vmatprep.subr.bf16.mxu1 %v19974_v16 }
 0xc92   :  { %9235 = vmatpush1.bf16.msra.mxu0 %v13025_v0  ;;  %v8647_v27 = vpop.f32.mrb[136].mxu0 }
 0xc93   :  { %9337 = vmatpush1.bf16.msra.mxu1 %v19975_v26  ;;  %v18496_v55 = vadd.f32 %v8647_v27, %v17780_v20  ;;  %v8749_v52 = vpop.f32.mrb[144].mxu1  ;;  %v8649_v56 = vpop.f32.mrb[137].mxu0  ;;  %9236 = vmatprep.subr.bf16.mxu0 %v13026_v31 }
 0xc94   :  { %v18502_v37 = vadd.f32 %v8749_v52, %v18215_v33  ;;  %v18505_v16 = vadd.f32 %v8649_v56, %v18210_v61  ;;  %v8751_v0 = vpop.f32.mrb[145].mxu1  ;;  %9338 = vmatprep.subr.bf16.mxu1 %v17773_v60  ;;  %v8651_v26 = vpop.f32.mrb[138].mxu0  ;;  %v13027_v61 = vld [vmem:[%s19230_s16 + $0x418] ss:$40 sps:$4 sm:$0xff]  }
 0xc95   :  { %v18509_v20 = vadd.f32 %v8751_v0, %v18213_v1  ;;  %v18512_v27 = vadd.f32 %v8651_v26, %v17802_v11  ;;  %v8753_v23 = vpop.f32.mrb[146].mxu1  ;;  %v8653_v54 = vpop.f32.mrb[139].mxu0  ;;  %v13028_v11 = vld [vmem:[%s19230_s16 + $0x46c] ss:$40 sps:$4 sm:$0xff]  }
 0xc96   :  { %v18515_v31 = vadd.f32 %v8753_v23, %v18230_v51  ;;  %9237 = vmatpush1.bf16.msra.mxu0 %v13027_v61  ;;  %v18521_v33 = vadd.f32 %v8653_v54, %v18226_v40  ;;  %v8755_v60 = vpop.f32.mrb[147].mxu1  ;;  %v13029_v51 = vld [vmem:[%s19230_s16 + $0x468] ss:$40 sps:$4 sm:$0xff]   ;;  %v13030_v23 = vld [vmem:[%s19230_s16 + $0x4bc] ss:$40 sps:$4 sm:$0xff]  }
 0xc97   :  { %9339 = vmatpush1.bf16.msra.mxu1 %v17796_v41  ;;  %v18525_v1 = vadd.f32 %v8755_v60, %v18228_v19  ;;  %9238 = vmatprep.subr.bf16.mxu0 %v13028_v11  ;;  %v13031_v61 = vld [vmem:[%s19230_s16 + $0x4b8] ss:$40 sps:$4 sm:$0xff]   ;;  %v19978_v11 = vld [vmem:[#allocation30_spill] sm:$0xff] }
 0xc98   :  { %9340 = vmatprep.subr.bf16.mxu1 %v17814_v3 }
 0xc9a   :  { %9239 = vmatpush1.bf16.msra.mxu0 %v13029_v51  ;;  %v8657_v40 = vpop.f32.mrb[140].mxu0  ;;  %v13040_v51 = vld [vmem:[%s19230_s16 + $0x1c] ss:$40 sps:$4 sm:$0xff]  }
 0xc9b   :  { %9341 = vmatpush1.bf16.msra.mxu1 %v17826_v36  ;;  %v18536_v41 = vadd.f32 %v8657_v40, %v17849_v17  ;;  %v8759_v19 = vpop.f32.mrb[148].mxu1  ;;  %v8659_v54 = vpop.f32.mrb[141].mxu0  ;;  %9240 = vmatprep.subr.bf16.mxu0 %v13030_v23  ;;  %v19979_v40 = vld [vmem:[#allocation66_spill] sm:$0xff]  ;;  %v19981_v23 = vld [vmem:[#allocation37_spill] sm:$0xff] }
 0xc9c   :  { %v18542_v3 = vadd.f32 %v8759_v19, %v18259_v5  ;;  %v18545_v52 = vadd.f32 %v8659_v54, %v18254_v58  ;;  %v8761_v56 = vpop.f32.mrb[149].mxu1  ;;  %9342 = vmatprep.subr.bf16.mxu1 %v17840_v34  ;;  %v8661_v36 = vpop.f32.mrb[142].mxu0  ;;  %v13032_v5 = vld [vmem:[%s19230_s16 + $0x50c] ss:$40 sps:$4 sm:$0xff]   ;;  %v13033_v34 = vld [vmem:[%s19230_s16 + $0x508] ss:$40 sps:$4 sm:$0xff]  }
 0xc9d   :  { %v18549_v17 = vadd.f32 %v8761_v56, %v18257_v12  ;;  %v8763_v0 = vpop.f32.mrb[150].mxu1  ;;  %v8662_v26 = vpop.f32.mrb[143].mxu0  ;;  %v13036_v58 = vld [vmem:[%s19230_s16 + $0x5ac] ss:$40 sps:$4 sm:$0xff]   ;;  %v13041_v19 = vld [vmem:[%s19230_s16 + $0x18] ss:$40 sps:$4 sm:$0xff]  }
 0xc9e   :  { %9241 = vmatpush1.bf16.msra.mxu0 %v13031_v61  ;;  %v8764_v60 = vpop.f32.mrb[151].mxu1  ;;  %v19977_v12 = vld [vmem:[#allocation39_spill] sm:$0xff]  ;;  %v19980_v54 = vld [vmem:[#allocation68_spill] sm:$0xff]  ;;  %v19982_v56 = vld [vmem:[#allocation70_spill] sm:$0xff] }
 0xc9f   :  { %9343 = vmatpush1.bf16.msra.mxu1 %v17861_v8  ;;  %9261 = vmatprep.subr.bf16.mxu0 %v13032_v5  ;;  %v13034_v8 = vld [vmem:[%s19230_s16 + $0x55c] ss:$40 sps:$4 sm:$0xff]   ;;  %v19984_v0 = vld [vmem:[#allocation43_spill] sm:$0xff] }
 0xca0   :  { %9363 = vmatprep.subr.bf16.mxu1 %v17873_v21  ;;  %v13035_v21 = vld [vmem:[%s19230_s16 + $0x558] ss:$40 sps:$4 sm:$0xff]   ;;  %v19988_v5 = vld [vmem:[#allocation47_spill] sm:$0xff] }
 0xca1   :  { %9243 = vmatmul.mubr.bf16.vlgmr.msra.gmra.mrb[160].mxu0 %v19943_v32  ;;  %v19983_v36 = vld [vmem:[#allocation40_spill] sm:$0xff]  ;;  %v19985_v26 = vld [vmem:[#allocation41_spill] sm:$0xff] }
 0xca2   :  { %9345 = vmatmul.mubr.bf16.vlgmr.msra.gmra.mrb[168].mxu1 %v19943_v32  ;;  %9252 = vmatprep.mubr.bf16.mxu0 %v18288_v48  ;;  %v19986_v61 = vld [vmem:[#allocation45_spill] sm:$0xff]  ;;  %v19987_v60 = vld [vmem:[#allocation44_spill] sm:$0xff] }
 0xca3   :  { %9262 = vmatpush1.bf16.msra.mxu0 %v13033_v34  ;;  %9354 = vmatprep.mubr.bf16.mxu1 %v18288_v48  ;;  %v19989_v34 = vld [vmem:[#allocation31_spill] sm:$0xff] }
 0xca4   :  { %9364 = vmatpush1.bf16.msra.mxu1 %v17888_v50  ;;  %9263 = vmatprep.subr.bf16.mxu0 %v13034_v8  ;;  %v13037_v50 = vld [vmem:[%s19230_s16 + $0x5a8] ss:$40 sps:$4 sm:$0xff]  }
 0xca5   :  { %9365 = vmatprep.subr.bf16.mxu1 %v17901_v30  ;;  %v13038_v30 = vld [vmem:[%s19230_s16 + $0x5fc] ss:$40 sps:$4 sm:$0xff]   ;;  %v19990_v8 = vld [vmem:[#allocation6_spill] sm:$0xff] }
 0xca7   :  { %9264 = vmatpush1.bf16.msra.mxu0 %v13035_v21  ;;  %v19991_v21 = vld [vmem:[#allocation7_spill] sm:$0xff] }
 0xca8   :  { %9366 = vmatpush1.bf16.msra.mxu1 %v17915_v46  ;;  %9265 = vmatprep.subr.bf16.mxu0 %v13036_v58  ;;  %v19976_v46 = vld [vmem:[#allocation91_spill] sm:$0xff]  ;;  %v19992_v58 = vld [vmem:[#allocation109_spill] sm:$0xff] }
 0xca9   :  { %9253 = vmatmul.mubr.bf16.gmra.mrb[164].mxu0 %v18323_v10  ;;  %9367 = vmatprep.subr.bf16.mxu1 %v17927_v15  ;;  %v13039_v15 = vld [vmem:[%s19230_s16 + $0x5f8] ss:$40 sps:$4 sm:$0xff]  }
 0xcaa   :  { %9355 = vmatmul.mubr.bf16.gmra.mrb[172].mxu1 %v18323_v10  ;;  %9293 = vmatprep.mubr.bf16.mxu0 %v19549_v28 }
 0xcab   :  { %9266 = vmatpush1.bf16.msra.mxu0 %v13037_v50  ;;  %9395 = vmatprep.mubr.bf16.mxu1 %v19549_v28  ;;  %v19993_v50 = vld [vmem:[#allocation8_spill] sm:$0xff] }
 0xcac   :  { %9368 = vmatpush1.bf16.msra.mxu1 %v19976_v46  ;;  %9267 = vmatprep.subr.bf16.mxu0 %v13038_v30  ;;  %v19994_v46 = vld [vmem:[#allocation48_spill] sm:$0xff] }
 0xcad   :  { %9369 = vmatprep.subr.bf16.mxu1 %v19977_v12  ;;  %v19998_v30 = vld [vmem:[#allocation52_spill] sm:$0xff]  ;;  %v20005_v12 = vld [vmem:[#allocation110_spill] sm:$0xff] }
 0xcaf   :  { %9268 = vmatpush1.bf16.msra.mxu0 %v13039_v15  ;;  %v20007_v15 = vld [vmem:[#allocation111_spill] sm:$0xff] }
 0xcb0   :  { %9370 = vmatpush1.bf16.msra.mxu1 %v19978_v11  ;;  %9414 = vmatprep.subr.bf16.mxu0 %v13040_v51  ;;  %v20009_v11 = vld [vmem:[#allocation112_spill] sm:$0xff]  ;;  %v20011_v51 = vld [vmem:[#allocation113_spill] sm:$0xff] }
 0xcb1   :  { %9516 = vmatprep.subr.bf16.mxu1 %v19979_v40  ;;  %v20013_v40 = vld [vmem:[#allocation114_spill] sm:$0xff] }
 0xcb2   :  { %11088 = vmatmul.mubr.msk.bf16.vlgmr.msra.gmra.mrb[160].mxu0 %vm1176_vm2, %v17910_v63 }
 0xcb3   :  { %11090 = vmatmul.mubr.msk.bf16.vlgmr.msra.gmra.mrb[168].mxu1 %vm1176_vm2, %v17910_v63  ;;  %9415 = vmatpush1.bf16.msra.mxu0 %v13041_v19 }
 0xcb4   :  { %9517 = vmatpush1.bf16.msra.mxu1 %v19980_v54  ;;  %9416 = vmatprep.subr.bf16.mxu0 %v19981_v23  ;;  %v20015_v54 = vld [vmem:[#allocation115_spill] sm:$0xff]  ;;  %v20016_v23 = vld [vmem:[#allocation117_spill] sm:$0xff] }
 0xcb5   :  { %9518 = vmatprep.subr.bf16.mxu1 %v19982_v56  ;;  %9303 = vmatprep.mubr.bf16.mxu0 %v19549_v28 }
 0xcb6   :  { %9405 = vmatprep.mubr.bf16.mxu1 %v19549_v28 }
 0xcb7   :  { %9417 = vmatpush1.bf16.msra.mxu0 %v19983_v36 }
 0xcb8   :  { %9519 = vmatpush1.bf16.msra.mxu1 %v19984_v0  ;;  %9418 = vmatprep.subr.bf16.mxu0 %v19985_v26  ;;  %v20017_v26 = vld [vmem:[#allocation65_spill] sm:$0xff] }
 0xcb9   :  { %9520 = vmatprep.subr.bf16.mxu1 %v19986_v61 }
 0xcba   :  { %11089 = vmatmul.mubr.msk.bf16.gmra.mrb[164].mxu0 %vm1176_vm2, %v17997_v4 }
 0xcbb   :  { %11091 = vmatmul.mubr.msk.bf16.gmra.mrb[176].mxu1 %vm1176_vm2, %v17997_v4  ;;  %9419 = vmatpush1.bf16.msra.mxu0 %v19987_v60  ;;  %v20018_v60 = vld [vmem:[#allocation116_spill] sm:$0xff] }
 0xcbc   :  { %9446 = vmatprep.mubr.bf16.mxu0 %v18047_v29  ;;  %9521 = vmatpush1.bf16.msra.mxu1 %v18037_v6  ;;  %v19995_v6 = vld [vmem:[#allocation49_spill] sm:$0xff] }
 0xcbd   :  { %9548 = vmatprep.mubr.bf16.mxu1 %v18047_v29  ;;  %9420 = vmatprep.subr.bf16.mxu0 %v19988_v5  ;;  %v19996_v29 = vld [vmem:[#allocation50_spill] sm:$0xff] }
 0xcbe   :  { %9522 = vmatprep.subr.bf16.mxu1 %v19989_v34  ;;  %v20019_v34 = vld [vmem:[#allocation119_spill] sm:$0xff] }
 0xcbf   :  { %9421 = vmatpush1.bf16.msra.mxu0 %v19990_v8 }
 0xcc0   :  { %9523 = vmatpush1.bf16.msra.mxu1 %v18065_v43  ;;  %9422 = vmatprep.subr.bf16.mxu0 %v19991_v21  ;;  %v19997_v43 = vld [vmem:[#allocation51_spill] sm:$0xff] }
 0xcc1   :  { %9524 = vmatprep.subr.bf16.mxu1 %v19992_v58 }
 0xcc3   :  { %9423 = vmatpush1.bf16.msra.mxu0 %v19993_v50  ;;  %v20020_v50 = vld [vmem:[#allocation71_spill] sm:$0xff] }
 0xcc4   :  { %9525 = vmatpush1.bf16.msra.mxu1 %v18086_v35  ;;  %9424 = vmatprep.subr.bf16.mxu0 %v19994_v46  ;;  %v19999_v35 = vld [vmem:[#allocation53_spill] sm:$0xff] }
 0xcc5   :  { %9526 = vmatprep.subr.bf16.mxu1 %v18093_v9  ;;  %v20000_v9 = vld [vmem:[#allocation54_spill] sm:$0xff] }
 0xcc7   :  { %9425 = vmatpush1.bf16.msra.mxu0 %v19995_v6  ;;  %v20021_v6 = vld [vmem:[#allocation118_spill] sm:$0xff] }
 0xcc8   :  { %9527 = vmatpush1.bf16.msra.mxu1 %v18103_v13  ;;  %9426 = vmatprep.subr.bf16.mxu0 %v19996_v29  ;;  %v20001_v13 = vld [vmem:[#allocation55_spill] sm:$0xff]  ;;  %v20022_v29 = vld [vmem:[#allocation72_spill] sm:$0xff] }
 0xcc9   :  { %9528 = vmatprep.subr.bf16.mxu1 %v18110_v62  ;;  %v20002_v62 = vld [vmem:[#allocation56_spill] sm:$0xff] }
 0xccb   :  { %9427 = vmatpush1.bf16.msra.mxu0 %v19997_v43  ;;  %v20023_v43 = vld [vmem:[#allocation120_spill] sm:$0xff] }
 0xccc   :  { %9529 = vmatpush1.bf16.msra.mxu1 %v18120_v59  ;;  %9428 = vmatprep.subr.bf16.mxu0 %v19998_v30  ;;  %v20003_v59 = vld [vmem:[#allocation14_spill] sm:$0xff] }
 0xccd   :  { %9530 = vmatprep.subr.bf16.mxu1 %v18127_v7  ;;  %v20004_v7 = vld [vmem:[#allocation24_spill] sm:$0xff]  ;;  %v20024_v30 = vld [vmem:[#allocation74_spill] sm:$0xff] }
 0xccf   :  { %9429 = vmatpush1.bf16.msra.mxu0 %v19999_v35 }
 0xcd0   :  { %9531 = vmatpush1.bf16.msra.mxu1 %v18137_v24  ;;  %9430 = vmatprep.subr.bf16.mxu0 %v20000_v9  ;;  %v20006_v24 = vld [vmem:[#allocation15_spill] sm:$0xff]  ;;  %v20025_v9 = vld [vmem:[#allocation121_spill] sm:$0xff] }
 0xcd1   :  { %9532 = vmatprep.subr.bf16.mxu1 %v18144_v49  ;;  %v20008_v49 = vld [vmem:[#allocation16_spill] sm:$0xff] }
 0xcd3   :  { %9431 = vmatpush1.bf16.msra.mxu0 %v20001_v13 }
 0xcd4   :  { %9533 = vmatpush1.bf16.msra.mxu1 %v18151_v18  ;;  %9432 = vmatprep.subr.bf16.mxu0 %v20002_v62  ;;  %v20010_v18 = vld [vmem:[#allocation25_spill] sm:$0xff] }
 0xcd5   :  { %9534 = vmatprep.subr.bf16.mxu1 %v18158_v38  ;;  %v20012_v38 = vld [vmem:[#allocation26_spill] sm:$0xff] }
 0xcd7   :  { %9433 = vmatpush1.bf16.msra.mxu0 %v20003_v59 }
 0xcd8   :  { %9535 = vmatpush1.bf16.msra.mxu1 %v18165_v22  ;;  %9434 = vmatprep.subr.bf16.mxu0 %v20004_v7  ;;  %v20014_v22 = vld [vmem:[#allocation17_spill] sm:$0xff]  ;;  %v20026_v7 = vld [vmem:[#allocation32_spill] sm:$0xff] }
 0xcd9   :  { %9536 = vmatprep.subr.bf16.mxu1 %v20005_v12 }
 0xcdb   :  { %9435 = vmatpush1.bf16.msra.mxu0 %v20006_v24  ;;  %v20027_v24 = vld [vmem:[#allocation122_spill] sm:$0xff] }
 0xcdc   :  { %9537 = vmatpush1.bf16.msra.mxu1 %v20007_v15  ;;  %9436 = vmatprep.subr.bf16.mxu0 %v20008_v49 }
 0xcdd   :  { %9538 = vmatprep.subr.bf16.mxu1 %v20009_v11 }
 0xcdf   :  { %9437 = vmatpush1.bf16.msra.mxu0 %v20010_v18  ;;  %v20028_v18 = vld [vmem:[#allocation34_spill] sm:$0xff] }
 0xce0   :  { %9539 = vmatpush1.bf16.msra.mxu1 %v20011_v51  ;;  %9438 = vmatprep.subr.bf16.mxu0 %v20012_v38  ;;  %v20029_v38 = vld [vmem:[#allocation27_spill] sm:$0xff] }
 0xce1   :  { %9540 = vmatprep.subr.bf16.mxu1 %v20013_v40  ;;  %v20031_v40 = vld [vmem:[#allocation35_spill] sm:$0xff] }
 0xce3   :  { %9439 = vmatpush1.bf16.msra.mxu0 %v20014_v22  ;;  %v8851_v19 = vpop.f32.mrb[144].mxu0 }
 0xce4   :  { %9541 = vmatpush1.bf16.msra.mxu1 %v20015_v54  ;;  %v18664_v56 = vadd.f32 %v8851_v19, %v20016_v23  ;;  %v18666_v36 = vpop.f32.mrb[152].mxu1  ;;  %v8853_v0 = vpop.f32.mrb[145].mxu0  ;;  %9440 = vmatprep.subr.bf16.mxu0 %v20017_v26 }
 0xce5   :  { %v18669_v61 = vpop.f32.mrb[153].mxu1  ;;  %9542 = vmatprep.subr.bf16.mxu1 %v20018_v60  ;;  %v8855_v5 = vpop.f32.mrb[146].mxu0 }
 0xce6   :  { %v18673_v8 = vadd.f32 %v8855_v5, %v20019_v34  ;;  %v18675_v21 = vpop.f32.mrb[154].mxu1  ;;  %v8857_v58 = vpop.f32.mrb[147].mxu0 }
 0xce7   :  { %9441 = vmatpush1.bf16.msra.mxu0 %v20020_v50  ;;  %v18678_v46 = vpop.f32.mrb[155].mxu1 }
 0xce8   :  { %9543 = vmatpush1.bf16.msra.mxu1 %v20021_v6  ;;  %9442 = vmatprep.subr.bf16.mxu0 %v20022_v29 }
 0xce9   :  { %9544 = vmatprep.subr.bf16.mxu1 %v20023_v43 }
 0xceb   :  { %9443 = vmatpush1.bf16.msra.mxu0 %v20024_v30  ;;  %v8861_v35 = vpop.f32.mrb[148].mxu0  ;;  %v20038_v30 = vld [vmem:[#allocation5_spill] sm:$0xff] }
 0xcec   :  { %9545 = vmatpush1.bf16.msra.mxu1 %v20025_v9  ;;  %v18686_v13 = vadd.f32 %v8861_v35, %v18267_v45  ;;  %v8963_v62 = vpop.f32.mrb[156].mxu1  ;;  %v8863_v59 = vpop.f32.mrb[149].mxu0  ;;  %9444 = vmatprep.subr.bf16.mxu0 %v20026_v7  ;;  %v20030_v45 = vld [vmem:[#allocation28_spill] sm:$0xff]  ;;  %v18746_v35 = vmul.u32.u64.low 2863311531, %v20038_v30  ;;  %v18747_v9 = vmul.u32.u64.high 2863311531, %v20038_v30, %v18746_v35 }
 0xced   :  { %v18689_v12 = vpop.f32.mrb[157].mxu1  ;;  %9546 = vmatprep.subr.bf16.mxu1 %v20027_v24  ;;  %v8865_v15 = vpop.f32.mrb[150].mxu0 }
 0xcee   :  { %v8967_v49 = vpop.f32.mrb[158].mxu1  ;;  %v8866_v11 = vpop.f32.mrb[151].mxu0  ;;  %v9725_v24 = vshrl.u32 %v18747_v9, 3 }
 0xcef   :  { %9445 = vmatpush1.bf16.msra.mxu0 %v20028_v18  ;;  %v8968_v51 = vpop.f32.mrb[159].mxu1 }
 0xcf0   :  { %9547 = vmatpush1.bf16.msra.mxu1 %v18273_v47  ;;  %9465 = vmatprep.subr.bf16.mxu0 %v20029_v38  ;;  %v20032_v47 = vld [vmem:[#allocation38_spill] sm:$0xff]  ;;  %v9726_v15 = vmul.u32 12, %v9725_v24 }
 0xcf1   :  { %9567 = vmatprep.subr.bf16.mxu1 %v18280_v44  ;;  %v20033_v44 = vld [vmem:[#allocation90_spill] sm:$0xff] }
 0xcf2   :  { %9447 = vmatmul.mubr.bf16.vlgmr.msra.gmra.mrb[168].mxu0 %v19943_v32 }
 0xcf3   :  { %9549 = vmatmul.mubr.bf16.vlgmr.msra.gmra.mrb[180].mxu1 %v19943_v32  ;;  %9456 = vmatprep.mubr.bf16.mxu0 %v18288_v48  ;;  %v20035_v32 = vld [vmem:[#allocation102_spill] sm:$0xff] }
 0xcf4   :  { %9466 = vmatpush1.bf16.msra.mxu0 %v20030_v45  ;;  %9558 = vmatprep.mubr.bf16.mxu1 %v18288_v48  ;;  %v20034_v48 = vld [vmem:[#allocation93_spill] sm:$0xff] }
 0xcf5   :  { %9568 = vmatpush1.bf16.msra.mxu1 %v18295_v42  ;;  %9467 = vmatprep.subr.bf16.mxu0 %v20031_v40  ;;  %v20036_v42 = vld [vmem:[#allocation29_spill] sm:$0xff] }
 0xcf6   :  { %9569 = vmatprep.subr.bf16.mxu1 %v18303_v2  ;;  %v20037_v2 = vld [vmem:[#allocation23_spill] sm:$0xff] }
 0xcf8   :  { %9468 = vmatpush1.bf16.msra.mxu0 %v20032_v47 }
 0xcf9   :  { %9570 = vmatpush1.bf16.msra.mxu1 %v18310_v57  ;;  %9469 = vmatprep.subr.bf16.mxu0 %v20033_v44 }
 0xcfa   :  { %9457 = vmatmul.mubr.bf16.gmra.mrb[172].mxu0 %v18323_v10  ;;  %9571 = vmatprep.subr.bf16.mxu1 %v18317_v53 }
 0xcfb   :  { %9559 = vmatmul.mubr.bf16.gmra.mrb[184].mxu1 %v18323_v10  ;;  %9497 = vmatprep.mubr.bf16.mxu0 %v19549_v28 }
 0xcfc   :  { %9470 = vmatpush1.bf16.msra.mxu0 %v20034_v48  ;;  %9599 = vmatprep.mubr.bf16.mxu1 %v19549_v28 }
 0xcfd   :  { %9572 = vmatpush1.bf16.msra.mxu1 %v18332_v14  ;;  %9471 = vmatprep.subr.bf16.mxu0 %v20035_v32 }
 0xcfe   :  { %9573 = vmatprep.subr.bf16.mxu1 %v18340_v25 }
 0xd00   :  { %9472 = vmatpush1.bf16.msra.mxu0 %v20036_v42 }
 0xd01   :  { %9574 = vmatpush1.bf16.msra.mxu1 %v20037_v2 }
 0xd03   :  { %11092 = vmatmul.mubr.msk.bf16.vlgmr.msra.gmra.mrb[168].mxu0 %vm1176_vm2, %v17910_v63 }
 0xd04   :  { %11094 = vmatmul.mubr.msk.bf16.vlgmr.msra.gmra.mrb[180].mxu1 %vm1176_vm2, %v17910_v63  ;;  %9507 = vmatprep.mubr.bf16.mxu0 %v19549_v28 }
 0xd05   :  { %9609 = vmatprep.mubr.bf16.mxu1 %v19549_v28 }
 0xd0b   :  { %11093 = vmatmul.mubr.msk.bf16.gmra.mrb[176].mxu0 %vm1176_vm2, %v17997_v4 }
 0xd0c   :  { %11095 = vmatmul.mubr.msk.bf16.gmra.mrb[184].mxu1 %vm1176_vm2, %v17997_v4 }
 0xd34   :  { %v9055_v57 = vpop.f32.mrb[152].mxu0 }
 0xd35   :  { %v9193_v53 = vpop.f32.mrb[160].mxu1  ;;  %v9057_v10 = vpop.f32.mrb[153].mxu0 }
 0xd36   :  { %v18728_v14 = vadd.f32 %v9193_v53, %v8853_v0  ;;  %v9195_v25 = vpop.f32.mrb[161].mxu1  ;;  %v9059_v22 = vpop.f32.mrb[154].mxu0 }
 0xd37   :  { %v18731_v19 = vadd.f32 %v9195_v25, %v18666_v36  ;;  %v9197_v63 = vpop.f32.mrb[162].mxu1  ;;  %v9061_v54 = vpop.f32.mrb[155].mxu0 }
 0xd38   :  { %v18733_v23 = vadd.f32 %v9197_v63, %v8857_v58  ;;  %v9199_v28 = vpop.f32.mrb[163].mxu1  ;;  %v9717_v58 = vadd.s32 8, %v20038_v30 }
 0xd39   :  { %v18736_v26 = vadd.f32 %v9199_v28, %v18675_v21 }
 0xd3a   :  { %v18749_v21 = vmul.u32.u64.low 2863311531, %v9717_v58  ;;  %v18750_v7 = vmul.u32.u64.high 2863311531, %v9717_v58, %v18749_v21 }
 0xd3c   :  { %v9065_v60 = vpop.f32.mrb[156].mxu0 }
 0xd3d   :  { %v9203_v4 = vpop.f32.mrb[164].mxu1  ;;  %v18738_v5 = vpop.f32.mrb[157].mxu0 }
 0xd3e   :  { %v18740_v34 = vadd.f32 %v9203_v4, %v8863_v59  ;;  %v9205_v0 = vpop.f32.mrb[165].mxu1  ;;  %v9069_v50 = vpop.f32.mrb[158].mxu0  ;;  %v9736_v59 = vshrl.u32 %v18750_v7, 3  ;;  %v20039_v4 = vld [vmem:[#allocation97_spill] sm:$0xff] }
 0xd3f   :  { %v18742_v6 = vadd.f32 %v9205_v0, %v8963_v62  ;;  %v9207_v36 = vpop.f32.mrb[166].mxu1  ;;  %v9070_v29 = vpop.f32.mrb[159].mxu0  ;;  %v9727_v62 = vsub.s32 %v20038_v30, %v9726_v15  ;;  %v20041_v7 = vld [vmem:[#allocation101_spill] sm:$0xff] }
 0xd40   :  { %v9208_v43 = vpop.f32.mrb[167].mxu1  ;;  %v9737_v49 = vmul.u32 12, %v9736_v59  ;;  %v20042_v24 = vrot.slane %v20041_v7, 1 }
 0xd41   :  { %vm9752_vm13 = vcmp.ne.s32.totalorder %v9727_v62, 0  ;;  %vm9755_vm14 = vcmp.lt.s32.totalorder %v9727_v62, 0  ;;  %v9761_v51 = vadd.s32 12, %v9727_v62 }
 0xd42   :  { %v9738_v11 = vsub.s32 %v9717_v58, %v9737_v49  ;;  %vm9758_vm1 = vmand %vm9755_vm14, %vm9752_vm13  ;;  %v9652_v59 = vsel %vm9627_vm10, %v20042_v24, 0.0  ;;  %v20050_v24 = vld [vmem:[#allocation99_spill] sm:$0xff] }
 0xd43   :  { %v18755_v44 = vsel %vm9758_vm1, %v9761_v51, %v9727_v62 }
 0xd44   :  { %vm9753_vm15 = vcmp.ne.s32.totalorder %v9738_v11, 0  ;;  %vm9756_vm0 = vcmp.lt.s32.totalorder %v9738_v11, 0  ;;  %v9762_v40 = vadd.s32 12, %v9738_v11  ;;  %vm9767_vm5 = vcmp.ne.s32.totalorder %v18755_v44, 11 }
 0xd45   :  { %vm9759_vm4 = vmand %vm9756_vm0, %vm9753_vm15  ;;  %v9770_v0 = vsel %vm9767_vm5, %v20039_v4, 0.0  ;;  %vm9779_vm7 = vcmp.ne.s32.totalorder %v18755_v44, 0 }
 0xd46   :  { %v18757_v48 = vsel %vm9759_vm4, %v9762_v40, %v9738_v11 }
 0xd47   :  { %vm9768_vm6 = vcmp.ne.s32.totalorder %v18757_v48, 11  ;;  %vm9780_vm8 = vcmp.ne.s32.totalorder %v18757_v48, 0 }
 0xd7d   :  { %v9356_v18 = vpop.f32.mrb[172].mxu1 }
 0xd7e   :  { %v9358_v38 = vpop.f32.mrb[173].mxu1 }
 0xd7f   :  { %v9360_v45 = vpop.f32.mrb[174].mxu1 }
 0xd80   :  { %v9361_v47 = vpop.f32.mrb[175].mxu1 }
 0xd85   :  { %v9295_v32 = vpop.f32.mrb[160].mxu0 }
 0xd86   :  { %v18761_v42 = vadd.f32 %v9295_v32, %v18669_v61  ;;  %v9397_v2 = vpop.f32.mrb[168].mxu1  ;;  %v9297_v53 = vpop.f32.mrb[161].mxu0  ;;  %v20043_v32 = vld [vmem:[#allocation100_spill] sm:$0xff] }
 0xd87   :  { %v18764_v25 = vadd.f32 %v9397_v2, %v9057_v10  ;;  %v18766_v63 = vadd.f32 %v9297_v53, %v9055_v57  ;;  %v9399_v28 = vpop.f32.mrb[169].mxu1  ;;  %v9299_v50 = vpop.f32.mrb[162].mxu0  ;;  %v20040_v57 = vld [vmem:[#allocation105_spill] sm:$0xff]  ;;  %v9776_v2 = vsel %vm9769_vm12, %v9652_v59, 0.0  ;;  %v9772_v59 = vsel %vm9767_vm5, %v20050_v24, 0.0 }
 0xd88   :  { %v18771_v36 = vadd.f32 %v9770_v0, %v9399_v28  ;;  %v18774_v29 = vadd.f32 %v9299_v50, %v18678_v46  ;;  %v9401_v61 = vpop.f32.mrb[170].mxu1  ;;  %v9301_v43 = vpop.f32.mrb[163].mxu0  ;;  %v9773_v35 = vsel %vm9768_vm6, %v20040_v57, 0.0  ;;  %v20045_v50 = vld [vmem:[#allocation98_spill] sm:$0xff] }
 0xd89   :  { %v18776_v30 = vadd.f32 %v9401_v61, %v9061_v54  ;;  %v18778_v58 = vadd.f32 %v9301_v43, %v9059_v22  ;;  %v9403_v10 = vpop.f32.mrb[171].mxu1  ;;  %v20046_v61 = vld [vmem:[#allocation103_spill] sm:$0xff] }
 0xd8a   :  { %v18783_v9 = vadd.f32 %v9773_v35, %v9403_v10  ;;  %v20047_v43 = vrot.slane %v20046_v61, 1  ;;  %v20048_v10 = vld [vmem:[#allocation95_spill] sm:$0xff] }
 0xd8d   :  { %v9305_v21 = vpop.f32.mrb[164].mxu0 }
 0xd8e   :  { %v18789_v46 = vadd.f32 %v9305_v21, %v18689_v12  ;;  %v9407_v15 = vpop.f32.mrb[176].mxu1  ;;  %v9307_v54 = vpop.f32.mrb[165].mxu0 }
 0xd8f   :  { %v9408_v49 = vadd.f32 %v9407_v15, %v9356_v18  ;;  %v18791_v22 = vadd.f32 %v9307_v54, %v9065_v60  ;;  %v9409_v62 = vpop.f32.mrb[177].mxu1  ;;  %v9309_v11 = vpop.f32.mrb[166].mxu0 }
 0xd90   :  { %v9410_v51 = vadd.f32 %v9409_v62, %v9358_v38  ;;  %v9411_v45 = vpop.f32.mrb[178].mxu1  ;;  %v9310_v40 = vpop.f32.mrb[167].mxu0  ;;  %v9771_v38 = vsel %vm9767_vm5, %v20045_v50, 0.0 }
 0xd91   :  { %v18794_v47 = vadd.f32 %v9408_v49, %v18738_v5  ;;  %v9412_v53 = vpop.f32.mrb[179].mxu1  ;;  %v20049_v5 = vrot.slane %v20048_v10, 1 }
 0xd92   :  { %v18798_v28 = vadd.f32 %v9776_v2, %v9410_v51  ;;  %v20051_v51 = vld [vmem:[#allocation106_spill] sm:$0xff] }
 0xd93   :  { %v9642_v57 = vsel %vm9627_vm10, %v20049_v5, %v20047_v43  ;;  %v9774_v45 = vsel %vm9768_vm6, %v20051_v51, 0.0 }
 0xd94   :  { %20044 = vst [vmem:[#allocation33_spill] sm:$0xff] %v18798_v28 }
 0xdcd   :  { %v9458_v12 = vpop.f32.mrb[172].mxu0 }
 0xdce   :  { %v9460_v4 = vpop.f32.mrb[173].mxu0 }
 0xdcf   :  { %v9462_v0 = vpop.f32.mrb[174].mxu0 }
 0xdd0   :  { %v9463_v18 = vpop.f32.mrb[175].mxu0  ;;  %v9775_v0 = vsel %vm9768_vm6, %v9642_v57, 0.0 }
 0xdd6   :  { %v9499_v60 = vpop.f32.mrb[168].mxu0 }
 0xdd7   :  { %v18808_v35 = vadd.f32 %v9771_v38, %v9499_v60  ;;  %v9601_v21 = vpop.f32.mrb[180].mxu1  ;;  %v9501_v7 = vpop.f32.mrb[169].mxu0 }
 0xdd8   :  { %v9665_v15 = vrot.slane %v9601_v21, 7  ;;  %v9664_v54 = vrot.slane %v9501_v7, 7  ;;  %v18813_v49 = vadd.f32 %v9772_v59, %v9501_v7  ;;  %v9603_v62 = vpop.f32.mrb[181].mxu1  ;;  %v9503_v11 = vpop.f32.mrb[170].mxu0 }
 0xdd9   :  { %v18818_v40 = vadd.f32 %v9774_v45, %v9503_v11  ;;  %v9605_v2 = vpop.f32.mrb[182].mxu1  ;;  %v9505_v53 = vpop.f32.mrb[171].mxu0  ;;  %v9666_v43 = vrot.slane %v9603_v62, 7  ;;  %v20053_v62 = vld [vmem:[#allocation107_spill] sm:$0xff] }
 0xdda   :  { %v9669_v18 = vrot.slane %v9605_v2, 7  ;;  %v9667_v60 = vrot.slane %v9505_v53, 7  ;;  %v18822_v50 = vadd.f32 %v9775_v0, %v9505_v53  ;;  %v9607_v38 = vpop.f32.mrb[183].mxu1  ;;  %9681 = vrot.lane.b32.xlu1 %v9665_v15, %s13073_s8  ;;  %9679 = vrot.lane.b32.xlu0 %v9664_v54, %s13073_s8 }
 0xddb   :  { %v9671_v5 = vrot.slane %v9607_v38, 7 }
 0xddc   :  { %20052 = vst [vmem:[#allocation81_spill] sm:$0xff] %v18822_v50  ;;  %v9668_v21 = vsel %vm1224_vm3, %v9664_v54, %v9667_v60  ;;  %v9670_v7 = vsel %vm1224_vm3, %v9665_v15, %v9669_v18  ;;  %v20054_v50 = vld [vmem:[#allocation108_spill] sm:$0xff] }
 0xddd   :  { %v9672_v24 = vsel %vm1224_vm3, %v9666_v43, %v9671_v5 }
 0xdde   :  { %9685 = vrot.lane.b32.xlu1 %v9668_v21, %s13073_s8  ;;  %9683 = vrot.lane.b32.xlu0 %v9666_v43, %s13073_s8  ;;  %v9509_v57 = vpop.f32.mrb[176].mxu0 }
 0xddf   :  { %v9611_v59 = vpop.f32.mrb[184].mxu1  ;;  %v9510_v11 = vadd.f32 %v9509_v57, %v9458_v12  ;;  %v9511_v51 = vpop.f32.mrb[177].mxu0 }
 0xde0   :  { %v9675_v45 = vrot.slane %v9611_v59, 7  ;;  %v9512_v2 = vadd.f32 %v9511_v51, %v9460_v4  ;;  %v9613_v53 = vpop.f32.mrb[185].mxu1  ;;  %v9513_v0 = vpop.f32.mrb[178].mxu0 }
 0xde1   :  { %v18832_v38 = vadd.f32 %v20053_v62, %v9510_v11  ;;  %v9677_v54 = vrot.slane %v9613_v53, 7  ;;  %v9615_v61 = vpop.f32.mrb[186].mxu1  ;;  %v9514_v15 = vpop.f32.mrb[179].mxu0 }
 0xde2   :  { %v9673_v10 = vrot.slane %v9512_v2, 7  ;;  %v18835_v28 = vadd.f32 %v20054_v50, %v9512_v2  ;;  %v9616_v21 = vpop.f32.mrb[187].mxu1  ;;  %9689 = vrot.lane.b32.xlu1 %v9672_v24, %s13073_s8  ;;  %9687 = vrot.lane.b32.xlu0 %v9670_v7, %s13073_s8  ;;  %v9676_v12 = vsel %vm1224_vm3, %v9669_v18, %v9675_v45  ;;  %v20055_v61 = vld [vmem:[#allocation64_spill] sm:$0xff]  ;;  %v20056_v50 = vld [vmem:[#allocation67_spill] sm:$0xff]  ;;  %v20057_v7 = vld [vmem:[#allocation69_spill] sm:$0xff] }
 0xde3   :  { %v9678_v4 = vsel %vm1224_vm3, %v9671_v5, %v9677_v54  ;;  %v20058_v18 = vld [vmem:[#allocation76_spill] sm:$0xff]  ;;  %v20060_v15 = vld [vmem:[#allocation46_spill] sm:$0xff] }
 0xde4   :  { %v9674_v43 = vsel %vm1224_vm3, %v9667_v60, %v9673_v10  ;;  %v20059_v10 = vld [vmem:[#allocation77_spill] sm:$0xff] }
 0xde6   :  { %9693 = vrot.lane.b32.xlu1 %v9676_v12, %s13073_s8  ;;  %9695 = vrot.lane.b32.xlu0 %v9678_v4, %s13073_s8 }
 0xdea   :  { %9988 = vrot.lane.b32.xlu1 %v20055_v61, %s13073_s8  ;;  %9691 = vrot.lane.b32.xlu0 %v9674_v43, %s13073_s8  ;;  %v20061_v61 = vld [vmem:[#allocation80_spill] sm:$0xff] }
 0xdee   :  { %9992 = vrot.lane.b32.xlu1 %v20056_v50, %s13073_s8  ;;  %9990 = vrot.lane.b32.xlu0 %v20057_v7, %s13073_s8 }
 0xdf2   :  { %9996 = vrot.lane.b32.xlu1 %v20058_v18, %s13073_s8  ;;  %9994 = vrot.lane.b32.xlu0 %v20059_v10, %s13073_s8 }
 0xdf6   :  { %10024 = vrot.lane.b32.xlu1 %v18505_v16, %s13073_s8  ;;  %10022 = vrot.lane.b32.xlu0 %v18496_v55, %s13073_s8 }
 0xdfa   :  { %10028 = vrot.lane.b32.xlu1 %v18512_v27, %s13073_s8  ;;  %10026 = vrot.lane.b32.xlu0 %v18502_v37, %s13073_s8 }
 0xdfe   :  { %10032 = vrot.lane.b32.xlu1 %v18515_v31, %s13073_s8  ;;  %10030 = vrot.lane.b32.xlu0 %v18521_v33, %s13073_s8 }
 0xe02   :  { %10036 = vrot.lane.b32.xlu1 %v18545_v52, %s13073_s8  ;;  %10034 = vrot.lane.b32.xlu0 %v18536_v41, %s13073_s8 }
 0xe06   :  { %10061 = vrot.lane.b32.xlu1 %v18509_v20, %s13073_s8  ;;  %10038 = vrot.lane.b32.xlu0 %v18542_v3, %s13073_s8 }
 0xe0a   :  { %10065 = vrot.lane.b32.xlu1 %v18525_v1, %s13073_s8  ;;  %10063 = vrot.lane.b32.xlu0 %v18664_v56, %s13073_s8 }
 0xe0e   :  { %10069 = vrot.lane.b32.xlu1 %v18549_v17, %s13073_s8  ;;  %10067 = vrot.lane.b32.xlu0 %v18673_v8, %s13073_s8 }
 0xe12   :  { %10071 = vrot.lane.b32.xlu0 %v18686_v13, %s13073_s8 }
 0xe4c   :  { %v9682_v55 = vpop.permute.xlu1 %9681  ;;  %v9680_v37 = vpop.permute.xlu0 %9679 }
 0xe4d   :  { %v9697_v16 = vsel %vm1176_vm2, %v9680_v37, %v9682_v55 }
 0xe4e   :  { %v9712_v52 = vsel %vm1224_vm3, 0.0, %v9697_v16 }
 0xe4f   :  { %v9782_v8 = vsel %vm9779_vm7, %v9712_v52, 0.0 }
 0xe50   :  { %v9686_v20 = vpop.permute.xlu1 %9685  ;;  %v9684_v27 = vpop.permute.xlu0 %9683 }
 0xe51   :  { %v9698_v31 = vsel %vm1176_vm2, %v9682_v55, %v9684_v27  ;;  %v9714_v33 = vsel %vm1224_vm3, 0.0, %v9684_v27 }
 0xe52   :  { %v9784_v1 = vsel %vm9779_vm7, %v9714_v33, 0.0  ;;  %v9713_v41 = vsel %vm1224_vm3, 0.0, %v9698_v31  ;;  %vm9781_vm3 = vcmp.ne.s32.totalorder %v20043_v32, 0 }
 0xe53   :  { %9804 = vrot.lane.b32.xlu1 %v9784_v1, %s13073_s8  ;;  %v9783_v3 = vsel %vm9779_vm7, %v9713_v41, 0.0 }
 0xe54   :  { %v9690_v17 = vpop.permute.xlu1 %9689  ;;  %v9688_v56 = vpop.permute.xlu0 %9687  ;;  %9802 = vrot.lane.b32.xlu0 %v9783_v3, %s13073_s8 }
 0xe55   :  { %v9700_v13 = vsel %vm1176_vm2, %v9688_v56, %v9690_v17  ;;  %v9787_v44 = vsel %vm9780_vm8, %v9690_v17, 0.0  ;;  %v9699_v60 = vsel %vm1176_vm2, %v9686_v20, %v9688_v56 }
 0xe56   :  { %v9786_v57 = vsel %vm9780_vm8, %v9700_v13, 0.0  ;;  %v9785_v59 = vsel %vm9780_vm8, %v9699_v60, 0.0 }
 0xe57   :  { %9800 = vrot.lane.b32.xlu1 %v9782_v8, %s13073_s8 }
 0xe58   :  { %v9694_v5 = vpop.permute.xlu1 %9693  ;;  %v9696_v24 = vpop.permute.xlu0 %9695  ;;  %9810 = vrot.lane.b32.xlu0 %v9787_v44, %s13073_s8 }
 0xe59   :  { %v9702_v48 = vsel %vm1176_vm2, %v9694_v5, %v9696_v24  ;;  %v9790_v2 = vsel %vm9781_vm3, %v9696_v24, 0.0 }
 0xe5a   :  { %v9789_v0 = vsel %vm9781_vm3, %v9702_v48, 0.0 }
 0xe5b   :  { %9808 = vrot.lane.b32.xlu1 %v9786_v57, %s13073_s8 }
 0xe5c   :  { %v9989_v11 = vpop.permute.xlu1 %9988  ;;  %v9692_v51 = vpop.permute.xlu0 %9691  ;;  %9806 = vrot.lane.b32.xlu0 %v9785_v59, %s13073_s8 }
 0xe5d   :  { %v9999_v45 = vsel %vm1176_vm2, %v18374_v39, %v9989_v11  ;;  %v9701_v53 = vsel %vm1176_vm2, %v9692_v51, %v9694_v5 }
 0xe5e   :  { %12694 = vtanh.f32 %v9999_v45  ;;  %v9788_v12 = vsel %vm9781_vm3, %v9701_v53, 0.0 }
 0xe5f   :  { %9816 = vrot.lane.b32.xlu1 %v9790_v2, %s13073_s8 }
 0xe60   :  { %v9993_v62 = vpop.permute.xlu1 %9992  ;;  %v9991_v54 = vpop.permute.xlu0 %9990  ;;  %9814 = vrot.lane.b32.xlu0 %v9789_v0, %s13073_s8 }
 0xe61   :  { %v10000_v21 = vsel %vm1176_vm2, %v20060_v15, %v9991_v54  ;;  %v10001_v39 = vsel %vm1176_vm2, %v9991_v54, %v9993_v62 }
 0xe62   :  { %12696 = vtanh.f32 %v10000_v21 }
 0xe63   :  { %12698 = vtanh.f32 %v10001_v39  ;;  %9812 = vrot.lane.b32.xlu1 %v9788_v12, %s13073_s8  ;;  %v20064_v12 = vld [vmem:[#allocation92_spill] sm:$0xff] }
 0xe64   :  { %v9997_v4 = vpop.permute.xlu1 %9996  ;;  %v9995_v43 = vpop.permute.xlu0 %9994  ;;  %10099 = vrot.lane.b32.xlu0 %v18731_v19, %s13073_s8 }
 0xe65   :  { %v10002_v50 = vsel %vm1176_vm2, %v20061_v61, %v9995_v43  ;;  %v10003_v7 = vsel %vm1176_vm2, %v9995_v43, %v9997_v4 }
 0xe66   :  { %12700 = vtanh.f32 %v10002_v50  ;;  %v20065_v50 = vld [vmem:[#allocation94_spill] sm:$0xff] }
 0xe67   :  { %12702 = vtanh.f32 %v10003_v7  ;;  %10097 = vrot.lane.b32.xlu1 %v18728_v14, %s13073_s8 }
 0xe68   :  { %v12695_v32 = vpop.eup %12694  ;;  %v10025_v18 = vpop.permute.xlu1 %10024  ;;  %10103 = vrot.lane.b32.xlu0 %v18733_v23, %s13073_s8 }
 0xe69   :  { %v10023_v10 = vpop.permute.xlu0 %10022  ;;  %10283 = vst [vmem:[%s19231_s17 + $0x30] sm:$0xff] %v12695_v32 }
 0xe6a   :  { %v10040_v19 = vsel %vm1176_vm2, %v10023_v10, %v10025_v18  ;;  %v10208_v55 = vsel %vm1176_vm2, %v9989_v11, %v10023_v10 }
 0xe6b   :  { %12704 = vtanh.f32 %v10208_v55  ;;  %10101 = vrot.lane.b32.xlu1 %v18761_v42, %s13073_s8 }
 0xe6c   :  { %12706 = vtanh.f32 %v10040_v19  ;;  %v12697_v14 = vpop.eup %12696  ;;  %v10029_v37 = vpop.permute.xlu1 %10028  ;;  %10107 = vrot.lane.b32.xlu0 %v18774_v29, %s13073_s8 }
 0xe6d   :  { %v10027_v16 = vpop.permute.xlu0 %10026  ;;  %v12699_v23 = vpop.eup %12698  ;;  %10302 = vst [vmem:[%s19231_s17 + $0xc8] sm:$0xff] %v12697_v14  ;;  %v10209_v20 = vsel %vm1176_vm2, %v9993_v62, %v10029_v37  ;;  %v20062_v62 = vld [vmem:[#allocation33_spill] sm:$0xff]  ;;  %v20067_v14 = vld [vmem:[#allocation95_spill] sm:$0xff] }
 0xe6e   :  { %v10041_v27 = vsel %vm1176_vm2, %v10025_v18, %v10027_v16  ;;  %10303 = vst [vmem:[%s19231_s17 + $0xd0] sm:$0xff] %v12699_v23  ;;  %12708 = vtanh.f32 %v10209_v20  ;;  %v20066_v18 = vld [vmem:[#allocation75_spill] sm:$0xff]  ;;  %v20068_v20 = vld [vmem:[#allocation96_spill] sm:$0xff] }
 0xe6f   :  { %12710 = vtanh.f32 %v10041_v27  ;;  %10105 = vrot.lane.b32.xlu1 %v18736_v26, %s13073_s8 }
 0xe70   :  { %v12701_v42 = vpop.eup %12700  ;;  %v10033_v29 = vpop.permute.xlu1 %10032  ;;  %10111 = vrot.lane.b32.xlu0 %v18742_v6, %s13073_s8 }
 0xe71   :  { %v10031_v31 = vpop.permute.xlu0 %10030  ;;  %v12703_v33 = vpop.eup %12702  ;;  %10322 = vst [vmem:[%s19231_s17 + $0x168] sm:$0xff] %v12701_v42 }
 0xe72   :  { %v10042_v1 = vsel %vm1176_vm2, %v10029_v37, %v10031_v31  ;;  %v10043_v41 = vsel %vm1176_vm2, %v10031_v31, %v10033_v29  ;;  %10323 = vst [vmem:[%s19231_s17 + $0x170] sm:$0xff] %v12703_v33 }
 0xe73   :  { %12712 = vtanh.f32 %v10042_v1  ;;  %10109 = vrot.lane.b32.xlu1 %v18740_v34, %s13073_s8 }
 0xe74   :  { %12714 = vtanh.f32 %v10043_v41  ;;  %v10037_v6 = vpop.permute.xlu1 %10036  ;;  %10136 = vrot.lane.b32.xlu0 %v18766_v63, %s13073_s8  ;;  %v20070_v41 = vld [vmem:[#allocation79_spill] sm:$0xff] }
 0xe75   :  { %v12705_v26 = vpop.eup %12704  ;;  %v10035_v3 = vpop.permute.xlu0 %10034 }
 0xe76   :  { %v12707_v52 = vpop.eup %12706  ;;  %10284 = vst [vmem:[%s19231_s17 + $0x38] sm:$0xff] %v12705_v26  ;;  %v10044_v17 = vsel %vm1176_vm2, %v10035_v3, %v10037_v6  ;;  %v10210_v56 = vsel %vm1176_vm2, %v9997_v4, %v10035_v3 }
 0xe77   :  { %10285 = vst [vmem:[%s19231_s17 + $0x40] sm:$0xff] %v12707_v52  ;;  %12716 = vtanh.f32 %v10210_v56  ;;  %10113 = vrot.lane.b32.xlu1 %v18789_v46, %s13073_s8  ;;  %v20071_v52 = vld [vmem:[#allocation104_spill] sm:$0xff] }
 0xe78   :  { %12718 = vtanh.f32 %v10044_v17  ;;  %v12709_v34 = vpop.eup %12708  ;;  %v10062_v63 = vpop.permute.xlu1 %10061  ;;  %10140 = vrot.lane.b32.xlu0 %v18778_v58, %s13073_s8 }
 0xe79   :  { %v10039_v8 = vpop.permute.xlu0 %10038  ;;  %v12711_v13 = vpop.eup %12710  ;;  %10304 = vst [vmem:[%s19231_s17 + $0xd8] sm:$0xff] %v12709_v34  ;;  %v10073_v44 = vsel %vm1176_vm2, %v10027_v16, %v10062_v63  ;;  %v20072_v34 = vld [vmem:[#allocation103_spill] sm:$0xff] }
 0xe7a   :  { %v10045_v60 = vsel %vm1176_vm2, %v10037_v6, %v10039_v8  ;;  %10286 = vst [vmem:[%s19231_s17 + $0x48] sm:$0xff] %v12711_v13  ;;  %12720 = vtanh.f32 %v10073_v44 }
 0xe7b   :  { %12722 = vtanh.f32 %v10045_v60  ;;  %10138 = vrot.lane.b32.xlu1 %v18764_v25, %s13073_s8 }
 0xe7c   :  { %v10066_v58 = vpop.permute.xlu1 %10065  ;;  %10144 = vrot.lane.b32.xlu0 %v18791_v22, %s13073_s8 }
 0xe7d   :  { %v12713_v46 = vpop.eup %12712  ;;  %v18981_v5 = vpop.permute.xlu0 %10063  ;;  %v10075_v57 = vsel %vm1176_vm2, %v10033_v29, %v10066_v58  ;;  %v20069_v29 = vld [vmem:[#allocation78_spill] sm:$0xff] }
 0xe7e   :  { %v12715_v24 = vpop.eup %12714  ;;  %10305 = vst [vmem:[%s19231_s17 + $0xe0] sm:$0xff] %v12713_v46  ;;  %v10074_v59 = vsel %vm1176_vm2, %v10062_v63, %v18981_v5  ;;  %12724 = vtanh.f32 %v10075_v57 }
 0xe7f   :  { %10306 = vst [vmem:[%s19231_s17 + $0xe8] sm:$0xff] %v12715_v24  ;;  %12726 = vtanh.f32 %v10074_v59  ;;  %10142 = vrot.lane.b32.xlu1 %v18776_v30, %s13073_s8 }
 0xe80   :  { %v10070_v22 = vpop.permute.xlu1 %10069  ;;  %10172 = vrot.lane.b32.xlu0 %v18771_v36, %s13073_s8 }
 0xe81   :  { %v12717_v25 = vpop.eup %12716  ;;  %v18996_v48 = vpop.permute.xlu0 %10067  ;;  %v10077_v51 = vsel %vm1176_vm2, %v10039_v8, %v10070_v22 }
 0xe82   :  { %v12719_v11 = vpop.eup %12718  ;;  %10324 = vst [vmem:[%s19231_s17 + $0x178] sm:$0xff] %v12717_v25  ;;  %v10076_v45 = vsel %vm1176_vm2, %v10066_v58, %v18996_v48  ;;  %12728 = vtanh.f32 %v10077_v51 }
 0xe83   :  { %10325 = vst [vmem:[%s19231_s17 + $0x180] sm:$0xff] %v12719_v11  ;;  %12730 = vtanh.f32 %v10076_v45  ;;  %10146 = vrot.lane.b32.xlu1 %v18794_v47, %s13073_s8 }
 0xe84   :  { %v12721_v36 = vpop.eup %12720  ;;  %10176 = vrot.lane.b32.xlu0 %v18813_v49, %s13073_s8 }
 0xe85   :  { %v19011_v30 = vpop.permute.xlu0 %10071  ;;  %v12723_v2 = vpop.eup %12722  ;;  %10287 = vst [vmem:[%s19231_s17 + $0x50] sm:$0xff] %v12721_v36 }
 0xe86   :  { %v10078_v53 = vsel %vm1176_vm2, %v10070_v22, %v19011_v30  ;;  %10326 = vst [vmem:[%s19231_s17 + $0x188] sm:$0xff] %v12723_v2 }
 0xe87   :  { %12732 = vtanh.f32 %v10078_v53  ;;  %10174 = vrot.lane.b32.xlu1 %v18808_v35, %s13073_s8 }
 0xe88   :  { %v12725_v47 = vpop.eup %12724  ;;  %10180 = vrot.lane.b32.xlu0 %v18818_v40, %s13073_s8  ;;  %v20063_v40 = vld [vmem:[#allocation81_spill] sm:$0xff] }
 0xe89   :  { %v12727_v49 = vpop.eup %12726  ;;  %10307 = vst [vmem:[%s19231_s17 + $0xf0] sm:$0xff] %v12725_v47 }
 0xe8a   :  { %10288 = vst [vmem:[%s19231_s17 + $0x58] sm:$0xff] %v12727_v49 }
 0xe8b   :  { %10178 = vrot.lane.b32.xlu1 %v18783_v9, %s13073_s8 }
 0xe8c   :  { %v12729_v0 = vpop.eup %12728  ;;  %10184 = vrot.lane.b32.xlu0 %v20062_v62, %s13073_s8 }
 0xe8d   :  { %v12731_v35 = vpop.eup %12730  ;;  %10327 = vst [vmem:[%s19231_s17 + $0x190] sm:$0xff] %v12729_v0 }
 0xe8e   :  { %10308 = vst [vmem:[%s19231_s17 + $0xf8] sm:$0xff] %v12731_v35 }
 0xe8f   :  { %10182 = vrot.lane.b32.xlu1 %v20063_v40, %s13073_s8 }
 0xe91   :  { %v12733_v54 = vpop.eup %12732 }
 0xe92   :  { %10328 = vst [vmem:[%s19231_s17 + $0x198] sm:$0xff] %v12733_v54 }
 0xec5   :  { %v9805_v9 = vpop.permute.xlu1 %9804 }
 0xec6   :  { %v9803_v15 = vpop.permute.xlu0 %9802 }
 0xec7   :  { %v9819_v61 = vsel %vm1176_vm2, %v9803_v15, %v9805_v9 }
 0xec8   :  { %v9835_v10 = vadd.f32 %v9819_v61, %v20066_v18 }
 0xec9   :  { %v9801_v21 = vpop.permute.xlu1 %9800 }
 0xeca   :  { %v9818_v39 = vsel %vm1176_vm2, %v9801_v21, %v9803_v15  ;;  %v9833_v4 = vadd.f32 %v9801_v21, %v20064_v12  ;;  %v9811_v43 = vpop.permute.xlu0 %9810 }
 0xecb   :  { %v9834_v7 = vadd.f32 %v9818_v39, %v20065_v50 }
 0xecc   :  { %9905 = vrot.lane.b32.xlu0 %v9833_v4, %s13073_s8 }
 0xecd   :  { %9907 = vrot.lane.b32.xlu1 %v9834_v7, %s13073_s8  ;;  %v9809_v32 = vpop.permute.xlu1 %9808 }
 0xece   :  { %v9807_v19 = vpop.permute.xlu0 %9806  ;;  %v9821_v16 = vsel %vm1176_vm2, %v9809_v32, %v9811_v43 }
 0xecf   :  { %v9820_v55 = vsel %vm1176_vm2, %v9807_v19, %v9809_v32  ;;  %v9836_v37 = vadd.f32 %v9807_v19, %v20067_v14  ;;  %v9838_v31 = vadd.f32 %v9821_v16, %v20069_v29 }
 0xed0   :  { %9909 = vrot.lane.b32.xlu0 %v9835_v10, %s13073_s8  ;;  %v9837_v27 = vadd.f32 %v9820_v55, %v20068_v20 }
 0xed1   :  { %9911 = vrot.lane.b32.xlu1 %v9836_v37, %s13073_s8  ;;  %v9817_v23 = vpop.permute.xlu1 %9816 }
 0xed2   :  { %v9815_v42 = vpop.permute.xlu0 %9814 }
 0xed3   :  { %v9823_v33 = vsel %vm1176_vm2, %v9815_v42, %v9817_v23 }
 0xed4   :  { %9913 = vrot.lane.b32.xlu0 %v9837_v27, %s13073_s8  ;;  %v9841_v26 = vadd.f32 %v9823_v33, %v20070_v41 }
 0xed5   :  { %9915 = vrot.lane.b32.xlu1 %v9838_v31, %s13073_s8  ;;  %v9813_v1 = vpop.permute.xlu1 %9812 }
 0xed6   :  { %v9822_v6 = vsel %vm1176_vm2, %v9813_v1, %v9815_v42  ;;  %v10100_v3 = vpop.permute.xlu0 %10099  ;;  %v9839_v63 = vadd.f32 %v9813_v1, %v20072_v34 }
 0xed7   :  { %v9840_v17 = vadd.f32 %v9822_v6, %v20071_v52 }
 0xed8   :  { %9921 = vrot.lane.b32.xlu0 %v9841_v26, %s13073_s8 }
 0xed9   :  { %9919 = vrot.lane.b32.xlu1 %v9840_v17, %s13073_s8  ;;  %v10098_v56 = vpop.permute.xlu1 %10097 }
 0xeda   :  { %v10115_v8 = vsel %vm1176_vm2, %v10098_v56, %v10100_v3  ;;  %v10211_v13 = vsel %vm1176_vm2, %v18981_v5, %v10098_v56  ;;  %v10104_v44 = vpop.permute.xlu0 %10103 }
 0xedb   :  { %12734 = vtanh.f32 %v10211_v13  ;;  %v10212_v60 = vsel %vm1176_vm2, %v18996_v48, %v10104_v44 }
 0xedc   :  { %12736 = vtanh.f32 %v10115_v8  ;;  %9917 = vrot.lane.b32.xlu0 %v9839_v63, %s13073_s8 }
 0xedd   :  { %12738 = vtanh.f32 %v10212_v60  ;;  %10186 = vrot.lane.b32.xlu1 %v18832_v38, %s13073_s8  ;;  %v10102_v46 = vpop.permute.xlu1 %10101 }
 0xede   :  { %v10116_v58 = vsel %vm1176_vm2, %v10100_v3, %v10102_v46  ;;  %v10108_v24 = vpop.permute.xlu0 %10107 }
 0xedf   :  { %12740 = vtanh.f32 %v10116_v58  ;;  %v20073_v58 = vld [vmem:[#allocation73_spill] sm:$0xff] }
 0xee0   :  { %10188 = vrot.lane.b32.xlu0 %v18835_v28, %s13073_s8 }
 0xee1   :  { %v10106_v5 = vpop.permute.xlu1 %10105 }
 0xee2   :  { %v10117_v57 = vsel %vm1176_vm2, %v10104_v44, %v10106_v5  ;;  %v10118_v59 = vsel %vm1176_vm2, %v10106_v5, %v10108_v24  ;;  %v10112_v25 = vpop.permute.xlu0 %10111 }
 0xee3   :  { %12742 = vtanh.f32 %v10117_v57 }
 0xee4   :  { %12744 = vtanh.f32 %v10118_v59 }
 0xee5   :  { %v12735_v22 = vpop.eup %12734  ;;  %v10110_v48 = vpop.permute.xlu1 %10109 }
 0xee6   :  { %v12737_v11 = vpop.eup %12736  ;;  %10289 = vst [vmem:[%s19231_s17 + $0x60] sm:$0xff] %v12735_v22  ;;  %v10119_v38 = vsel %vm1176_vm2, %v10110_v48, %v10112_v25  ;;  %v10213_v28 = vsel %vm1176_vm2, %v19011_v30, %v10110_v48  ;;  %v10137_v51 = vpop.permute.xlu0 %10136  ;;  %v20074_v48 = vld [vmem:[#allocation42_spill] sm:$0xff] }
 0xee7   :  { %v12739_v45 = vpop.eup %12738  ;;  %10290 = vst [vmem:[%s19231_s17 + $0x68] sm:$0xff] %v12737_v11  ;;  %12746 = vtanh.f32 %v10213_v28  ;;  %v10148_v36 = vsel %vm1176_vm2, %v10102_v46, %v10137_v51 }
 0xee8   :  { %10309 = vst [vmem:[%s19231_s17 + $0x100] sm:$0xff] %v12739_v45  ;;  %12748 = vtanh.f32 %v10119_v38 }
 0xee9   :  { %v12741_v2 = vpop.eup %12740  ;;  %12750 = vtanh.f32 %v10148_v36  ;;  %v10114_v53 = vpop.permute.xlu1 %10113 }
 0xeea   :  { %10291 = vst [vmem:[%s19231_s17 + $0x70] sm:$0xff] %v12741_v2  ;;  %v10120_v30 = vsel %vm1176_vm2, %v10112_v25, %v10114_v53  ;;  %v10141_v47 = vpop.permute.xlu0 %10140 }
 0xeeb   :  { %12752 = vtanh.f32 %v10120_v30  ;;  %v10150_v49 = vsel %vm1176_vm2, %v10108_v24, %v10141_v47 }
 0xeec   :  { %12754 = vtanh.f32 %v10150_v49 }
 0xeed   :  { %v12743_v0 = vpop.eup %12742  ;;  %v10139_v62 = vpop.permute.xlu1 %10138 }
 0xeee   :  { %v12745_v35 = vpop.eup %12744  ;;  %10310 = vst [vmem:[%s19231_s17 + $0x108] sm:$0xff] %v12743_v0  ;;  %v10149_v40 = vsel %vm1176_vm2, %v10137_v51, %v10139_v62  ;;  %v10145_v54 = vpop.permute.xlu0 %10144  ;;  %v20075_v51 = vld [vmem:[#allocation13_spill] sm:$0xff] }
 0xeef   :  { %10311 = vst [vmem:[%s19231_s17 + $0x110] sm:$0xff] %v12745_v35  ;;  %12756 = vtanh.f32 %v10149_v40  ;;  %v10152_v9 = vsel %vm1176_vm2, %v10114_v53, %v10145_v54 }
 0xef0   :  { %12758 = vtanh.f32 %v10152_v9 }
 0xef1   :  { %v12747_v15 = vpop.eup %12746  ;;  %v10143_v21 = vpop.permute.xlu1 %10142 }
 0xef2   :  { %v12749_v39 = vpop.eup %12748  ;;  %10329 = vst [vmem:[%s19231_s17 + $0x1a0] sm:$0xff] %v12747_v15  ;;  %v10151_v12 = vsel %vm1176_vm2, %v10141_v47, %v10143_v21  ;;  %v10173_v4 = vpop.permute.xlu0 %10172 }
 0xef3   :  { %v12751_v43 = vpop.eup %12750  ;;  %10330 = vst [vmem:[%s19231_s17 + $0x1a8] sm:$0xff] %v12749_v39  ;;  %12760 = vtanh.f32 %v10151_v12  ;;  %v10214_v61 = vsel %vm1176_vm2, %v10139_v62, %v10173_v4 }
 0xef4   :  { %10292 = vst [vmem:[%s19231_s17 + $0x78] sm:$0xff] %v12751_v43  ;;  %12762 = vtanh.f32 %v10214_v61 }
 0xef5   :  { %v12753_v50 = vpop.eup %12752  ;;  %v10147_v7 = vpop.permute.xlu1 %10146 }
 0xef6   :  { %v12755_v32 = vpop.eup %12754  ;;  %10331 = vst [vmem:[%s19231_s17 + $0x1b0] sm:$0xff] %v12753_v50  ;;  %v10153_v18 = vsel %vm1176_vm2, %v10145_v54, %v10147_v7  ;;  %v10177_v10 = vpop.permute.xlu0 %10176 }
 0xef7   :  { %10312 = vst [vmem:[%s19231_s17 + $0x118] sm:$0xff] %v12755_v32  ;;  %12764 = vtanh.f32 %v10153_v18 }
 0xef9   :  { %v12757_v19 = vpop.eup %12756  ;;  %v10175_v55 = vpop.permute.xlu1 %10174 }
 0xefa   :  { %v12759_v14 = vpop.eup %12758  ;;  %10293 = vst [vmem:[%s19231_s17 + $0x80] sm:$0xff] %v12757_v19  ;;  %v10190_v37 = vsel %vm1176_vm2, %v10173_v4, %v10175_v55  ;;  %v10191_v16 = vsel %vm1176_vm2, %v10175_v55, %v10177_v10  ;;  %v10181_v23 = vpop.permute.xlu0 %10180 }
 0xefb   :  { %10332 = vst [vmem:[%s19231_s17 + $0x1b8] sm:$0xff] %v12759_v14  ;;  %12766 = vtanh.f32 %v10190_v37 }
 0xefc   :  { %12768 = vtanh.f32 %v10191_v16 }
 0xefd   :  { %v12761_v20 = vpop.eup %12760  ;;  %v10179_v27 = vpop.permute.xlu1 %10178 }
 0xefe   :  { %v12763_v42 = vpop.eup %12762  ;;  %10313 = vst [vmem:[%s19231_s17 + $0x120] sm:$0xff] %v12761_v20  ;;  %v10192_v29 = vsel %vm1176_vm2, %v10179_v27, %v10181_v23  ;;  %v10215_v31 = vsel %vm1176_vm2, %v10143_v21, %v10179_v27  ;;  %v10185_v33 = vpop.permute.xlu0 %10184 }
 0xeff   :  { %10294 = vst [vmem:[%s19231_s17 + $0x88] sm:$0xff] %v12763_v42  ;;  %12770 = vtanh.f32 %v10215_v31  ;;  %v10216_v1 = vsel %vm1176_vm2, %v10147_v7, %v10185_v33 }
 0xf00   :  { %12772 = vtanh.f32 %v10192_v29 }
 0xf01   :  { %v12765_v41 = vpop.eup %12764  ;;  %12774 = vtanh.f32 %v10216_v1  ;;  %v10183_v26 = vpop.permute.xlu1 %10182 }
 0xf02   :  { %10333 = vst [vmem:[%s19231_s17 + $0x1c0] sm:$0xff] %v12765_v41  ;;  %v10193_v6 = vsel %vm1176_vm2, %v10181_v23, %v10183_v26 }
 0xf03   :  { %12776 = vtanh.f32 %v10193_v6 }
 0xf05   :  { %v12767_v3 = vpop.eup %12766 }
 0xf06   :  { %v12769_v52 = vpop.eup %12768  ;;  %10295 = vst [vmem:[%s19231_s17 + $0x90] sm:$0xff] %v12767_v3 }
 0xf07   :  { %10296 = vst [vmem:[%s19231_s17 + $0x98] sm:$0xff] %v12769_v52 }
 0xf09   :  { %v12771_v17 = vpop.eup %12770 }
 0xf0a   :  { %v12773_v56 = vpop.eup %12772  ;;  %10314 = vst [vmem:[%s19231_s17 + $0x128] sm:$0xff] %v12771_v17 }
 0xf0b   :  { %v12775_v34 = vpop.eup %12774  ;;  %10315 = vst [vmem:[%s19231_s17 + $0x130] sm:$0xff] %v12773_v56 }
 0xf0c   :  { %10334 = vst [vmem:[%s19231_s17 + $0x1c8] sm:$0xff] %v12775_v34 }
 0xf0d   :  { %v12777_v63 = vpop.eup %12776 }
 0xf0e   :  { %10316 = vst [vmem:[%s19231_s17 + $0x138] sm:$0xff] %v12777_v63 }
 0xf3e   :  { %v9906_v8 = vpop.permute.xlu0 %9905 }
 0xf3f   :  { %v9908_v13 = vpop.permute.xlu1 %9907 }
 0xf40   :  { %v9923_v44 = vsel %vm1176_vm2, %v9906_v8, %v9908_v13 }
 0xf41   :  { %12778 = vtanh.f32 %v9923_v44 }
 0xf42   :  { %v9910_v60 = vpop.permute.xlu0 %9909 }
 0xf43   :  { %v9924_v46 = vsel %vm1176_vm2, %v9908_v13, %v9910_v60  ;;  %v10205_v24 = vsel %vm1176_vm2, %v9910_v60, %v20073_v58  ;;  %v9912_v5 = vpop.permute.xlu1 %9911 }
 0xf44   :  { %12780 = vtanh.f32 %v9924_v46 }
 0xf45   :  { %12782 = vtanh.f32 %v10205_v24 }
 0xf46   :  { %v9914_v57 = vpop.permute.xlu0 %9913 }
 0xf47   :  { %v9925_v59 = vsel %vm1176_vm2, %v9912_v5, %v9914_v57  ;;  %v9916_v25 = vpop.permute.xlu1 %9915 }
 0xf48   :  { %12784 = vtanh.f32 %v9925_v59  ;;  %v9926_v22 = vsel %vm1176_vm2, %v9914_v57, %v9916_v25  ;;  %v10206_v11 = vsel %vm1176_vm2, %v9916_v25, %v20074_v48 }
 0xf49   :  { %12786 = vtanh.f32 %v9926_v22 }
 0xf4a   :  { %12788 = vtanh.f32 %v10206_v11  ;;  %v9922_v38 = vpop.permute.xlu0 %9921 }
 0xf4b   :  { %v12779_v28 = vpop.eup %12778  ;;  %v10207_v45 = vsel %vm1176_vm2, %v9922_v38, %v20075_v51  ;;  %v9920_v36 = vpop.permute.xlu1 %9919 }
 0xf4c   :  { %10277 = vst [vmem:[%s19231_s17] sm:$0xff] %v12779_v28  ;;  %12790 = vtanh.f32 %v10207_v45  ;;  %v9928_v2 = vsel %vm1176_vm2, %v9920_v36, %v9922_v38 }
 0xf4d   :  { %12792 = vtanh.f32 %v9928_v2 }
 0xf4e   :  { %v12781_v53 = vpop.eup %12780  ;;  %v9918_v30 = vpop.permute.xlu0 %9917 }
 0xf4f   :  { %v12783_v47 = vpop.eup %12782  ;;  %10278 = vst [vmem:[%s19231_s17 + $0x8] sm:$0xff] %v12781_v53  ;;  %v9927_v49 = vsel %vm1176_vm2, %v9918_v30, %v9920_v36  ;;  %v10187_v0 = vpop.permute.xlu1 %10186 }
 0xf50   :  { %10279 = vst [vmem:[%s19231_s17 + $0x10] sm:$0xff] %v12783_v47  ;;  %12794 = vtanh.f32 %v9927_v49  ;;  %v10194_v62 = vsel %vm1176_vm2, %v10185_v33, %v10187_v0 }
 0xf51   :  { %12796 = vtanh.f32 %v10194_v62 }
 0xf52   :  { %v12785_v35 = vpop.eup %12784  ;;  %v10189_v40 = vpop.permute.xlu0 %10188 }
 0xf53   :  { %v12787_v54 = vpop.eup %12786  ;;  %10297 = vst [vmem:[%s19231_s17 + $0xa0] sm:$0xff] %v12785_v35  ;;  %v10195_v9 = vsel %vm1176_vm2, %v10187_v0, %v10189_v40 }
 0xf54   :  { %v12789_v15 = vpop.eup %12788  ;;  %10298 = vst [vmem:[%s19231_s17 + $0xa8] sm:$0xff] %v12787_v54  ;;  %12798 = vtanh.f32 %v10195_v9 }
 0xf55   :  { %10299 = vst [vmem:[%s19231_s17 + $0xb0] sm:$0xff] %v12789_v15 }
 0xf56   :  { %v12791_v21 = vpop.eup %12790 }
 0xf57   :  { %v12793_v39 = vpop.eup %12792  ;;  %10319 = vst [vmem:[%s19231_s17 + $0x150] sm:$0xff] %v12791_v21 }
 0xf58   :  { %10318 = vst [vmem:[%s19231_s17 + $0x148] sm:$0xff] %v12793_v39 }
 0xf5a   :  { %v12795_v12 = vpop.eup %12794 }
 0xf5b   :  { %v12797_v4 = vpop.eup %12796  ;;  %10317 = vst [vmem:[%s19231_s17 + $0x140] sm:$0xff] %v12795_v12 }
 0xf5c   :  { %10335 = vst [vmem:[%s19231_s17 + $0x1d0] sm:$0xff] %v12797_v4 }
 0xf5e   :  { %v12799_v43 = vpop.eup %12798 }
 0xf5f   :  { %10336 = vst [vmem:[%s19231_s17 + $0x1d8] sm:$0xff] %v12799_v43 }
 0xf60   :  { %10341 = vsyncpa [#allocation3], 1 }

</bundles_post_ra>
